<compile_context>
chip_gen: v5e
topology: v5e:2x2
jax: 0.10.0
libtpu: 0.0.40
codegen_flags: <defaults>
</compile_context>

<pallas_src>
import functools

import jax
import jax.numpy as jnp
from jax.experimental import pallas as pl
from jax.experimental.pallas import tpu as pltpu


def _aspp_kernel(x_ref, w_ref, xcol_ref, b_ref, o_ref, yacc_ref, ypad_ref, *,
                 dilations, H, W, Lp, pad):
    k = pl.program_id(1)
    HW = H * W
    HWp = HW + 2 * pad

    @pl.when(k == 0)
    def _():
        yacc_ref[...] = jnp.zeros_like(yacc_ref)

    # ---- steady state: ONE fused bf16 MXU matmul per channel tile ----------
    # (nb*9*Lp, tc) @ (tc, HW) -> f32, accumulated in-place across k.
    yacc_ref[...] += jnp.dot(w_ref[k], x_ref[0],
                             preferred_element_type=jnp.float32)

    # ---- epilogue: tap shift / mask / sum, ONCE per image ------------------
    @pl.when(k == pl.num_programs(1) - 1)
    def _():
        # Zero the halo strips (pad is a 128 multiple -> aligned stores).
        ypad_ref[:, :pad] = jnp.zeros((9 * Lp, pad), jnp.float32)
        ypad_ref[:, pad + HW:] = jnp.zeros((9 * Lp, HWp - pad - HW),
                                           jnp.float32)

        xcol = xcol_ref[...]                     # (1, HW) int32 lane x-coord
        acc = jnp.zeros((Lp, HW), jnp.float32)
        for b, d in enumerate(dilations):
            # Stage this branch's 9*Lp rows inside the zero halo
            # (lane-aligned store: pad % 128 == 0).
            ypad_ref[:, pad:pad + HW] = \
                yacc_ref[b * 9 * Lp:(b + 1) * 9 * Lp, :]
            for kw in range(3):
                sx = (kw - 1) * d
                part = None
                for kh in range(3):
                    sy = (kh - 1) * d
                    s = sy * W + sx              # flat shift of this tap
                    r0 = (kh * 3 + kw) * Lp
                    # Rows that fall off the image read the zero halo.
                    tap = ypad_ref[r0:r0 + Lp, pad + s:pad + s + HW]
                    part = tap if part is None else part + tap
                if sx != 0:
                    # One column-wrap mask shared by the 3 row-taps of this sx.
                    valid = (xcol >= -sx) & (xcol < W - sx)
                    part = jnp.where(valid, part, 0.0)
                acc = acc + part
        # TODO(synk): emit bf16 here if the downstream upsample tolerates it.
        o_ref[0] = (acc + b_ref[...]).astype(o_ref.dtype)


def classifier_module_forward(x_nchw, weights, biases, dilations, paddings,
                              *, tc=512):
    """Sum of dilated 3x3 convs (padding == dilation). NCHW in -> NCHW out.

    x_nchw:  (N, Cin, H, W) float32
    weights: list of (NoLabels, Cin, 3, 3) float32 (PyTorch OIHW)
    biases:  list of (NoLabels,) float32
    """
    assert list(dilations) == list(paddings), \
        "ASPP head uses padding == dilation so output spatial == input spatial"
    N, Cin, H, W = x_nchw.shape
    NoLabels = weights[0].shape[0]
    nb = len(weights)
    assert Cin % tc == 0
    HW = H * W
    Lp = -(-NoLabels // 8) * 8            # labels padded to a sublane multiple
    d_max = max(dilations)
    # Halo covering the largest flat shift, rounded up to a lane multiple so
    # the staging write starts on a 128-lane boundary.
    pad = -(-(d_max * (W + 1)) // 128) * 128
    HWp = HW + 2 * pad
    M = nb * 9 * Lp                       # fused matmul M dimension

    # ---- glue (plain JAX; layout-only / tiny) -------------------------------
    x_flat = x_nchw.reshape(N, Cin, HW).astype(jnp.bfloat16)

    # (nb, O, Cin, 3, 3) -> pad O -> (nb, kh, kw, Lp, Cin)
    #   -> (nb*9*Lp, Cin) -> (Cin//tc, nb*9*Lp, tc)
    w_stack = jnp.stack(weights, axis=0)
    if Lp != NoLabels:
        w_stack = jnp.pad(
            w_stack, ((0, 0), (0, Lp - NoLabels), (0, 0), (0, 0), (0, 0)))
    w_packed = jnp.transpose(w_stack, (0, 3, 4, 1, 2)).reshape(M, Cin)
    w_packed = w_packed.reshape(M, Cin // tc, tc)
    w_packed = jnp.transpose(w_packed, (1, 0, 2)).astype(jnp.bfloat16)

    bias_total = jnp.sum(jnp.stack(biases, axis=0), axis=0)
    bias_total = jnp.pad(bias_total, (0, Lp - NoLabels))
    bias_total = bias_total.reshape(Lp, 1).astype(jnp.float32)

    xcol = (jnp.arange(HW, dtype=jnp.int32) % W).reshape(1, HW)

    kernel = functools.partial(_aspp_kernel, dilations=tuple(dilations),
                               H=H, W=W, Lp=Lp, pad=pad)

    # VMEM budget derived from the actual shapes (worst case: weights double
    # buffered if the single-buffer hint is rejected). Capped at 64 MiB (v7x).
    need = (2 * M * Cin * 2            # packed weights (bf16)
            + 2 * tc * HW * 2          # activation block, double-buffered
            + 2 * Lp * HW * 4          # output block, double-buffered
            + M * HW * 4               # yacc scratch (f32)
            + 9 * Lp * HWp * 4         # haloed staging scratch (f32)
            + 8 * HW * 4 + Lp * 128 * 4)
    vmem_limit = int(min(64 << 20, max(32 << 20, need + (4 << 20))))

    def _call(single_buffer_consts):
        def _const_spec(shape):
            ndim = len(shape)
            kwargs = {}
            if single_buffer_consts:
                kwargs["pipeline_mode"] = pl.Buffered(1)
            return pl.BlockSpec(shape, lambda n, k, _nd=ndim: (0,) * _nd,
                                **kwargs)

        grid_spec = pltpu.PrefetchScalarGridSpec(
            num_scalar_prefetch=0,
            grid=(N, Cin // tc),
            in_specs=[
                # activation channel tile, streamed per (n, k)
                pl.BlockSpec((1, tc, HW), lambda n, k: (n, k, 0)),
                # packed weights: constant block index -> resident in VMEM
                _const_spec((Cin // tc, M, tc)),
                # per-lane x coordinate (column-wrap masking in the epilogue)
                _const_spec((1, HW)),
                # pre-summed bias
                _const_spec((Lp, 1)),
            ],
            out_specs=pl.BlockSpec((1, Lp, HW), lambda n, k: (n, 0, 0)),
            scratch_shapes=[
                pltpu.VMEM((M, HW), jnp.float32),        # fused f32 accumulator
                pltpu.VMEM((9 * Lp, HWp), jnp.float32),  # zero-haloed staging
            ],
        )
        return pl.pallas_call(
            kernel,
            out_shape=jax.ShapeDtypeStruct((N, Lp, HW), jnp.float32),
            grid_spec=grid_spec,
            compiler_params=pltpu.CompilerParams(
                dimension_semantics=("parallel", "arbitrary"),
                vmem_limit_bytes=vmem_limit,
            ),
        )(x_flat, w_packed, xcol, bias_total)

    try:
        out = _call(True)
    except Exception:
        # Installed Pallas rejected single-buffered constant blocks; fall back
        # to the default double-buffered constants (identical semantics).
        out = _call(False)

    return out.reshape(N, Lp, H, W)[:, :NoLabels]


def _reference(x_nchw, weights, biases, dilations, paddings):
    # bf16 inputs, f32 accumulation: same precision contract as the kernel.
    xb = x_nchw.astype(jnp.bfloat16)
    out = None
    for w, b, d, p in zip(weights, biases, dilations, paddings):
        y = jax.lax.conv_general_dilated(
            xb, w.astype(jnp.bfloat16), window_strides=(1, 1),
            padding=[(p, p), (p, p)], rhs_dilation=(d, d),
            dimension_numbers=("NCHW", "OIHW", "NCHW"),
            preferred_element_type=jnp.float32)
        y = y + b[None, :, None, None]
        out = y if out is None else out + y
    return out


if __name__ == "__main__":
    # Small test shapes. Cin=2048 is fixed by the module; spatial kept small.
    N, Cin, H, W = 2, 2048, 16, 16
    NoLabels = 8
    dilation_series = [2, 4, 6, 8]   # real head uses [6, 12, 18, 24]
    padding_series = [2, 4, 6, 8]

    key = jax.random.PRNGKey(0)
    kx, *kws = jax.random.split(key, 1 + 2 * len(dilation_series))

    x_nchw = jax.random.normal(kx, (N, Cin, H, W), dtype=jnp.float32)

    weights, biases = [], []
    for i in range(len(dilation_series)):
        # module init: weight ~ N(0, 0.01); bias deterministic pseudo-random.
        w = 0.01 * jax.random.normal(kws[2 * i], (NoLabels, Cin, 3, 3),
                                     dtype=jnp.float32)
        b = 0.1 * jax.random.normal(kws[2 * i + 1], (NoLabels,),
                                    dtype=jnp.float32)
        weights.append(w)
        biases.append(b)

    out = classifier_module_forward(x_nchw, weights, biases,
                                    dilation_series, padding_series)
    out = jax.block_until_ready(out)

    ref = _reference(x_nchw, weights, biases, dilation_series, padding_series)
    ref = jax.block_until_ready(ref)

    assert out.shape == (N, NoLabels, H, W)
    max_err = float(jnp.max(jnp.abs(out - ref)))
    assert jnp.allclose(out, ref, atol=2e-2, rtol=2e-2), max_err
    print("KERNEL_OK")
</pallas_src>

<mosaic_0001>
module attributes {stable_mosaic.version = 11 : i64} {
  func.func @_aspp_kernel(%arg0: i32, %arg1: i32, %arg2: memref<1x512x256xbf16, #tpu.memory_space<vmem>>, %arg3: memref<4x288x512xbf16, #tpu.memory_space<vmem>>, %arg4: memref<1x256xi32, #tpu.memory_space<vmem>>, %arg5: memref<8x1xf32, #tpu.memory_space<vmem>>, %arg6: memref<1x8x256xf32, #tpu.memory_space<vmem>>, %arg7: memref<288x256xf32, #tpu.memory_space<vmem>>, %arg8: memref<72x768xf32, #tpu.memory_space<vmem>>) attributes {dimension_semantics = [#tpu.dimension_semantics<parallel>, #tpu.dimension_semantics<arbitrary>], iteration_bounds = array<i64: 2, 4>, scalar_prefetch = 0 : i64, scratch_operands = 2 : i64, tpu.core_type = #tpu.core_type<tc>, window_params = [{transform_indices = @transform_0, window_bounds = array<i64: 1, 512, 256>}, {pipeline_mode = #tpu.pipeline_mode<synchronous>, transform_indices = @transform_1, window_bounds = array<i64: 4, 288, 512>}, {pipeline_mode = #tpu.pipeline_mode<synchronous>, transform_indices = @transform_2, window_bounds = array<i64: 1, 256>}, {pipeline_mode = #tpu.pipeline_mode<synchronous>, transform_indices = @transform_3, window_bounds = array<i64: 8, 1>}, {transform_indices = @transform_4, window_bounds = array<i64: 1, 8, 256>}]} {
    %c0_i32 = arith.constant 0 : i32
    %0 = arith.cmpi eq, %arg1, %c0_i32 : i32
    %1 = arith.extui %0 : i1 to i32
    %c0_i32_0 = arith.constant 0 : i32
    %2 = arith.cmpi ne, %1, %c0_i32_0 : i32
    scf.if %2 {
      %cst_10 = arith.constant 0.000000e+00 : f32
      %15 = vector.broadcast %cst_10 : f32 to vector<288x256xf32>
      %c0_11 = arith.constant 0 : index
      %c0_12 = arith.constant 0 : index
      %16 = vector.load %arg7[%c0_11, %c0_12] : memref<288x256xf32, #tpu.memory_space<vmem>>, vector<288x256xf32>
      tpu.vector_store %arg7[%c0_11, %c0_12], %15 {strides = array<i32>} : memref<288x256xf32, #tpu.memory_space<vmem>>, vector<288x256xf32>,
    } else {
    }
    %c0 = arith.constant 0 : index
    %c0_1 = arith.constant 0 : index
    %3 = vector.load %arg7[%c0, %c0_1] : memref<288x256xf32, #tpu.memory_space<vmem>>, vector<288x256xf32>
    %4 = arith.index_cast %arg1 : i32 to index
    %c0_2 = arith.constant 0 : index
    %c0_3 = arith.constant 0 : index
    %5 = vector.load %arg3[%4, %c0_2, %c0_3] : memref<4x288x512xbf16, #tpu.memory_space<vmem>>, vector<1x288x512xbf16>
    %6 = vector.shape_cast %5 : vector<1x288x512xbf16> to vector<288x512xbf16>
    %c0_4 = arith.constant 0 : index
    %c0_5 = arith.constant 0 : index
    %c0_6 = arith.constant 0 : index
    %7 = vector.load %arg2[%c0_4, %c0_5, %c0_6] : memref<1x512x256xbf16, #tpu.memory_space<vmem>>, vector<1x512x256xbf16>
    %8 = vector.shape_cast %7 : vector<1x512x256xbf16> to vector<512x256xbf16>
    %cst = arith.constant dense<0.000000e+00> : vector<288x256xf32>
    %9 = tpu.matmul %6, %8, %cst {dimension_numbers = #tpu.dot_dimension_numbers<[1], [0], [0], [1], [0, 0, 1, 1], [], []>} : vector<288x512xbf16>, vector<512x256xbf16>, vector<288x256xf32> -> vector<288x256xf32>
    %10 = arith.addf %3, %9 : vector<288x256xf32>
    %c0_7 = arith.constant 0 : index
    %c0_8 = arith.constant 0 : index
    %11 = vector.load %arg7[%c0_7, %c0_8] : memref<288x256xf32, #tpu.memory_space<vmem>>, vector<288x256xf32>
    tpu.vector_store %arg7[%c0_7, %c0_8], %10 {strides = array<i32>} : memref<288x256xf32, #tpu.memory_space<vmem>>, vector<288x256xf32>,
    %c3_i32 = arith.constant 3 : i32
    %12 = arith.cmpi eq, %arg1, %c3_i32 : i32
    %13 = arith.extui %12 : i1 to i32
    %c0_i32_9 = arith.constant 0 : i32
    %14 = arith.cmpi ne, %13, %c0_i32_9 : i32
    scf.if %14 {
      %cst_10 = arith.constant 0.000000e+00 : f32
      %15 = vector.broadcast %cst_10 : f32 to vector<72x256xf32>
      %c0_11 = arith.constant 0 : index
      %c0_12 = arith.constant 0 : index
      %16 = vector.load %arg8[%c0_11, %c0_12] : memref<72x768xf32, #tpu.memory_space<vmem>>, vector<72x256xf32>
      tpu.vector_store %arg8[%c0_11, %c0_12], %15 {strides = array<i32>} : memref<72x768xf32, #tpu.memory_space<vmem>>, vector<72x256xf32>,
      %cst_13 = arith.constant 0.000000e+00 : f32
      %17 = vector.broadcast %cst_13 : f32 to vector<72x256xf32>
      %c0_14 = arith.constant 0 : index
      %c512 = arith.constant 512 : index
      %18 = vector.load %arg8[%c0_14, %c512] : memref<72x768xf32, #tpu.memory_space<vmem>>, vector<72x256xf32>
      tpu.vector_store %arg8[%c0_14, %c512], %17 {strides = array<i32>} : memref<72x768xf32, #tpu.memory_space<vmem>>, vector<72x256xf32>,
      %c0_15 = arith.constant 0 : index
      %c0_16 = arith.constant 0 : index
      %19 = vector.load %arg4[%c0_15, %c0_16] : memref<1x256xi32, #tpu.memory_space<vmem>>, vector<1x256xi32>
      %cst_17 = arith.constant 0.000000e+00 : f32
      %20 = vector.broadcast %cst_17 : f32 to vector<8x256xf32>
      %c0_18 = arith.constant 0 : index
      %c0_19 = arith.constant 0 : index
      %21 = vector.load %arg7[%c0_18, %c0_19] : memref<288x256xf32, #tpu.memory_space<vmem>>, vector<72x256xf32>
      %c0_20 = arith.constant 0 : index
      %c256 = arith.constant 256 : index
      %22 = vector.load %arg8[%c0_20, %c256] : memref<72x768xf32, #tpu.memory_space<vmem>>, vector<72x256xf32>
      tpu.vector_store %arg8[%c0_20, %c256], %21 {strides = array<i32>} : memref<72x768xf32, #tpu.memory_space<vmem>>, vector<72x256xf32>,
      %c0_21 = arith.constant 0 : index
      %c222 = arith.constant 222 : index
      %23 = vector.load %arg8[%c0_21, %c222] : memref<72x768xf32, #tpu.memory_space<vmem>>, vector<8x256xf32>
      %c24 = arith.constant 24 : index
      %c254 = arith.constant 254 : index
      %24 = vector.load %arg8[%c24, %c254] : memref<72x768xf32, #tpu.memory_space<vmem>>, vector<8x256xf32>
      %25 = arith.addf %23, %24 : vector<8x256xf32>
      %c48 = arith.constant 48 : index
      %c286 = arith.constant 286 : index
      %26 = vector.load %arg8[%c48, %c286] : memref<72x768xf32, #tpu.memory_space<vmem>>, vector<8x256xf32>
      %27 = arith.addf %25, %26 : vector<8x256xf32>
      %c2_i32 = arith.constant 2 : i32
      %28 = vector.broadcast %c2_i32 : i32 to vector<1x256xi32>
      %29 = arith.cmpi sge, %19, %28 : vector<1x256xi32>
      %c18_i32 = arith.constant 18 : i32
      %30 = vector.broadcast %c18_i32 : i32 to vector<1x256xi32>
      %31 = arith.cmpi slt, %19, %30 : vector<1x256xi32>
      %32 = arith.andi %29, %31 : vector<1x256xi1>
      %cst_22 = arith.constant 0.000000e+00 : f32
      %33 = vector.shape_cast %32 : vector<1x256xi1> to vector<1x256xi1>
      %34 = vector.broadcast %33 : vector<1x256xi1> to vector<8x256xi1>
      %35 = vector.broadcast %cst_22 : f32 to vector<8x256xf32>
      %36 = arith.select %34, %27, %35 : vector<8x256xi1>, vector<8x256xf32>
      %37 = arith.addf %20, %36 : vector<8x256xf32>
      %c8 = arith.constant 8 : index
      %c224 = arith.constant 224 : index
      %38 = vector.load %arg8[%c8, %c224] : memref<72x768xf32, #tpu.memory_space<vmem>>, vector<8x256xf32>
      %c32 = arith.constant 32 : index
      %c256_23 = arith.constant 256 : index
      %39 = vector.load %arg8[%c32, %c256_23] : memref<72x768xf32, #tpu.memory_space<vmem>>, vector<8x256xf32>
      %40 = arith.addf %38, %39 : vector<8x256xf32>
      %c56 = arith.constant 56 : index
      %c288 = arith.constant 288 : index
      %41 = vector.load %arg8[%c56, %c288] : memref<72x768xf32, #tpu.memory_space<vmem>>, vector<8x256xf32>
      %42 = arith.addf %40, %41 : vector<8x256xf32>
      %43 = arith.addf %37, %42 : vector<8x256xf32>
      %c16 = arith.constant 16 : index
      %c226 = arith.constant 226 : index
      %44 = vector.load %arg8[%c16, %c226] : memref<72x768xf32, #tpu.memory_space<vmem>>, vector<8x256xf32>
      %c40 = arith.constant 40 : index
      %c258 = arith.constant 258 : index
      %45 = vector.load %arg8[%c40, %c258] : memref<72x768xf32, #tpu.memory_space<vmem>>, vector<8x256xf32>
      %46 = arith.addf %44, %45 : vector<8x256xf32>
      %c64 = arith.constant 64 : index
      %c290 = arith.constant 290 : index
      %47 = vector.load %arg8[%c64, %c290] : memref<72x768xf32, #tpu.memory_space<vmem>>, vector<8x256xf32>
      %48 = arith.addf %46, %47 : vector<8x256xf32>
      %c-2_i32 = arith.constant -2 : i32
      %49 = vector.broadcast %c-2_i32 : i32 to vector<1x256xi32>
      %50 = arith.cmpi sge, %19, %49 : vector<1x256xi32>
      %c14_i32 = arith.constant 14 : i32
      %51 = vector.broadcast %c14_i32 : i32 to vector<1x256xi32>
      %52 = arith.cmpi slt, %19, %51 : vector<1x256xi32>
      %53 = arith.andi %50, %52 : vector<1x256xi1>
      %cst_24 = arith.constant 0.000000e+00 : f32
      %54 = vector.shape_cast %53 : vector<1x256xi1> to vector<1x256xi1>
      %55 = vector.broadcast %54 : vector<1x256xi1> to vector<8x256xi1>
      %56 = vector.broadcast %cst_24 : f32 to vector<8x256xf32>
      %57 = arith.select %55, %48, %56 : vector<8x256xi1>, vector<8x256xf32>
      %58 = arith.addf %43, %57 : vector<8x256xf32>
      %c72 = arith.constant 72 : index
      %c0_25 = arith.constant 0 : index
      %59 = vector.load %arg7[%c72, %c0_25] : memref<288x256xf32, #tpu.memory_space<vmem>>, vector<72x256xf32>
      %c0_26 = arith.constant 0 : index
      %c256_27 = arith.constant 256 : index
      %60 = vector.load %arg8[%c0_26, %c256_27] : memref<72x768xf32, #tpu.memory_space<vmem>>, vector<72x256xf32>
      tpu.vector_store %arg8[%c0_26, %c256_27], %59 {strides = array<i32>} : memref<72x768xf32, #tpu.memory_space<vmem>>, vector<72x256xf32>,
      %c0_28 = arith.constant 0 : index
      %c188 = arith.constant 188 : index
      %61 = vector.load %arg8[%c0_28, %c188] : memref<72x768xf32, #tpu.memory_space<vmem>>, vector<8x256xf32>
      %c24_29 = arith.constant 24 : index
      %c252 = arith.constant 252 : index
      %62 = vector.load %arg8[%c24_29, %c252] : memref<72x768xf32, #tpu.memory_space<vmem>>, vector<8x256xf32>
      %63 = arith.addf %61, %62 : vector<8x256xf32>
      %c48_30 = arith.constant 48 : index
      %c316 = arith.constant 316 : index
      %64 = vector.load %arg8[%c48_30, %c316] : memref<72x768xf32, #tpu.memory_space<vmem>>, vector<8x256xf32>
      %65 = arith.addf %63, %64 : vector<8x256xf32>
      %c4_i32 = arith.constant 4 : i32
      %66 = vector.broadcast %c4_i32 : i32 to vector<1x256xi32>
      %67 = arith.cmpi sge, %19, %66 : vector<1x256xi32>
      %c20_i32 = arith.constant 20 : i32
      %68 = vector.broadcast %c20_i32 : i32 to vector<1x256xi32>
      %69 = arith.cmpi slt, %19, %68 : vector<1x256xi32>
      %70 = arith.andi %67, %69 : vector<1x256xi1>
      %cst_31 = arith.constant 0.000000e+00 : f32
      %71 = vector.shape_cast %70 : vector<1x256xi1> to vector<1x256xi1>
      %72 = vector.broadcast %71 : vector<1x256xi1> to vector<8x256xi1>
      %73 = vector.broadcast %cst_31 : f32 to vector<8x256xf32>
      %74 = arith.select %72, %65, %73 : vector<8x256xi1>, vector<8x256xf32>
      %75 = arith.addf %58, %74 : vector<8x256xf32>
      %c8_32 = arith.constant 8 : index
      %c192 = arith.constant 192 : index
      %76 = vector.load %arg8[%c8_32, %c192] : memref<72x768xf32, #tpu.memory_space<vmem>>, vector<8x256xf32>
      %c32_33 = arith.constant 32 : index
      %c256_34 = arith.constant 256 : index
      %77 = vector.load %arg8[%c32_33, %c256_34] : memref<72x768xf32, #tpu.memory_space<vmem>>, vector<8x256xf32>
      %78 = arith.addf %76, %77 : vector<8x256xf32>
      %c56_35 = arith.constant 56 : index
      %c320 = arith.constant 320 : index
      %79 = vector.load %arg8[%c56_35, %c320] : memref<72x768xf32, #tpu.memory_space<vmem>>, vector<8x256xf32>
      %80 = arith.addf %78, %79 : vector<8x256xf32>
      %81 = arith.addf %75, %80 : vector<8x256xf32>
      %c16_36 = arith.constant 16 : index
      %c196 = arith.constant 196 : index
      %82 = vector.load %arg8[%c16_36, %c196] : memref<72x768xf32, #tpu.memory_space<vmem>>, vector<8x256xf32>
      %c40_37 = arith.constant 40 : index
      %c260 = arith.constant 260 : index
      %83 = vector.load %arg8[%c40_37, %c260] : memref<72x768xf32, #tpu.memory_space<vmem>>, vector<8x256xf32>
      %84 = arith.addf %82, %83 : vector<8x256xf32>
      %c64_38 = arith.constant 64 : index
      %c324 = arith.constant 324 : index
      %85 = vector.load %arg8[%c64_38, %c324] : memref<72x768xf32, #tpu.memory_space<vmem>>, vector<8x256xf32>
      %86 = arith.addf %84, %85 : vector<8x256xf32>
      %c-4_i32 = arith.constant -4 : i32
      %87 = vector.broadcast %c-4_i32 : i32 to vector<1x256xi32>
      %88 = arith.cmpi sge, %19, %87 : vector<1x256xi32>
      %c12_i32 = arith.constant 12 : i32
      %89 = vector.broadcast %c12_i32 : i32 to vector<1x256xi32>
      %90 = arith.cmpi slt, %19, %89 : vector<1x256xi32>
      %91 = arith.andi %88, %90 : vector<1x256xi1>
      %cst_39 = arith.constant 0.000000e+00 : f32
      %92 = vector.shape_cast %91 : vector<1x256xi1> to vector<1x256xi1>
      %93 = vector.broadcast %92 : vector<1x256xi1> to vector<8x256xi1>
      %94 = vector.broadcast %cst_39 : f32 to vector<8x256xf32>
      %95 = arith.select %93, %86, %94 : vector<8x256xi1>, vector<8x256xf32>
      %96 = arith.addf %81, %95 : vector<8x256xf32>
      %c144 = arith.constant 144 : index
      %c0_40 = arith.constant 0 : index
      %97 = vector.load %arg7[%c144, %c0_40] : memref<288x256xf32, #tpu.memory_space<vmem>>, vector<72x256xf32>
      %c0_41 = arith.constant 0 : index
      %c256_42 = arith.constant 256 : index
      %98 = vector.load %arg8[%c0_41, %c256_42] : memref<72x768xf32, #tpu.memory_space<vmem>>, vector<72x256xf32>
      tpu.vector_store %arg8[%c0_41, %c256_42], %97 {strides = array<i32>} : memref<72x768xf32, #tpu.memory_space<vmem>>, vector<72x256xf32>,
      %c0_43 = arith.constant 0 : index
      %c154 = arith.constant 154 : index
      %99 = vector.load %arg8[%c0_43, %c154] : memref<72x768xf32, #tpu.memory_space<vmem>>, vector<8x256xf32>
      %c24_44 = arith.constant 24 : index
      %c250 = arith.constant 250 : index
      %100 = vector.load %arg8[%c24_44, %c250] : memref<72x768xf32, #tpu.memory_space<vmem>>, vector<8x256xf32>
      %101 = arith.addf %99, %100 : vector<8x256xf32>
      %c48_45 = arith.constant 48 : index
      %c346 = arith.constant 346 : index
      %102 = vector.load %arg8[%c48_45, %c346] : memref<72x768xf32, #tpu.memory_space<vmem>>, vector<8x256xf32>
      %103 = arith.addf %101, %102 : vector<8x256xf32>
      %c6_i32 = arith.constant 6 : i32
      %104 = vector.broadcast %c6_i32 : i32 to vector<1x256xi32>
      %105 = arith.cmpi sge, %19, %104 : vector<1x256xi32>
      %c22_i32 = arith.constant 22 : i32
      %106 = vector.broadcast %c22_i32 : i32 to vector<1x256xi32>
      %107 = arith.cmpi slt, %19, %106 : vector<1x256xi32>
      %108 = arith.andi %105, %107 : vector<1x256xi1>
      %cst_46 = arith.constant 0.000000e+00 : f32
      %109 = vector.shape_cast %108 : vector<1x256xi1> to vector<1x256xi1>
      %110 = vector.broadcast %109 : vector<1x256xi1> to vector<8x256xi1>
      %111 = vector.broadcast %cst_46 : f32 to vector<8x256xf32>
      %112 = arith.select %110, %103, %111 : vector<8x256xi1>, vector<8x256xf32>
      %113 = arith.addf %96, %112 : vector<8x256xf32>
      %c8_47 = arith.constant 8 : index
      %c160 = arith.constant 160 : index
      %114 = vector.load %arg8[%c8_47, %c160] : memref<72x768xf32, #tpu.memory_space<vmem>>, vector<8x256xf32>
      %c32_48 = arith.constant 32 : index
      %c256_49 = arith.constant 256 : index
      %115 = vector.load %arg8[%c32_48, %c256_49] : memref<72x768xf32, #tpu.memory_space<vmem>>, vector<8x256xf32>
      %116 = arith.addf %114, %115 : vector<8x256xf32>
      %c56_50 = arith.constant 56 : index
      %c352 = arith.constant 352 : index
      %117 = vector.load %arg8[%c56_50, %c352] : memref<72x768xf32, #tpu.memory_space<vmem>>, vector<8x256xf32>
      %118 = arith.addf %116, %117 : vector<8x256xf32>
      %119 = arith.addf %113, %118 : vector<8x256xf32>
      %c16_51 = arith.constant 16 : index
      %c166 = arith.constant 166 : index
      %120 = vector.load %arg8[%c16_51, %c166] : memref<72x768xf32, #tpu.memory_space<vmem>>, vector<8x256xf32>
      %c40_52 = arith.constant 40 : index
      %c262 = arith.constant 262 : index
      %121 = vector.load %arg8[%c40_52, %c262] : memref<72x768xf32, #tpu.memory_space<vmem>>, vector<8x256xf32>
      %122 = arith.addf %120, %121 : vector<8x256xf32>
      %c64_53 = arith.constant 64 : index
      %c358 = arith.constant 358 : index
      %123 = vector.load %arg8[%c64_53, %c358] : memref<72x768xf32, #tpu.memory_space<vmem>>, vector<8x256xf32>
      %124 = arith.addf %122, %123 : vector<8x256xf32>
      %c-6_i32 = arith.constant -6 : i32
      %125 = vector.broadcast %c-6_i32 : i32 to vector<1x256xi32>
      %126 = arith.cmpi sge, %19, %125 : vector<1x256xi32>
      %c10_i32 = arith.constant 10 : i32
      %127 = vector.broadcast %c10_i32 : i32 to vector<1x256xi32>
      %128 = arith.cmpi slt, %19, %127 : vector<1x256xi32>
      %129 = arith.andi %126, %128 : vector<1x256xi1>
      %cst_54 = arith.constant 0.000000e+00 : f32
      %130 = vector.shape_cast %129 : vector<1x256xi1> to vector<1x256xi1>
      %131 = vector.broadcast %130 : vector<1x256xi1> to vector<8x256xi1>
      %132 = vector.broadcast %cst_54 : f32 to vector<8x256xf32>
      %133 = arith.select %131, %124, %132 : vector<8x256xi1>, vector<8x256xf32>
      %134 = arith.addf %119, %133 : vector<8x256xf32>
      %c216 = arith.constant 216 : index
      %c0_55 = arith.constant 0 : index
      %135 = vector.load %arg7[%c216, %c0_55] : memref<288x256xf32, #tpu.memory_space<vmem>>, vector<72x256xf32>
      %c0_56 = arith.constant 0 : index
      %c256_57 = arith.constant 256 : index
      %136 = vector.load %arg8[%c0_56, %c256_57] : memref<72x768xf32, #tpu.memory_space<vmem>>, vector<72x256xf32>
      tpu.vector_store %arg8[%c0_56, %c256_57], %135 {strides = array<i32>} : memref<72x768xf32, #tpu.memory_space<vmem>>, vector<72x256xf32>,
      %c0_58 = arith.constant 0 : index
      %c120 = arith.constant 120 : index
      %137 = vector.load %arg8[%c0_58, %c120] : memref<72x768xf32, #tpu.memory_space<vmem>>, vector<8x256xf32>
      %c24_59 = arith.constant 24 : index
      %c248 = arith.constant 248 : index
      %138 = vector.load %arg8[%c24_59, %c248] : memref<72x768xf32, #tpu.memory_space<vmem>>, vector<8x256xf32>
      %139 = arith.addf %137, %138 : vector<8x256xf32>
      %c48_60 = arith.constant 48 : index
      %c376 = arith.constant 376 : index
      %140 = vector.load %arg8[%c48_60, %c376] : memref<72x768xf32, #tpu.memory_space<vmem>>, vector<8x256xf32>
      %141 = arith.addf %139, %140 : vector<8x256xf32>
      %c8_i32 = arith.constant 8 : i32
      %142 = vector.broadcast %c8_i32 : i32 to vector<1x256xi32>
      %143 = arith.cmpi sge, %19, %142 : vector<1x256xi32>
      %c24_i32 = arith.constant 24 : i32
      %144 = vector.broadcast %c24_i32 : i32 to vector<1x256xi32>
      %145 = arith.cmpi slt, %19, %144 : vector<1x256xi32>
      %146 = arith.andi %143, %145 : vector<1x256xi1>
      %cst_61 = arith.constant 0.000000e+00 : f32
      %147 = vector.shape_cast %146 : vector<1x256xi1> to vector<1x256xi1>
      %148 = vector.broadcast %147 : vector<1x256xi1> to vector<8x256xi1>
      %149 = vector.broadcast %cst_61 : f32 to vector<8x256xf32>
      %150 = arith.select %148, %141, %149 : vector<8x256xi1>, vector<8x256xf32>
      %151 = arith.addf %134, %150 : vector<8x256xf32>
      %c8_62 = arith.constant 8 : index
      %c128 = arith.constant 128 : index
      %152 = vector.load %arg8[%c8_62, %c128] : memref<72x768xf32, #tpu.memory_space<vmem>>, vector<8x256xf32>
      %c32_63 = arith.constant 32 : index
      %c256_64 = arith.constant 256 : index
      %153 = vector.load %arg8[%c32_63, %c256_64] : memref<72x768xf32, #tpu.memory_space<vmem>>, vector<8x256xf32>
      %154 = arith.addf %152, %153 : vector<8x256xf32>
      %c56_65 = arith.constant 56 : index
      %c384 = arith.constant 384 : index
      %155 = vector.load %arg8[%c56_65, %c384] : memref<72x768xf32, #tpu.memory_space<vmem>>, vector<8x256xf32>
      %156 = arith.addf %154, %155 : vector<8x256xf32>
      %157 = arith.addf %151, %156 : vector<8x256xf32>
      %c16_66 = arith.constant 16 : index
      %c136 = arith.constant 136 : index
      %158 = vector.load %arg8[%c16_66, %c136] : memref<72x768xf32, #tpu.memory_space<vmem>>, vector<8x256xf32>
      %c40_67 = arith.constant 40 : index
      %c264 = arith.constant 264 : index
      %159 = vector.load %arg8[%c40_67, %c264] : memref<72x768xf32, #tpu.memory_space<vmem>>, vector<8x256xf32>
      %160 = arith.addf %158, %159 : vector<8x256xf32>
      %c64_68 = arith.constant 64 : index
      %c392 = arith.constant 392 : index
      %161 = vector.load %arg8[%c64_68, %c392] : memref<72x768xf32, #tpu.memory_space<vmem>>, vector<8x256xf32>
      %162 = arith.addf %160, %161 : vector<8x256xf32>
      %c-8_i32 = arith.constant -8 : i32
      %163 = vector.broadcast %c-8_i32 : i32 to vector<1x256xi32>
      %164 = arith.cmpi sge, %19, %163 : vector<1x256xi32>
      %c8_i32_69 = arith.constant 8 : i32
      %165 = vector.broadcast %c8_i32_69 : i32 to vector<1x256xi32>
      %166 = arith.cmpi slt, %19, %165 : vector<1x256xi32>
      %167 = arith.andi %164, %166 : vector<1x256xi1>
      %cst_70 = arith.constant 0.000000e+00 : f32
      %168 = vector.shape_cast %167 : vector<1x256xi1> to vector<1x256xi1>
      %169 = vector.broadcast %168 : vector<1x256xi1> to vector<8x256xi1>
      %170 = vector.broadcast %cst_70 : f32 to vector<8x256xf32>
      %171 = arith.select %169, %162, %170 : vector<8x256xi1>, vector<8x256xf32>
      %172 = arith.addf %157, %171 : vector<8x256xf32>
      %c0_71 = arith.constant 0 : index
      %c0_72 = arith.constant 0 : index
      %173 = vector.load %arg5[%c0_71, %c0_72] : memref<8x1xf32, #tpu.memory_space<vmem>>, vector<8x1xf32>
      %174 = vector.broadcast %173 : vector<8x1xf32> to vector<8x256xf32>
      %175 = arith.addf %172, %174 : vector<8x256xf32>
      %c0_73 = arith.constant 0 : index
      %c0_74 = arith.constant 0 : index
      %c0_75 = arith.constant 0 : index
      %176 = vector.load %arg6[%c0_73, %c0_74, %c0_75] : memref<1x8x256xf32, #tpu.memory_space<vmem>>, vector<1x8x256xf32>
      %177 = vector.shape_cast %176 : vector<1x8x256xf32> to vector<8x256xf32>
      %178 = vector.shape_cast %175 : vector<8x256xf32> to vector<1x8x256xf32>
      tpu.vector_store %arg6[%c0_73, %c0_74, %c0_75], %178 {strides = array<i32>} : memref<1x8x256xf32, #tpu.memory_space<vmem>>, vector<1x8x256xf32>,
    } else {
    }
    return
  }
  func.func @transform_0(%arg0: i32, %arg1: i32) -> (i32, i32, i32) {
    %c0_i32 = arith.constant 0 : i32
    %c0_i32_0 = arith.constant 0 : i32
    return %arg0, %arg1, %c0_i32 : i32, i32, i32
  }
  func.func @transform_1(%arg0: i32, %arg1: i32) -> (i32, i32, i32) {
    %c0_i32 = arith.constant 0 : i32
    %c0_i32_0 = arith.constant 0 : i32
    %c0_i32_1 = arith.constant 0 : i32
    %c0_i32_2 = arith.constant 0 : i32
    return %c0_i32, %c0_i32_0, %c0_i32_1 : i32, i32, i32
  }
  func.func @transform_2(%arg0: i32, %arg1: i32) -> (i32, i32) {
    %c0_i32 = arith.constant 0 : i32
    %c0_i32_0 = arith.constant 0 : i32
    %c0_i32_1 = arith.constant 0 : i32
    return %c0_i32, %c0_i32_0 : i32, i32
  }
  func.func @transform_3(%arg0: i32, %arg1: i32) -> (i32, i32) {
    %c0_i32 = arith.constant 0 : i32
    %c0_i32_0 = arith.constant 0 : i32
    %c0_i32_1 = arith.constant 0 : i32
    return %c0_i32, %c0_i32_0 : i32, i32
  }
  func.func @transform_4(%arg0: i32, %arg1: i32) -> (i32, i32, i32) {
    %c0_i32 = arith.constant 0 : i32
    %c0_i32_0 = arith.constant 0 : i32
    %c0_i32_1 = arith.constant 0 : i32
    return %arg0, %c0_i32, %c0_i32_0 : i32, i32, i32
  }
}

module attributes {stable_mosaic.version = 11 : i64} {
  func.func @_aspp_kernel(%arg0: i32, %arg1: i32, %arg2: memref<1x512x256xbf16, #tpu.memory_space<vmem>>, %arg3: memref<4x288x512xbf16, #tpu.memory_space<vmem>>, %arg4: memref<1x256xi32, #tpu.memory_space<vmem>>, %arg5: memref<8x1xf32, #tpu.memory_space<vmem>>, %arg6: memref<1x8x256xf32, #tpu.memory_space<vmem>>, %arg7: memref<288x256xf32, #tpu.memory_space<vmem>>, %arg8: memref<72x768xf32, #tpu.memory_space<vmem>>) attributes {dimension_semantics = [#tpu.dimension_semantics<parallel>, #tpu.dimension_semantics<arbitrary>], iteration_bounds = array<i64: 2, 4>, scalar_prefetch = 0 : i64, scratch_operands = 2 : i64, tpu.core_type = #tpu.core_type<tc>, window_params = [{transform_indices = @transform_0, window_bounds = array<i64: 1, 512, 256>}, {pipeline_mode = #tpu.pipeline_mode<synchronous>, transform_indices = @transform_1, window_bounds = array<i64: 4, 288, 512>}, {pipeline_mode = #tpu.pipeline_mode<synchronous>, transform_indices = @transform_2, window_bounds = array<i64: 1, 256>}, {pipeline_mode = #tpu.pipeline_mode<synchronous>, transform_indices = @transform_3, window_bounds = array<i64: 8, 1>}, {transform_indices = @transform_4, window_bounds = array<i64: 1, 8, 256>}]} {
    %c0_i32 = arith.constant 0 : i32
    %0 = arith.cmpi eq, %arg1, %c0_i32 : i32
    %1 = arith.extui %0 : i1 to i32
    %c0_i32_0 = arith.constant 0 : i32
    %2 = arith.cmpi ne, %1, %c0_i32_0 : i32
    scf.if %2 {
      %cst_10 = arith.constant 0.000000e+00 : f32
      %15 = vector.broadcast %cst_10 : f32 to vector<288x256xf32>
      %c0_11 = arith.constant 0 : index
      %c0_12 = arith.constant 0 : index
      %16 = vector.load %arg7[%c0_11, %c0_12] : memref<288x256xf32, #tpu.memory_space<vmem>>, vector<288x256xf32>
      tpu.vector_store %arg7[%c0_11, %c0_12], %15 {strides = array<i32>} : memref<288x256xf32, #tpu.memory_space<vmem>>, vector<288x256xf32>,
    } else {
    }
    %c0 = arith.constant 0 : index
    %c0_1 = arith.constant 0 : index
    %3 = vector.load %arg7[%c0, %c0_1] : memref<288x256xf32, #tpu.memory_space<vmem>>, vector<288x256xf32>
    %4 = arith.index_cast %arg1 : i32 to index
    %c0_2 = arith.constant 0 : index
    %c0_3 = arith.constant 0 : index
    %5 = vector.load %arg3[%4, %c0_2, %c0_3] : memref<4x288x512xbf16, #tpu.memory_space<vmem>>, vector<1x288x512xbf16>
    %6 = vector.shape_cast %5 : vector<1x288x512xbf16> to vector<288x512xbf16>
    %c0_4 = arith.constant 0 : index
    %c0_5 = arith.constant 0 : index
    %c0_6 = arith.constant 0 : index
    %7 = vector.load %arg2[%c0_4, %c0_5, %c0_6] : memref<1x512x256xbf16, #tpu.memory_space<vmem>>, vector<1x512x256xbf16>
    %8 = vector.shape_cast %7 : vector<1x512x256xbf16> to vector<512x256xbf16>
    %cst = arith.constant dense<0.000000e+00> : vector<288x256xf32>
    %9 = tpu.matmul %6, %8, %cst {dimension_numbers = #tpu.dot_dimension_numbers<[1], [0], [0], [1], [0, 0, 1, 1], [], []>} : vector<288x512xbf16>, vector<512x256xbf16>, vector<288x256xf32> -> vector<288x256xf32>
    %10 = arith.addf %3, %9 : vector<288x256xf32>
    %c0_7 = arith.constant 0 : index
    %c0_8 = arith.constant 0 : index
    %11 = vector.load %arg7[%c0_7, %c0_8] : memref<288x256xf32, #tpu.memory_space<vmem>>, vector<288x256xf32>
    tpu.vector_store %arg7[%c0_7, %c0_8], %10 {strides = array<i32>} : memref<288x256xf32, #tpu.memory_space<vmem>>, vector<288x256xf32>,
    %c3_i32 = arith.constant 3 : i32
    %12 = arith.cmpi eq, %arg1, %c3_i32 : i32
    %13 = arith.extui %12 : i1 to i32
    %c0_i32_9 = arith.constant 0 : i32
    %14 = arith.cmpi ne, %13, %c0_i32_9 : i32
    scf.if %14 {
      %cst_10 = arith.constant 0.000000e+00 : f32
      %15 = vector.broadcast %cst_10 : f32 to vector<72x256xf32>
      %c0_11 = arith.constant 0 : index
      %c0_12 = arith.constant 0 : index
      %16 = vector.load %arg8[%c0_11, %c0_12] : memref<72x768xf32, #tpu.memory_space<vmem>>, vector<72x256xf32>
      tpu.vector_store %arg8[%c0_11, %c0_12], %15 {strides = array<i32>} : memref<72x768xf32, #tpu.memory_space<vmem>>, vector<72x256xf32>,
      %cst_13 = arith.constant 0.000000e+00 : f32
      %17 = vector.broadcast %cst_13 : f32 to vector<72x256xf32>
      %c0_14 = arith.constant 0 : index
      %c512 = arith.constant 512 : index
      %18 = vector.load %arg8[%c0_14, %c512] : memref<72x768xf32, #tpu.memory_space<vmem>>, vector<72x256xf32>
      tpu.vector_store %arg8[%c0_14, %c512], %17 {strides = array<i32>} : memref<72x768xf32, #tpu.memory_space<vmem>>, vector<72x256xf32>,
      %c0_15 = arith.constant 0 : index
      %c0_16 = arith.constant 0 : index
      %19 = vector.load %arg4[%c0_15, %c0_16] : memref<1x256xi32, #tpu.memory_space<vmem>>, vector<1x256xi32>
      %cst_17 = arith.constant 0.000000e+00 : f32
      %20 = vector.broadcast %cst_17 : f32 to vector<8x256xf32>
      %c0_18 = arith.constant 0 : index
      %c0_19 = arith.constant 0 : index
      %21 = vector.load %arg7[%c0_18, %c0_19] : memref<288x256xf32, #tpu.memory_space<vmem>>, vector<72x256xf32>
      %c0_20 = arith.constant 0 : index
      %c256 = arith.constant 256 : index
      %22 = vector.load %arg8[%c0_20, %c256] : memref<72x768xf32, #tpu.memory_space<vmem>>, vector<72x256xf32>
      tpu.vector_store %arg8[%c0_20, %c256], %21 {strides = array<i32>} : memref<72x768xf32, #tpu.memory_space<vmem>>, vector<72x256xf32>,
      %c0_21 = arith.constant 0 : index
      %c222 = arith.constant 222 : index
      %23 = vector.load %arg8[%c0_21, %c222] : memref<72x768xf32, #tpu.memory_space<vmem>>, vector<8x256xf32>
      %c24 = arith.constant 24 : index
      %c254 = arith.constant 254 : index
      %24 = vector.load %arg8[%c24, %c254] : memref<72x768xf32, #tpu.memory_space<vmem>>, vector<8x256xf32>
      %25 = arith.addf %23, %24 : vector<8x256xf32>
      %c48 = arith.constant 48 : index
      %c286 = arith.constant 286 : index
      %26 = vector.load %arg8[%c48, %c286] : memref<72x768xf32, #tpu.memory_space<vmem>>, vector<8x256xf32>
      %27 = arith.addf %25, %26 : vector<8x256xf32>
      %c2_i32 = arith.constant 2 : i32
      %28 = vector.broadcast %c2_i32 : i32 to vector<1x256xi32>
      %29 = arith.cmpi sge, %19, %28 : vector<1x256xi32>
      %c18_i32 = arith.constant 18 : i32
      %30 = vector.broadcast %c18_i32 : i32 to vector<1x256xi32>
      %31 = arith.cmpi slt, %19, %30 : vector<1x256xi32>
      %32 = arith.andi %29, %31 : vector<1x256xi1>
      %cst_22 = arith.constant 0.000000e+00 : f32
      %33 = vector.shape_cast %32 : vector<1x256xi1> to vector<1x256xi1>
      %34 = vector.broadcast %33 : vector<1x256xi1> to vector<8x256xi1>
      %35 = vector.broadcast %cst_22 : f32 to vector<8x256xf32>
      %36 = arith.select %34, %27, %35 : vector<8x256xi1>, vector<8x256xf32>
      %37 = arith.addf %20, %36 : vector<8x256xf32>
      %c8 = arith.constant 8 : index
      %c224 = arith.constant 224 : index
      %38 = vector.load %arg8[%c8, %c224] : memref<72x768xf32, #tpu.memory_space<vmem>>, vector<8x256xf32>
      %c32 = arith.constant 32 : index
      %c256_23 = arith.constant 256 : index
      %39 = vector.load %arg8[%c32, %c256_23] : memref<72x768xf32, #tpu.memory_space<vmem>>, vector<8x256xf32>
      %40 = arith.addf %38, %39 : vector<8x256xf32>
      %c56 = arith.constant 56 : index
      %c288 = arith.constant 288 : index
      %41 = vector.load %arg8[%c56, %c288] : memref<72x768xf32, #tpu.memory_space<vmem>>, vector<8x256xf32>
      %42 = arith.addf %40, %41 : vector<8x256xf32>
      %43 = arith.addf %37, %42 : vector<8x256xf32>
      %c16 = arith.constant 16 : index
      %c226 = arith.constant 226 : index
      %44 = vector.load %arg8[%c16, %c226] : memref<72x768xf32, #tpu.memory_space<vmem>>, vector<8x256xf32>
      %c40 = arith.constant 40 : index
      %c258 = arith.constant 258 : index
      %45 = vector.load %arg8[%c40, %c258] : memref<72x768xf32, #tpu.memory_space<vmem>>, vector<8x256xf32>
      %46 = arith.addf %44, %45 : vector<8x256xf32>
      %c64 = arith.constant 64 : index
      %c290 = arith.constant 290 : index
      %47 = vector.load %arg8[%c64, %c290] : memref<72x768xf32, #tpu.memory_space<vmem>>, vector<8x256xf32>
      %48 = arith.addf %46, %47 : vector<8x256xf32>
      %c-2_i32 = arith.constant -2 : i32
      %49 = vector.broadcast %c-2_i32 : i32 to vector<1x256xi32>
      %50 = arith.cmpi sge, %19, %49 : vector<1x256xi32>
      %c14_i32 = arith.constant 14 : i32
      %51 = vector.broadcast %c14_i32 : i32 to vector<1x256xi32>
      %52 = arith.cmpi slt, %19, %51 : vector<1x256xi32>
      %53 = arith.andi %50, %52 : vector<1x256xi1>
      %cst_24 = arith.constant 0.000000e+00 : f32
      %54 = vector.shape_cast %53 : vector<1x256xi1> to vector<1x256xi1>
      %55 = vector.broadcast %54 : vector<1x256xi1> to vector<8x256xi1>
      %56 = vector.broadcast %cst_24 : f32 to vector<8x256xf32>
      %57 = arith.select %55, %48, %56 : vector<8x256xi1>, vector<8x256xf32>
      %58 = arith.addf %43, %57 : vector<8x256xf32>
      %c72 = arith.constant 72 : index
      %c0_25 = arith.constant 0 : index
      %59 = vector.load %arg7[%c72, %c0_25] : memref<288x256xf32, #tpu.memory_space<vmem>>, vector<72x256xf32>
      %c0_26 = arith.constant 0 : index
      %c256_27 = arith.constant 256 : index
      %60 = vector.load %arg8[%c0_26, %c256_27] : memref<72x768xf32, #tpu.memory_space<vmem>>, vector<72x256xf32>
      tpu.vector_store %arg8[%c0_26, %c256_27], %59 {strides = array<i32>} : memref<72x768xf32, #tpu.memory_space<vmem>>, vector<72x256xf32>,
      %c0_28 = arith.constant 0 : index
      %c188 = arith.constant 188 : index
      %61 = vector.load %arg8[%c0_28, %c188] : memref<72x768xf32, #tpu.memory_space<vmem>>, vector<8x256xf32>
      %c24_29 = arith.constant 24 : index
      %c252 = arith.constant 252 : index
      %62 = vector.load %arg8[%c24_29, %c252] : memref<72x768xf32, #tpu.memory_space<vmem>>, vector<8x256xf32>
      %63 = arith.addf %61, %62 : vector<8x256xf32>
      %c48_30 = arith.constant 48 : index
      %c316 = arith.constant 316 : index
      %64 = vector.load %arg8[%c48_30, %c316] : memref<72x768xf32, #tpu.memory_space<vmem>>, vector<8x256xf32>
      %65 = arith.addf %63, %64 : vector<8x256xf32>
      %c4_i32 = arith.constant 4 : i32
      %66 = vector.broadcast %c4_i32 : i32 to vector<1x256xi32>
      %67 = arith.cmpi sge, %19, %66 : vector<1x256xi32>
      %c20_i32 = arith.constant 20 : i32
      %68 = vector.broadcast %c20_i32 : i32 to vector<1x256xi32>
      %69 = arith.cmpi slt, %19, %68 : vector<1x256xi32>
      %70 = arith.andi %67, %69 : vector<1x256xi1>
      %cst_31 = arith.constant 0.000000e+00 : f32
      %71 = vector.shape_cast %70 : vector<1x256xi1> to vector<1x256xi1>
      %72 = vector.broadcast %71 : vector<1x256xi1> to vector<8x256xi1>
      %73 = vector.broadcast %cst_31 : f32 to vector<8x256xf32>
      %74 = arith.select %72, %65, %73 : vector<8x256xi1>, vector<8x256xf32>
      %75 = arith.addf %58, %74 : vector<8x256xf32>
      %c8_32 = arith.constant 8 : index
      %c192 = arith.constant 192 : index
      %76 = vector.load %arg8[%c8_32, %c192] : memref<72x768xf32, #tpu.memory_space<vmem>>, vector<8x256xf32>
      %c32_33 = arith.constant 32 : index
      %c256_34 = arith.constant 256 : index
      %77 = vector.load %arg8[%c32_33, %c256_34] : memref<72x768xf32, #tpu.memory_space<vmem>>, vector<8x256xf32>
      %78 = arith.addf %76, %77 : vector<8x256xf32>
      %c56_35 = arith.constant 56 : index
      %c320 = arith.constant 320 : index
      %79 = vector.load %arg8[%c56_35, %c320] : memref<72x768xf32, #tpu.memory_space<vmem>>, vector<8x256xf32>
      %80 = arith.addf %78, %79 : vector<8x256xf32>
      %81 = arith.addf %75, %80 : vector<8x256xf32>
      %c16_36 = arith.constant 16 : index
      %c196 = arith.constant 196 : index
      %82 = vector.load %arg8[%c16_36, %c196] : memref<72x768xf32, #tpu.memory_space<vmem>>, vector<8x256xf32>
      %c40_37 = arith.constant 40 : index
      %c260 = arith.constant 260 : index
      %83 = vector.load %arg8[%c40_37, %c260] : memref<72x768xf32, #tpu.memory_space<vmem>>, vector<8x256xf32>
      %84 = arith.addf %82, %83 : vector<8x256xf32>
      %c64_38 = arith.constant 64 : index
      %c324 = arith.constant 324 : index
      %85 = vector.load %arg8[%c64_38, %c324] : memref<72x768xf32, #tpu.memory_space<vmem>>, vector<8x256xf32>
      %86 = arith.addf %84, %85 : vector<8x256xf32>
      %c-4_i32 = arith.constant -4 : i32
      %87 = vector.broadcast %c-4_i32 : i32 to vector<1x256xi32>
      %88 = arith.cmpi sge, %19, %87 : vector<1x256xi32>
      %c12_i32 = arith.constant 12 : i32
      %89 = vector.broadcast %c12_i32 : i32 to vector<1x256xi32>
      %90 = arith.cmpi slt, %19, %89 : vector<1x256xi32>
      %91 = arith.andi %88, %90 : vector<1x256xi1>
      %cst_39 = arith.constant 0.000000e+00 : f32
      %92 = vector.shape_cast %91 : vector<1x256xi1> to vector<1x256xi1>
      %93 = vector.broadcast %92 : vector<1x256xi1> to vector<8x256xi1>
      %94 = vector.broadcast %cst_39 : f32 to vector<8x256xf32>
      %95 = arith.select %93, %86, %94 : vector<8x256xi1>, vector<8x256xf32>
      %96 = arith.addf %81, %95 : vector<8x256xf32>
      %c144 = arith.constant 144 : index
      %c0_40 = arith.constant 0 : index
      %97 = vector.load %arg7[%c144, %c0_40] : memref<288x256xf32, #tpu.memory_space<vmem>>, vector<72x256xf32>
      %c0_41 = arith.constant 0 : index
      %c256_42 = arith.constant 256 : index
      %98 = vector.load %arg8[%c0_41, %c256_42] : memref<72x768xf32, #tpu.memory_space<vmem>>, vector<72x256xf32>
      tpu.vector_store %arg8[%c0_41, %c256_42], %97 {strides = array<i32>} : memref<72x768xf32, #tpu.memory_space<vmem>>, vector<72x256xf32>,
      %c0_43 = arith.constant 0 : index
      %c154 = arith.constant 154 : index
      %99 = vector.load %arg8[%c0_43, %c154] : memref<72x768xf32, #tpu.memory_space<vmem>>, vector<8x256xf32>
      %c24_44 = arith.constant 24 : index
      %c250 = arith.constant 250 : index
      %100 = vector.load %arg8[%c24_44, %c250] : memref<72x768xf32, #tpu.memory_space<vmem>>, vector<8x256xf32>
      %101 = arith.addf %99, %100 : vector<8x256xf32>
      %c48_45 = arith.constant 48 : index
      %c346 = arith.constant 346 : index
      %102 = vector.load %arg8[%c48_45, %c346] : memref<72x768xf32, #tpu.memory_space<vmem>>, vector<8x256xf32>
      %103 = arith.addf %101, %102 : vector<8x256xf32>
      %c6_i32 = arith.constant 6 : i32
      %104 = vector.broadcast %c6_i32 : i32 to vector<1x256xi32>
      %105 = arith.cmpi sge, %19, %104 : vector<1x256xi32>
      %c22_i32 = arith.constant 22 : i32
      %106 = vector.broadcast %c22_i32 : i32 to vector<1x256xi32>
      %107 = arith.cmpi slt, %19, %106 : vector<1x256xi32>
      %108 = arith.andi %105, %107 : vector<1x256xi1>
      %cst_46 = arith.constant 0.000000e+00 : f32
      %109 = vector.shape_cast %108 : vector<1x256xi1> to vector<1x256xi1>
      %110 = vector.broadcast %109 : vector<1x256xi1> to vector<8x256xi1>
      %111 = vector.broadcast %cst_46 : f32 to vector<8x256xf32>
      %112 = arith.select %110, %103, %111 : vector<8x256xi1>, vector<8x256xf32>
      %113 = arith.addf %96, %112 : vector<8x256xf32>
      %c8_47 = arith.constant 8 : index
      %c160 = arith.constant 160 : index
      %114 = vector.load %arg8[%c8_47, %c160] : memref<72x768xf32, #tpu.memory_space<vmem>>, vector<8x256xf32>
      %c32_48 = arith.constant 32 : index
      %c256_49 = arith.constant 256 : index
      %115 = vector.load %arg8[%c32_48, %c256_49] : memref<72x768xf32, #tpu.memory_space<vmem>>, vector<8x256xf32>
      %116 = arith.addf %114, %115 : vector<8x256xf32>
      %c56_50 = arith.constant 56 : index
      %c352 = arith.constant 352 : index
      %117 = vector.load %arg8[%c56_50, %c352] : memref<72x768xf32, #tpu.memory_space<vmem>>, vector<8x256xf32>
      %118 = arith.addf %116, %117 : vector<8x256xf32>
      %119 = arith.addf %113, %118 : vector<8x256xf32>
      %c16_51 = arith.constant 16 : index
      %c166 = arith.constant 166 : index
      %120 = vector.load %arg8[%c16_51, %c166] : memref<72x768xf32, #tpu.memory_space<vmem>>, vector<8x256xf32>
      %c40_52 = arith.constant 40 : index
      %c262 = arith.constant 262 : index
      %121 = vector.load %arg8[%c40_52, %c262] : memref<72x768xf32, #tpu.memory_space<vmem>>, vector<8x256xf32>
      %122 = arith.addf %120, %121 : vector<8x256xf32>
      %c64_53 = arith.constant 64 : index
      %c358 = arith.constant 358 : index
      %123 = vector.load %arg8[%c64_53, %c358] : memref<72x768xf32, #tpu.memory_space<vmem>>, vector<8x256xf32>
      %124 = arith.addf %122, %123 : vector<8x256xf32>
      %c-6_i32 = arith.constant -6 : i32
      %125 = vector.broadcast %c-6_i32 : i32 to vector<1x256xi32>
      %126 = arith.cmpi sge, %19, %125 : vector<1x256xi32>
      %c10_i32 = arith.constant 10 : i32
      %127 = vector.broadcast %c10_i32 : i32 to vector<1x256xi32>
      %128 = arith.cmpi slt, %19, %127 : vector<1x256xi32>
      %129 = arith.andi %126, %128 : vector<1x256xi1>
      %cst_54 = arith.constant 0.000000e+00 : f32
      %130 = vector.shape_cast %129 : vector<1x256xi1> to vector<1x256xi1>
      %131 = vector.broadcast %130 : vector<1x256xi1> to vector<8x256xi1>
      %132 = vector.broadcast %cst_54 : f32 to vector<8x256xf32>
      %133 = arith.select %131, %124, %132 : vector<8x256xi1>, vector<8x256xf32>
      %134 = arith.addf %119, %133 : vector<8x256xf32>
      %c216 = arith.constant 216 : index
      %c0_55 = arith.constant 0 : index
      %135 = vector.load %arg7[%c216, %c0_55] : memref<288x256xf32, #tpu.memory_space<vmem>>, vector<72x256xf32>
      %c0_56 = arith.constant 0 : index
      %c256_57 = arith.constant 256 : index
      %136 = vector.load %arg8[%c0_56, %c256_57] : memref<72x768xf32, #tpu.memory_space<vmem>>, vector<72x256xf32>
      tpu.vector_store %arg8[%c0_56, %c256_57], %135 {strides = array<i32>} : memref<72x768xf32, #tpu.memory_space<vmem>>, vector<72x256xf32>,
      %c0_58 = arith.constant 0 : index
      %c120 = arith.constant 120 : index
      %137 = vector.load %arg8[%c0_58, %c120] : memref<72x768xf32, #tpu.memory_space<vmem>>, vector<8x256xf32>
      %c24_59 = arith.constant 24 : index
      %c248 = arith.constant 248 : index
      %138 = vector.load %arg8[%c24_59, %c248] : memref<72x768xf32, #tpu.memory_space<vmem>>, vector<8x256xf32>
      %139 = arith.addf %137, %138 : vector<8x256xf32>
      %c48_60 = arith.constant 48 : index
      %c376 = arith.constant 376 : index
      %140 = vector.load %arg8[%c48_60, %c376] : memref<72x768xf32, #tpu.memory_space<vmem>>, vector<8x256xf32>
      %141 = arith.addf %139, %140 : vector<8x256xf32>
      %c8_i32 = arith.constant 8 : i32
      %142 = vector.broadcast %c8_i32 : i32 to vector<1x256xi32>
      %143 = arith.cmpi sge, %19, %142 : vector<1x256xi32>
      %c24_i32 = arith.constant 24 : i32
      %144 = vector.broadcast %c24_i32 : i32 to vector<1x256xi32>
      %145 = arith.cmpi slt, %19, %144 : vector<1x256xi32>
      %146 = arith.andi %143, %145 : vector<1x256xi1>
      %cst_61 = arith.constant 0.000000e+00 : f32
      %147 = vector.shape_cast %146 : vector<1x256xi1> to vector<1x256xi1>
      %148 = vector.broadcast %147 : vector<1x256xi1> to vector<8x256xi1>
      %149 = vector.broadcast %cst_61 : f32 to vector<8x256xf32>
      %150 = arith.select %148, %141, %149 : vector<8x256xi1>, vector<8x256xf32>
      %151 = arith.addf %134, %150 : vector<8x256xf32>
      %c8_62 = arith.constant 8 : index
      %c128 = arith.constant 128 : index
      %152 = vector.load %arg8[%c8_62, %c128] : memref<72x768xf32, #tpu.memory_space<vmem>>, vector<8x256xf32>
      %c32_63 = arith.constant 32 : index
      %c256_64 = arith.constant 256 : index
      %153 = vector.load %arg8[%c32_63, %c256_64] : memref<72x768xf32, #tpu.memory_space<vmem>>, vector<8x256xf32>
      %154 = arith.addf %152, %153 : vector<8x256xf32>
      %c56_65 = arith.constant 56 : index
      %c384 = arith.constant 384 : index
      %155 = vector.load %arg8[%c56_65, %c384] : memref<72x768xf32, #tpu.memory_space<vmem>>, vector<8x256xf32>
      %156 = arith.addf %154, %155 : vector<8x256xf32>
      %157 = arith.addf %151, %156 : vector<8x256xf32>
      %c16_66 = arith.constant 16 : index
      %c136 = arith.constant 136 : index
      %158 = vector.load %arg8[%c16_66, %c136] : memref<72x768xf32, #tpu.memory_space<vmem>>, vector<8x256xf32>
      %c40_67 = arith.constant 40 : index
      %c264 = arith.constant 264 : index
      %159 = vector.load %arg8[%c40_67, %c264] : memref<72x768xf32, #tpu.memory_space<vmem>>, vector<8x256xf32>
      %160 = arith.addf %158, %159 : vector<8x256xf32>
      %c64_68 = arith.constant 64 : index
      %c392 = arith.constant 392 : index
      %161 = vector.load %arg8[%c64_68, %c392] : memref<72x768xf32, #tpu.memory_space<vmem>>, vector<8x256xf32>
      %162 = arith.addf %160, %161 : vector<8x256xf32>
      %c-8_i32 = arith.constant -8 : i32
      %163 = vector.broadcast %c-8_i32 : i32 to vector<1x256xi32>
      %164 = arith.cmpi sge, %19, %163 : vector<1x256xi32>
      %c8_i32_69 = arith.constant 8 : i32
      %165 = vector.broadcast %c8_i32_69 : i32 to vector<1x256xi32>
      %166 = arith.cmpi slt, %19, %165 : vector<1x256xi32>
      %167 = arith.andi %164, %166 : vector<1x256xi1>
      %cst_70 = arith.constant 0.000000e+00 : f32
      %168 = vector.shape_cast %167 : vector<1x256xi1> to vector<1x256xi1>
      %169 = vector.broadcast %168 : vector<1x256xi1> to vector<8x256xi1>
      %170 = vector.broadcast %cst_70 : f32 to vector<8x256xf32>
      %171 = arith.select %169, %162, %170 : vector<8x256xi1>, vector<8x256xf32>
      %172 = arith.addf %157, %171 : vector<8x256xf32>
      %c0_71 = arith.constant 0 : index
      %c0_72 = arith.constant 0 : index
      %173 = vector.load %arg5[%c0_71, %c0_72] : memref<8x1xf32, #tpu.memory_space<vmem>>, vector<8x1xf32>
      %174 = vector.broadcast %173 : vector<8x1xf32> to vector<8x256xf32>
      %175 = arith.addf %172, %174 : vector<8x256xf32>
      %c0_73 = arith.constant 0 : index
      %c0_74 = arith.constant 0 : index
      %c0_75 = arith.constant 0 : index
      %176 = vector.load %arg6[%c0_73, %c0_74, %c0_75] : memref<1x8x256xf32, #tpu.memory_space<vmem>>, vector<1x8x256xf32>
      %177 = vector.shape_cast %176 : vector<1x8x256xf32> to vector<8x256xf32>
      %178 = vector.shape_cast %175 : vector<8x256xf32> to vector<1x8x256xf32>
      tpu.vector_store %arg6[%c0_73, %c0_74, %c0_75], %178 {strides = array<i32>} : memref<1x8x256xf32, #tpu.memory_space<vmem>>, vector<1x8x256xf32>,
    } else {
    }
    return
  }
  func.func @transform_0(%arg0: i32, %arg1: i32) -> (i32, i32, i32) {
    %c0_i32 = arith.constant 0 : i32
    %c0_i32_0 = arith.constant 0 : i32
    return %arg0, %arg1, %c0_i32 : i32, i32, i32
  }
  func.func @transform_1(%arg0: i32, %arg1: i32) -> (i32, i32, i32) {
    %c0_i32 = arith.constant 0 : i32
    %c0_i32_0 = arith.constant 0 : i32
    %c0_i32_1 = arith.constant 0 : i32
    %c0_i32_2 = arith.constant 0 : i32
    return %c0_i32, %c0_i32_0, %c0_i32_1 : i32, i32, i32
  }
  func.func @transform_2(%arg0: i32, %arg1: i32) -> (i32, i32) {
    %c0_i32 = arith.constant 0 : i32
    %c0_i32_0 = arith.constant 0 : i32
    %c0_i32_1 = arith.constant 0 : i32
    return %c0_i32, %c0_i32_0 : i32, i32
  }
  func.func @transform_3(%arg0: i32, %arg1: i32) -> (i32, i32) {
    %c0_i32 = arith.constant 0 : i32
    %c0_i32_0 = arith.constant 0 : i32
    %c0_i32_1 = arith.constant 0 : i32
    return %c0_i32, %c0_i32_0 : i32, i32
  }
  func.func @transform_4(%arg0: i32, %arg1: i32) -> (i32, i32, i32) {
    %c0_i32 = arith.constant 0 : i32
    %c0_i32_0 = arith.constant 0 : i32
    %c0_i32_1 = arith.constant 0 : i32
    return %arg0, %c0_i32, %c0_i32_0 : i32, i32, i32
  }
}

</mosaic_0001>

<bundles_post_ra>
// kernel: tpu_custom_call.1
= control target key start
LH: loop header
LB: loop body
LE: loop exit
PB: predicated region body
PF: predicated region fallthrough
CT: control target
= control target key end

     0   :  { %s5361_s0 = inlined_call_operand.hbm [shape: bf16[2,2048,256], index: 0, kind: input, shape index: {}]   ;;  %s5362_s1 = inlined_call_operand.hbm [shape: bf16[4,288,512], index: 1, kind: input, shape index: {}]   ;;  %s5363_s2 = inlined_call_operand.hbm [shape: s32[1,256], index: 2, kind: input, shape index: {}]   ;;  %s5364_s3 = inlined_call_operand.vmem [shape: f32[8,1], index: 3, kind: input, shape index: {}]   ;;  %s5365_s4 = inlined_call_operand.hbm [shape: f32[2,8,256], index: 4, kind: output, shape index: {}]  }
   0x1   :  { %5400 = sst [smem:[#allocation47_spill]] %s5362_s1 }
   0x2   :  { %5401 = sst [smem:[#allocation48_spill]] %s5363_s2 }
   0x3   :  { %5402 = sst [smem:[#allocation49_spill]] %s5364_s3 }
   0x4   :  { %5403 = sst [smem:[#allocation50_spill]] %s5365_s4 }
   0x5   :  { %9 = vsyncpa [#allocation5], 0 }
   0x6   :  { %11 = vsyncpa [#allocation5 + $0x1], 0 }
   0x7   :  { %12 = vsyncpa [#allocation8], 0 }
   0x8   :  { %13 = vsyncpa [#allocation6], 0 }
   0x9   :  { %15 = vsyncpa [#allocation6 + $0x1], 0  ;;  %s4257_s15 = smov 0   ;;  %s4259_s16 = smov 0  }
   0xa   :  { %s4261_s17 = smov 0   ;;  %s4263_s18 = smov 0  }
   0xb   :  { %s4265_s19 = smov 0   ;;  %s4267_s20 = smov 0  }
   0xc   :  { %s4269_s21 = smov 0   ;;  %s4271_s22 = smov 0  }
   0xd   :  { %s4273_s23 = smov 0   ;;  %s4275_s24 = smov 0  }
   0xe   :  { %s4277_s25 = smov 0  }
   0xf LB: > { %5404 = sst [smem:[#allocation14_spill]] %s4170_s15  ;;  %s3115_s26 = sadd.s32 4294967295, %s4210_s25   ;;  %s4210_s25 = sphi %s4277_s25, %s21_s25   ;;  %s4206_s24 = sphi %s4275_s24, %s5502_s24   ;;  %s4202_s23 = sphi %s4273_s23, %s5501_s23   ;;  %s4198_s22 = sphi %s4271_s22, %s5500_s22   ;;  %s4194_s21 = sphi %s4269_s21, %s5499_s21   ;;  %s4190_s20 = sphi %s4267_s20, %s5498_s20   ;;  %s4186_s19 = sphi %s4265_s19, %s5497_s19   ;;  %s4182_s18 = sphi %s4263_s18, %s5496_s18   ;;  %s4178_s17 = sphi %s4261_s17, %s5495_s17   ;;  %s4174_s16 = sphi %s4259_s16, %s5494_s16   ;;  %s4170_s15 = sphi %s4257_s15, %s5493_s15  }
  0x10   : > { %5405 = sst [smem:[#allocation15_spill]] %s4194_s21  ;;  %s3116_s27 = sadd.s32 4294967294, %s4210_s25  }
  0x11   : > { %5406 = sst [smem:[#allocation16_spill]] %s4198_s22  ;;  %p55_p0 = scmp.ne.s32.totalorder %s4186_s19, %s4182_s18 }
  0x12   : > { %p4313_p1 = scmp.eq.s32.totalorder %s3115_s26, 0  ;;  %p141_p2 = scmp.ne.s32.totalorder %s4178_s17, %s4174_s16 }
  0x13   : > { %p142_p3 = scmp.eq.s32.totalorder %s3115_s26, 7  ;;  %p147_p5 = scmp.ne.s32.totalorder %s4174_s16, %s4170_s15 }
  0x14   : > { %p4321_p4 = por %p4313_p1, %p55_p0  ;;  %p148_p7 = scmp.eq.s32.totalorder %s3116_s27, 7 }
  0x15   : > { %p4327_p6 = por %p142_p3, %p141_p2  ;;  %p3117_p8 = scmp.ge.s32.totalorder %s4210_s25, 1 }
  0x16   : > { %p155_p9 = scmp.lt.s32.totalorder %s4210_s25, 9  ;;  %p4333_p10 = por %p148_p7, %p147_p5 }
  0x17   : > { %s5409_s30 = scalar_select %p4327_p6, 1, 0 }
  0x18   : > { %s5411_s5 = scalar_select %p4333_p10, 1, 0 }
  0x19   : > { %5410 = sst [smem:[#allocation17_spill]] %s5409_s30  ;;  %p4337_p11 = pnand %p3117_p8, %p155_p9 }
  0x1a   : > { %5412 = sst [smem:[#allocation18_spill]] %s5411_s5  ;;  %s4212_s10 = smov [#allocation7]  }
  0x1b   : > { %s5414_s1 = sld [smem:[#allocation47_spill]]  ;;  %p3834_p12 = pneg %p4337_p11 }
  0x1c   : > { %s168_s11 = sshll.u32 %s4212_s10, 4  ;;  %s5415_s2 = sld [smem:[#allocation48_spill]]  ;;  %s169_s11 = int_to_ptr.vmem [resolvable:$true] %s168_s11 }
  0x1d   : > { %p3835_p13 = pnand %p3834_p12, %p4313_p1  ;;  %s4213_s18 = smov 256  }
  0x1e   : > { %s4214_s26 = smov 16   ;;  %s4215_s27 = smov [#allocation9]  }
  0x1f   : > { %s183_s7 = sshll.u32 %s4215_s27, 4  ;;  %s30_s8 = sadd.s32 1, %s4202_s23  ;;  %s184_s7 = int_to_ptr.vmem [resolvable:$true] %s183_s7 }
  0x20   : > { %p31_p0 = scmp.ge.s32.totalorder %s30_s8, 4  ;;  %s33_s10 = sadd.s32 1, %s4206_s24 }
  0x21   : > { %s166_s9 = sshll.u32 %s5414_s1, 4  ;;  %s42_s12 = sadd.s32 1, %s4190_s20  ;;  %s167_s9 = int_to_ptr.hbm [resolvable:$true] %s166_s9 }
  0x22   : > { %s181_s14 = sshll.u32 %s5415_s2, 4  ;;  %p49_p2 = scmp.ne.s32.totalorder %s4190_s20, %s4186_s19  ;;  %s182_s14 = int_to_ptr.hbm [resolvable:$true] %s181_s14 }
  0x23   : > { %3837 = dma.hbm_to_vmem [thread:$0]  (!%p3835_p13), %s167_s9, 36864, %s169_s11, [#allocation8], %s4213_s18, %s4213_s18, %s4214_s26  }
  0x24   : > { %3840 = dma.hbm_to_vmem [thread:$0]  (!%p3835_p13), %s182_s14, 32, %s184_s7, [#allocation8]  }
  0x25   : > { %s5504_s8 = smov (%p31_p0, %s30_s8), 0  ;;  %s5506_s10 = smov (!%p31_p0, %s33_s10), %s4206_s24 }
  0x26   : > { %5416 = sst [smem:[#allocation19_spill]] %s5504_s8  ;;  %s38_s9 = ssub.s32 %s4202_s23, %s5504_s8 }
  0x27   : > { %p50_p3 = scmp.eq.s32.totalorder %s4210_s25, 0  ;;  %p35_p5 = scmp.ge.s32.totalorder %s5506_s10, 2 }
  0x28   : > { %s131_s11 = sadd.s32 1, %s4178_s17  ;;  %p3851_p8 = scmp.lt.s32.totalorder %s4210_s25, 8 }
  0x29   : > { %p4363_p7 = por %p50_p3, %p49_p2  ;;  %s5508_s10 = smov (%p35_p5, %s5506_s10), 0 }
  0x2a   : > { %s197_s14 = sand.u32 1, %s4190_s20   ;;  %s3683_s18 = sshll.u32 %s4202_s23, 7 }
  0x2b   : > { %s37_s26 = ssub.s32 %s4206_s24, %s5508_s10  ;;  %s3121_s7 = sshll.u32 %s197_s14, 9 }
  0x2c   : > { %s39_s27 = sor.u32 %s38_s9, %s37_s26  ;;  %p129_p9 = scmp.eq.s32.totalorder %s37_s26, 0 }
  0x2d   : > { %p40_p12 = scmp.eq.s32.totalorder %s39_s27, 0  ;;  %s3124_s8 = sshll.u32 %s4206_s24, 9 }
  0x2e   : > { %s4375_s1 = scalar_select %p129_p9, %s4178_s17, %s131_s11  }
  0x2f   : > { %s4378_s2 = scalar_select %p40_p12, %s4190_s20, %s42_s12  }
  0x30   : > { %s207_s5 = sadd.s32 %s3683_s18, %s3124_s8  ;;  %s201_s15 = scalar_lea.vmem [#allocation4], %s3121_s7 }
  0x31   : > { %s212_s4 = sshll.u32 %s201_s15, 4  ;;  %s3125_s30 = sshll.u32 %s207_s5, 2  ;;  %s213_s4 = int_to_ptr.vmem [resolvable:$true] %s212_s4 }
  0x32   : > { %s209_s21 = scalar_lea.hbm %s5361_s0, %s3125_s30  ;;  %p3842_p13 = pnand %p3851_p8, %p4363_p7 }
  0x33   : > { %s210_s9 = sshll.u32 %s209_s21, 4  ;;  %s198_s26 = scalar_lea.sflag [#allocation5], %s197_s14  ;;  %s211_s9 = int_to_ptr.hbm [resolvable:$true] %s210_s9 }
  0x34   : > { %s4216_s11 = smov 128   ;;  %s4217_s27 = smov 8  }
  0x35   : > { %3844 = dma.hbm_to_vmem [thread:$0]  (!%p3842_p13), %s211_s9, 8192, %s213_s4, %s198_s26, %s4216_s11, %s4216_s11, %s4217_s27  }
  0x36   : > { %224 = sbr.rel (%p4337_p11) target bundleno = 1397 (0x575), region = 36 }
  0x3b   : > { %s226_s15 = sand.u32 1, %s4186_s19  }
  0x3c   : > { %s3127_s5 = sshll.u32 %s226_s15, 9  ;;  %s227_s8 = scalar_lea.sflag [#allocation5], %s226_s15 }
  0x3d   : > { %s4391_s12 = scalar_lea.vmem [#allocation4], %s3127_s5 }
  0x3e   : > { %4157 = dma.done.wait (%p4321_p4), %s227_s8, 8192  }
  0x3f   : > { %4159 = vsyncadd (%p4321_p4), %s227_s8, 4294959104 }
  0x40   : > { %4161 = dma.done.wait (%p4313_p1), [#allocation8], 36896  }
  0x41   : > { %4163 = vsyncadd (%p4313_p1), [#allocation8], 4294930400  ;;  %s263_s3 = sand.u32 1, %s4174_s16   ;;  %s5418_s22 = sld [smem:[#allocation15_spill]] }
  0x42   : > { %s3130_s4 = sshll.u32 %s263_s3, 4 }
  0x43   : > { %s4404_s21 = scalar_lea.vmem [#allocation10], %s3130_s4 }
  0x47   : > { %p3131_p11 = scmp.ne.s32.totalorder %s5418_s22, 0 }
  0x49   : > { %270 = sbr.rel (%p3131_p11) target bundleno = 151 (0x97), region = 52 }
  0x4e   : > { %v4218_v0 = vmov 0.0  }
  0x4f   : > { %271 = vst [vmem:[#allocation2 + $0xc8] sm:$0xff] %v4218_v0 }
  0x50   : > { %272 = vst [vmem:[#allocation2 + $0x8] sm:$0xff] %v4218_v0 }
  0x51   : > { %273 = vst [vmem:[#allocation2 + $0x40] sm:$0xff] %v4218_v0 }
  0x52   : > { %274 = vst [vmem:[#allocation2 + $0x28] sm:$0xff] %v4218_v0 }
  0x53   : > { %275 = vst [vmem:[#allocation2 + $0xe8] sm:$0xff] %v4218_v0 }
  0x54   : > { %276 = vst [vmem:[#allocation2 + $0xf0] sm:$0xff] %v4218_v0 }
  0x55   : > { %277 = vst [vmem:[#allocation2 + $0x70] sm:$0xff] %v4218_v0 }
  0x56   : > { %278 = vst [vmem:[#allocation2 + $0x120] sm:$0xff] %v4218_v0 }
  0x57   : > { %279 = vst [vmem:[#allocation2 + $0xd8] sm:$0xff] %v4218_v0 }
  0x58   : > { %280 = vst [vmem:[#allocation2 + $0x18] sm:$0xff] %v4218_v0 }
  0x59   : > { %281 = vst [vmem:[#allocation2 + $0xb0] sm:$0xff] %v4218_v0 }
  0x5a   : > { %282 = vst [vmem:[#allocation2 + $0x158] sm:$0xff] %v4218_v0 }
  0x5b   : > { %283 = vst [vmem:[#allocation2 + $0x108] sm:$0xff] %v4218_v0 }
  0x5c   : > { %284 = vst [vmem:[#allocation2 + $0x110] sm:$0xff] %v4218_v0 }
  0x5d   : > { %285 = vst [vmem:[#allocation2 + $0x1f8] sm:$0xff] %v4218_v0 }
  0x5e   : > { %286 = vst [vmem:[#allocation2 + $0xb8] sm:$0xff] %v4218_v0 }
  0x5f   : > { %287 = vst [vmem:[#allocation2 + $0x180] sm:$0xff] %v4218_v0 }
  0x60   : > { %288 = vst [vmem:[#allocation2 + $0x190] sm:$0xff] %v4218_v0 }
  0x61   : > { %289 = vst [vmem:[#allocation2 + $0x140] sm:$0xff] %v4218_v0 }
  0x62   : > { %290 = vst [vmem:[#allocation2 + $0x1c0] sm:$0xff] %v4218_v0 }
  0x63   : > { %291 = vst [vmem:[#allocation2 + $0xd0] sm:$0xff] %v4218_v0 }
  0x64   : > { %292 = vst [vmem:[#allocation2 + $0x138] sm:$0xff] %v4218_v0 }
  0x65   : > { %293 = vst [vmem:[#allocation2 + $0x60] sm:$0xff] %v4218_v0 }
  0x66   : > { %294 = vst [vmem:[#allocation2 + $0x1b8] sm:$0xff] %v4218_v0 }
  0x67   : > { %295 = vst [vmem:[#allocation2 + $0x88] sm:$0xff] %v4218_v0 }
  0x68   : > { %296 = vst [vmem:[#allocation2] sm:$0xff] %v4218_v0 }
  0x69   : > { %297 = vst [vmem:[#allocation2 + $0x188] sm:$0xff] %v4218_v0 }
  0x6a   : > { %298 = vst [vmem:[#allocation2 + $0x38] sm:$0xff] %v4218_v0 }
  0x6b   : > { %299 = vst [vmem:[#allocation2 + $0x1a8] sm:$0xff] %v4218_v0 }
  0x6c   : > { %300 = vst [vmem:[#allocation2 + $0x220] sm:$0xff] %v4218_v0 }
  0x6d   : > { %301 = vst [vmem:[#allocation2 + $0x1e8] sm:$0xff] %v4218_v0 }
  0x6e   : > { %302 = vst [vmem:[#allocation2 + $0x1c8] sm:$0xff] %v4218_v0 }
  0x6f   : > { %303 = vst [vmem:[#allocation2 + $0x80] sm:$0xff] %v4218_v0 }
  0x70   : > { %304 = vst [vmem:[#allocation2 + $0xf8] sm:$0xff] %v4218_v0 }
  0x71   : > { %305 = vst [vmem:[#allocation2 + $0x78] sm:$0xff] %v4218_v0 }
  0x72   : > { %306 = vst [vmem:[#allocation2 + $0x170] sm:$0xff] %v4218_v0 }
  0x73   : > { %307 = vst [vmem:[#allocation2 + $0x198] sm:$0xff] %v4218_v0 }
  0x74   : > { %308 = vst [vmem:[#allocation2 + $0xe0] sm:$0xff] %v4218_v0 }
  0x75   : > { %309 = vst [vmem:[#allocation2 + $0x1e0] sm:$0xff] %v4218_v0 }
  0x76   : > { %310 = vst [vmem:[#allocation2 + $0x1f0] sm:$0xff] %v4218_v0 }
  0x77   : > { %311 = vst [vmem:[#allocation2 + $0x48] sm:$0xff] %v4218_v0 }
  0x78   : > { %312 = vst [vmem:[#allocation2 + $0x98] sm:$0xff] %v4218_v0 }
  0x79   : > { %313 = vst [vmem:[#allocation2 + $0x238] sm:$0xff] %v4218_v0 }
  0x7a   : > { %314 = vst [vmem:[#allocation2 + $0x160] sm:$0xff] %v4218_v0 }
  0x7b   : > { %315 = vst [vmem:[#allocation2 + $0x50] sm:$0xff] %v4218_v0 }
  0x7c   : > { %316 = vst [vmem:[#allocation2 + $0x100] sm:$0xff] %v4218_v0 }
  0x7d   : > { %317 = vst [vmem:[#allocation2 + $0x30] sm:$0xff] %v4218_v0 }
  0x7e   : > { %318 = vst [vmem:[#allocation2 + $0x1b0] sm:$0xff] %v4218_v0 }
  0x7f   : > { %319 = vst [vmem:[#allocation2 + $0x90] sm:$0xff] %v4218_v0 }
  0x80   : > { %320 = vst [vmem:[#allocation2 + $0x130] sm:$0xff] %v4218_v0 }
  0x81   : > { %321 = vst [vmem:[#allocation2 + $0x68] sm:$0xff] %v4218_v0 }
  0x82   : > { %322 = vst [vmem:[#allocation2 + $0x230] sm:$0xff] %v4218_v0 }
  0x83   : > { %323 = vst [vmem:[#allocation2 + $0x1d8] sm:$0xff] %v4218_v0 }
  0x84   : > { %324 = vst [vmem:[#allocation2 + $0x228] sm:$0xff] %v4218_v0 }
  0x85   : > { %325 = vst [vmem:[#allocation2 + $0x218] sm:$0xff] %v4218_v0 }
  0x86   : > { %326 = vst [vmem:[#allocation2 + $0x200] sm:$0xff] %v4218_v0 }
  0x87   : > { %327 = vst [vmem:[#allocation2 + $0x10] sm:$0xff] %v4218_v0 }
  0x88   : > { %328 = vst [vmem:[#allocation2 + $0x128] sm:$0xff] %v4218_v0 }
  0x89   : > { %329 = vst [vmem:[#allocation2 + $0x178] sm:$0xff] %v4218_v0 }
  0x8a   : > { %330 = vst [vmem:[#allocation2 + $0x208] sm:$0xff] %v4218_v0 }
  0x8b   : > { %331 = vst [vmem:[#allocation2 + $0x210] sm:$0xff] %v4218_v0 }
  0x8c   : > { %332 = vst [vmem:[#allocation2 + $0x1d0] sm:$0xff] %v4218_v0 }
  0x8d   : > { %333 = vst [vmem:[#allocation2 + $0x168] sm:$0xff] %v4218_v0 }
  0x8e   : > { %334 = vst [vmem:[#allocation2 + $0xc0] sm:$0xff] %v4218_v0 }
  0x8f   : > { %335 = vst [vmem:[#allocation2 + $0x1a0] sm:$0xff] %v4218_v0 }
  0x90   : > { %336 = vst [vmem:[#allocation2 + $0x58] sm:$0xff] %v4218_v0 }
  0x91   : > { %337 = vst [vmem:[#allocation2 + $0x118] sm:$0xff] %v4218_v0 }
  0x92   : > { %338 = vst [vmem:[#allocation2 + $0x20] sm:$0xff] %v4218_v0 }
  0x93   : > { %339 = vst [vmem:[#allocation2 + $0x148] sm:$0xff] %v4218_v0 }
  0x94   : > { %340 = vst [vmem:[#allocation2 + $0xa8] sm:$0xff] %v4218_v0 }
  0x95   : > { %341 = vst [vmem:[#allocation2 + $0x150] sm:$0xff] %v4218_v0 }
  0x96   : > { %342 = vst [vmem:[#allocation2 + $0xa0] sm:$0xff] %v4218_v0 }
  0x97 PF: > { %v3479_v1 = vld [vmem:[%s4391_s12 + $0x70] sm:$0xf]  ;;  %v3772_v2 = vld [vmem:[%s4391_s12 + $0x74] sm:$0xf0]  ;;  %v3471_v12 = vld [vmem:[%s4391_s12 + $0x60] sm:$0xf] }
  0x98   : > { %v3543_v3 = vld [vmem:[%s4391_s12 + $0xf0] sm:$0xf]  ;;  %v3480_v4 = vor.u32 %v3772_v2, %v3479_v1  ;;  %v3788_v5 = vld [vmem:[%s4391_s12 + $0xf4] sm:$0xf0]  ;;  %v3770_v14 = vld [vmem:[%s4391_s12 + $0x64] sm:$0xf0] }
  0x99   : > { %v3607_v6 = vld [vmem:[%s4391_s12 + $0x170] sm:$0xf]  ;;  %v3804_v7 = vld [vmem:[%s4391_s12 + $0x174] sm:$0xf0]  ;;  %v3544_v8 = vor.u32 %v3788_v5, %v3543_v3  ;;  %v3535_v15 = vld [vmem:[%s4391_s12 + $0xe0] sm:$0xf]  ;;  %v3472_v17 = vor.u32 %v3770_v14, %v3471_v12 }
  0x9a   : > { %v3608_v9 = vor.u32 %v3804_v7, %v3607_v6  ;;  %v3671_v10 = vld [vmem:[%s4391_s12 + $0x1f0] sm:$0xf]  ;;  %v3820_v11 = vld [vmem:[%s4391_s12 + $0x1f4] sm:$0xf0]  ;;  %1234 = vmatpush.bf16.msra.mxu0 %v3480_v4  ;;  %v3786_v16 = vld [vmem:[%s4391_s12 + $0xe4] sm:$0xf0] }
  0x9b   : > { %v3672_v13 = vor.u32 %v3820_v11, %v3671_v10  ;;  %1333 = vmatpush.bf16.msra.mxu1 %v3544_v8  ;;  %v3536_v18 = vor.u32 %v3786_v16, %v3535_v15  ;;  %v3599_v19 = vld [vmem:[%s4391_s12 + $0x160] sm:$0xf]  ;;  %v3802_v20 = vld [vmem:[%s4391_s12 + $0x164] sm:$0xf0]  ;;  %v3463_v24 = vld [vmem:[%s4391_s12 + $0x50] sm:$0xf] }
  0x9c   : > { %1432 = vmatpush.bf16.msra.mxu2 %v3608_v9  ;;  %v3663_v21 = vld [vmem:[%s4391_s12 + $0x1e0] sm:$0xf]  ;;  %v3600_v22 = vor.u32 %v3802_v20, %v3599_v19  ;;  %v3818_v23 = vld [vmem:[%s4391_s12 + $0x1e4] sm:$0xf0]  ;;  %v3768_v25 = vld [vmem:[%s4391_s12 + $0x54] sm:$0xf0] }
  0x9d   : > { %1531 = vmatpush.bf16.msra.mxu3 %v3672_v13  ;;  %v3664_v26 = vor.u32 %v3818_v23, %v3663_v21  ;;  %v3527_v27 = vld [vmem:[%s4391_s12 + $0xd0] sm:$0xf]  ;;  %v3784_v28 = vld [vmem:[%s4391_s12 + $0xd4] sm:$0xf0]  ;;  %v3464_v30 = vor.u32 %v3768_v25, %v3463_v24  ;;  %v3455_v36 = vld [vmem:[%s4391_s12 + $0x40] sm:$0xf] }
  0x9e   : > { %v3591_v29 = vld [vmem:[%s4391_s12 + $0x150] sm:$0xf]  ;;  %1235 = vmatpush.bf16.msra.mxu0 %v3472_v17  ;;  %v3800_v31 = vld [vmem:[%s4391_s12 + $0x154] sm:$0xf0]  ;;  %v3528_v34 = vor.u32 %v3784_v28, %v3527_v27  ;;  %v3766_v37 = vld [vmem:[%s4391_s12 + $0x44] sm:$0xf0] }
  0x9f   : > { %v3655_v32 = vld [vmem:[%s4391_s12 + $0x1d0] sm:$0xf]  ;;  %v3816_v33 = vld [vmem:[%s4391_s12 + $0x1d4] sm:$0xf0]  ;;  %1334 = vmatpush.bf16.msra.mxu1 %v3536_v18  ;;  %v3592_v35 = vor.u32 %v3800_v31, %v3591_v29  ;;  %v3519_v38 = vld [vmem:[%s4391_s12 + $0xc0] sm:$0xf]  ;;  %v3456_v45 = vor.u32 %v3766_v37, %v3455_v36 }
  0xa0   : > { %1433 = vmatpush.bf16.msra.mxu2 %v3600_v22  ;;  %v3656_v39 = vor.u32 %v3816_v33, %v3655_v32  ;;  %v3782_v40 = vld [vmem:[%s4391_s12 + $0xc4] sm:$0xf0]  ;;  %v3583_v41 = vld [vmem:[%s4391_s12 + $0x140] sm:$0xf]  ;;  %v3447_v48 = vld [vmem:[%s4391_s12 + $0x30] sm:$0xf] }
  0xa1   : > { %1532 = vmatpush.bf16.msra.mxu3 %v3664_v26  ;;  %v3798_v42 = vld [vmem:[%s4391_s12 + $0x144] sm:$0xf0]  ;;  %v3647_v43 = vld [vmem:[%s4391_s12 + $0x1c0] sm:$0xf]  ;;  %v3520_v46 = vor.u32 %v3782_v40, %v3519_v38  ;;  %v3764_v49 = vld [vmem:[%s4391_s12 + $0x34] sm:$0xf0] }
  0xa2   : > { %v3814_v44 = vld [vmem:[%s4391_s12 + $0x1c4] sm:$0xf0]  ;;  %1236 = vmatpush.bf16.msra.mxu0 %v3464_v30  ;;  %v3584_v47 = vor.u32 %v3798_v42, %v3583_v41  ;;  %v3511_v50 = vld [vmem:[%s4391_s12 + $0xb0] sm:$0xf]  ;;  %v3780_v52 = vld [vmem:[%s4391_s12 + $0xb4] sm:$0xf0]  ;;  %v3448_v57 = vor.u32 %v3764_v49, %v3447_v48 }
  0xa3   : > { %1335 = vmatpush.bf16.msra.mxu1 %v3528_v34  ;;  %v3648_v51 = vor.u32 %v3814_v44, %v3647_v43  ;;  %v3575_v53 = vld [vmem:[%s4391_s12 + $0x130] sm:$0xf]  ;;  %v3796_v54 = vld [vmem:[%s4391_s12 + $0x134] sm:$0xf0]  ;;  %v3512_v58 = vor.u32 %v3780_v52, %v3511_v50  ;;  %v3439_v60 = vld [vmem:[%s4391_s12 + $0x20] sm:$0xf] }
  0xa4   : > { %1434 = vmatpush.bf16.msra.mxu2 %v3592_v35  ;;  %v3639_v55 = vld [vmem:[%s4391_s12 + $0x1b0] sm:$0xf]  ;;  %v3812_v56 = vld [vmem:[%s4391_s12 + $0x1b4] sm:$0xf0]  ;;  %v3576_v59 = vor.u32 %v3796_v54, %v3575_v53  ;;  %v3762_v61 = vld [vmem:[%s4391_s12 + $0x24] sm:$0xf0] }
  0xa5   : > { %1533 = vmatpush.bf16.msra.mxu3 %v3656_v39  ;;  %v3503_v62 = vld [vmem:[%s4391_s12 + $0xa0] sm:$0xf]  ;;  %v3640_v63 = vor.u32 %v3812_v56, %v3639_v55  ;;  %v3778_v0 = vld [vmem:[%s4391_s12 + $0xa4] sm:$0xf0]  ;;  %s5419_s28 = sld [smem:[#allocation15_spill]]  ;;  %v3440_v5 = vor.u32 %v3762_v61, %v3439_v60 }
  0xa6   : > { %1237 = vmatpush.bf16.msra.mxu0 %v3456_v45  ;;  %v3567_v1 = vld [vmem:[%s4391_s12 + $0x120] sm:$0xf]  ;;  %v3794_v2 = vld [vmem:[%s4391_s12 + $0x124] sm:$0xf0]  ;;  %v3431_v6 = vld [vmem:[%s4391_s12 + $0x10] sm:$0xf]  ;;  %v3504_v7 = vor.u32 %v3778_v0, %v3503_v62 }
  0xa7   : > { %1336 = vmatpush.bf16.msra.mxu1 %v3520_v46  ;;  %v3631_v3 = vld [vmem:[%s4391_s12 + $0x1a0] sm:$0xf]  ;;  %v3810_v4 = vld [vmem:[%s4391_s12 + $0x1a4] sm:$0xf0]  ;;  %v3568_v8 = vor.u32 %v3794_v2, %v3567_v1  ;;  %v3760_v9 = vld [vmem:[%s4391_s12 + $0x14] sm:$0xf0] }
  0xa8   : > { %1435 = vmatpush.bf16.msra.mxu2 %v3584_v47  ;;  %v3495_v10 = vld [vmem:[%s4391_s12 + $0x90] sm:$0xf]  ;;  %v3776_v11 = vld [vmem:[%s4391_s12 + $0x94] sm:$0xf0]  ;;  %v3632_v12 = vor.u32 %v3810_v4, %v3631_v3  ;;  %v3423_v17 = vld [vmem:[%s4391_s12] sm:$0xf]  ;;  %v3432_v18 = vor.u32 %v3760_v9, %v3431_v6 }
  0xa9   : > { %1534 = vmatpush.bf16.msra.mxu3 %v3648_v51  ;;  %v3559_v13 = vld [vmem:[%s4391_s12 + $0x110] sm:$0xf]  ;;  %v3792_v14 = vld [vmem:[%s4391_s12 + $0x114] sm:$0xf0]  ;;  %v3758_v19 = vld [vmem:[%s4391_s12 + $0x4] sm:$0xf0]  ;;  %v3496_v22 = vor.u32 %v3776_v11, %v3495_v10 }
  0xaa   : > { %1238 = vmatpush.bf16.msra.mxu0 %v3448_v57  ;;  %v3623_v15 = vld [vmem:[%s4391_s12 + $0x190] sm:$0xf]  ;;  %v3808_v16 = vld [vmem:[%s4391_s12 + $0x194] sm:$0xf0]  ;;  %v3487_v20 = vld [vmem:[%s4391_s12 + $0x80] sm:$0xf]  ;;  %v3560_v23 = vor.u32 %v3792_v14, %v3559_v13  ;;  %v3424_v33 = vor.u32 %v3758_v19, %v3423_v17 }
  0xab   : > { %1337 = vmatpush.bf16.msra.mxu1 %v3512_v58  ;;  %s3684_s29 = smul.u32 576, %s5419_s28  ;;  %v3774_v21 = vld [vmem:[%s4391_s12 + $0x84] sm:$0xf0]  ;;  %v3551_v24 = vld [vmem:[%s4391_s12 + $0x100] sm:$0xf]  ;;  %v3624_v26 = vor.u32 %v3808_v16, %v3623_v15  ;;  %p3677_p1 = scmp.ne.s32.totalorder %s5419_s28, 3 }
  0xac   : > { %1436 = vmatpush.bf16.msra.mxu2 %v3576_v59  ;;  %v3790_v25 = vld [vmem:[%s4391_s12 + $0x104] sm:$0xf0]  ;;  %v3615_v27 = vld [vmem:[%s4391_s12 + $0x180] sm:$0xf]  ;;  %v3803_v29 = vld [vmem:[%s4391_s12 + $0x174] sm:$0xf]  ;;  %v3488_v38 = vor.u32 %v3774_v21, %v3487_v20 }
  0xad   : > { %1535 = vmatpush.bf16.msra.mxu3 %v3640_v63  ;;  %v3806_v28 = vld [vmem:[%s4391_s12 + $0x184] sm:$0xf0]  ;;  %v3609_v30 = vld [vmem:[%s4391_s12 + $0x178] sm:$0xf0]  ;;  %v3819_v31 = vld [vmem:[%s4391_s12 + $0x1f4] sm:$0xf]  ;;  %v3552_v39 = vor.u32 %v3790_v25, %v3551_v24 }
  0xae   : > { %1239 = vmatpush.bf16.msra.mxu0 %v3440_v5  ;;  %v3673_v32 = vld [vmem:[%s4391_s12 + $0x1f8] sm:$0xf0]  ;;  %s4548_s30 = scalar_lea.vmem [#allocation7], %s3684_s29  ;;  %v3771_v37 = vld [vmem:[%s4391_s12 + $0x74] sm:$0xf]  ;;  %v3616_v43 = vor.u32 %v3806_v28, %v3615_v27  ;;  %v3612_v46 = vor.u32 %v3803_v29, %v3609_v30  ;;  %s4219_s6 = smov (!%p3677_p1), 96  }
  0xaf   : > { %1338 = vmatpush.bf16.msra.mxu1 %v3504_v7  ;;  %v3135_v34 = vld [vmem:[%s4548_s30] sm:$0xf]  ;;  %v3687_v35 = vld [vmem:[%s4548_s30 + $0xc] sm:$0xf0]  ;;  %v3685_v36 = vld [vmem:[%s4548_s30 + $0x4] sm:$0xf]  ;;  %v3676_v49 = vor.u32 %v3819_v31, %v3673_v32 }
  0xb0   : > { %1437 = vmatpush.bf16.msra.mxu2 %v3568_v8  ;;  %v3137_v40 = vld [vmem:[%s4548_s30 + $0x10] sm:$0xf0]  ;;  %v3143_v41 = vld [vmem:[%s4548_s30 + $0x8] sm:$0xf]  ;;  %v3688_v42 = vld [vmem:[%s4548_s30 + $0x14] sm:$0xf0]  ;;  %v4560_v48 = vor.u32 %v3687_v35, %v3135_v34 }
  0xb1   : > { %1536 = vmatpush.bf16.msra.mxu3 %v3632_v12  ;;  %v3686_v44 = vld [vmem:[%s4548_s30 + $0xc] sm:$0xf]  ;;  %v3145_v45 = vld [vmem:[%s4548_s30 + $0x18] sm:$0xf0]  ;;  %v3787_v50 = vld [vmem:[%s4391_s12 + $0xf4] sm:$0xf]  ;;  %v4564_v52 = vor.u32 %v3685_v36, %v3137_v40  ;;  %v4566_v53 = vor.u32 %v3688_v42, %v3143_v41 }
  0xb2   : > { %1240 = vmatpush.bf16.msra.mxu0 %v3432_v18  ;;  %v3481_v47 = vld [vmem:[%s4391_s12 + $0x78] sm:$0xf0]  ;;  %v4568_v54 = vor.u32 %v3686_v44, %v3145_v45  ;;  %v3801_v57 = vld [vmem:[%s4391_s12 + $0x164] sm:$0xf]  ;;  %v3601_v58 = vld [vmem:[%s4391_s12 + $0x168] sm:$0xf0] }
  0xb3   : > { %1339 = vmatpush.bf16.msra.mxu1 %v3496_v22  ;;  %v3545_v51 = vld [vmem:[%s4391_s12 + $0xf8] sm:$0xf0]  ;;  %v3484_v55 = vor.u32 %v3771_v37, %v3481_v47  ;;  %v3817_v59 = vld [vmem:[%s4391_s12 + $0x1e4] sm:$0xf]  ;;  %v3604_v60 = vor.u32 %v3801_v57, %v3601_v58  ;;  %v3665_v61 = vld [vmem:[%s4391_s12 + $0x1e8] sm:$0xf0] }
  0xb4   : > { %1438 = vmatpush.bf16.msra.mxu2 %v3560_v23  ;;  %v3548_v56 = vor.u32 %v3787_v50, %v3545_v51  ;;  %v3769_v62 = vld [vmem:[%s4391_s12 + $0x64] sm:$0xf]  ;;  %v3473_v63 = vld [vmem:[%s4391_s12 + $0x68] sm:$0xf0]  ;;  %v3668_v0 = vor.u32 %v3817_v59, %v3665_v61  ;;  %v3151_v5 = vld [vmem:[%s4548_s30 + $0x20] sm:$0xf] }
  0xb5   : > { %1537 = vmatpush.bf16.msra.mxu3 %v3624_v26  ;;  %v3476_v1 = vor.u32 %v3769_v62, %v3473_v63  ;;  %v3785_v2 = vld [vmem:[%s4391_s12 + $0xe4] sm:$0xf]  ;;  %v3537_v3 = vld [vmem:[%s4391_s12 + $0xe8] sm:$0xf0]  ;;  %v3691_v6 = vld [vmem:[%s4548_s30 + $0x2c] sm:$0xf0] }
  0xb6   : > { %1241 = vmatpush.bf16.msra.mxu0 %v3424_v33  ;;  %v3540_v4 = vor.u32 %v3785_v2, %v3537_v3  ;;  %v3689_v7 = vld [vmem:[%s4548_s30 + $0x24] sm:$0xf]  ;;  %v3153_v8 = vld [vmem:[%s4548_s30 + $0x30] sm:$0xf0]  ;;  %v3159_v9 = vld [vmem:[%s4548_s30 + $0x28] sm:$0xf]  ;;  %v4590_v13 = vor.u32 %v3691_v6, %v3151_v5 }
  0xb7   : > { %1340 = vmatpush.bf16.msra.mxu1 %v3488_v38  ;;  %v3692_v10 = vld [vmem:[%s4548_s30 + $0x34] sm:$0xf0]  ;;  %v3690_v11 = vld [vmem:[%s4548_s30 + $0x2c] sm:$0xf]  ;;  %v3161_v12 = vld [vmem:[%s4548_s30 + $0x38] sm:$0xf0]  ;;  %v4592_v14 = vor.u32 %v3689_v7, %v3153_v8 }
  0xb8   : > { %1439 = vmatpush.bf16.msra.mxu2 %v3552_v39  ;;  %v4594_v15 = vor.u32 %v3692_v10, %v3159_v9  ;;  %v4596_v16 = vor.u32 %v3690_v11, %v3161_v12  ;;  %v3167_v17 = vld [vmem:[%s4548_s30 + $0x40] sm:$0xf]  ;;  %v3695_v18 = vld [vmem:[%s4548_s30 + $0x4c] sm:$0xf0]  ;;  %v3693_v19 = vld [vmem:[%s4548_s30 + $0x44] sm:$0xf] }
  0xb9   : > { %1538 = vmatpush.bf16.msra.mxu3 %v3616_v43  ;;  %1242 = vmatmul.bf16.vlgmr.msra.gmra.mxu0 %v4560_v48  ;;  %v3169_v20 = vld [vmem:[%s4548_s30 + $0x50] sm:$0xf0]  ;;  %v3175_v21 = vld [vmem:[%s4548_s30 + $0x48] sm:$0xf]  ;;  %v3696_v22 = vld [vmem:[%s4548_s30 + $0x54] sm:$0xf0]  ;;  %v4610_v25 = vor.u32 %v3695_v18, %v3167_v17 }
  0xba   : > { %1341 = vmatmul.bf16.vlgmr.msra.gmra.mxu1 %v4564_v52  ;;  %1630 = vmatpush.bf16.msrb.mxu0 %v3484_v55  ;;  %v3694_v23 = vld [vmem:[%s4548_s30 + $0x4c] sm:$0xf]  ;;  %v3177_v24 = vld [vmem:[%s4548_s30 + $0x58] sm:$0xf0]  ;;  %v4612_v26 = vor.u32 %v3693_v19, %v3169_v20  ;;  %v4614_v27 = vor.u32 %v3696_v22, %v3175_v21  ;;  %v3799_v29 = vld [vmem:[%s4391_s12 + $0x154] sm:$0xf] }
  0xbb   : > { %1440 = vmatmul.bf16.vlgmr.msra.gmra.mxu2 %v4566_v53  ;;  %1729 = vmatpush.bf16.msrb.mxu1 %v3548_v56  ;;  %v4616_v28 = vor.u32 %v3694_v23, %v3177_v24  ;;  %v3593_v30 = vld [vmem:[%s4391_s12 + $0x158] sm:$0xf0]  ;;  %v3815_v31 = vld [vmem:[%s4391_s12 + $0x1d4] sm:$0xf]  ;;  %v3183_v41 = vld [vmem:[%s4548_s30 + $0x60] sm:$0xf] }
  0xbc   : > { %1828 = vmatpush.bf16.msrb.mxu2 %v3612_v46  ;;  %1539 = vmatmul.bf16.vlgmr.msra.gmra.mxu3 %v4568_v54  ;;  %v3596_v32 = vor.u32 %v3799_v29, %v3593_v30  ;;  %v3657_v33 = vld [vmem:[%s4391_s12 + $0x1d8] sm:$0xf0]  ;;  %v3767_v34 = vld [vmem:[%s4391_s12 + $0x54] sm:$0xf]  ;;  %v3699_v42 = vld [vmem:[%s4548_s30 + $0x6c] sm:$0xf0] }
  0xbd   : > { %1927 = vmatpush.bf16.msrb.mxu3 %v3676_v49  ;;  %v3465_v35 = vld [vmem:[%s4391_s12 + $0x58] sm:$0xf0]  ;;  %v3660_v36 = vor.u32 %v3815_v31, %v3657_v33  ;;  %v3783_v38 = vld [vmem:[%s4391_s12 + $0xd4] sm:$0xf]  ;;  %v3697_v43 = vld [vmem:[%s4548_s30 + $0x64] sm:$0xf]  ;;  %v4638_v50 = vor.u32 %v3699_v42, %v3183_v41 }
  0xbe   : > { %1631 = vmatpush.bf16.msrb.mxu0 %v3476_v1  ;;  %v3468_v37 = vor.u32 %v3767_v34, %v3465_v35  ;;  %v3529_v39 = vld [vmem:[%s4391_s12 + $0xd8] sm:$0xf0]  ;;  %v3185_v44 = vld [vmem:[%s4548_s30 + $0x70] sm:$0xf0]  ;;  %v3191_v45 = vld [vmem:[%s4548_s30 + $0x68] sm:$0xf] }
  0xbf   : > { %1730 = vmatpush.bf16.msrb.mxu1 %v3540_v4  ;;  %v3532_v40 = vor.u32 %v3783_v38, %v3529_v39  ;;  %v3700_v46 = vld [vmem:[%s4548_s30 + $0x74] sm:$0xf0]  ;;  %v3698_v47 = vld [vmem:[%s4548_s30 + $0x6c] sm:$0xf]  ;;  %v3193_v49 = vld [vmem:[%s4548_s30 + $0x78] sm:$0xf0]  ;;  %v4640_v51 = vor.u32 %v3697_v43, %v3185_v44 }
  0xc0   : > { %1829 = vmatpush.bf16.msrb.mxu2 %v3604_v60  ;;  %v4642_v55 = vor.u32 %v3700_v46, %v3191_v45  ;;  %v4644_v56 = vor.u32 %v3698_v47, %v3193_v49  ;;  %v3199_v57 = vld [vmem:[%s4548_s30 + $0x80] sm:$0xf]  ;;  %v3703_v58 = vld [vmem:[%s4548_s30 + $0x8c] sm:$0xf0]  ;;  %v3701_v59 = vld [vmem:[%s4548_s30 + $0x84] sm:$0xf] }
  0xc1   : > { %1928 = vmatpush.bf16.msrb.mxu3 %v3668_v0  ;;  %v3201_v60 = vld [vmem:[%s4548_s30 + $0x90] sm:$0xf0]  ;;  %v3207_v61 = vld [vmem:[%s4548_s30 + $0x88] sm:$0xf]  ;;  %v3704_v62 = vld [vmem:[%s4548_s30 + $0x94] sm:$0xf0]  ;;  %v4658_v1 = vor.u32 %v3703_v58, %v3199_v57 }
  0xc2   : > { %1632 = vmatpush.bf16.msrb.mxu0 %v3468_v37  ;;  %v3702_v63 = vld [vmem:[%s4548_s30 + $0x8c] sm:$0xf]  ;;  %v3209_v0 = vld [vmem:[%s4548_s30 + $0x98] sm:$0xf0]  ;;  %v4660_v2 = vor.u32 %v3701_v59, %v3201_v60  ;;  %v4662_v3 = vor.u32 %v3704_v62, %v3207_v61  ;;  %v3797_v5 = vld [vmem:[%s4391_s12 + $0x144] sm:$0xf] }
  0xc3   : > { %1731 = vmatpush.bf16.msrb.mxu1 %v3532_v40  ;;  %v4664_v4 = vor.u32 %v3702_v63, %v3209_v0  ;;  %v3585_v6 = vld [vmem:[%s4391_s12 + $0x148] sm:$0xf0]  ;;  %v3813_v7 = vld [vmem:[%s4391_s12 + $0x1c4] sm:$0xf]  ;;  %v3215_v11 = vld [vmem:[%s4548_s30 + $0xa0] sm:$0xf] }
  0xc4   : > { %1830 = vmatpush.bf16.msrb.mxu2 %v3596_v32  ;;  %v3588_v8 = vor.u32 %v3797_v5, %v3585_v6  ;;  %v3649_v9 = vld [vmem:[%s4391_s12 + $0x1c8] sm:$0xf0]  ;;  %v3707_v12 = vld [vmem:[%s4548_s30 + $0xac] sm:$0xf0]  ;;  %v3705_v17 = vld [vmem:[%s4548_s30 + $0xa4] sm:$0xf] }
  0xc5   : > { %1929 = vmatpush.bf16.msrb.mxu3 %v3660_v36  ;;  %v3652_v10 = vor.u32 %v3813_v7, %v3649_v9  ;;  %v3217_v18 = vld [vmem:[%s4548_s30 + $0xb0] sm:$0xf0]  ;;  %v3223_v19 = vld [vmem:[%s4548_s30 + $0xa8] sm:$0xf]  ;;  %v3708_v20 = vld [vmem:[%s4548_s30 + $0xb4] sm:$0xf0]  ;;  %v4682_v23 = vor.u32 %v3707_v12, %v3215_v11 }
  0xc6   : > { %v3706_v21 = vld [vmem:[%s4548_s30 + $0xac] sm:$0xf]  ;;  %v3225_v22 = vld [vmem:[%s4548_s30 + $0xb8] sm:$0xf0]  ;;  %v4684_v24 = vor.u32 %v3705_v17, %v3217_v18  ;;  %v4686_v29 = vor.u32 %v3708_v20, %v3223_v19  ;;  %v3765_v31 = vld [vmem:[%s4391_s12 + $0x44] sm:$0xf] }
  0xc7   : > { %v4688_v30 = vor.u32 %v3706_v21, %v3225_v22  ;;  %v3457_v32 = vld [vmem:[%s4391_s12 + $0x48] sm:$0xf0]  ;;  %v3781_v33 = vld [vmem:[%s4391_s12 + $0xc4] sm:$0xf]  ;;  %v3231_v37 = vld [vmem:[%s4548_s30 + $0xc0] sm:$0xf] }
  0xc8   : > { %1831 = vmatpush.bf16.msrb.mxu2 %v3588_v8  ;;  %v3460_v34 = vor.u32 %v3765_v31, %v3457_v32  ;;  %v3521_v35 = vld [vmem:[%s4391_s12 + $0xc8] sm:$0xf0]  ;;  %v3711_v38 = vld [vmem:[%s4548_s30 + $0xcc] sm:$0xf0]  ;;  %v3709_v39 = vld [vmem:[%s4548_s30 + $0xc4] sm:$0xf] }
  0xc9   : > { %1247 = vmatmul.bf16.gmra.mxu0 %v4590_v13  ;;  %1930 = vmatpush.bf16.msrb.mxu3 %v3652_v10  ;;  %v3524_v36 = vor.u32 %v3781_v33, %v3521_v35  ;;  %v3233_v40 = vld [vmem:[%s4548_s30 + $0xd0] sm:$0xf0]  ;;  %v3239_v41 = vld [vmem:[%s4548_s30 + $0xc8] sm:$0xf]  ;;  %v3712_v42 = vld [vmem:[%s4548_s30 + $0xd4] sm:$0xf0]  ;;  %v4706_v45 = vor.u32 %v3711_v38, %v3231_v37 }
  0xca   : > { %1346 = vmatmul.bf16.gmra.mxu1 %v4592_v14  ;;  %1633 = vmatpush.bf16.msrb.mxu0 %v3460_v34  ;;  %v3710_v43 = vld [vmem:[%s4548_s30 + $0xcc] sm:$0xf]  ;;  %v3241_v44 = vld [vmem:[%s4548_s30 + $0xd8] sm:$0xf0]  ;;  %v4708_v46 = vor.u32 %v3709_v39, %v3233_v40  ;;  %v4710_v47 = vor.u32 %v3712_v42, %v3239_v41  ;;  %v3247_v57 = vld [vmem:[%s4548_s30 + $0xe0] sm:$0xf] }
  0xcb   : > { %1445 = vmatmul.bf16.gmra.mxu2 %v4594_v15  ;;  %1732 = vmatpush.bf16.msrb.mxu1 %v3524_v36  ;;  %v4712_v49 = vor.u32 %v3710_v43, %v3241_v44  ;;  %v3715_v58 = vld [vmem:[%s4548_s30 + $0xec] sm:$0xf0]  ;;  %v3713_v59 = vld [vmem:[%s4548_s30 + $0xe4] sm:$0xf]  ;;  %v3249_v60 = vld [vmem:[%s4548_s30 + $0xf0] sm:$0xf0] }
  0xcc   : > { %1544 = vmatmul.bf16.gmra.mxu3 %v4596_v16  ;;  %v3255_v61 = vld [vmem:[%s4548_s30 + $0xe8] sm:$0xf]  ;;  %v3716_v62 = vld [vmem:[%s4548_s30 + $0xf4] sm:$0xf0]  ;;  %v3714_v63 = vld [vmem:[%s4548_s30 + $0xec] sm:$0xf]  ;;  %v4726_v5 = vor.u32 %v3715_v58, %v3247_v57  ;;  %v4728_v6 = vor.u32 %v3713_v59, %v3249_v60 }
  0xcd   : > { %v3257_v0 = vld [vmem:[%s4548_s30 + $0xf8] sm:$0xf0]  ;;  %v4730_v7 = vor.u32 %v3716_v62, %v3255_v61  ;;  %v3795_v9 = vld [vmem:[%s4391_s12 + $0x134] sm:$0xf]  ;;  %v3263_v19 = vld [vmem:[%s4548_s30 + $0x100] sm:$0xf] }
  0xce   : > { %v4732_v8 = vor.u32 %v3714_v63, %v3257_v0  ;;  %v3577_v10 = vld [vmem:[%s4391_s12 + $0x138] sm:$0xf0]  ;;  %v3811_v11 = vld [vmem:[%s4391_s12 + $0x1b4] sm:$0xf]  ;;  %v3719_v20 = vld [vmem:[%s4548_s30 + $0x10c] sm:$0xf0] }
  0xcf   : > { %v3580_v12 = vor.u32 %v3795_v9, %v3577_v10  ;;  %v3641_v17 = vld [vmem:[%s4391_s12 + $0x1b8] sm:$0xf0]  ;;  %v3717_v21 = vld [vmem:[%s4548_s30 + $0x104] sm:$0xf]  ;;  %v3265_v22 = vld [vmem:[%s4548_s30 + $0x110] sm:$0xf0]  ;;  %v4753_v38 = vor.u32 %v3719_v20, %v3263_v19 }
  0xd0   : > { %v3644_v18 = vor.u32 %v3811_v11, %v3641_v17  ;;  %v3271_v31 = vld [vmem:[%s4548_s30 + $0x108] sm:$0xf]  ;;  %v3720_v32 = vld [vmem:[%s4548_s30 + $0x114] sm:$0xf0]  ;;  %v3718_v33 = vld [vmem:[%s4548_s30 + $0x10c] sm:$0xf]  ;;  %v4756_v42 = vor.u32 %v3717_v21, %v3265_v22 }
  0xd1   : > { %1832 = vmatpush.bf16.msrb.mxu2 %v3580_v12  ;;  %v3273_v34 = vld [vmem:[%s4548_s30 + $0x118] sm:$0xf0]  ;;  %v3763_v35 = vld [vmem:[%s4391_s12 + $0x34] sm:$0xf]  ;;  %v4758_v43 = vor.u32 %v3720_v32, %v3271_v31  ;;  %v343_v0 = vld [vmem:[#allocation2 + $0xc8] sm:$0xff]  ;;  %s4220_s13 = smov (!%p3677_p1), 64  }
  0xd2   : > { %1931 = vmatpush.bf16.msrb.mxu3 %v3644_v18  ;;  %v3449_v36 = vld [vmem:[%s4391_s12 + $0x38] sm:$0xf0]  ;;  %v3779_v37 = vld [vmem:[%s4391_s12 + $0xb4] sm:$0xf]  ;;  %v4760_v58 = vor.u32 %v3718_v33, %v3273_v34  ;;  %v3279_v12 = vld [vmem:[%s4548_s30 + $0x120] sm:$0xf] }
  0xd3   : > { %v3452_v39 = vor.u32 %v3763_v35, %v3449_v36  ;;  %v3513_v40 = vld [vmem:[%s4391_s12 + $0xb8] sm:$0xf0]  ;;  %v3723_v17 = vld [vmem:[%s4548_s30 + $0x12c] sm:$0xf0]  ;;  %v3721_v18 = vld [vmem:[%s4548_s30 + $0x124] sm:$0xf] }
  0xd4   : > { %v3516_v44 = vor.u32 %v3779_v37, %v3513_v40  ;;  %5420 = vst [vmem:[#allocation20_spill] sm:$0xff] %v4760_v58  ;;  %v3281_v19 = vld [vmem:[%s4548_s30 + $0x130] sm:$0xf0]  ;;  %v3287_v20 = vld [vmem:[%s4548_s30 + $0x128] sm:$0xf]  ;;  %v4774_v34 = vor.u32 %v3723_v17, %v3279_v12  ;;  %s4222_s14 = smov (!%p3677_p1), 32  }
  0xd5   : > { %1634 = vmatpush.bf16.msrb.mxu0 %v3452_v39  ;;  %v3724_v21 = vld [vmem:[%s4548_s30 + $0x134] sm:$0xf0]  ;;  %v3722_v31 = vld [vmem:[%s4548_s30 + $0x12c] sm:$0xf]  ;;  %v3289_v32 = vld [vmem:[%s4548_s30 + $0x138] sm:$0xf0]  ;;  %v4776_v39 = vor.u32 %v3721_v18, %v3281_v19 }
  0xd6   : > { %1733 = vmatpush.bf16.msrb.mxu1 %v3516_v44  ;;  %5421 = vst [vmem:[#allocation21_spill] sm:$0xff] %v4774_v34  ;;  %v4778_v40 = vor.u32 %v3724_v21, %v3287_v20  ;;  %v3295_v17 = vld [vmem:[%s4548_s30 + $0x140] sm:$0xf]  ;;  %v3727_v18 = vld [vmem:[%s4548_s30 + $0x14c] sm:$0xf0]  ;;  %s4223_s18 = smov (!%p3677_p1), 30  }
  0xd7   : > { %5422 = vst [vmem:[#allocation22_spill] sm:$0xff] %v4776_v39  ;;  %v3725_v20 = vld [vmem:[%s4548_s30 + $0x144] sm:$0xf]  ;;  %v3297_v21 = vld [vmem:[%s4548_s30 + $0x150] sm:$0xf0]  ;;  %s4224_s7 = smov (!%p3677_p1), 68  }
  0xd8   : > { %5423 = vst [vmem:[#allocation23_spill] sm:$0xff] %v4778_v40  ;;  %s4225_s9 = smov (!%p3677_p1), 34   ;;  %s4226_s26 = smov (!%p3677_p1), 60  }
  0xd9   : > { %1252 = vmatmul.bf16.gmra.mxu0 %v4610_v25  ;;  %s4227_s11 = smov (!%p3677_p1), 102   ;;  %s4229_s27 = smov (!%p3677_p1), 90  }
  0xda   : > { %1351 = vmatmul.bf16.gmra.mxu1 %v4612_v26  ;;  %s4230_s15 = smov (!%p3677_p1), 8   ;;  %s4231_s5 = smov (!%p3677_p1), 120  }
  0xdb   : > { %1450 = vmatmul.bf16.gmra.mxu2 %v4614_v27  ;;  %s5474_s4 = sld [smem:[#allocation49_spill]] (!%p3677_p1) }
  0xdc   : > { %1549 = vmatmul.bf16.gmra.mxu3 %v4616_v28 }
  0xe9   : > { %1257 = vmatmul.bf16.gmra.mxu0 %v4638_v50 }
  0xea   : > { %1356 = vmatmul.bf16.gmra.mxu1 %v4640_v51 }
  0xeb   : > { %1455 = vmatmul.bf16.gmra.mxu2 %v4642_v55 }
  0xec   : > { %1554 = vmatmul.bf16.gmra.mxu3 %v4644_v56 }
  0xf9   : > { %1262 = vmatmul.bf16.gmra.mxu0 %v4658_v1 }
  0xfa   : > { %1361 = vmatmul.bf16.gmra.mxu1 %v4660_v2 }
  0xfb   : > { %1460 = vmatmul.bf16.gmra.mxu2 %v4662_v3 }
  0xfc   : > { %1559 = vmatmul.bf16.gmra.mxu3 %v4664_v4 }
 0x109   : > { %1267 = vmatmul.bf16.gmra.mxu0 %v4682_v23 }
 0x10a   : > { %1366 = vmatmul.bf16.gmra.mxu1 %v4684_v24 }
 0x10b   : > { %1465 = vmatmul.bf16.gmra.mxu2 %v4686_v29 }
 0x10c   : > { %1564 = vmatmul.bf16.gmra.mxu3 %v4688_v30 }
 0x119   : > { %1272 = vmatmul.bf16.gmra.mxu0 %v4706_v45 }
 0x11a   : > { %1371 = vmatmul.bf16.gmra.mxu1 %v4708_v46 }
 0x11b   : > { %1470 = vmatmul.bf16.gmra.mxu2 %v4710_v47 }
 0x11c   : > { %1569 = vmatmul.bf16.gmra.mxu3 %v4712_v49 }
 0x129   : > { %1277 = vmatmul.bf16.gmra.mxu0 %v4726_v5 }
 0x12a   : > { %1376 = vmatmul.bf16.gmra.mxu1 %v4728_v6 }
 0x12b   : > { %1475 = vmatmul.bf16.gmra.mxu2 %v4730_v7 }
 0x12c   : > { %1574 = vmatmul.bf16.gmra.mxu3 %v4732_v8 }
 0x136   : > { %v1243_v41 = vpop.f32.mrf.mxu0 }
 0x137   : > { %v1342_v57 = vpop.f32.mrf.mxu1 }
 0x138   : > { %v1343_v59 = vadd.f32 %v1342_v57, %v1243_v41  ;;  %v345_v41 = vld [vmem:[#allocation2 + $0x40] sm:$0xff]  ;;  %v4780_v57 = vor.u32 %v3722_v31, %v3289_v32  ;;  %v3728_v31 = vld [vmem:[%s4548_s30 + $0x154] sm:$0xf0]  ;;  %v3726_v32 = vld [vmem:[%s4548_s30 + $0x14c] sm:$0xf] }
 0x139   : > { %1282 = vmatmul.bf16.gmra.mxu0 %v4753_v38 }
 0x13a   : > { %1381 = vmatmul.bf16.gmra.mxu1 %v4756_v42  ;;  %5424 = vst [vmem:[#allocation24_spill] sm:$0xff] %v4780_v57 }
 0x13b   : > { %1480 = vmatmul.bf16.gmra.mxu2 %v4758_v43 }
 0x13c   : > { %1579 = vmatmul.bf16.gmra.mxu3 %v4760_v58 }
 0x13e   : > { %v1441_v60 = vpop.f32.mrf.mxu2  ;;  %v1245_v63 = vpop.f32.mrf.mxu0 }
 0x13f   : > { %v1442_v61 = vadd.f32 %v1441_v60, %v1343_v59  ;;  %v1540_v62 = vpop.f32.mrf.mxu3  ;;  %v1344_v9 = vpop.f32.mrf.mxu1 }
 0x140   : > { %v1345_v22 = vadd.f32 %v1344_v9, %v1245_v63 }
 0x141   : > { %v1541_v10 = vadd.f32 %v1540_v62, %v1442_v61 }
 0x143   : > { %v2026_v11 = vadd.f32 %v1541_v10, %v343_v0  ;;  %v347_v10 = vld [vmem:[#allocation2 + $0xe8] sm:$0xff] }
 0x145   : > { %2098 = vst [vmem:[#allocation2 + $0xc8] sm:$0xff] %v2026_v11 }
 0x146   : > { %v1443_v33 = vpop.f32.mrf.mxu2  ;;  %v1248_v37 = vpop.f32.mrf.mxu0 }
 0x147   : > { %v1444_v35 = vadd.f32 %v1443_v33, %v1345_v22  ;;  %v1542_v36 = vpop.f32.mrf.mxu3  ;;  %v1347_v44 = vpop.f32.mrf.mxu1  ;;  %v3303_v22 = vld [vmem:[%s4548_s30 + $0x148] sm:$0xf]  ;;  %v3305_v33 = vld [vmem:[%s4548_s30 + $0x158] sm:$0xf0] }
 0x148   : > { %v1348_v61 = vadd.f32 %v1347_v44, %v1248_v37  ;;  %v3569_v37 = vld [vmem:[%s4391_s12 + $0x128] sm:$0xf0]  ;;  %v4796_v44 = vor.u32 %v3727_v18, %v3295_v17  ;;  %v4808_v58 = vor.u32 %v3726_v32, %v3305_v33  ;;  %v351_v32 = vld [vmem:[#allocation2 + $0xd8] sm:$0xff] }
 0x149   : > { %v1543_v59 = vadd.f32 %v1542_v36, %v1444_v35  ;;  %1287 = vmatmul.bf16.gmra.mxu0 %v4774_v34  ;;  %v3793_v36 = vld [vmem:[%s4391_s12 + $0x124] sm:$0xf] }
 0x14a   : > { %1386 = vmatmul.bf16.gmra.mxu1 %v4776_v39  ;;  %v349_v39 = vld [vmem:[#allocation2 + $0x70] sm:$0xff] }
 0x14b   : > { %v2028_v60 = vadd.f32 %v1543_v59, %v345_v41  ;;  %1485 = vmatmul.bf16.gmra.mxu2 %v4778_v40  ;;  %v3572_v59 = vor.u32 %v3793_v36, %v3569_v37  ;;  %v3505_v40 = vld [vmem:[%s4391_s12 + $0xa8] sm:$0xf0]  ;;  %v3311_v37 = vld [vmem:[%s4548_s30 + $0x160] sm:$0xf] }
 0x14c   : > { %1584 = vmatmul.bf16.gmra.mxu3 %v4780_v57  ;;  %v4803_v57 = vor.u32 %v3728_v31, %v3303_v22 }
 0x14d   : > { %2100 = vst [vmem:[#allocation2 + $0x40] sm:$0xff] %v2028_v60  ;;  %v3809_v60 = vld [vmem:[%s4391_s12 + $0x1a4] sm:$0xf]  ;;  %1833 = vmatpush.bf16.msrb.mxu2 %v3572_v59 }
 0x14e   : > { %v1446_v62 = vpop.f32.mrf.mxu2  ;;  %v1250_v9 = vpop.f32.mrf.mxu0  ;;  %v3729_v59 = vld [vmem:[%s4548_s30 + $0x164] sm:$0xf] }
 0x14f   : > { %v1447_v63 = vadd.f32 %v1446_v62, %v1348_v61  ;;  %v1545_v0 = vpop.f32.mrf.mxu3  ;;  %v1349_v11 = vpop.f32.mrf.mxu1  ;;  %v3633_v61 = vld [vmem:[%s4391_s12 + $0x1a8] sm:$0xf0]  ;;  %v3761_v62 = vld [vmem:[%s4391_s12 + $0x24] sm:$0xf] }
 0x150   : > { %v1350_v35 = vadd.f32 %v1349_v11, %v1250_v9  ;;  %v3441_v9 = vld [vmem:[%s4391_s12 + $0x28] sm:$0xf0]  ;;  %v3777_v11 = vld [vmem:[%s4391_s12 + $0xa4] sm:$0xf] }
 0x151   : > { %v1546_v12 = vadd.f32 %v1545_v0, %v1447_v63  ;;  %v3444_v17 = vor.u32 %v3761_v62, %v3441_v9  ;;  %v3508_v18 = vor.u32 %v3777_v11, %v3505_v40  ;;  %v3732_v62 = vld [vmem:[%s4548_s30 + $0x174] sm:$0xf0] }
 0x153   : > { %v2030_v19 = vadd.f32 %v1546_v12, %v347_v10  ;;  %v4801_v12 = vor.u32 %v3725_v20, %v3297_v21  ;;  %1734 = vmatpush.bf16.msrb.mxu1 %v3508_v18  ;;  %1635 = vmatpush.bf16.msrb.mxu0 %v3444_v17 }
 0x155   : > { %2102 = vst [vmem:[#allocation2 + $0xe8] sm:$0xff] %v2030_v19  ;;  %v3636_v19 = vor.u32 %v3809_v60, %v3633_v61  ;;  %v3313_v60 = vld [vmem:[%s4548_s30 + $0x170] sm:$0xf0]  ;;  %v3319_v61 = vld [vmem:[%s4548_s30 + $0x168] sm:$0xf] }
 0x156   : > { %v1448_v41 = vpop.f32.mrf.mxu2  ;;  %v1253_v10 = vpop.f32.mrf.mxu0 }
 0x157   : > { %v1449_v63 = vadd.f32 %v1448_v41, %v1350_v35  ;;  %v1547_v0 = vpop.f32.mrf.mxu3  ;;  %v1352_v34 = vpop.f32.mrf.mxu1  ;;  %1932 = vmatpush.bf16.msrb.mxu3 %v3636_v19  ;;  %v3731_v41 = vld [vmem:[%s4548_s30 + $0x16c] sm:$0xf0] }
 0x158   : > { %v1353_v21 = vadd.f32 %v1352_v34, %v1253_v10  ;;  %v3321_v10 = vld [vmem:[%s4548_s30 + $0x178] sm:$0xf0]  ;;  %v4822_v9 = vor.u32 %v3731_v41, %v3311_v37  ;;  %v355_v41 = vld [vmem:[#allocation2 + $0x108] sm:$0xff] }
 0x159   : > { %v1548_v36 = vadd.f32 %v1547_v0, %v1449_v63  ;;  %1292 = vmatmul.bf16.gmra.mxu0 %v4796_v44  ;;  %v3730_v0 = vld [vmem:[%s4548_s30 + $0x16c] sm:$0xf] }
 0x15a   : > { %1391 = vmatmul.bf16.gmra.mxu1 %v4801_v12  ;;  %5425 = vst [vmem:[#allocation25_spill] sm:$0xff] %v4822_v9 }
 0x15b   : > { %v2032_v20 = vadd.f32 %v1548_v36, %v349_v39  ;;  %1490 = vmatmul.bf16.gmra.mxu2 %v4803_v57  ;;  %v4824_v36 = vor.u32 %v3729_v59, %v3313_v60 }
 0x15c   : > { %1589 = vmatmul.bf16.gmra.mxu3 %v4808_v58 }
 0x15d   : > { %2104 = vst [vmem:[#allocation2 + $0x70] sm:$0xff] %v2032_v20  ;;  %v4826_v20 = vor.u32 %v3732_v62, %v3319_v61  ;;  %v3327_v61 = vld [vmem:[%s4548_s30 + $0x180] sm:$0xf]  ;;  %v3735_v62 = vld [vmem:[%s4548_s30 + $0x18c] sm:$0xf0] }
 0x15e   : > { %v1451_v40 = vpop.f32.mrf.mxu2  ;;  %v1255_v39 = vpop.f32.mrf.mxu0  ;;  %5426 = vst [vmem:[#allocation26_spill] sm:$0xff] %v4824_v36 }
 0x15f   : > { %v1452_v22 = vadd.f32 %v1451_v40, %v1353_v21  ;;  %v1550_v31 = vpop.f32.mrf.mxu3  ;;  %v1354_v34 = vpop.f32.mrf.mxu1  ;;  %5427 = vst [vmem:[#allocation27_spill] sm:$0xff] %v4826_v20  ;;  %v353_v21 = vld [vmem:[#allocation2 + $0xb0] sm:$0xff] }
 0x160   : > { %v1355_v63 = vadd.f32 %v1354_v34, %v1255_v39 }
 0x161   : > { %v1551_v33 = vadd.f32 %v1550_v31, %v1452_v22  ;;  %v4828_v22 = vor.u32 %v3730_v0, %v3321_v10  ;;  %v3733_v0 = vld [vmem:[%s4548_s30 + $0x184] sm:$0xf]  ;;  %v3329_v10 = vld [vmem:[%s4548_s30 + $0x190] sm:$0xf0] }
 0x163   : > { %v2034_v35 = vadd.f32 %v1551_v33, %v351_v32  ;;  %5428 = vst [vmem:[#allocation28_spill] sm:$0xff] %v4828_v22 }
 0x165   : > { %2106 = vst [vmem:[#allocation2 + $0xd8] sm:$0xff] %v2034_v35 }
 0x166   : > { %v1453_v19 = vpop.f32.mrf.mxu2  ;;  %v1258_v18 = vpop.f32.mrf.mxu0 }
 0x167   : > { %v1454_v11 = vadd.f32 %v1453_v19, %v1355_v63  ;;  %v1552_v17 = vpop.f32.mrf.mxu3  ;;  %v1357_v40 = vpop.f32.mrf.mxu1  ;;  %v3335_v19 = vld [vmem:[%s4548_s30 + $0x188] sm:$0xf] }
 0x168   : > { %v1358_v32 = vadd.f32 %v1357_v40, %v1258_v18  ;;  %v3337_v18 = vld [vmem:[%s4548_s30 + $0x198] sm:$0xf0]  ;;  %v3791_v40 = vld [vmem:[%s4391_s12 + $0x114] sm:$0xf] }
 0x169   : > { %v1553_v31 = vadd.f32 %v1552_v17, %v1454_v11  ;;  %1297 = vmatmul.bf16.gmra.mxu0 %v4822_v9  ;;  %v3736_v11 = vld [vmem:[%s4548_s30 + $0x194] sm:$0xf0]  ;;  %v3734_v17 = vld [vmem:[%s4548_s30 + $0x18c] sm:$0xf] }
 0x16a   : > { %1396 = vmatmul.bf16.gmra.mxu1 %v4824_v36 }
 0x16b   : > { %v2036_v39 = vadd.f32 %v1553_v31, %v353_v21  ;;  %1495 = vmatmul.bf16.gmra.mxu2 %v4826_v20  ;;  %v3561_v31 = vld [vmem:[%s4391_s12 + $0x118] sm:$0xf0] }
 0x16c   : > { %1594 = vmatmul.bf16.gmra.mxu3 %v4828_v22 }
 0x16d   : > { %2108 = vst [vmem:[#allocation2 + $0xb0] sm:$0xff] %v2036_v39 }
 0x16e   : > { %v1456_v34 = vpop.f32.mrf.mxu2  ;;  %v1260_v37 = vpop.f32.mrf.mxu0 }
 0x16f   : > { %v1457_v33 = vadd.f32 %v1456_v34, %v1358_v32  ;;  %v1555_v35 = vpop.f32.mrf.mxu3  ;;  %v1359_v59 = vpop.f32.mrf.mxu1  ;;  %v4844_v32 = vor.u32 %v3735_v62, %v3327_v61  ;;  %v3564_v34 = vor.u32 %v3791_v40, %v3561_v31  ;;  %v359_v40 = vld [vmem:[#allocation2 + $0x180] sm:$0xff] }
 0x170   : > { %v1360_v21 = vadd.f32 %v1359_v59, %v1260_v37  ;;  %v4852_v59 = vor.u32 %v3734_v17, %v3337_v18 }
 0x171   : > { %v1556_v60 = vadd.f32 %v1555_v35, %v1457_v33  ;;  %5429 = vst [vmem:[#allocation29_spill] sm:$0xff] %v4844_v32  ;;  %v3807_v33 = vld [vmem:[%s4391_s12 + $0x194] sm:$0xf]  ;;  %v3625_v35 = vld [vmem:[%s4391_s12 + $0x198] sm:$0xf0]  ;;  %1834 = vmatpush.bf16.msrb.mxu2 %v3564_v34 }
 0x172   : > { %v3628_v9 = vor.u32 %v3807_v33, %v3625_v35  ;;  %5432 = vst [vmem:[#allocation32_spill] sm:$0xff] %v4852_v59  ;;  %v3343_v33 = vld [vmem:[%s4548_s30 + $0x1a0] sm:$0xf]  ;;  %v3739_v35 = vld [vmem:[%s4548_s30 + $0x1ac] sm:$0xf0] }
 0x173   : > { %v2038_v63 = vadd.f32 %v1556_v60, %v355_v41  ;;  %v4848_v41 = vor.u32 %v3733_v0, %v3329_v10  ;;  %v4850_v60 = vor.u32 %v3736_v11, %v3335_v19  ;;  %v3759_v0 = vld [vmem:[%s4391_s12 + $0x14] sm:$0xf]  ;;  %v3433_v10 = vld [vmem:[%s4391_s12 + $0x18] sm:$0xf0] }
 0x174   : > { %1933 = vmatpush.bf16.msrb.mxu3 %v3628_v9  ;;  %v3436_v11 = vor.u32 %v3759_v0, %v3433_v10  ;;  %v3775_v9 = vld [vmem:[%s4391_s12 + $0x94] sm:$0xf]  ;;  %v3353_v10 = vld [vmem:[%s4548_s30 + $0x1b8] sm:$0xf0] }
 0x175   : > { %2110 = vst [vmem:[#allocation2 + $0x108] sm:$0xff] %v2038_v63  ;;  %v357_v63 = vld [vmem:[#allocation2 + $0x1f8] sm:$0xff] }
 0x176   : > { %v1458_v39 = vpop.f32.mrf.mxu2  ;;  %v1263_v36 = vpop.f32.mrf.mxu0  ;;  %5430 = vst [vmem:[#allocation30_spill] sm:$0xff] %v4848_v41  ;;  %1636 = vmatpush.bf16.msrb.mxu0 %v3436_v11 }
 0x177   : > { %v1459_v22 = vadd.f32 %v1458_v39, %v1360_v21  ;;  %v1557_v20 = vpop.f32.mrf.mxu3  ;;  %5431 = vst [vmem:[#allocation31_spill] sm:$0xff] %v4850_v60  ;;  %v1362_v37 = vpop.f32.mrf.mxu1 }
 0x178   : > { %v1363_v21 = vadd.f32 %v1362_v37, %v1263_v36  ;;  %v3345_v37 = vld [vmem:[%s4548_s30 + $0x1b0] sm:$0xf0] }
 0x179   : > { %v1558_v61 = vadd.f32 %v1557_v20, %v1459_v22  ;;  %1302 = vmatmul.bf16.gmra.mxu0 %v4844_v32  ;;  %v3497_v20 = vld [vmem:[%s4391_s12 + $0x98] sm:$0xf0] }
 0x17a   : > { %1401 = vmatmul.bf16.gmra.mxu1 %v4848_v41  ;;  %v3500_v18 = vor.u32 %v3775_v9, %v3497_v20  ;;  %v3385_v41 = vld [vmem:[%s4548_s30 + $0x1f8] sm:$0xf0] }
 0x17b   : > { %v2040_v62 = vadd.f32 %v1558_v61, %v357_v63  ;;  %1500 = vmatmul.bf16.gmra.mxu2 %v4850_v60  ;;  %v3737_v63 = vld [vmem:[%s4548_s30 + $0x1a4] sm:$0xf]  ;;  %v3351_v61 = vld [vmem:[%s4548_s30 + $0x1a8] sm:$0xf] }
 0x17c   : > { %1599 = vmatmul.bf16.gmra.mxu3 %v4852_v59  ;;  %1735 = vmatpush.bf16.msrb.mxu1 %v3500_v18  ;;  %v4870_v59 = vor.u32 %v3739_v35, %v3343_v33  ;;  %v4872_v11 = vor.u32 %v3737_v63, %v3345_v37  ;;  %v363_v37 = vld [vmem:[#allocation2 + $0xd0] sm:$0xff] }
 0x17d   : > { %2112 = vst [vmem:[#allocation2 + $0x1f8] sm:$0xff] %v2040_v62  ;;  %v3740_v62 = vld [vmem:[%s4548_s30 + $0x1b4] sm:$0xf0] }
 0x17e   : > { %v1461_v19 = vpop.f32.mrf.mxu2  ;;  %v1265_v17 = vpop.f32.mrf.mxu0  ;;  %5433 = vst [vmem:[#allocation33_spill] sm:$0xff] %v4870_v59 }
 0x17f   : > { %v1462_v36 = vadd.f32 %v1461_v19, %v1363_v21  ;;  %v1560_v22 = vpop.f32.mrf.mxu3  ;;  %v1364_v31 = vpop.f32.mrf.mxu1  ;;  %v3738_v21 = vld [vmem:[%s4548_s30 + $0x1ac] sm:$0xf]  ;;  %5434 = vst [vmem:[#allocation34_spill] sm:$0xff] %v4872_v11 }
 0x180   : > { %v1365_v0 = vadd.f32 %v1364_v31, %v1265_v17 }
 0x181   : > { %v1561_v39 = vadd.f32 %v1560_v22, %v1462_v36  ;;  %v4874_v36 = vor.u32 %v3740_v62, %v3351_v61  ;;  %v361_v22 = vld [vmem:[#allocation2 + $0x140] sm:$0xff] }
 0x183   : > { %v2042_v34 = vadd.f32 %v1561_v39, %v359_v40  ;;  %5435 = vst [vmem:[#allocation35_spill] sm:$0xff] %v4874_v36  ;;  %v4876_v40 = vor.u32 %v3738_v21, %v3353_v10  ;;  %v3743_v21 = vld [vmem:[%s4548_s30 + $0x1cc] sm:$0xf0]  ;;  %v3741_v10 = vld [vmem:[%s4548_s30 + $0x1c4] sm:$0xf] }
 0x185   : > { %2114 = vst [vmem:[#allocation2 + $0x180] sm:$0xff] %v2042_v34 }
 0x186   : > { %v1463_v19 = vpop.f32.mrf.mxu2  ;;  %v1268_v60 = vpop.f32.mrf.mxu0  ;;  %5436 = vst [vmem:[#allocation36_spill] sm:$0xff] %v4876_v40 }
 0x187   : > { %v1464_v9 = vadd.f32 %v1463_v19, %v1365_v0  ;;  %v1562_v20 = vpop.f32.mrf.mxu3  ;;  %v1367_v18 = vpop.f32.mrf.mxu1  ;;  %v3359_v0 = vld [vmem:[%s4548_s30 + $0x1c0] sm:$0xf]  ;;  %v3361_v19 = vld [vmem:[%s4548_s30 + $0x1d0] sm:$0xf0] }
 0x188   : > { %v1368_v31 = vadd.f32 %v1367_v18, %v1268_v60  ;;  %v3742_v18 = vld [vmem:[%s4548_s30 + $0x1cc] sm:$0xf] }
 0x189   : > { %v1563_v39 = vadd.f32 %v1562_v20, %v1464_v9  ;;  %1307 = vmatmul.bf16.gmra.mxu0 %v4870_v59  ;;  %v3367_v9 = vld [vmem:[%s4548_s30 + $0x1c8] sm:$0xf]  ;;  %v3744_v20 = vld [vmem:[%s4548_s30 + $0x1d4] sm:$0xf0]  ;;  %v3746_v59 = vld [vmem:[%s4548_s30 + $0x1ec] sm:$0xf] }
 0x18a   : > { %1406 = vmatmul.bf16.gmra.mxu1 %v4872_v11 }
 0x18b   : > { %v2044_v17 = vadd.f32 %v1563_v39, %v361_v22  ;;  %1505 = vmatmul.bf16.gmra.mxu2 %v4874_v36  ;;  %v3369_v39 = vld [vmem:[%s4548_s30 + $0x1d8] sm:$0xf0] }
 0x18c   : > { %1604 = vmatmul.bf16.gmra.mxu3 %v4876_v40  ;;  %v4890_v40 = vor.u32 %v3743_v21, %v3359_v0  ;;  %v3789_v21 = vld [vmem:[%s4391_s12 + $0x104] sm:$0xf] }
 0x18d   : > { %2116 = vst [vmem:[#allocation2 + $0x140] sm:$0xff] %v2044_v17 }
 0x18e   : > { %v1466_v34 = vpop.f32.mrf.mxu2  ;;  %v1270_v63 = vpop.f32.mrf.mxu0  ;;  %5437 = vst [vmem:[#allocation37_spill] sm:$0xff] %v4890_v40 }
 0x18f   : > { %v1467_v33 = vadd.f32 %v1466_v34, %v1368_v31  ;;  %v1565_v35 = vpop.f32.mrf.mxu3  ;;  %v1369_v61 = vpop.f32.mrf.mxu1 }
 0x190   : > { %v1370_v22 = vadd.f32 %v1369_v61, %v1270_v63  ;;  %v4896_v63 = vor.u32 %v3742_v18, %v3369_v39  ;;  %v3757_v18 = vld [vmem:[%s4391_s12 + $0x4] sm:$0xf] }
 0x191   : > { %v1566_v62 = vadd.f32 %v1565_v35, %v1467_v33  ;;  %v4892_v33 = vor.u32 %v3741_v10, %v3361_v19  ;;  %v4894_v35 = vor.u32 %v3744_v20, %v3367_v9  ;;  %v3553_v10 = vld [vmem:[%s4391_s12 + $0x108] sm:$0xf0]  ;;  %v3805_v20 = vld [vmem:[%s4391_s12 + $0x184] sm:$0xf] }
 0x192   : > { %5440 = vst [vmem:[#allocation40_spill] sm:$0xff] %v4896_v63  ;;  %v3556_v9 = vor.u32 %v3789_v21, %v3553_v10 }
 0x193   : > { %v2046_v60 = vadd.f32 %v1566_v62, %v363_v37  ;;  %5438 = vst [vmem:[#allocation38_spill] sm:$0xff] %v4892_v33  ;;  %v365_v37 = vld [vmem:[#allocation2 + $0x60] sm:$0xff] }
 0x194   : > { %5439 = vst [vmem:[#allocation39_spill] sm:$0xff] %v4894_v35  ;;  %1835 = vmatpush.bf16.msrb.mxu2 %v3556_v9 }
 0x195   : > { %2118 = vst [vmem:[#allocation2 + $0xd0] sm:$0xff] %v2046_v60 }
 0x196   : > { %v1468_v17 = vpop.f32.mrf.mxu2  ;;  %v1273_v36 = vpop.f32.mrf.mxu0 }
 0x197   : > { %v1469_v31 = vadd.f32 %v1468_v17, %v1370_v22  ;;  %v1567_v34 = vpop.f32.mrf.mxu3  ;;  %v1372_v62 = vpop.f32.mrf.mxu1  ;;  %v3617_v22 = vld [vmem:[%s4391_s12 + $0x188] sm:$0xf0] }
 0x198   : > { %v1373_v0 = vadd.f32 %v1372_v62, %v1273_v36  ;;  %v3489_v62 = vld [vmem:[%s4391_s12 + $0x88] sm:$0xf0] }
 0x199   : > { %v1568_v61 = vadd.f32 %v1567_v34, %v1469_v31  ;;  %1312 = vmatmul.bf16.gmra.mxu0 %v4890_v40  ;;  %v3620_v31 = vor.u32 %v3805_v20, %v3617_v22  ;;  %v3425_v34 = vld [vmem:[%s4391_s12 + $0x8] sm:$0xf0]  ;;  %v3375_v20 = vld [vmem:[%s4548_s30 + $0x1e0] sm:$0xf]  ;;  %v3747_v22 = vld [vmem:[%s4548_s30 + $0x1ec] sm:$0xf0] }
 0x19a   : > { %1411 = vmatmul.bf16.gmra.mxu1 %v4892_v33  ;;  %v3428_v21 = vor.u32 %v3757_v18, %v3425_v34  ;;  %v3383_v33 = vld [vmem:[%s4548_s30 + $0x1e8] sm:$0xf]  ;;  %v3748_v40 = vld [vmem:[%s4548_s30 + $0x1f4] sm:$0xf0]  ;;  %v4918_v32 = vor.u32 %v3747_v22, %v3375_v20  ;;  %v3749_v20 = vld [vmem:[%s4548_s30 + $0x204] sm:$0xf] }
 0x19b   : > { %v2048_v60 = vadd.f32 %v1568_v61, %v365_v37  ;;  %1510 = vmatmul.bf16.gmra.mxu2 %v4894_v35  ;;  %v3773_v37 = vld [vmem:[%s4391_s12 + $0x84] sm:$0xf]  ;;  %v367_v61 = vld [vmem:[#allocation2 + $0x88] sm:$0xff]  ;;  %1934 = vmatpush.bf16.msrb.mxu3 %v3620_v31  ;;  %v3377_v35 = vld [vmem:[%s4548_s30 + $0x1f0] sm:$0xf0]  ;;  %v4922_v31 = vor.u32 %v3748_v40, %v3383_v33 }
 0x19c   : > { %1609 = vmatmul.bf16.gmra.mxu3 %v4896_v63  ;;  %v3492_v10 = vor.u32 %v3773_v37, %v3489_v62  ;;  %1637 = vmatpush.bf16.msrb.mxu0 %v3428_v21  ;;  %v3745_v63 = vld [vmem:[%s4548_s30 + $0x1e4] sm:$0xf]  ;;  %v369_v37 = vld [vmem:[#allocation2 + $0x188] sm:$0xff]  ;;  %v3393_v22 = vld [vmem:[%s4548_s30 + $0x210] sm:$0xf0] }
 0x19d   : > { %2120 = vst [vmem:[#allocation2 + $0x60] sm:$0xff] %v2048_v60  ;;  %v371_v33 = vld [vmem:[#allocation2 + $0x1a8] sm:$0xff] }
 0x19e   : > { %v1471_v19 = vpop.f32.mrf.mxu2  ;;  %v1275_v36 = vpop.f32.mrf.mxu0  ;;  %1736 = vmatpush.bf16.msrb.mxu1 %v3492_v10  ;;  %5441 = vst [vmem:[#allocation41_spill] sm:$0xff] %v4922_v31 }
 0x19f   : > { %v1472_v39 = vadd.f32 %v1471_v19, %v1373_v0  ;;  %v1570_v17 = vpop.f32.mrf.mxu3  ;;  %v1374_v60 = vpop.f32.mrf.mxu1 }
 0x1a0   : > { %v1375_v11 = vadd.f32 %v1374_v60, %v1275_v36 }
 0x1a1   : > { %v1571_v0 = vadd.f32 %v1570_v17, %v1472_v39  ;;  %v4920_v17 = vor.u32 %v3745_v63, %v3377_v35 }
 0x1a3   : > { %v2050_v19 = vadd.f32 %v1571_v0, %v367_v61  ;;  %v4924_v61 = vor.u32 %v3746_v59, %v3385_v41  ;;  %v3391_v0 = vld [vmem:[%s4548_s30 + $0x200] sm:$0xf] }
 0x1a5   : > { %2122 = vst [vmem:[#allocation2 + $0x88] sm:$0xff] %v2050_v19  ;;  %v3751_v19 = vld [vmem:[%s4548_s30 + $0x20c] sm:$0xf0] }
 0x1a6   : > { %v1473_v9 = vpop.f32.mrf.mxu2  ;;  %v1278_v39 = vpop.f32.mrf.mxu0  ;;  %5442 = vst [vmem:[#allocation42_spill] sm:$0xff] %v4924_v61 }
 0x1a7   : > { %v1474_v18 = vadd.f32 %v1473_v9, %v1375_v11  ;;  %v1572_v34 = vpop.f32.mrf.mxu3  ;;  %v1377_v62 = vpop.f32.mrf.mxu1  ;;  %v3399_v9 = vld [vmem:[%s4548_s30 + $0x208] sm:$0xf] }
 0x1a8   : > { %v1378_v60 = vadd.f32 %v1377_v62, %v1278_v39  ;;  %v3750_v39 = vld [vmem:[%s4548_s30 + $0x20c] sm:$0xf] }
 0x1a9   : > { %v1573_v21 = vadd.f32 %v1572_v34, %v1474_v18  ;;  %1317 = vmatmul.bf16.gmra.mxu0 %v4918_v32  ;;  %v3752_v18 = vld [vmem:[%s4548_s30 + $0x214] sm:$0xf0] }
 0x1aa   : > { %1416 = vmatmul.bf16.gmra.mxu1 %v4920_v17 }
 0x1ab   : > { %v2052_v36 = vadd.f32 %v1573_v21, %v369_v37  ;;  %1515 = vmatmul.bf16.gmra.mxu2 %v4922_v31  ;;  %v3401_v37 = vld [vmem:[%s4548_s30 + $0x218] sm:$0xf0]  ;;  %v4938_v21 = vor.u32 %v3751_v19, %v3391_v0 }
 0x1ac   : > { %1614 = vmatmul.bf16.gmra.mxu3 %v4924_v61  ;;  %v4940_v61 = vor.u32 %v3749_v20, %v3393_v22  ;;  %v375_v22 = vld [vmem:[#allocation2 + $0x80] sm:$0xff] }
 0x1ad   : > { %2124 = vst [vmem:[#allocation2 + $0x188] sm:$0xff] %v2052_v36 }
 0x1ae   : > { %v1476_v41 = vpop.f32.mrf.mxu2  ;;  %v1280_v40 = vpop.f32.mrf.mxu0  ;;  %5443 = vst [vmem:[#allocation43_spill] sm:$0xff] %v4938_v21 }
 0x1af   : > { %v1477_v59 = vadd.f32 %v1476_v41, %v1378_v60  ;;  %v1575_v11 = vpop.f32.mrf.mxu3  ;;  %v1379_v35 = vpop.f32.mrf.mxu1  ;;  %5444 = vst [vmem:[#allocation44_spill] sm:$0xff] %v4940_v61 }
 0x1b0   : > { %v1380_v34 = vadd.f32 %v1379_v35, %v1280_v40 }
 0x1b1   : > { %v1576_v63 = vadd.f32 %v1575_v11, %v1477_v59  ;;  %v4942_v59 = vor.u32 %v3752_v18, %v3399_v9  ;;  %v373_v11 = vld [vmem:[#allocation2 + $0x1e8] sm:$0xff] }
 0x1b3   : > { %v2054_v10 = vadd.f32 %v1576_v63, %v371_v33  ;;  %5445 = vst [vmem:[#allocation45_spill] sm:$0xff] %v4942_v59  ;;  %v4944_v63 = vor.u32 %v3750_v39, %v3401_v37  ;;  %v3755_v39 = vld [vmem:[%s4548_s30 + $0x22c] sm:$0xf0]  ;;  %v3753_v37 = vld [vmem:[%s4548_s30 + $0x224] sm:$0xf] }
 0x1b5   : > { %2126 = vst [vmem:[#allocation2 + $0x1a8] sm:$0xff] %v2054_v10 }
 0x1b6   : > { %v1478_v62 = vpop.f32.mrf.mxu2  ;;  %v1283_v41 = vpop.f32.mrf.mxu0  ;;  %5446 = vst [vmem:[#allocation46_spill] sm:$0xff] %v4944_v63 }
 0x1b7   : > { %v1479_v36 = vadd.f32 %v1478_v62, %v1380_v34  ;;  %v1577_v60 = vpop.f32.mrf.mxu3  ;;  %v1382_v33 = vpop.f32.mrf.mxu1  ;;  %v3407_v34 = vld [vmem:[%s4548_s30 + $0x220] sm:$0xf]  ;;  %v3409_v62 = vld [vmem:[%s4548_s30 + $0x230] sm:$0xf0] }
 0x1b8   : > { %v1383_v35 = vadd.f32 %v1382_v33, %v1283_v41  ;;  %v3417_v33 = vld [vmem:[%s4548_s30 + $0x238] sm:$0xf0] }
 0x1b9   : > { %v1578_v31 = vadd.f32 %v1577_v60, %v1479_v36  ;;  %1322 = vmatmul.bf16.gmra.mxu0 %v4938_v21  ;;  %v3415_v36 = vld [vmem:[%s4548_s30 + $0x228] sm:$0xf]  ;;  %v3756_v60 = vld [vmem:[%s4548_s30 + $0x234] sm:$0xf0] }
 0x1ba   : > { %1421 = vmatmul.bf16.gmra.mxu1 %v4940_v61  ;;  %v4960_v61 = vor.u32 %v3753_v37, %v3409_v62  ;;  %v379_v62 = vld [vmem:[#allocation2 + $0x198] sm:$0xff] }
 0x1bb   : > { %v2056_v40 = vadd.f32 %v1578_v31, %v373_v11  ;;  %1520 = vmatmul.bf16.gmra.mxu2 %v4942_v59  ;;  %v3754_v11 = vld [vmem:[%s4548_s30 + $0x22c] sm:$0xf] }
 0x1bc   : > { %1619 = vmatmul.bf16.gmra.mxu3 %v4944_v63  ;;  %v4958_v63 = vor.u32 %v3755_v39, %v3407_v34 }
 0x1bd   : > { %2128 = vst [vmem:[#allocation2 + $0x1e8] sm:$0xff] %v2056_v40 }
 0x1be   : > { %v1481_v10 = vpop.f32.mrf.mxu2  ;;  %v1285_v20 = vpop.f32.mrf.mxu0 }
 0x1bf   : > { %v1482_v0 = vadd.f32 %v1481_v10, %v1383_v35  ;;  %v1580_v19 = vpop.f32.mrf.mxu3  ;;  %v1384_v31 = vpop.f32.mrf.mxu1 }
 0x1c0   : > { %v1385_v41 = vadd.f32 %v1384_v31, %v1285_v20 }
 0x1c1   : > { %v1581_v9 = vadd.f32 %v1580_v19, %v1482_v0  ;;  %v4962_v0 = vor.u32 %v3756_v60, %v3415_v36  ;;  %v377_v19 = vld [vmem:[#allocation2 + $0x78] sm:$0xff] }
 0x1c3   : > { %v2058_v18 = vadd.f32 %v1581_v9, %v375_v22  ;;  %v4964_v9 = vor.u32 %v3754_v11, %v3417_v33 }
 0x1c5   : > { %2130 = vst [vmem:[#allocation2 + $0x80] sm:$0xff] %v2058_v18 }
 0x1c6   : > { %v1483_v40 = vpop.f32.mrf.mxu2  ;;  %v1288_v59 = vpop.f32.mrf.mxu0 }
 0x1c7   : > { %v1484_v35 = vadd.f32 %v1483_v40, %v1385_v41  ;;  %v1582_v10 = vpop.f32.mrf.mxu3  ;;  %v1387_v22 = vpop.f32.mrf.mxu1 }
 0x1c8   : > { %v1388_v31 = vadd.f32 %v1387_v22, %v1288_v59 }
 0x1c9   : > { %v1583_v21 = vadd.f32 %v1582_v10, %v1484_v35  ;;  %1327 = vmatmul.bf16.gmra.mxu0 %v4958_v63  ;;  %v381_v35 = vld [vmem:[#allocation2 + $0x1e0] sm:$0xff] }
 0x1ca   : > { %1426 = vmatmul.bf16.gmra.mxu1 %v4960_v61 }
 0x1cb   : > { %v2060_v20 = vadd.f32 %v1583_v21, %v377_v19  ;;  %1525 = vmatmul.bf16.gmra.mxu2 %v4962_v0 }
 0x1cc   : > { %1624 = vmatmul.bf16.gmra.mxu3 %v4964_v9 }
 0x1cd   : > { %2132 = vst [vmem:[#allocation2 + $0x78] sm:$0xff] %v2060_v20 }
 0x1ce   : > { %v1486_v18 = vpop.f32.mrf.mxu2  ;;  %v1290_v37 = vpop.f32.mrf.mxu0 }
 0x1cf   : > { %v1487_v34 = vadd.f32 %v1486_v18, %v1388_v31  ;;  %v1585_v39 = vpop.f32.mrf.mxu3  ;;  %v1389_v36 = vpop.f32.mrf.mxu1 }
 0x1d0   : > { %v1390_v11 = vadd.f32 %v1389_v36, %v1290_v37  ;;  %v383_v37 = vld [vmem:[#allocation2 + $0x48] sm:$0xff] }
 0x1d1   : > { %v1586_v60 = vadd.f32 %v1585_v39, %v1487_v34 }
 0x1d3   : > { %v2062_v41 = vadd.f32 %v1586_v60, %v379_v62 }
 0x1d5   : > { %2134 = vst [vmem:[#allocation2 + $0x198] sm:$0xff] %v2062_v41 }
 0x1d6   : > { %v1488_v33 = vpop.f32.mrf.mxu2  ;;  %v1293_v40 = vpop.f32.mrf.mxu0 }
 0x1d7   : > { %v1489_v21 = vadd.f32 %v1488_v33, %v1390_v11  ;;  %v1587_v59 = vpop.f32.mrf.mxu3  ;;  %v1392_v10 = vpop.f32.mrf.mxu1 }
 0x1d8   : > { %v1393_v20 = vadd.f32 %v1392_v10, %v1293_v40 }
 0x1d9   : > { %v1588_v19 = vadd.f32 %v1587_v59, %v1489_v21  ;;  %1638 = vmatmul.bf16.vlgmr.msrb.gmra.mxu0 %v4560_v48 }
 0x1da   : > { %1737 = vmatmul.bf16.vlgmr.msrb.gmra.mxu1 %v4564_v52  ;;  %v385_v52 = vld [vmem:[#allocation2 + $0x238] sm:$0xff] }
 0x1db   : > { %v2064_v22 = vadd.f32 %v1588_v19, %v381_v35  ;;  %1836 = vmatmul.bf16.vlgmr.msrb.gmra.mxu2 %v4566_v53 }
 0x1dc   : > { %1935 = vmatmul.bf16.vlgmr.msrb.gmra.mxu3 %v4568_v54 }
 0x1dd   : > { %2136 = vst [vmem:[#allocation2 + $0x1e0] sm:$0xff] %v2064_v22 }
 0x1de   : > { %v1491_v31 = vpop.f32.mrf.mxu2  ;;  %v1295_v39 = vpop.f32.mrf.mxu0 }
 0x1df   : > { %v1492_v18 = vadd.f32 %v1491_v31, %v1393_v20  ;;  %v1590_v34 = vpop.f32.mrf.mxu3  ;;  %v1394_v62 = vpop.f32.mrf.mxu1  ;;  %v387_v20 = vld [vmem:[#allocation2 + $0x50] sm:$0xff] }
 0x1e0   : > { %v1395_v41 = vadd.f32 %v1394_v62, %v1295_v39 }
 0x1e1   : > { %v1591_v36 = vadd.f32 %v1590_v34, %v1492_v18 }
 0x1e3   : > { %v2066_v60 = vadd.f32 %v1591_v36, %v383_v37 }
 0x1e5   : > { %2138 = vst [vmem:[#allocation2 + $0x48] sm:$0xff] %v2066_v60 }
 0x1e6   : > { %v1493_v48 = vpop.f32.mrf.mxu2  ;;  %v1298_v21 = vpop.f32.mrf.mxu0 }
 0x1e7   : > { %v1494_v11 = vadd.f32 %v1493_v48, %v1395_v41  ;;  %v1592_v33 = vpop.f32.mrf.mxu3  ;;  %v1397_v59 = vpop.f32.mrf.mxu1 }
 0x1e8   : > { %v1398_v40 = vadd.f32 %v1397_v59, %v1298_v21 }
 0x1e9   : > { %v1593_v53 = vadd.f32 %v1592_v33, %v1494_v11  ;;  %1643 = vmatmul.bf16.gmra.mxu0 %v4590_v13 }
 0x1ea   : > { %1742 = vmatmul.bf16.gmra.mxu1 %v4592_v14  ;;  %v389_v14 = vld [vmem:[#allocation2 + $0x30] sm:$0xff] }
 0x1eb   : > { %v2068_v54 = vadd.f32 %v1593_v53, %v385_v52  ;;  %1841 = vmatmul.bf16.gmra.mxu2 %v4594_v15  ;;  %v391_v52 = vld [vmem:[#allocation2 + $0x90] sm:$0xff] }
 0x1ec   : > { %1940 = vmatmul.bf16.gmra.mxu3 %v4596_v16 }
 0x1ed   : > { %2140 = vst [vmem:[#allocation2 + $0x238] sm:$0xff] %v2068_v54 }
 0x1ee   : > { %v1496_v35 = vpop.f32.mrf.mxu2  ;;  %v1300_v22 = vpop.f32.mrf.mxu0 }
 0x1ef   : > { %v1497_v10 = vadd.f32 %v1496_v35, %v1398_v40  ;;  %v1595_v19 = vpop.f32.mrf.mxu3  ;;  %v1399_v31 = vpop.f32.mrf.mxu1 }
 0x1f0   : > { %v1400_v39 = vadd.f32 %v1399_v31, %v1300_v22 }
 0x1f1   : > { %v1596_v18 = vadd.f32 %v1595_v19, %v1497_v10 }
 0x1f3   : > { %v2070_v34 = vadd.f32 %v1596_v18, %v387_v20 }
 0x1f5   : > { %2142 = vst [vmem:[#allocation2 + $0x50] sm:$0xff] %v2070_v34 }
 0x1f6   : > { %v1498_v13 = vpop.f32.mrf.mxu2  ;;  %v1303_v36 = vpop.f32.mrf.mxu0 }
 0x1f7   : > { %v1499_v37 = vadd.f32 %v1498_v13, %v1400_v39  ;;  %v1597_v62 = vpop.f32.mrf.mxu3  ;;  %v1402_v60 = vpop.f32.mrf.mxu1  ;;  %v395_v13 = vld [vmem:[#allocation2 + $0x1d8] sm:$0xff] }
 0x1f8   : > { %v1403_v41 = vadd.f32 %v1402_v60, %v1303_v36 }
 0x1f9   : > { %v1598_v15 = vadd.f32 %v1597_v62, %v1499_v37  ;;  %1648 = vmatmul.bf16.gmra.mxu0 %v4610_v25 }
 0x1fa   : > { %1747 = vmatmul.bf16.gmra.mxu1 %v4612_v26  ;;  %v393_v26 = vld [vmem:[#allocation2 + $0x68] sm:$0xff] }
 0x1fb   : > { %v2072_v16 = vadd.f32 %v1598_v15, %v389_v14  ;;  %1846 = vmatmul.bf16.gmra.mxu2 %v4614_v27 }
 0x1fc   : > { %1945 = vmatmul.bf16.gmra.mxu3 %v4616_v28 }
 0x1fd   : > { %2144 = vst [vmem:[#allocation2 + $0x30] sm:$0xff] %v2072_v16 }
 0x1fe   : > { %v1501_v48 = vpop.f32.mrf.mxu2  ;;  %v1305_v21 = vpop.f32.mrf.mxu0 }
 0x1ff   : > { %v1502_v11 = vadd.f32 %v1501_v48, %v1403_v41  ;;  %v1600_v33 = vpop.f32.mrf.mxu3  ;;  %v1404_v59 = vpop.f32.mrf.mxu1 }
 0x200   : > { %v1405_v40 = vadd.f32 %v1404_v59, %v1305_v21  ;;  %v399_v59 = vld [vmem:[#allocation2 + $0x10] sm:$0xff] }
 0x201   : > { %v1601_v53 = vadd.f32 %v1600_v33, %v1502_v11 }
 0x203   : > { %v2074_v54 = vadd.f32 %v1601_v53, %v391_v52 }
 0x205   : > { %2146 = vst [vmem:[#allocation2 + $0x90] sm:$0xff] %v2074_v54 }
 0x206   : > { %v1503_v25 = vpop.f32.mrf.mxu2  ;;  %v1308_v19 = vpop.f32.mrf.mxu0 }
 0x207   : > { %v1504_v35 = vadd.f32 %v1503_v25, %v1405_v40  ;;  %v1602_v10 = vpop.f32.mrf.mxu3  ;;  %v1407_v22 = vpop.f32.mrf.mxu1 }
 0x208   : > { %v1408_v20 = vadd.f32 %v1407_v22, %v1308_v19 }
 0x209   : > { %v1603_v27 = vadd.f32 %v1602_v10, %v1504_v35  ;;  %1653 = vmatmul.bf16.gmra.mxu0 %v4638_v50 }
 0x20a   : > { %1752 = vmatmul.bf16.gmra.mxu1 %v4640_v51  ;;  %v397_v51 = vld [vmem:[#allocation2 + $0x218] sm:$0xff] }
 0x20b   : > { %v2076_v28 = vadd.f32 %v1603_v27, %v393_v26  ;;  %1851 = vmatmul.bf16.gmra.mxu2 %v4642_v55 }
 0x20c   : > { %1950 = vmatmul.bf16.gmra.mxu3 %v4644_v56 }
 0x20d   : > { %2148 = vst [vmem:[#allocation2 + $0x68] sm:$0xff] %v2076_v28 }
 0x20e   : > { %v1506_v31 = vpop.f32.mrf.mxu2  ;;  %v1310_v39 = vpop.f32.mrf.mxu0 }
 0x20f   : > { %v1507_v18 = vadd.f32 %v1506_v31, %v1408_v20  ;;  %v1605_v34 = vpop.f32.mrf.mxu3  ;;  %v1409_v37 = vpop.f32.mrf.mxu1 }
 0x210   : > { %v1410_v14 = vadd.f32 %v1409_v37, %v1310_v39 }
 0x211   : > { %v1606_v62 = vadd.f32 %v1605_v34, %v1507_v18  ;;  %v403_v18 = vld [vmem:[#allocation2 + $0x210] sm:$0xff] }
 0x213   : > { %v2078_v36 = vadd.f32 %v1606_v62, %v395_v13 }
 0x215   : > { %2150 = vst [vmem:[#allocation2 + $0x1d8] sm:$0xff] %v2078_v36 }
 0x216   : > { %v1508_v50 = vpop.f32.mrf.mxu2  ;;  %v1313_v16 = vpop.f32.mrf.mxu0 }
 0x217   : > { %v1509_v60 = vadd.f32 %v1508_v50, %v1410_v14  ;;  %v1607_v15 = vpop.f32.mrf.mxu3  ;;  %v1412_v41 = vpop.f32.mrf.mxu1 }
 0x218   : > { %v1413_v48 = vadd.f32 %v1412_v41, %v1313_v16 }
 0x219   : > { %v1608_v55 = vadd.f32 %v1607_v15, %v1509_v60  ;;  %1658 = vmatmul.bf16.gmra.mxu0 %v4658_v1 }
 0x21a   : > { %1757 = vmatmul.bf16.gmra.mxu1 %v4660_v2  ;;  %v401_v2 = vld [vmem:[#allocation2 + $0x178] sm:$0xff] }
 0x21b   : > { %v2080_v56 = vadd.f32 %v1608_v55, %v397_v51  ;;  %1856 = vmatmul.bf16.gmra.mxu2 %v4662_v3  ;;  %v407_v55 = vld [vmem:[#allocation2 + $0x1a0] sm:$0xff] }
 0x21c   : > { %1955 = vmatmul.bf16.gmra.mxu3 %v4664_v4 }
 0x21d   : > { %2152 = vst [vmem:[#allocation2 + $0x218] sm:$0xff] %v2080_v56 }
 0x21e   : > { %v1511_v11 = vpop.f32.mrf.mxu2  ;;  %v1315_v52 = vpop.f32.mrf.mxu0 }
 0x21f   : > { %v1512_v33 = vadd.f32 %v1511_v11, %v1413_v48  ;;  %v1610_v21 = vpop.f32.mrf.mxu3  ;;  %v1414_v53 = vpop.f32.mrf.mxu1 }
 0x220   : > { %v1415_v25 = vadd.f32 %v1414_v53, %v1315_v52 }
 0x221   : > { %v1611_v54 = vadd.f32 %v1610_v21, %v1512_v33 }
 0x223   : > { %v2082_v40 = vadd.f32 %v1611_v54, %v399_v59 }
 0x225   : > { %2154 = vst [vmem:[#allocation2 + $0x10] sm:$0xff] %v2082_v40 }
 0x226   : > { %v1513_v1 = vpop.f32.mrf.mxu2  ;;  %v1318_v19 = vpop.f32.mrf.mxu0 }
 0x227   : > { %v1514_v35 = vadd.f32 %v1513_v1, %v1415_v25  ;;  %v1612_v10 = vpop.f32.mrf.mxu3  ;;  %v1417_v26 = vpop.f32.mrf.mxu1 }
 0x228   : > { %v1418_v22 = vadd.f32 %v1417_v26, %v1318_v19 }
 0x229   : > { %v1613_v3 = vadd.f32 %v1612_v10, %v1514_v35  ;;  %1663 = vmatmul.bf16.gmra.mxu0 %v4682_v23  ;;  %v411_v10 = vld [vmem:[#allocation2 + $0x148] sm:$0xff] }
 0x22a   : > { %1762 = vmatmul.bf16.gmra.mxu1 %v4684_v24  ;;  %v405_v24 = vld [vmem:[#allocation2 + $0x168] sm:$0xff] }
 0x22b   : > { %v2084_v4 = vadd.f32 %v1613_v3, %v401_v2  ;;  %1861 = vmatmul.bf16.gmra.mxu2 %v4686_v29 }
 0x22c   : > { %1960 = vmatmul.bf16.gmra.mxu3 %v4688_v30 }
 0x22d   : > { %2156 = vst [vmem:[#allocation2 + $0x178] sm:$0xff] %v2084_v4 }
 0x22e   : > { %v1516_v27 = vpop.f32.mrf.mxu2  ;;  %v1320_v31 = vpop.f32.mrf.mxu0 }
 0x22f   : > { %v1517_v28 = vadd.f32 %v1516_v27, %v1418_v22  ;;  %v1615_v20 = vpop.f32.mrf.mxu3  ;;  %v1419_v34 = vpop.f32.mrf.mxu1 }
 0x230   : > { %v1420_v37 = vadd.f32 %v1419_v34, %v1320_v31  ;;  %v5447_v31 = vld [vmem:[#allocation20_spill] sm:$0xff] }
 0x231   : > { %v1616_v39 = vadd.f32 %v1615_v20, %v1517_v28 }
 0x233   : > { %v2086_v13 = vadd.f32 %v1616_v39, %v403_v18 }
 0x235   : > { %2158 = vst [vmem:[#allocation2 + $0x210] sm:$0xff] %v2086_v13 }
 0x236   : > { %v1518_v23 = vpop.f32.mrf.mxu2  ;;  %v1323_v14 = vpop.f32.mrf.mxu0 }
 0x237   : > { %v1519_v62 = vadd.f32 %v1518_v23, %v1420_v37  ;;  %v1617_v36 = vpop.f32.mrf.mxu3  ;;  %v1422_v50 = vpop.f32.mrf.mxu1  ;;  %v344_v37 = vld [vmem:[#allocation2 + $0x8] sm:$0xff] }
 0x238   : > { %v1423_v60 = vadd.f32 %v1422_v50, %v1323_v14 }
 0x239   : > { %v1618_v29 = vadd.f32 %v1617_v36, %v1519_v62  ;;  %1668 = vmatmul.bf16.gmra.mxu0 %v4706_v45 }
 0x23a   : > { %1767 = vmatmul.bf16.gmra.mxu1 %v4708_v46  ;;  %v409_v46 = vld [vmem:[#allocation2 + $0x118] sm:$0xff] }
 0x23b   : > { %v2088_v30 = vadd.f32 %v1618_v29, %v405_v24  ;;  %1866 = vmatmul.bf16.gmra.mxu2 %v4710_v47 }
 0x23c   : > { %1965 = vmatmul.bf16.gmra.mxu3 %v4712_v49 }
 0x23d   : > { %2160 = vst [vmem:[#allocation2 + $0x168] sm:$0xff] %v2088_v30 }
 0x23e   : > { %v1521_v15 = vpop.f32.mrf.mxu2  ;;  %v1325_v41 = vpop.f32.mrf.mxu0 }
 0x23f   : > { %v1522_v16 = vadd.f32 %v1521_v15, %v1423_v60  ;;  %v1620_v51 = vpop.f32.mrf.mxu3  ;;  %v1424_v56 = vpop.f32.mrf.mxu1  ;;  %v5448_v60 = vld [vmem:[#allocation21_spill] sm:$0xff] }
 0x240   : > { %v1425_v33 = vadd.f32 %v1424_v56, %v1325_v41  ;;  %v5450_v41 = vld [vmem:[#allocation23_spill] sm:$0xff] }
 0x241   : > { %v1621_v48 = vadd.f32 %v1620_v51, %v1522_v16  ;;  %v5449_v51 = vld [vmem:[#allocation22_spill] sm:$0xff] }
 0x243   : > { %v2090_v11 = vadd.f32 %v1621_v48, %v407_v55  ;;  %v5451_v55 = vld [vmem:[#allocation24_spill] sm:$0xff] }
 0x245   : > { %2162 = vst [vmem:[#allocation2 + $0x1a0] sm:$0xff] %v2090_v11 }
 0x246   : > { %v1523_v45 = vpop.f32.mrf.mxu2  ;;  %v1328_v59 = vpop.f32.mrf.mxu0 }
 0x247   : > { %v1524_v21 = vadd.f32 %v1523_v45, %v1425_v33  ;;  %v1622_v52 = vpop.f32.mrf.mxu3  ;;  %v1427_v53 = vpop.f32.mrf.mxu1  ;;  %v348_v45 = vld [vmem:[#allocation2 + $0xf0] sm:$0xff] }
 0x248   : > { %v1428_v54 = vadd.f32 %v1427_v53, %v1328_v59 }
 0x249   : > { %v1623_v47 = vadd.f32 %v1622_v52, %v1524_v21  ;;  %1673 = vmatmul.bf16.gmra.mxu0 %v4726_v5 }
 0x24a   : > { %1772 = vmatmul.bf16.gmra.mxu1 %v4728_v6  ;;  %v413_v6 = vld [vmem:[#allocation2 + $0x150] sm:$0xff] }
 0x24b   : > { %v2092_v49 = vadd.f32 %v1623_v47, %v409_v46  ;;  %1871 = vmatmul.bf16.gmra.mxu2 %v4730_v7 }
 0x24c   : > { %1970 = vmatmul.bf16.gmra.mxu3 %v4732_v8 }
 0x24d   : > { %2164 = vst [vmem:[#allocation2 + $0x118] sm:$0xff] %v2092_v49 }
 0x24e   : > { %v1526_v40 = vpop.f32.mrf.mxu2  ;;  %v1330_v35 = vpop.f32.mrf.mxu0 }
 0x24f   : > { %v1527_v25 = vadd.f32 %v1526_v40, %v1428_v54  ;;  %v1625_v1 = vpop.f32.mrf.mxu3  ;;  %v1429_v19 = vpop.f32.mrf.mxu1  ;;  %v350_v40 = vld [vmem:[#allocation2 + $0x120] sm:$0xff] }
 0x250   : > { %v1430_v3 = vadd.f32 %v1429_v19, %v1330_v35 }
 0x251   : > { %v1626_v2 = vadd.f32 %v1625_v1, %v1527_v25 }
 0x253   : > { %v2094_v26 = vadd.f32 %v1626_v2, %v411_v10 }
 0x255   : > { %2166 = vst [vmem:[#allocation2 + $0x148] sm:$0xff] %v2094_v26 }
 0x256   : > { %v1528_v5 = vpop.f32.mrf.mxu2  ;;  %v1639_v27 = vpop.f32.mrf.mxu0 }
 0x257   : > { %v1529_v4 = vadd.f32 %v1528_v5, %v1430_v3  ;;  %v1627_v22 = vpop.f32.mrf.mxu3  ;;  %v1738_v28 = vpop.f32.mrf.mxu1  ;;  %v352_v5 = vld [vmem:[#allocation2 + $0x18] sm:$0xff] }
 0x258   : > { %v1739_v20 = vadd.f32 %v1738_v28, %v1639_v27 }
 0x259   : > { %v1628_v7 = vadd.f32 %v1627_v22, %v1529_v4  ;;  %1678 = vmatmul.bf16.gmra.mxu0 %v4753_v38 }
 0x25a   : > { %1777 = vmatmul.bf16.gmra.mxu1 %v4756_v42  ;;  %v346_v42 = vld [vmem:[#allocation2 + $0x28] sm:$0xff] }
 0x25b   : > { %v2096_v8 = vadd.f32 %v1628_v7, %v413_v6  ;;  %1876 = vmatmul.bf16.gmra.mxu2 %v4758_v43 }
 0x25c   : > { %1975 = vmatmul.bf16.gmra.mxu3 %v5447_v31  ;;  %v5452_v31 = vld [vmem:[#allocation25_spill] sm:$0xff] }
 0x25d   : > { %2168 = vst [vmem:[#allocation2 + $0x150] sm:$0xff] %v2096_v8 }
 0x25e   : > { %v1837_v18 = vpop.f32.mrf.mxu2  ;;  %v1641_v13 = vpop.f32.mrf.mxu0 }
 0x25f   : > { %v1838_v34 = vadd.f32 %v1837_v18, %v1739_v20  ;;  %v1936_v39 = vpop.f32.mrf.mxu3  ;;  %v1740_v23 = vpop.f32.mrf.mxu1 }
 0x260   : > { %v1741_v14 = vadd.f32 %v1740_v23, %v1641_v13  ;;  %v5455_v13 = vld [vmem:[#allocation28_spill] sm:$0xff] }
 0x261   : > { %v1937_v62 = vadd.f32 %v1936_v39, %v1838_v34  ;;  %v5453_v34 = vld [vmem:[#allocation26_spill] sm:$0xff]  ;;  %v5454_v39 = vld [vmem:[#allocation27_spill] sm:$0xff] }
 0x263   : > { %v2027_v36 = vadd.f32 %v1937_v62, %v344_v37 }
 0x265   : > { %2099 = vst [vmem:[#allocation2 + $0x8] sm:$0xff] %v2027_v36 }
 0x266   : > { %v1839_v38 = vpop.f32.mrf.mxu2  ;;  %v1644_v29 = vpop.f32.mrf.mxu0 }
 0x267   : > { %v1840_v24 = vadd.f32 %v1839_v38, %v1741_v14  ;;  %v1938_v50 = vpop.f32.mrf.mxu3  ;;  %v1743_v30 = vpop.f32.mrf.mxu1  ;;  %v356_v14 = vld [vmem:[#allocation2 + $0x110] sm:$0xff] }
 0x268   : > { %v1744_v16 = vadd.f32 %v1743_v30, %v1644_v29 }
 0x269   : > { %v1939_v43 = vadd.f32 %v1938_v50, %v1840_v24  ;;  %1683 = vmatmul.bf16.gmra.mxu0 %v5448_v60 }
 0x26a   : > { %1782 = vmatmul.bf16.gmra.mxu1 %v5449_v51 }
 0x26b   : > { %v2029_v15 = vadd.f32 %v1939_v43, %v346_v42  ;;  %1881 = vmatmul.bf16.gmra.mxu2 %v5450_v41  ;;  %v5456_v41 = vld [vmem:[#allocation29_spill] sm:$0xff] }
 0x26c   : > { %1980 = vmatmul.bf16.gmra.mxu3 %v5451_v55 }
 0x26d   : > { %2101 = vst [vmem:[#allocation2 + $0x28] sm:$0xff] %v2029_v15  ;;  %v358_v15 = vld [vmem:[#allocation2 + $0xb8] sm:$0xff] }
 0x26e   : > { %v1842_v56 = vpop.f32.mrf.mxu2  ;;  %v1646_v33 = vpop.f32.mrf.mxu0 }
 0x26f   : > { %v1843_v48 = vadd.f32 %v1842_v56, %v1744_v16  ;;  %v1941_v11 = vpop.f32.mrf.mxu3  ;;  %v1745_v21 = vpop.f32.mrf.mxu1 }
 0x270   : > { %v1746_v46 = vadd.f32 %v1745_v21, %v1646_v33  ;;  %v5459_v33 = vld [vmem:[#allocation32_spill] sm:$0xff] }
 0x271   : > { %v1942_v52 = vadd.f32 %v1941_v11, %v1843_v48  ;;  %v5457_v48 = vld [vmem:[#allocation30_spill] sm:$0xff]  ;;  %v5458_v11 = vld [vmem:[#allocation31_spill] sm:$0xff] }
 0x273   : > { %v2031_v59 = vadd.f32 %v1942_v52, %v348_v45 }
 0x275   : > { %2103 = vst [vmem:[#allocation2 + $0xf0] sm:$0xff] %v2031_v59 }
 0x276   : > { %v1844_v53 = vpop.f32.mrf.mxu2  ;;  %v1649_v54 = vpop.f32.mrf.mxu0 }
 0x277   : > { %v1845_v47 = vadd.f32 %v1844_v53, %v1746_v46  ;;  %v1943_v49 = vpop.f32.mrf.mxu3  ;;  %v1748_v25 = vpop.f32.mrf.mxu1  ;;  %v360_v46 = vld [vmem:[#allocation2 + $0x190] sm:$0xff] }
 0x278   : > { %v1749_v10 = vadd.f32 %v1748_v25, %v1649_v54 }
 0x279   : > { %v1944_v1 = vadd.f32 %v1943_v49, %v1845_v47  ;;  %1688 = vmatmul.bf16.gmra.mxu0 %v4796_v44 }
 0x27a   : > { %1787 = vmatmul.bf16.gmra.mxu1 %v4801_v12  ;;  %v354_v12 = vld [vmem:[#allocation2 + $0x158] sm:$0xff] }
 0x27b   : > { %v2033_v35 = vadd.f32 %v1944_v1, %v350_v40  ;;  %1886 = vmatmul.bf16.gmra.mxu2 %v4803_v57 }
 0x27c   : > { %1985 = vmatmul.bf16.gmra.mxu3 %v4808_v58 }
 0x27d   : > { %2105 = vst [vmem:[#allocation2 + $0x120] sm:$0xff] %v2033_v35 }
 0x27e   : > { %v1847_v19 = vpop.f32.mrf.mxu2  ;;  %v1651_v3 = vpop.f32.mrf.mxu0 }
 0x27f   : > { %v1848_v2 = vadd.f32 %v1847_v19, %v1749_v10  ;;  %v1946_v26 = vpop.f32.mrf.mxu3  ;;  %v1750_v4 = vpop.f32.mrf.mxu1  ;;  %v362_v10 = vld [vmem:[#allocation2 + $0x1c0] sm:$0xff] }
 0x280   : > { %v1751_v6 = vadd.f32 %v1750_v4, %v1651_v3  ;;  %v5461_v4 = vld [vmem:[#allocation34_spill] sm:$0xff] }
 0x281   : > { %v1947_v22 = vadd.f32 %v1946_v26, %v1848_v2  ;;  %v5460_v26 = vld [vmem:[#allocation33_spill] sm:$0xff] }
 0x283   : > { %v2035_v27 = vadd.f32 %v1947_v22, %v352_v5  ;;  %v5462_v22 = vld [vmem:[#allocation35_spill] sm:$0xff] }
 0x285   : > { %2107 = vst [vmem:[#allocation2 + $0x18] sm:$0xff] %v2035_v27  ;;  %v5463_v27 = vld [vmem:[#allocation36_spill] sm:$0xff] }
 0x286   : > { %v1849_v44 = vpop.f32.mrf.mxu2  ;;  %v1654_v8 = vpop.f32.mrf.mxu0 }
 0x287   : > { %v1850_v28 = vadd.f32 %v1849_v44, %v1751_v6  ;;  %v1948_v7 = vpop.f32.mrf.mxu3  ;;  %v1753_v20 = vpop.f32.mrf.mxu1 }
 0x288   : > { %v1754_v18 = vadd.f32 %v1753_v20, %v1654_v8  ;;  %v364_v8 = vld [vmem:[#allocation2 + $0x138] sm:$0xff] }
 0x289   : > { %v1949_v57 = vadd.f32 %v1948_v7, %v1850_v28  ;;  %1693 = vmatmul.bf16.gmra.mxu0 %v5452_v31 }
 0x28a   : > { %1792 = vmatmul.bf16.gmra.mxu1 %v5453_v34 }
 0x28b   : > { %v2037_v58 = vadd.f32 %v1949_v57, %v354_v12  ;;  %1891 = vmatmul.bf16.gmra.mxu2 %v5454_v39 }
 0x28c   : > { %1990 = vmatmul.bf16.gmra.mxu3 %v5455_v13  ;;  %v366_v13 = vld [vmem:[#allocation2 + $0x1b8] sm:$0xff] }
 0x28d   : > { %2109 = vst [vmem:[#allocation2 + $0x158] sm:$0xff] %v2037_v58 }
 0x28e   : > { %v1852_v37 = vpop.f32.mrf.mxu2  ;;  %v1656_v36 = vpop.f32.mrf.mxu0 }
 0x28f   : > { %v1853_v23 = vadd.f32 %v1852_v37, %v1754_v18  ;;  %v1951_v62 = vpop.f32.mrf.mxu3  ;;  %v1755_v38 = vpop.f32.mrf.mxu1 }
 0x290   : > { %v1756_v29 = vadd.f32 %v1755_v38, %v1656_v36  ;;  %v5465_v38 = vld [vmem:[#allocation38_spill] sm:$0xff] }
 0x291   : > { %v1952_v24 = vadd.f32 %v1951_v62, %v1853_v23  ;;  %v5464_v62 = vld [vmem:[#allocation37_spill] sm:$0xff] }
 0x293   : > { %v2039_v50 = vadd.f32 %v1952_v24, %v356_v14  ;;  %v5466_v24 = vld [vmem:[#allocation39_spill] sm:$0xff] }
 0x295   : > { %2111 = vst [vmem:[#allocation2 + $0x110] sm:$0xff] %v2039_v50  ;;  %v5467_v50 = vld [vmem:[#allocation40_spill] sm:$0xff] }
 0x296   : > { %v1854_v42 = vpop.f32.mrf.mxu2  ;;  %v1659_v60 = vpop.f32.mrf.mxu0 }
 0x297   : > { %v1855_v30 = vadd.f32 %v1854_v42, %v1756_v29  ;;  %v1953_v43 = vpop.f32.mrf.mxu3  ;;  %v1758_v16 = vpop.f32.mrf.mxu1 }
 0x298   : > { %v1759_v56 = vadd.f32 %v1758_v16, %v1659_v60  ;;  %v368_v60 = vld [vmem:[#allocation2] sm:$0xff] }
 0x299   : > { %v1954_v51 = vadd.f32 %v1953_v43, %v1855_v30  ;;  %1698 = vmatmul.bf16.gmra.mxu0 %v5456_v41 }
 0x29a   : > { %1797 = vmatmul.bf16.gmra.mxu1 %v5457_v48 }
 0x29b   : > { %v2041_v55 = vadd.f32 %v1954_v51, %v358_v15  ;;  %1896 = vmatmul.bf16.gmra.mxu2 %v5458_v11 }
 0x29c   : > { %1995 = vmatmul.bf16.gmra.mxu3 %v5459_v33  ;;  %v370_v33 = vld [vmem:[#allocation2 + $0x38] sm:$0xff] }
 0x29d   : > { %2113 = vst [vmem:[#allocation2 + $0xb8] sm:$0xff] %v2041_v55 }
 0x29e   : > { %v1857_v45 = vpop.f32.mrf.mxu2  ;;  %v1661_v59 = vpop.f32.mrf.mxu0 }
 0x29f   : > { %v1858_v21 = vadd.f32 %v1857_v45, %v1759_v56  ;;  %v1956_v52 = vpop.f32.mrf.mxu3  ;;  %v1760_v53 = vpop.f32.mrf.mxu1 }
 0x2a0   : > { %v1761_v54 = vadd.f32 %v1760_v53, %v1661_v59  ;;  %v5469_v53 = vld [vmem:[#allocation42_spill] sm:$0xff] }
 0x2a1   : > { %v1957_v47 = vadd.f32 %v1956_v52, %v1858_v21 }
 0x2a3   : > { %v2043_v49 = vadd.f32 %v1957_v47, %v360_v46  ;;  %v5468_v46 = vld [vmem:[#allocation41_spill] sm:$0xff] }
 0x2a5   : > { %2115 = vst [vmem:[#allocation2 + $0x190] sm:$0xff] %v2043_v49 }
 0x2a6   : > { %v1859_v40 = vpop.f32.mrf.mxu2  ;;  %v1664_v35 = vpop.f32.mrf.mxu0 }
 0x2a7   : > { %v1860_v25 = vadd.f32 %v1859_v40, %v1761_v54  ;;  %v1958_v1 = vpop.f32.mrf.mxu3  ;;  %v1763_v19 = vpop.f32.mrf.mxu1 }
 0x2a8   : > { %v1764_v5 = vadd.f32 %v1763_v19, %v1664_v35 }
 0x2a9   : > { %v1959_v2 = vadd.f32 %v1958_v1, %v1860_v25  ;;  %1703 = vmatmul.bf16.gmra.mxu0 %v5460_v26  ;;  %v372_v25 = vld [vmem:[#allocation2 + $0x220] sm:$0xff] }
 0x2aa   : > { %1802 = vmatmul.bf16.gmra.mxu1 %v5461_v4 }
 0x2ab   : > { %v2045_v3 = vadd.f32 %v1959_v2, %v362_v10  ;;  %1901 = vmatmul.bf16.gmra.mxu2 %v5462_v22  ;;  %v5470_v22 = vld [vmem:[#allocation43_spill] sm:$0xff] }
 0x2ac   : > { %2000 = vmatmul.bf16.gmra.mxu3 %v5463_v27 }
 0x2ad   : > { %2117 = vst [vmem:[#allocation2 + $0x1c0] sm:$0xff] %v2045_v3 }
 0x2ae   : > { %v1862_v6 = vpop.f32.mrf.mxu2  ;;  %v1666_v7 = vpop.f32.mrf.mxu0 }
 0x2af   : > { %v1863_v44 = vadd.f32 %v1862_v6, %v1764_v5  ;;  %v1961_v28 = vpop.f32.mrf.mxu3  ;;  %v1765_v12 = vpop.f32.mrf.mxu1 }
 0x2b0   : > { %v1766_v31 = vadd.f32 %v1765_v12, %v1666_v7  ;;  %v5473_v7 = vld [vmem:[#allocation46_spill] sm:$0xff] }
 0x2b1   : > { %v1962_v20 = vadd.f32 %v1961_v28, %v1863_v44  ;;  %v5471_v44 = vld [vmem:[#allocation44_spill] sm:$0xff]  ;;  %v5472_v28 = vld [vmem:[#allocation45_spill] sm:$0xff] }
 0x2b3   : > { %v2047_v57 = vadd.f32 %v1962_v20, %v364_v8 }
 0x2b5   : > { %2119 = vst [vmem:[#allocation2 + $0x138] sm:$0xff] %v2047_v57 }
 0x2b6   : > { %v1864_v58 = vpop.f32.mrf.mxu2  ;;  %v1669_v39 = vpop.f32.mrf.mxu0 }
 0x2b7   : > { %v1865_v18 = vadd.f32 %v1864_v58, %v1766_v31  ;;  %v1963_v34 = vpop.f32.mrf.mxu3  ;;  %v1768_v37 = vpop.f32.mrf.mxu1  ;;  %v376_v31 = vld [vmem:[#allocation2 + $0xf8] sm:$0xff] }
 0x2b8   : > { %v1769_v14 = vadd.f32 %v1768_v37, %v1669_v39 }
 0x2b9   : > { %v1964_v23 = vadd.f32 %v1963_v34, %v1865_v18  ;;  %1708 = vmatmul.bf16.gmra.mxu0 %v5464_v62 }
 0x2ba   : > { %1807 = vmatmul.bf16.gmra.mxu1 %v5465_v38 }
 0x2bb   : > { %v2049_v36 = vadd.f32 %v1964_v23, %v366_v13  ;;  %1906 = vmatmul.bf16.gmra.mxu2 %v5466_v24 }
 0x2bc   : > { %2005 = vmatmul.bf16.gmra.mxu3 %v5467_v50 }
 0x2bd   : > { %2121 = vst [vmem:[#allocation2 + $0x1b8] sm:$0xff] %v2049_v36  ;;  %v378_v36 = vld [vmem:[#allocation2 + $0x170] sm:$0xff] }
 0x2be   : > { %v1867_v29 = vpop.f32.mrf.mxu2  ;;  %v1671_v43 = vpop.f32.mrf.mxu0 }
 0x2bf   : > { %v1868_v42 = vadd.f32 %v1867_v29, %v1769_v14  ;;  %v1966_v30 = vpop.f32.mrf.mxu3  ;;  %v1770_v15 = vpop.f32.mrf.mxu1 }
 0x2c0   : > { %v1771_v41 = vadd.f32 %v1770_v15, %v1671_v43 }
 0x2c1   : > { %v1967_v16 = vadd.f32 %v1966_v30, %v1868_v42 }
 0x2c3   : > { %v2051_v51 = vadd.f32 %v1967_v16, %v368_v60  ;;  %v380_v60 = vld [vmem:[#allocation2 + $0xe0] sm:$0xff] }
 0x2c5   : > { %2123 = vst [vmem:[#allocation2] sm:$0xff] %v2051_v51 }
 0x2c6   : > { %v1869_v55 = vpop.f32.mrf.mxu2  ;;  %v1674_v11 = vpop.f32.mrf.mxu0 }
 0x2c7   : > { %v1870_v56 = vadd.f32 %v1869_v55, %v1771_v41  ;;  %v1968_v48 = vpop.f32.mrf.mxu3  ;;  %v1773_v45 = vpop.f32.mrf.mxu1 }
 0x2c8   : > { %v1774_v59 = vadd.f32 %v1773_v45, %v1674_v11 }
 0x2c9   : > { %v1969_v21 = vadd.f32 %v1968_v48, %v1870_v56  ;;  %1713 = vmatmul.bf16.gmra.mxu0 %v4918_v32 }
 0x2ca   : > { %1812 = vmatmul.bf16.gmra.mxu1 %v4920_v17  ;;  %v374_v17 = vld [vmem:[#allocation2 + $0x1c8] sm:$0xff] }
 0x2cb   : > { %v2053_v52 = vadd.f32 %v1969_v21, %v370_v33  ;;  %1911 = vmatmul.bf16.gmra.mxu2 %v5468_v46  ;;  %v384_v46 = vld [vmem:[#allocation2 + $0x98] sm:$0xff] }
 0x2cc   : > { %2010 = vmatmul.bf16.gmra.mxu3 %v5469_v53 }
 0x2cd   : > { %2125 = vst [vmem:[#allocation2 + $0x38] sm:$0xff] %v2053_v52 }
 0x2ce   : > { %v1872_v47 = vpop.f32.mrf.mxu2  ;;  %v1676_v40 = vpop.f32.mrf.mxu0 }
 0x2cf   : > { %v1873_v49 = vadd.f32 %v1872_v47, %v1774_v59  ;;  %v1971_v54 = vpop.f32.mrf.mxu3  ;;  %v1775_v1 = vpop.f32.mrf.mxu1 }
 0x2d0   : > { %v1776_v19 = vadd.f32 %v1775_v1, %v1676_v40 }
 0x2d1   : > { %v1972_v35 = vadd.f32 %v1971_v54, %v1873_v49 }
 0x2d3   : > { %v2055_v10 = vadd.f32 %v1972_v35, %v372_v25 }
 0x2d5   : > { %2127 = vst [vmem:[#allocation2 + $0x220] sm:$0xff] %v2055_v10  ;;  %v386_v10 = vld [vmem:[#allocation2 + $0x160] sm:$0xff] }
 0x2d6   : > { %v1874_v32 = vpop.f32.mrf.mxu2  ;;  %v1679_v3 = vpop.f32.mrf.mxu0 }
 0x2d7   : > { %v1875_v2 = vadd.f32 %v1874_v32, %v1776_v19  ;;  %v1973_v26 = vpop.f32.mrf.mxu3  ;;  %v1778_v5 = vpop.f32.mrf.mxu1 }
 0x2d8   : > { %v1779_v6 = vadd.f32 %v1778_v5, %v1679_v3 }
 0x2d9   : > { %v1974_v4 = vadd.f32 %v1973_v26, %v1875_v2  ;;  %1718 = vmatmul.bf16.gmra.mxu0 %v5470_v22  ;;  %v388_v22 = vld [vmem:[#allocation2 + $0x100] sm:$0xff] }
 0x2da   : > { %1817 = vmatmul.bf16.gmra.mxu1 %v5471_v44 }
 0x2db   : > { %v2057_v27 = vadd.f32 %v1974_v4, %v374_v17  ;;  %1916 = vmatmul.bf16.gmra.mxu2 %v5472_v28 }
 0x2dc   : > { %2015 = vmatmul.bf16.gmra.mxu3 %v5473_v7 }
 0x2dd   : > { %2129 = vst [vmem:[#allocation2 + $0x1c8] sm:$0xff] %v2057_v27 }
 0x2de   : > { %v1877_v8 = vpop.f32.mrf.mxu2  ;;  %v1681_v57 = vpop.f32.mrf.mxu0 }
 0x2df   : > { %v1878_v12 = vadd.f32 %v1877_v8, %v1779_v6  ;;  %v1976_v20 = vpop.f32.mrf.mxu3  ;;  %v1780_v58 = vpop.f32.mrf.mxu1 }
 0x2e0   : > { %v1781_v39 = vadd.f32 %v1780_v58, %v1681_v57  ;;  %v390_v57 = vld [vmem:[#allocation2 + $0x1b0] sm:$0xff] }
 0x2e1   : > { %v1977_v18 = vadd.f32 %v1976_v20, %v1878_v12 }
 0x2e3   : > { %v2059_v34 = vadd.f32 %v1977_v18, %v376_v31 }
 0x2e5   : > { %2131 = vst [vmem:[#allocation2 + $0xf8] sm:$0xff] %v2059_v34 }
 0x2e6   : > { %v1879_v13 = vpop.f32.mrf.mxu2  ;;  %v1684_v62 = vpop.f32.mrf.mxu0 }
 0x2e7   : > { %v1880_v37 = vadd.f32 %v1879_v13, %v1781_v39  ;;  %v1978_v23 = vpop.f32.mrf.mxu3  ;;  %v1783_v14 = vpop.f32.mrf.mxu1 }
 0x2e8   : > { %v1784_v50 = vadd.f32 %v1783_v14, %v1684_v62  ;;  %v392_v62 = vld [vmem:[#allocation2 + $0x130] sm:$0xff] }
 0x2e9   : > { %v1979_v38 = vadd.f32 %v1978_v23, %v1880_v37  ;;  %1723 = vmatmul.bf16.gmra.mxu0 %v4958_v63 }
 0x2ea   : > { %1822 = vmatmul.bf16.gmra.mxu1 %v4960_v61  ;;  %v382_v61 = vld [vmem:[#allocation2 + $0x1f0] sm:$0xff] }
 0x2eb   : > { %v2061_v24 = vadd.f32 %v1979_v38, %v378_v36  ;;  %1921 = vmatmul.bf16.gmra.mxu2 %v4962_v0 }
 0x2ec   : > { %2020 = vmatmul.bf16.gmra.mxu3 %v4964_v9 }
 0x2ed   : > { %2133 = vst [vmem:[#allocation2 + $0x170] sm:$0xff] %v2061_v24 }
 0x2ee   : > { %v1882_v29 = vpop.f32.mrf.mxu2  ;;  %v1686_v43 = vpop.f32.mrf.mxu0 }
 0x2ef   : > { %v1883_v42 = vadd.f32 %v1882_v29, %v1784_v50  ;;  %v1981_v30 = vpop.f32.mrf.mxu3  ;;  %v1785_v15 = vpop.f32.mrf.mxu1 }
 0x2f0   : > { %v1786_v41 = vadd.f32 %v1785_v15, %v1686_v43  ;;  %v394_v43 = vld [vmem:[#allocation2 + $0x230] sm:$0xff] }
 0x2f1   : > { %v1982_v16 = vadd.f32 %v1981_v30, %v1883_v42 }
 0x2f3   : > { %v2063_v51 = vadd.f32 %v1982_v16, %v380_v60 }
 0x2f5   : > { %2135 = vst [vmem:[#allocation2 + $0xe0] sm:$0xff] %v2063_v51 }
 0x2f6   : > { %v1884_v63 = vpop.f32.mrf.mxu2  ;;  %v1689_v48 = vpop.f32.mrf.mxu0 }
 0x2f7   : > { %v1885_v55 = vadd.f32 %v1884_v63, %v1786_v41  ;;  %v1983_v56 = vpop.f32.mrf.mxu3  ;;  %v1788_v11 = vpop.f32.mrf.mxu1 }
 0x2f8   : > { %v1789_v9 = vadd.f32 %v1788_v11, %v1689_v48  ;;  %v396_v48 = vld [vmem:[#allocation2 + $0x228] sm:$0xff] }
 0x2f9   : > { %v1984_v0 = vadd.f32 %v1983_v56, %v1885_v55 }
 0x2fb   : > { %v2065_v33 = vadd.f32 %v1984_v0, %v382_v61 }
 0x2fd   : > { %2137 = vst [vmem:[#allocation2 + $0x1f0] sm:$0xff] %v2065_v33 }
 0x2fe   : > { %v1887_v45 = vpop.f32.mrf.mxu2  ;;  %v1691_v59 = vpop.f32.mrf.mxu0 }
 0x2ff   : > { %v1888_v21 = vadd.f32 %v1887_v45, %v1789_v9  ;;  %v1986_v52 = vpop.f32.mrf.mxu3  ;;  %v1790_v53 = vpop.f32.mrf.mxu1 }
 0x300   : > { %v1791_v54 = vadd.f32 %v1790_v53, %v1691_v59  ;;  %v398_v59 = vld [vmem:[#allocation2 + $0x200] sm:$0xff] }
 0x301   : > { %v1987_v47 = vadd.f32 %v1986_v52, %v1888_v21 }
 0x303   : > { %v2067_v49 = vadd.f32 %v1987_v47, %v384_v46 }
 0x305   : > { %2139 = vst [vmem:[#allocation2 + $0x98] sm:$0xff] %v2067_v49 }
 0x306   : > { %v1889_v40 = vpop.f32.mrf.mxu2  ;;  %v1694_v35 = vpop.f32.mrf.mxu0 }
 0x307   : > { %v1890_v25 = vadd.f32 %v1889_v40, %v1791_v54  ;;  %v1988_v1 = vpop.f32.mrf.mxu3  ;;  %v1793_v19 = vpop.f32.mrf.mxu1 }
 0x308   : > { %v1794_v26 = vadd.f32 %v1793_v19, %v1694_v35  ;;  %v400_v35 = vld [vmem:[#allocation2 + $0x128] sm:$0xff] }
 0x309   : > { %v1989_v32 = vadd.f32 %v1988_v1, %v1890_v25 }
 0x30b   : > { %v2069_v2 = vadd.f32 %v1989_v32, %v386_v10 }
 0x30d   : > { %2141 = vst [vmem:[#allocation2 + $0x160] sm:$0xff] %v2069_v2 }
 0x30e   : > { %v1892_v3 = vpop.f32.mrf.mxu2  ;;  %v1696_v4 = vpop.f32.mrf.mxu0 }
 0x30f   : > { %v1893_v17 = vadd.f32 %v1892_v3, %v1794_v26  ;;  %v1991_v5 = vpop.f32.mrf.mxu3  ;;  %v1795_v27 = vpop.f32.mrf.mxu1 }
 0x310   : > { %v1796_v28 = vadd.f32 %v1795_v27, %v1696_v4  ;;  %v402_v4 = vld [vmem:[#allocation2 + $0x208] sm:$0xff] }
 0x311   : > { %v1992_v6 = vadd.f32 %v1991_v5, %v1893_v17 }
 0x313   : > { %v2071_v44 = vadd.f32 %v1992_v6, %v388_v22 }
 0x315   : > { %2143 = vst [vmem:[#allocation2 + $0x100] sm:$0xff] %v2071_v44 }
 0x316   : > { %v1894_v7 = vpop.f32.mrf.mxu2  ;;  %v1699_v20 = vpop.f32.mrf.mxu0 }
 0x317   : > { %v1895_v8 = vadd.f32 %v1894_v7, %v1796_v28  ;;  %v1993_v12 = vpop.f32.mrf.mxu3  ;;  %v1798_v31 = vpop.f32.mrf.mxu1 }
 0x318   : > { %v1799_v34 = vadd.f32 %v1798_v31, %v1699_v20  ;;  %v404_v20 = vld [vmem:[#allocation2 + $0x1d0] sm:$0xff] }
 0x319   : > { %v1994_v58 = vadd.f32 %v1993_v12, %v1895_v8 }
 0x31b   : > { %v2073_v18 = vadd.f32 %v1994_v58, %v390_v57 }
 0x31d   : > { %2145 = vst [vmem:[#allocation2 + $0x1b0] sm:$0xff] %v2073_v18 }
 0x31e   : > { %v1897_v39 = vpop.f32.mrf.mxu2  ;;  %v1701_v23 = vpop.f32.mrf.mxu0 }
 0x31f   : > { %v1898_v13 = vadd.f32 %v1897_v39, %v1799_v34  ;;  %v1996_v37 = vpop.f32.mrf.mxu3  ;;  %v1800_v36 = vpop.f32.mrf.mxu1 }
 0x320   : > { %v1801_v24 = vadd.f32 %v1800_v36, %v1701_v23  ;;  %v406_v23 = vld [vmem:[#allocation2 + $0xc0] sm:$0xff] }
 0x321   : > { %v1997_v14 = vadd.f32 %v1996_v37, %v1898_v13 }
 0x323   : > { %v2075_v38 = vadd.f32 %v1997_v14, %v392_v62 }
 0x325   : > { %2147 = vst [vmem:[#allocation2 + $0x130] sm:$0xff] %v2075_v38 }
 0x326   : > { %v1899_v50 = vpop.f32.mrf.mxu2  ;;  %v1704_v30 = vpop.f32.mrf.mxu0 }
 0x327   : > { %v1900_v29 = vadd.f32 %v1899_v50, %v1801_v24  ;;  %v1998_v42 = vpop.f32.mrf.mxu3  ;;  %v1803_v60 = vpop.f32.mrf.mxu1 }
 0x328   : > { %v1804_v51 = vadd.f32 %v1803_v60, %v1704_v30  ;;  %v408_v30 = vld [vmem:[#allocation2 + $0x58] sm:$0xff] }
 0x329   : > { %v1999_v15 = vadd.f32 %v1998_v42, %v1900_v29 }
 0x32b   : > { %v2077_v16 = vadd.f32 %v1999_v15, %v394_v43 }
 0x32d   : > { %2149 = vst [vmem:[#allocation2 + $0x230] sm:$0xff] %v2077_v16 }
 0x32e   : > { %v1902_v41 = vpop.f32.mrf.mxu2  ;;  %v1706_v56 = vpop.f32.mrf.mxu0 }
 0x32f   : > { %v1903_v63 = vadd.f32 %v1902_v41, %v1804_v51  ;;  %v2001_v55 = vpop.f32.mrf.mxu3  ;;  %v1805_v61 = vpop.f32.mrf.mxu1 }
 0x330   : > { %v1806_v33 = vadd.f32 %v1805_v61, %v1706_v56 }
 0x331   : > { %v2002_v11 = vadd.f32 %v2001_v55, %v1903_v63  ;;  %v410_v55 = vld [vmem:[#allocation2 + $0x20] sm:$0xff] }
 0x333   : > { %v2079_v0 = vadd.f32 %v2002_v11, %v396_v48 }
 0x335   : > { %2151 = vst [vmem:[#allocation2 + $0x228] sm:$0xff] %v2079_v0 }
 0x336   : > { %v1904_v9 = vpop.f32.mrf.mxu2  ;;  %v1709_v52 = vpop.f32.mrf.mxu0 }
 0x337   : > { %v1905_v45 = vadd.f32 %v1904_v9, %v1806_v33  ;;  %v2003_v21 = vpop.f32.mrf.mxu3  ;;  %v1808_v46 = vpop.f32.mrf.mxu1 }
 0x338   : > { %v1809_v49 = vadd.f32 %v1808_v46, %v1709_v52 }
 0x339   : > { %v2004_v53 = vadd.f32 %v2003_v21, %v1905_v45  ;;  %v412_v21 = vld [vmem:[#allocation2 + $0xa8] sm:$0xff] }
 0x33b   : > { %v2081_v47 = vadd.f32 %v2004_v53, %v398_v59 }
 0x33d   : > { %2153 = vst [vmem:[#allocation2 + $0x200] sm:$0xff] %v2081_v47 }
 0x33e   : > { %v1907_v54 = vpop.f32.mrf.mxu2  ;;  %v1711_v1 = vpop.f32.mrf.mxu0 }
 0x33f   : > { %v1908_v40 = vadd.f32 %v1907_v54, %v1809_v49  ;;  %v2006_v25 = vpop.f32.mrf.mxu3  ;;  %v1810_v10 = vpop.f32.mrf.mxu1 }
 0x340   : > { %v1811_v2 = vadd.f32 %v1810_v10, %v1711_v1 }
 0x341   : > { %v2007_v19 = vadd.f32 %v2006_v25, %v1908_v40  ;;  %v414_v40 = vld [vmem:[#allocation2 + $0xa0] sm:$0xff] }
 0x343   : > { %v2083_v32 = vadd.f32 %v2007_v19, %v400_v35 }
 0x345   : > { %2155 = vst [vmem:[#allocation2 + $0x128] sm:$0xff] %v2083_v32 }
 0x346   : > { %v1909_v26 = vpop.f32.mrf.mxu2  ;;  %v1714_v5 = vpop.f32.mrf.mxu0 }
 0x347   : > { %v1910_v3 = vadd.f32 %v1909_v26, %v1811_v2  ;;  %v2008_v17 = vpop.f32.mrf.mxu3  ;;  %v1813_v22 = vpop.f32.mrf.mxu1 }
 0x348   : > { %v1814_v44 = vadd.f32 %v1813_v22, %v1714_v5 }
 0x349   : > { %v2009_v27 = vadd.f32 %v2008_v17, %v1910_v3 }
 0x34b   : > { %v2085_v6 = vadd.f32 %v2009_v27, %v402_v4 }
 0x34d   : > { %2157 = vst [vmem:[#allocation2 + $0x208] sm:$0xff] %v2085_v6 }
 0x34e   : > { %v1912_v28 = vpop.f32.mrf.mxu2  ;;  %v1716_v12 = vpop.f32.mrf.mxu0 }
 0x34f   : > { %v1913_v7 = vadd.f32 %v1912_v28, %v1814_v44  ;;  %v2011_v8 = vpop.f32.mrf.mxu3  ;;  %v1815_v57 = vpop.f32.mrf.mxu1 }
 0x350   : > { %v1816_v18 = vadd.f32 %v1815_v57, %v1716_v12 }
 0x351   : > { %v2012_v31 = vadd.f32 %v2011_v8, %v1913_v7 }
 0x353   : > { %v2087_v58 = vadd.f32 %v2012_v31, %v404_v20 }
 0x355   : > { %2159 = vst [vmem:[#allocation2 + $0x1d0] sm:$0xff] %v2087_v58 }
 0x356   : > { %v1914_v34 = vpop.f32.mrf.mxu2  ;;  %v1719_v37 = vpop.f32.mrf.mxu0 }
 0x357   : > { %v1915_v39 = vadd.f32 %v1914_v34, %v1816_v18  ;;  %v2013_v13 = vpop.f32.mrf.mxu3  ;;  %v1818_v62 = vpop.f32.mrf.mxu1 }
 0x358   : > { %v1819_v38 = vadd.f32 %v1818_v62, %v1719_v37 }
 0x359   : > { %v2014_v36 = vadd.f32 %v2013_v13, %v1915_v39 }
 0x35b   : > { %v2089_v14 = vadd.f32 %v2014_v36, %v406_v23 }
 0x35d   : > { %2161 = vst [vmem:[#allocation2 + $0xc0] sm:$0xff] %v2089_v14 }
 0x35e   : > { %v1917_v24 = vpop.f32.mrf.mxu2  ;;  %v1721_v42 = vpop.f32.mrf.mxu0 }
 0x35f   : > { %v1918_v50 = vadd.f32 %v1917_v24, %v1819_v38  ;;  %v2016_v29 = vpop.f32.mrf.mxu3  ;;  %v1820_v43 = vpop.f32.mrf.mxu1 }
 0x360   : > { %v1821_v16 = vadd.f32 %v1820_v43, %v1721_v42 }
 0x361   : > { %v2017_v60 = vadd.f32 %v2016_v29, %v1918_v50 }
 0x363   : > { %v2091_v15 = vadd.f32 %v2017_v60, %v408_v30 }
 0x365   : > { %2163 = vst [vmem:[#allocation2 + $0x58] sm:$0xff] %v2091_v15 }
 0x366   : > { %v1919_v51 = vpop.f32.mrf.mxu2  ;;  %v1724_v56 = vpop.f32.mrf.mxu0 }
 0x367   : > { %v1920_v41 = vadd.f32 %v1919_v51, %v1821_v16  ;;  %v2018_v63 = vpop.f32.mrf.mxu3  ;;  %v1823_v48 = vpop.f32.mrf.mxu1 }
 0x368   : > { %v1824_v0 = vadd.f32 %v1823_v48, %v1724_v56 }
 0x369   : > { %v2019_v61 = vadd.f32 %v2018_v63, %v1920_v41 }
 0x36b   : > { %v2093_v11 = vadd.f32 %v2019_v61, %v410_v55 }
 0x36d   : > { %2165 = vst [vmem:[#allocation2 + $0x20] sm:$0xff] %v2093_v11 }
 0x36e   : > { %v1922_v33 = vpop.f32.mrf.mxu2  ;;  %v1726_v59 = vpop.f32.mrf.mxu0 }
 0x36f   : > { %v1923_v9 = vadd.f32 %v1922_v33, %v1824_v0  ;;  %v2021_v45 = vpop.f32.mrf.mxu3  ;;  %v1825_v46 = vpop.f32.mrf.mxu1 }
 0x370   : > { %v1826_v47 = vadd.f32 %v1825_v46, %v1726_v59 }
 0x371   : > { %v2022_v52 = vadd.f32 %v2021_v45, %v1923_v9 }
 0x373   : > { %v2095_v53 = vadd.f32 %v2022_v52, %v412_v21 }
 0x375   : > { %2167 = vst [vmem:[#allocation2 + $0xa8] sm:$0xff] %v2095_v53 }
 0x376   : > { %v1924_v49 = vpop.f32.mrf.mxu2 }
 0x377   : > { %v1925_v54 = vadd.f32 %v1924_v49, %v1826_v47  ;;  %v2023_v25 = vpop.f32.mrf.mxu3 }
 0x379   : > { %v2024_v1 = vadd.f32 %v2023_v25, %v1925_v54  ;;  %2173 = sbr.rel (%p3677_p1) target bundleno = 1376 (0x560), region = 56 }
 0x37b   : > { %v2097_v35 = vadd.f32 %v2024_v1, %v414_v40 }
 0x37d   : > { %2169 = vst [vmem:[#allocation2 + $0xa0] sm:$0xff] %v2097_v35 }
 0x37e   : > { %v2218_v10 = vld [vmem:[#allocation2 + $0x120] sm:$0xff]  ;;  %v2224_v19 = vld [vmem:[#allocation2 + $0x110] sm:$0xff]  ;;  %v4221_v32 = vmov 0.0   ;;  %v2223_v2 = vld [vmem:[#allocation2 + $0x108] sm:$0xff]  ;;  %vm2283_vm0 = vcmask 523264   ;;  %vm2262_vm1 = vcmask 785408  }
 0x37f   : > { %2260 = vrot.lane.b32.xlu1 %v2218_v10, %s4219_s6  ;;  %2279 = vrot.lane.b32.xlu2 %v2224_v19, %s4220_s13  ;;  %v2217_v26 = vld [vmem:[#allocation2 + $0x70] sm:$0xff]  ;;  %v2220_v3 = vld [vmem:[#allocation2 + $0x18] sm:$0xff]  ;;  %v2227_v44 = vld [vmem:[#allocation2 + $0x180] sm:$0xff]  ;;  %vm2365_vm2 = vcmask 261120   ;;  %vm2617_vm6 = vcmask 490496   ;;  %vm2309_vm10 = vcmask 277504  }
 0x380   : > { %3964 = vrot.lane.b32.xlu0 %v4221_v32, %s4219_s6  ;;  %v2225_v17 = vld [vmem:[#allocation2 + $0x1f8] sm:$0xff]  ;;  %v2221_v4 = vld [vmem:[#allocation2 + $0xb0] sm:$0xff]  ;;  %v2448_v28 = vld [vmem:[#allocation2] sm:$0xff]  ;;  %vm2432_vm14 = vcmask 244736  }
 0x381   : > { %v2219_v5 = vld [vmem:[#allocation2 + $0xd8] sm:$0xff]  ;;  %v2228_v6 = vld [vmem:[#allocation2 + $0x190] sm:$0xff]  ;;  %v2449_v7 = vld [vmem:[#allocation2 + $0x188] sm:$0xff] }
 0x382   : > { %v2222_v22 = vld [vmem:[#allocation2 + $0x158] sm:$0xff]  ;;  %v2447_v8 = vld [vmem:[#allocation2 + $0x88] sm:$0xff]  ;;  %v2452_v20 = vld [vmem:[#allocation2 + $0x220] sm:$0xff] }
 0x383   : > { %v2226_v27 = vld [vmem:[#allocation2 + $0xb8] sm:$0xff]  ;;  %v2451_v12 = vld [vmem:[#allocation2 + $0x1a8] sm:$0xff]  ;;  %v2639_v58 = vld [vmem:[#allocation2 + $0x130] sm:$0xff] }
 0x384   : > { %v2450_v57 = vld [vmem:[#allocation2 + $0x38] sm:$0xff]  ;;  %v2633_v18 = vld [vmem:[#allocation2 + $0x160] sm:$0xff]  ;;  %v2638_v34 = vld [vmem:[#allocation2 + $0x90] sm:$0xff] }
 0x385   : > { %v2632_v31 = vld [vmem:[#allocation2 + $0x238] sm:$0xff]  ;;  %v2635_v39 = vld [vmem:[#allocation2 + $0x100] sm:$0xff]  ;;  %v2634_v13 = vld [vmem:[#allocation2 + $0x50] sm:$0xff] }
 0x386   : > { %v2636_v36 = vld [vmem:[#allocation2 + $0x30] sm:$0xff]  ;;  %v2442_v55 = vld [vmem:[#allocation2 + $0x1c0] sm:$0xff]  ;;  %v2453_v11 = vld [vmem:[#allocation2 + $0x1e8] sm:$0xff] }
 0x387   : > { %2277 = vrot.lane.b32.xlu1 %v2223_v2, %s4220_s13  ;;  %3969 = vrot.lane.b32.xlu2 %v4221_v32, %s4220_s13  ;;  %v2455_v9 = vld [vmem:[#allocation2 + $0x80] sm:$0xff]  ;;  %v2212_v52 = vld [vmem:[#allocation2 + $0x8] sm:$0xff]  ;;  %v2444_v47 = vld [vmem:[#allocation2 + $0x138] sm:$0xff] }
 0x388   : > { %2258 = vrot.lane.b32.xlu0 %v2217_v26, %s4219_s6  ;;  %v2457_v1 = vld [vmem:[#allocation2 + $0x78] sm:$0xff]  ;;  %v2213_v19 = vld [vmem:[#allocation2 + $0x40] sm:$0xff] }
 0x38f   : > { %2327 = vrot.lane.b32.xlu1 %v2220_v3, %s4219_s6  ;;  %2342 = vrot.lane.b32.xlu2 %v2225_v17, %s4220_s13 }
 0x390   : > { %2325 = vrot.lane.b32.xlu0 %v2219_v5, %s4219_s6  ;;  %v2211_v5 = vld [vmem:[#allocation2 + $0xc8] sm:$0xff] }
 0x397   : > { %2381 = vrot.lane.b32.xlu1 %v2221_v4, %s4219_s6  ;;  %2383 = vrot.lane.b32.xlu2 %v2222_v22, %s4219_s6 }
 0x398   : > { %2344 = vrot.lane.b32.xlu0 %v2226_v27, %s4220_s13 }
 0x39f   : > { %2403 = vrot.lane.b32.xlu1 %v2228_v6, %s4220_s13  ;;  %3974 = vrot.lane.b32.xlu2 %v4221_v32, %s4220_s13 }
 0x3a0   : > { %2401 = vrot.lane.b32.xlu0 %v2227_v44, %s4220_s13 }
 0x3a7   : > { %2490 = vrot.lane.b32.xlu1 %v2448_v28, %s4220_s13  ;;  %2539 = vrot.lane.b32.xlu2 %v2449_v7, %s4220_s13 }
 0x3a8   : > { %2488 = vrot.lane.b32.xlu0 %v2447_v8, %s4220_s13 }
 0x3af   : > { %2580 = vrot.lane.b32.xlu1 %v2451_v12, %s4220_s13  ;;  %2582 = vrot.lane.b32.xlu2 %v2452_v20, %s4220_s13 }
 0x3b0   : > { %2541 = vrot.lane.b32.xlu0 %v2450_v57, %s4220_s13 }
 0x3b7   : > { %2673 = vrot.lane.b32.xlu2 %v2632_v31, %s4222_s14  ;;  %3984 = vrot.lane.b32.xlu1 %v4221_v32, %s4222_s14  ;;  %v2446_v31 = vld [vmem:[#allocation2 + $0x1b8] sm:$0xff] }
 0x3b8   : > { %3979 = vrot.lane.b32.xlu0 %v4221_v32, %s4220_s13 }
 0x3bf   : > { %2693 = vrot.lane.b32.xlu2 %v2639_v58, %s4220_s13  ;;  %2691 = vrot.lane.b32.xlu1 %v2638_v34, %s4220_s13 }
 0x3c0   : > { %2675 = vrot.lane.b32.xlu0 %v2633_v18, %s4222_s14  ;;  %v2216_v18 = vld [vmem:[#allocation2 + $0xf0] sm:$0xff] }
 0x3c7   : > { %2740 = vrot.lane.b32.xlu1 %v2635_v39, %s4222_s14  ;;  %2793 = vrot.lane.b32.xlu2 %v2636_v36, %s4222_s14  ;;  %v2215_v36 = vld [vmem:[#allocation2 + $0xe8] sm:$0xff] }
 0x3c8   : > { %2738 = vrot.lane.b32.xlu0 %v2634_v13, %s4222_s14 }
 0x3d9   : > { %v5077_v37 = vpop.permute.xlu2 %2279 }
 0x3e1   : > { %v5082_v14 = vpop.permute.xlu2 %3969 }
 0x3e2   : > { %v3971_v21 = vunpack.i.l.bf16 %v5082_v14 }
 0x3e4   : > { %v2285_v49 = vsel %vm2283_vm0, %v5077_v37, %v3971_v21  ;;  %v2454_v21 = vld [vmem:[#allocation2 + $0x1c8] sm:$0xff] }
 0x3e9   : > { %v2343_v29 = vpop.permute.xlu2 %2342 }
 0x3f1   : > { %v2261_v23 = vpop.permute.xlu1 %2260  ;;  %v5093_v15 = vpop.permute.xlu2 %2383 }
 0x3f2   : > { %v5079_v62 = vpop.permute.xlu0 %3964  ;;  %v2270_v53 = vadd.f32 %v2261_v23, %v2212_v52  ;;  %v2458_v52 = vld [vmem:[#allocation2 + $0x170] sm:$0xff] }
 0x3f3   : > { %v3966_v10 = vunpack.i.l.bf16 %v5079_v62  ;;  %v3967_v6 = vunpack.i.h.bf16 %v5079_v62 }
 0x3f4   : > { %v2291_v25 = vadd.f32 %v2285_v49, %v2270_v53  ;;  %v2626_v49 = vld [vmem:[#allocation2 + $0x198] sm:$0xff] }
 0x3f5   : > { %v2388_v34 = vsel %vm2262_vm1, %v5093_v15, %v3967_v6 }
 0x3f6   : > { %v2394_v62 = vadd.f32 %v2388_v34, %v2216_v18 }
 0x3f9   : > { %v5084_v38 = vpop.permute.xlu1 %2277  ;;  %v3975_v63 = vpop.permute.xlu2 %3974 }
 0x3fa   : > { %v2259_v24 = vpop.permute.xlu0 %2258  ;;  %v3977_v56 = vunpack.i.h.bf16 %v3975_v63  ;;  %v3976_v12 = vunpack.i.l.bf16 %v3975_v63  ;;  %v2284_v57 = vsel %vm2283_vm0, %v5084_v38, %v5077_v37 }
 0x3fb   : > { %v2263_v3 = vsel %vm2262_vm1, %v3966_v10, %v2259_v24  ;;  %v2264_v4 = vsel %vm2262_vm1, %v2259_v24, %v2261_v23  ;;  %v2214_v24 = vld [vmem:[#allocation2 + $0x28] sm:$0xff] }
 0x3fc   : > { %v2289_v44 = vadd.f32 %v5084_v38, %v2263_v3  ;;  %v2269_v8 = vadd.f32 %v2264_v4, %v2211_v5  ;;  %v3972_v38 = vunpack.i.h.bf16 %v5082_v14  ;;  %v2643_v3 = vld [vmem:[#allocation2 + $0x228] sm:$0xff]  ;;  %v2627_v5 = vld [vmem:[#allocation2 + $0xe0] sm:$0xff] }
 0x3fe   : > { %v2290_v13 = vadd.f32 %v2284_v57, %v2269_v8 }
 0x401   : > { %v5086_v50 = vpop.permute.xlu1 %2327  ;;  %v2540_v59 = vpop.permute.xlu2 %2539 }
 0x402   : > { %v2326_v42 = vpop.permute.xlu0 %2325  ;;  %v2553_v46 = vadd.f32 %v2540_v59, %v2455_v9 }
 0x403   : > { %v2353_v30 = vadd.f32 %v2343_v29, %v2326_v42  ;;  %v2329_v2 = vsel %vm2262_vm1, %v2326_v42, %v5086_v50 }
 0x404   : > { %v2334_v22 = vadd.f32 %v2329_v2, %v2213_v19 }
 0x405   : > { %2359 = vrot.lane.b32.xlu1 %v2353_v30, %s4222_s14  ;;  %v2443_v30 = vld [vmem:[#allocation2 + $0xd0] sm:$0xff] }
 0x409   : > { %v5089_v43 = vpop.permute.xlu1 %2381  ;;  %v2583_v20 = vpop.permute.xlu2 %2582 }
 0x40a   : > { %v5091_v60 = vpop.permute.xlu0 %2344  ;;  %v2387_v37 = vsel %vm2262_vm1, %v5089_v43, %v5093_v15 }
 0x40b   : > { %v2348_v17 = vsel %vm2283_vm0, %v2343_v29, %v5091_v60  ;;  %v2393_v42 = vadd.f32 %v2387_v37, %v2215_v36  ;;  %v2349_v15 = vsel %vm2283_vm0, %v5091_v60, %v3972_v38 }
 0x40c   : > { %v2354_v7 = vadd.f32 %v2348_v17, %v2334_v22 }
 0x411   : > { %v5095_v16 = vpop.permute.xlu1 %2403 }
 0x412   : > { %v5097_v51 = vpop.permute.xlu0 %2401  ;;  %v2408_v39 = vsel %vm2283_vm0, %v5095_v16, %v3976_v12 }
 0x413   : > { %v2412_v41 = vadd.f32 %v5097_v51, %v5089_v43  ;;  %v2414_v29 = vadd.f32 %v2408_v39, %v2394_v62  ;;  %v2407_v63 = vsel %vm2283_vm0, %v5097_v51, %v5095_v16  ;;  %v2335_v43 = vadd.f32 %v5086_v50, %v2214_v24  ;;  %v2445_v16 = vld [vmem:[#allocation2 + $0x60] sm:$0xff] }
 0x414   : > { %v5195_v62 = vld [vmem:[#allocation9] sm:$0x3] }
 0x415   : > { %2426 = vrot.lane.b32.xlu0 %v2412_v41, %s4223_s18  ;;  %vm2292_vm3 = vcmp.ge.s32.totalorder %v5195_v62, 2  ;;  %vm2293_vm4 = vcmp.lt.s32.totalorder %v5195_v62, 18  ;;  %vm2415_vm7 = vcmp.ge.s32.totalorder %v5195_v62, 4294967294  ;;  %vm2416_vm8 = vcmp.lt.s32.totalorder %v5195_v62, 14 }
 0x416   : > { %vm2294_vm5 = vmand %vm2292_vm3, %vm2293_vm4  ;;  %vm2506_vm12 = vcmp.ge.s32.totalorder %v5195_v62, 4  ;;  %vm2507_vm13 = vcmp.lt.s32.totalorder %v5195_v62, 20  ;;  %vm2600_vm15 = vcmp.ge.s32.totalorder %v5195_v62, 4294967292  ;;  %vm2601_vm3 = vcmp.lt.s32.totalorder %v5195_v62, 12 }
 0x417   : > { %vm2417_vm9 = vmand %vm2415_vm7, %vm2416_vm8 }
 0x418   : > { %vm2602_vm8 = vmand %vm2600_vm15, %vm2601_vm3  ;;  %vm2827_vm15 = vcmp.ge.s32.totalorder %v5195_v62, 4294967290  ;;  %vm2828_vm3 = vcmp.lt.s32.totalorder %v5195_v62, 10 }
 0x419   : > { %v5102_v48 = vpop.permute.xlu1 %2490 }
 0x41a   : > { %v2499_v61 = vadd.f32 %v5102_v48, %v2442_v55  ;;  %v5105_v0 = vpop.permute.xlu0 %2488  ;;  %v2413_v55 = vadd.f32 %v2407_v63, %v2393_v42 }
 0x41b   : > { %v2492_v33 = vsel %vm2283_vm0, %v3977_v56, %v5105_v0  ;;  %v2456_v56 = vld [vmem:[#allocation2 + $0xf8] sm:$0xff] }
 0x41c   : > { %2521 = vrot.lane.b32.xlu1 %v2499_v61, %s4224_s7  ;;  %v2503_v45 = vadd.f32 %v2492_v33, %v2453_v11  ;;  %v2355_v61 = vadd.f32 %v2349_v15, %v2335_v43  ;;  %v2441_v11 = vld [vmem:[#allocation2 + $0x140] sm:$0xff]  ;;  %v2493_v33 = vsel %vm2283_vm0, %v5105_v0, %v5102_v48  ;;  %v2642_v0 = vld [vmem:[#allocation2 + $0x1d8] sm:$0xff] }
 0x41d   : > { %v2498_v50 = vadd.f32 %v2493_v33, %v2441_v11 }
 0x41e   : > { %2517 = vrot.lane.b32.xlu2 %v2503_v45, %s4224_s7  ;;  %v2640_v45 = vld [vmem:[#allocation2 + $0x68] sm:$0xff] }
 0x421   : > { %v2581_v35 = vpop.permute.xlu1 %2580 }
 0x422   : > { %v2542_v54 = vpop.permute.xlu0 %2541  ;;  %v2597_v26 = vadd.f32 %v2581_v35, %v2457_v1  ;;  %v2586_v51 = vsel %vm2283_vm0, %v2581_v35, %v2583_v20 }
 0x423   : > { %v2549_v40 = vadd.f32 %v2542_v54, %v2444_v47  ;;  %v2543_v41 = vsel %vm2283_vm0, %v2540_v59, %v2542_v54  ;;  %v2592_v60 = vadd.f32 %v2586_v51, %v2445_v16  ;;  %v2674_v59 = vpop.permute.xlu2 %2673 }
 0x424   : > { %2559 = vrot.lane.b32.xlu1 %v2553_v46, %s4220_s13  ;;  %v2548_v14 = vadd.f32 %v2543_v41, %v2443_v30  ;;  %v2504_v46 = vadd.f32 %v2498_v50, %v2454_v21 }
 0x425   : > { %2563 = vrot.lane.b32.xlu0 %v2549_v40, %s4220_s13  ;;  %v2598_v53 = vadd.f32 %v2592_v60, %v2458_v52  ;;  %v2637_v40 = vld [vmem:[#allocation2 + $0x1b0] sm:$0xff] }
 0x426   : > { %2307 = vrot.lane.b32.xlu2 %v2291_v25, %s4225_s9  ;;  %v2554_v9 = vadd.f32 %v2548_v14, %v2456_v56  ;;  %v2641_v25 = vld [vmem:[#allocation2 + $0x230] sm:$0xff] }
 0x429   : > { %v5164_v47 = vpop.permute.xlu1 %3984 }
 0x42a   : > { %v5124_v27 = vpop.permute.xlu0 %3979 }
 0x42b   : > { %v3981_v28 = vunpack.i.l.bf16 %v5124_v27  ;;  %v3982_v1 = vunpack.i.h.bf16 %v5124_v27  ;;  %v2694_v35 = vpop.permute.xlu2 %2693 }
 0x42c   : > { %2611 = vrot.lane.b32.xlu1 %v2597_v26, %s4226_s26  ;;  %v3986_v26 = vunpack.i.l.bf16 %v5164_v47 }
 0x42d   : > { %2303 = vrot.lane.b32.xlu0 %v2289_v44, %s4225_s9  ;;  %v2587_v58 = vsel %vm2283_vm0, %v2583_v20, %v3981_v28  ;;  %v2698_v19 = vsel %vm2283_vm0, %v2694_v35, %v3982_v1  ;;  %v4228_v20 = vmov 0  }
 0x42e   : > { %2361 = vrot.lane.b32.xlu2 %v2354_v7, %s4222_s14  ;;  %v2593_v23 = vadd.f32 %v2587_v58, %v2446_v31  ;;  %v2677_v4 = vsel %vm2365_vm2, %v3986_v26, %v2674_v59  ;;  %3993 = vset.pattern.permute.xlu0 %v4228_v20  ;;  %v2295_v42 = vsel %vm2294_vm5, 1, %v4228_v20  ;;  %v2418_v14 = vsel %vm2417_vm9, 1, %v4228_v20  ;;  %vm2508_vm5 = vmand %vm2506_vm12, %vm2507_vm13 }
 0x42f   : > { %v2296_v63 = vperm.slane %v2295_v42, 0  ;;  %v2419_v16 = vperm.slane %v2418_v14, 0  ;;  %v2297_v51 = vperm.slane %v2295_v42, 1  ;;  %v2420_v50 = vperm.slane %v2418_v14, 1  ;;  %v2863_v14 = vld [vmem:[#allocation2 + $0x1a0] sm:$0xff] }
 0x430   : > { %vm2523_vm9 = vcmask 556032  }
 0x431   : > { %v2692_v17 = vpop.permute.xlu1 %2691  ;;  %vm2298_vm11 = vcmp.eq.s32.totalorder %v2296_v63, 1  ;;  %vm2421_vm4 = vcmp.eq.s32.totalorder %v2419_v16, 1  ;;  %vm2299_vm7 = vcmp.eq.s32.totalorder %v2297_v51, 1 }
 0x432   : > { %v2676_v48 = vpop.permute.xlu0 %2675  ;;  %v2697_v22 = vsel %vm2283_vm0, %v2692_v17, %v2694_v35 }
 0x433   : > { %v2678_v54 = vsel %vm2365_vm2, %v2674_v59, %v2676_v48  ;;  %v2684_v27 = vadd.f32 %v2676_v48, %v2627_v5  ;;  %v2702_v6 = vadd.f32 %v2697_v22, %v2677_v4 }
 0x434   : > { %2305 = vrot.lane.b32.xlu1 %v2290_v13, %s4225_s9  ;;  %v2683_v10 = vadd.f32 %v2678_v54, %v2626_v49  ;;  %v2603_v54 = vsel %vm2602_vm8, 1, %v4228_v20 }
 0x435   : > { %2615 = vrot.lane.b32.xlu0 %v2593_v23, %s4226_s26  ;;  %v2704_v44 = vadd.f32 %v3982_v1, %v2684_v27  ;;  %v2605_v26 = vperm.slane %v2603_v54, 1 }
 0x436   : > { %2430 = vrot.lane.b32.xlu2 %v2414_v29, %s4223_s18  ;;  %v2703_v2 = vadd.f32 %v2698_v19, %v2683_v10  ;;  %v2604_v19 = vperm.slane %v2603_v54, 0 }
 0x437   : > { %vm2607_vm13 = vcmp.eq.s32.totalorder %v2605_v26, 1 }
 0x438   : > { %vm2606_vm12 = vcmp.eq.s32.totalorder %v2604_v19, 1 }
 0x439   : > { %v5178_v28 = vpop.permute.xlu1 %2740 }
 0x43a   : > { %v5180_v7 = vpop.permute.xlu0 %2738 }
 0x43b   : > { %v5185_v8 = vsel %vm2365_vm2, %v5180_v7, %v5178_v28 }
 0x43c   : > { %2428 = vrot.lane.b32.xlu1 %v2413_v55, %s4223_s18 }
 0x43d   : > { %2363 = vrot.lane.b32.xlu0 %v2355_v61, %s4222_s14 }
 0x43e   : > { %2561 = vrot.lane.b32.xlu2 %v2554_v9, %s4220_s13 }
 0x444   : > { %2755 = vrot.lane.b32.xlu1 %v2640_v45, %s4220_s13 }
 0x445   : > { %2519 = vrot.lane.b32.xlu0 %v2504_v46, %s4224_s7  ;;  %v2509_v46 = vsel %vm2508_vm5, 1, %v4228_v20  ;;  %vm2905_vm5 = vcmp.lt.s32.totalorder %v5195_v62, 24 }
 0x446   : > { %2613 = vrot.lane.b32.xlu2 %v2598_v53, %s4226_s26  ;;  %v2511_v1 = vperm.slane %v2509_v46, 1 }
 0x44c   : > { %2813 = vrot.lane.b32.xlu1 %v2642_v0, %s4220_s13 }
 0x44d   : > { %2795 = vrot.lane.b32.xlu0 %v2637_v40, %s4222_s14 }
 0x44e   : > { %2757 = vrot.lane.b32.xlu2 %v2641_v25, %s4220_s13  ;;  %v2510_v25 = vperm.slane %v2509_v46, 0  ;;  %v2866_v46 = vld [vmem:[#allocation2 + $0x20] sm:$0xff] }
 0x454   : > { %2718 = vrot.lane.b32.xlu1 %v2703_v2, %s4227_s11 }
 0x455   : > { %3989 = vrot.lane.b32.xlu0 %v4221_v32, %s4220_s13  ;;  %v5187_v32 = vpop.permute.xlu2 %2793 }
 0x456   : > { %2815 = vrot.lane.b32.xlu2 %v2643_v3, %s4220_s13 }
 0x45d   : > { %2716 = vrot.lane.b32.xlu0 %v2702_v6, %s4227_s11 }
 0x45e   : > { %2720 = vrot.lane.b32.xlu2 %v2704_v44, %s4227_s11 }
 0x477   : > { %v2360_v31 = vpop.permute.xlu1 %2359 }
 0x478   : > { %v5189_v12 = vpop.permute.xlu2 %2517 }
 0x480   : > { %v2308_v57 = vpop.permute.xlu2 %2307 }
 0x487   : > { %v2427_v39 = vpop.permute.xlu0 %2426 }
 0x488   : > { %v2362_v58 = vpop.permute.xlu2 %2361 }
 0x489   : > { %v2366_v18 = vsel %vm2365_vm2, %v2360_v31, %v2362_v58 }
 0x48e   : > { %v5193_v34 = vpop.permute.xlu1 %2521 }
 0x490   : > { %v2431_v13 = vpop.permute.xlu2 %2430 }
 0x496   : > { %v2560_v23 = vpop.permute.xlu1 %2559 }
 0x497   : > { %v2564_v36 = vpop.permute.xlu0 %2563 }
 0x498   : > { %v2562_v37 = vpop.permute.xlu2 %2561 }
 0x499   : > { %v5200_v38 = vsel %vm2283_vm0, %v2560_v23, %v2562_v37  ;;  %v5203_v24 = vsel %vm2283_vm0, %v2562_v37, %v2564_v36 }
 0x49e   : > { %v2612_v29 = vpop.permute.xlu1 %2611 }
 0x49f   : > { %v2304_v30 = vpop.permute.xlu0 %2303 }
 0x4a0   : > { %v2614_v41 = vpop.permute.xlu2 %2613 }
 0x4a1   : > { %v5209_v43 = vsel %vm2617_vm6, %v2612_v29, %v2614_v41  ;;  %v2628_v29 = vld [vmem:[#allocation2 + $0x1e0] sm:$0xff] }
 0x4a2   : > { %v2747_v63 = vadd.f32 %v5185_v8, %v2628_v29 }
 0x4a6   : > { %v2306_v15 = vpop.permute.xlu1 %2305 }
 0x4a7   : > { %v2310_v55 = vsel %vm2309_vm10, %v2304_v30, %v2306_v15  ;;  %v2311_v56 = vsel %vm2309_vm10, %v2306_v15, %v2308_v57  ;;  %v2616_v11 = vpop.permute.xlu0 %2615  ;;  %vm2512_vm10 = vcmp.eq.s32.totalorder %v2510_v25, 1 }
 0x4a8   : > { %v2314_v61 = vsel %vm2298_vm11, %v2310_v55, 0.0  ;;  %v2619_v9 = vsel %vm2617_vm6, %v2614_v41, %v2616_v11  ;;  %vm2422_vm6 = vcmp.eq.s32.totalorder %v2420_v50, 1  ;;  %v2315_v53 = vsel %vm2299_vm7, %v2311_v56, 0.0  ;;  %v2758_v35 = vpop.permute.xlu2 %2757  ;;  %v2870_v55 = vld [vmem:[#allocation2 + $0xa0] sm:$0xff]  ;;  %vm2829_vm7 = vmand %vm2827_vm15, %vm2828_vm3 }
 0x4a9   : > { %v2370_v33 = vadd.f32 %v2366_v18, %v2314_v61  ;;  %vm2513_vm11 = vcmp.eq.s32.totalorder %v2511_v1, 1  ;;  %v2622_v18 = vsel %vm2606_vm12, %v5209_v43, 0.0  ;;  %v3987_v56 = vunpack.i.h.bf16 %v5164_v47 }
 0x4aa   : > { %v2954_v8 = vadd.f32 %v2870_v55, %v2863_v14  ;;  %vm2957_vm12 = vcmp.ge.s32.totalorder %v5195_v62, 4294967288  ;;  %vm2921_vm15 = vcmask 64512  }
 0x4ae   : > { %v2429_v60 = vpop.permute.xlu1 %2428 }
 0x4af   : > { %v2433_v45 = vsel %vm2432_vm14, %v2427_v39, %v2429_v60  ;;  %v2434_v21 = vsel %vm2432_vm14, %v2429_v60, %v2431_v13  ;;  %v2364_v59 = vpop.permute.xlu0 %2363 }
 0x4b0   : > { %v2437_v52 = vsel %vm2421_vm4, %v2433_v45, 0.0  ;;  %v2367_v0 = vsel %vm2365_vm2, %v2362_v58, %v2364_v59  ;;  %v2438_v40 = vsel %vm2422_vm6, %v2434_v21, 0.0  ;;  %v2816_v39 = vpop.permute.xlu2 %2815  ;;  %v2853_v21 = vld [vmem:[#allocation2 + $0x218] sm:$0xff]  ;;  %v2859_v59 = vld [vmem:[#allocation2 + $0x210] sm:$0xff]  ;;  %vm2904_vm4 = vcmp.ge.s32.totalorder %v5195_v62, 8 }
 0x4b1   : > { %v2439_v48 = vadd.f32 %v2437_v52, %v2370_v33  ;;  %v2371_v49 = vadd.f32 %v2367_v0, %v2315_v53  ;;  %v2631_v33 = vld [vmem:[#allocation2 + $0x98] sm:$0xff]  ;;  %v2860_v52 = vld [vmem:[#allocation2 + $0x1d0] sm:$0xff]  ;;  %vm2906_vm8 = vmand %vm2904_vm4, %vm2905_vm5  ;;  %vm2722_vm6 = vcmask 834560  }
 0x4b2   : > { %v2897_v53 = vadd.f32 %v2860_v52, %v2853_v21  ;;  %v2857_v0 = vld [vmem:[#allocation2 + $0x178] sm:$0xff] }
 0x4b3   : > { %v2440_v10 = vadd.f32 %v2438_v40, %v2371_v49  ;;  %v2864_v49 = vld [vmem:[#allocation2 + $0x58] sm:$0xff]  ;;  %v2858_v40 = vld [vmem:[#allocation2 + $0x208] sm:$0xff] }
 0x4b4   : > { %v2949_v54 = vadd.f32 %v2864_v49, %v2857_v0 }
 0x4b6   : > { %v2756_v2 = vpop.permute.xlu1 %2755 }
 0x4b7   : > { %v2761_v3 = vsel %vm2283_vm0, %v2756_v2, %v2758_v35  ;;  %v2520_v5 = vpop.permute.xlu0 %2519 }
 0x4b8   : > { %v2766_v17 = vadd.f32 %v2761_v3, %v5180_v7  ;;  %v2524_v4 = vsel %vm2523_vm9, %v5189_v12, %v2520_v5  ;;  %v2525_v22 = vsel %vm2523_vm9, %v2520_v5, %v5193_v34  ;;  %v2623_v7 = vsel %vm2607_vm13, %v2619_v9, 0.0  ;;  %v2630_v9 = vld [vmem:[#allocation2 + $0x48] sm:$0xff]  ;;  %v2721_v1 = vpop.permute.xlu2 %2720 }
 0x4b9   : > { %v2528_v27 = vsel %vm2512_vm10, %v2524_v4, 0.0  ;;  %v2529_v6 = vsel %vm2513_vm11, %v2525_v22, 0.0  ;;  %v2830_v22 = vsel %vm2829_vm7, 1, %v4228_v20  ;;  %vm2844_vm11 = vcmask 736256  }
 0x4ba   : > { %2772 = vrot.lane.b32.xlu0 %v2766_v17, %s4219_s6  ;;  %v2530_v44 = vadd.f32 %v2528_v27, %v2439_v48  ;;  %v2531_v57 = vadd.f32 %v2529_v6, %v2440_v10  ;;  %v2902_v48 = vadd.f32 %v2866_v46, %v2859_v59  ;;  %vm2958_vm13 = vcmp.lt.s32.totalorder %v5195_v62, 8 }
 0x4bc   : > { %v2569_v31 = vadd.f32 %v5200_v38, %v2530_v44  ;;  %v2570_v58 = vadd.f32 %v5203_v24, %v2531_v57  ;;  %v2629_v38 = vld [vmem:[#allocation2 + $0x1f0] sm:$0xff]  ;;  %v2865_v24 = vld [vmem:[#allocation2 + $0x118] sm:$0xff] }
 0x4bd   : > { %v2748_v30 = vadd.f32 %v5178_v28, %v2629_v38 }
 0x4be   : > { %v2814_v13 = vpop.permute.xlu1 %2813  ;;  %v5229_v34 = vadd.f32 %v2623_v7, %v2570_v58  ;;  %v5231_v23 = vadd.f32 %v2622_v18, %v2569_v31  ;;  %v2907_v31 = vsel %vm2906_vm8, 1, %v4228_v20  ;;  %v2831_v7 = vperm.slane %v2830_v22, 0 }
 0x4bf   : > { %v2819_v12 = vsel %vm2283_vm0, %v2814_v13, %v2816_v39  ;;  %v2796_v37 = vpop.permute.xlu0 %2795  ;;  %v2908_v13 = vperm.slane %v2907_v31, 0 }
 0x4c0   : > { %v2824_v36 = vadd.f32 %v2819_v12, %v5187_v32  ;;  %v2800_v28 = vsel %vm2365_vm2, %v2796_v37, %v3987_v56  ;;  %v2799_v16 = vsel %vm2365_vm2, %v5187_v32, %v2796_v37  ;;  %v2983_v32 = vld [vmem:[%s5474_s4] sm:$0xff]  ;;  %vm2706_vm2 = vcmp.lt.s32.totalorder %v5195_v62, 22 }
 0x4c1   : > { %v2806_v51 = vadd.f32 %v2800_v28, %v2631_v33  ;;  %v2805_v60 = vadd.f32 %v2799_v16, %v2630_v9  ;;  %v2909_v12 = vperm.slane %v2907_v31, 1  ;;  %vm5288_vm3 = vcmp.eq.s32.totalorder %v2908_v13, 1  ;;  %v2855_v9 = vld [vmem:[#allocation2 + $0x10] sm:$0xff] }
 0x4c2   : > { %2838 = vrot.lane.b32.xlu0 %v2824_v36, %s4229_s27 }
 0x4c3   : > { %vm5292_vm4 = vcmp.eq.s32.totalorder %v2909_v12, 1 }
 0x4c6   : > { %v2719_v10 = vpop.permute.xlu1 %2718 }
 0x4c7   : > { %v3990_v42 = vpop.permute.xlu0 %3989  ;;  %v2724_v58 = vsel %vm2722_vm6, %v2719_v10, %v2721_v1 }
 0x4c8   : > { %v3991_v41 = vunpack.i.l.bf16 %v3990_v42  ;;  %v3992_v11 = vunpack.i.h.bf16 %v3990_v42 }
 0x4ca   : > { %2915 = vrot.lane.b32.xlu0 %v2865_v24, %s4230_s15  ;;  %v2768_v43 = vadd.f32 %v3991_v41, %v2748_v30  ;;  %v2762_v15 = vsel %vm2283_vm0, %v2758_v35, %v3991_v41  ;;  %v2820_v50 = vsel %vm2283_vm0, %v2816_v39, %v3992_v11  ;;  %v2826_v47 = vadd.f32 %v3992_v11, %v2806_v51 }
 0x4cb   : > { %v2767_v61 = vadd.f32 %v2762_v15, %v2747_v63  ;;  %v2825_v45 = vadd.f32 %v2820_v50, %v2805_v60  ;;  %vm2705_vm0 = vcmp.ge.s32.totalorder %v5195_v62, 6  ;;  %v2832_v39 = vperm.slane %v2830_v22, 1  ;;  %v2861_v50 = vld [vmem:[#allocation2 + $0x168] sm:$0xff]  ;;  %v2862_v60 = vld [vmem:[#allocation2 + $0xc0] sm:$0xff] }
 0x4cc   : > { %2776 = vrot.lane.b32.xlu2 %v2768_v43, %s4219_s6  ;;  %vm2707_vm14 = vmand %vm2705_vm0, %vm2706_vm2  ;;  %vm5276_vm0 = vcmp.eq.s32.totalorder %v2831_v7, 1 }
 0x4cd   : > { %2774 = vrot.lane.b32.xlu1 %v2767_v61, %s4219_s6  ;;  %v2708_v3 = vsel %vm2707_vm14, 1, %v4228_v20  ;;  %vm5280_vm2 = vcmp.eq.s32.totalorder %v2832_v39, 1  ;;  %vm2959_vm14 = vmand %vm2957_vm12, %vm2958_vm13 }
 0x4ce   : > { %v2710_v17 = vperm.slane %v2708_v3, 1  ;;  %v2709_v5 = vperm.slane %v2708_v3, 0 }
 0x4cf   : > { %v2717_v25 = vpop.permute.xlu0 %2716 }
 0x4d0   : > { %vm5261_vm9 = vcmp.eq.s32.totalorder %v2710_v17, 1  ;;  %vm5265_vm10 = vcmp.eq.s32.totalorder %v2709_v5, 1  ;;  %v2723_v18 = vsel %vm2722_vm6, %v2717_v25, %v2719_v10 }
 0x4d1   : > { %v2728_v36 = vsel %vm5261_vm9, %v2724_v58, 0.0  ;;  %v2727_v37 = vsel %vm5265_vm10, %v2723_v18, 0.0 }
 0x4d2   : > { %2968 = vrot.lane.b32.xlu0 %v2954_v8, %s4231_s5  ;;  %v2730_v63 = vadd.f32 %v2728_v36, %v5229_v34  ;;  %v2729_v43 = vadd.f32 %v2727_v37, %v5231_v23  ;;  %v2960_v34 = vsel %vm2959_vm14, 1, %v4228_v20 }
 0x4d3   : > { %v2961_v52 = vperm.slane %v2960_v34, 0  ;;  %v2962_v59 = vperm.slane %v2960_v34, 1 }
 0x4d4   : > { %2842 = vrot.lane.b32.xlu2 %v2826_v47, %s4229_s27  ;;  %v2868_v47 = vld [vmem:[#allocation2 + $0xa8] sm:$0xff] }
 0x4d5   : > { %2840 = vrot.lane.b32.xlu1 %v2825_v45, %s4229_s27  ;;  %vm2963_vm5 = vcmp.eq.s32.totalorder %v2961_v52, 1  ;;  %vm2964_vm7 = vcmp.eq.s32.totalorder %v2962_v59, 1 }
 0x4da   : > { %2986 = vperm.xlu0 %3993, %v2983_v32   ;;  %v2935_v32 = vadd.f32 %v2862_v60, %v2855_v9 }
 0x4dc   : > { %2919 = vrot.lane.b32.xlu2 %v2897_v53, %s4230_s15  ;;  %v2938_v53 = vadd.f32 %v2868_v47, %v2861_v50 }
 0x4dd   : > { %2917 = vrot.lane.b32.xlu1 %v2902_v48, %s4230_s15 }
 0x4e4   : > { %2972 = vrot.lane.b32.xlu2 %v2858_v40, %s4231_s5 }
 0x4e5   : > { %2970 = vrot.lane.b32.xlu1 %v2949_v54, %s4231_s5 }
 0x526   : > { %v2777_v19 = vpop.permute.xlu2 %2776 }
 0x52c   : > { %v2773_v35 = vpop.permute.xlu0 %2772 }
 0x52e   : > { %v2843_v4 = vpop.permute.xlu2 %2842 }
 0x534   : > { %v2839_v2 = vpop.permute.xlu0 %2838 }
 0x536   : > { %v2920_v38 = vpop.permute.xlu2 %2919 }
 0x53c   : > { %v2916_v27 = vpop.permute.xlu0 %2915 }
 0x53e   : > { %v2973_v48 = vpop.permute.xlu2 %2972 }
 0x53f   : > { %v2775_v26 = vpop.permute.xlu1 %2774 }
 0x540   : > { %v2778_v62 = vsel %vm2262_vm1, %v2773_v35, %v2775_v26  ;;  %v2779_v41 = vsel %vm2262_vm1, %v2775_v26, %v2777_v19  ;;  %vm2974_vm1 = vcmask 982016  }
 0x541   : > { %v2782_v33 = vadd.f32 %v2778_v62, %v2729_v43  ;;  %v2783_v23 = vadd.f32 %v2779_v41, %v2730_v63 }
 0x544   : > { %v2969_v11 = vpop.permute.xlu0 %2968 }
 0x547   : > { %v2841_v57 = vpop.permute.xlu1 %2840 }
 0x548   : > { %v2845_v42 = vsel %vm2844_vm11, %v2839_v2, %v2841_v57  ;;  %v2846_v30 = vsel %vm2844_vm11, %v2841_v57, %v2843_v4 }
 0x549   : > { %v2849_v55 = vsel %vm5276_vm0, %v2845_v42, 0.0  ;;  %v2850_v56 = vsel %vm5280_vm2, %v2846_v30, 0.0 }
 0x54a   : > { %v2851_v45 = vadd.f32 %v2849_v55, %v2782_v33  ;;  %v2852_v21 = vadd.f32 %v2850_v56, %v2783_v23 }
 0x54c   : > { %v2987_v10 = vpop.permute.xlu0 %2986 }
 0x54f   : > { %v2918_v61 = vpop.permute.xlu1 %2917 }
 0x550   : > { %v2922_v28 = vsel %vm2921_vm15, %v2916_v27, %v2918_v61  ;;  %v2923_v8 = vsel %vm2921_vm15, %v2918_v61, %v2920_v38 }
 0x551   : > { %v2926_v16 = vsel %vm5288_vm3, %v2922_v28, 0.0  ;;  %v2927_v51 = vsel %vm5292_vm4, %v2923_v8, 0.0 }
 0x552   : > { %v2928_v46 = vadd.f32 %v2926_v16, %v2851_v45  ;;  %v2929_v20 = vadd.f32 %v2927_v51, %v2852_v21 }
 0x554   : > { %v2940_v40 = vadd.f32 %v2938_v53, %v2928_v46  ;;  %v2941_v25 = vadd.f32 %v2935_v32, %v2929_v20 }
 0x557   : > { %v2971_v0 = vpop.permute.xlu1 %2970 }
 0x558   : > { %v2975_v49 = vsel %vm2974_vm1, %v2969_v11, %v2971_v0  ;;  %v2976_v54 = vsel %vm2974_vm1, %v2971_v0, %v2973_v48 }
 0x559   : > { %v2979_v1 = vsel %vm2963_vm5, %v2975_v49, 0.0  ;;  %v2980_v35 = vsel %vm2964_vm7, %v2976_v54, 0.0 }
 0x55a   : > { %v2981_v19 = vadd.f32 %v2979_v1, %v2940_v40  ;;  %v2982_v2 = vadd.f32 %v2980_v35, %v2941_v25 }
 0x55c   : > { %v2989_v26 = vadd.f32 %v2987_v10, %v2981_v19  ;;  %v2990_v3 = vadd.f32 %v2987_v10, %v2982_v2 }
 0x55e   : > { %2991 = vst [vmem:[%s4404_s21] sm:$0xff] %v2989_v26 }
 0x55f   : > { %2992 = vst [vmem:[%s4404_s21 + $0x8] sm:$0xff] %v2990_v3 }
 0x560 PF: > { %s5487_s22 = sld [smem:[#allocation16_spill]]  ;;  %s3007_s18 = sshll.u32 %s4404_s21, 4  ;;  %s3008_s18 = int_to_ptr.vmem [resolvable:$true] %s3007_s18 }
 0x561   : > { %s5489_s13 = sld [smem:[#allocation50_spill]]  ;;  %s2994_s9 = scalar_lea.sflag [#allocation6], %s263_s3 }
 0x566   : > { %s3821_s29 = sshll.u32 %s5487_s22, 4 }
 0x567   : > { %s3005_s14 = scalar_lea.hbm %s5489_s13, %s3821_s29  ;;  %s4104_s5 = scalar_lea.hbm %s5489_s13, 32 }
 0x568   : > { %s3009_s7 = sshll.u32 %s3005_s14, 4  ;;  %s3010_s7 = int_to_ptr.hbm [resolvable:$true] %s3009_s7 }
 0x569   : > { %s4098_s26 = sshra.s32 %s3010_s7, 4  ;;  %s4099_s26 = int_to_ptr.hbm [resolvable:$true] %s4098_s26 }
 0x56a   : > { %s4100_s11 = scalar_lea.hbm %s4099_s26, 16  ;;  %p4105_p3 = scmp.lt.s32.totalorder %s4099_s26, %s5489_s13 }
 0x56b   : > { %p4101_p4 = scmp.ne.s32.totalorder %s4099_s26, %s4100_s11  ;;  %p4106_p5 = scmp.lt.s32.totalorder %s4104_s5, %s4100_s11 }
 0x56d   : > { %p4102_p0 = pnand %p4101_p4, %p4327_p6  ;;  %p4107_p7 = por %p4106_p5, %p4105_p3 }
 0x56f   : > { %p4103_p2 = pneg %p4102_p0 }
 0x571   : > { %p4108_p8 = pnand %p4107_p7, %p4103_p2 }
 0x573   : > { %4111 = shalt.err (!%p4108_p8)
}
 0x574   : > { %3832 = dma.vmem_to_hbm [thread:$0]  (%p4327_p6), %s3008_s18, 256, %s3010_s7, %s2994_s9  }
 0x575 PF: > { %s5490_s3 = sld [smem:[#allocation14_spill]]  ;;  %p3854_p9 = scmp.ge.s32.totalorder %s4210_s25, 2 }
 0x577   : > { %p3846_p12 = pnand %p3854_p9, %p4333_p10 }
 0x579   : > { %p3847_p13 = pneg %p3846_p12 }
 0x57b   : > { %s3021_s4 = sand.u32 1, %s5490_s3  }
 0x57c   : > { %s3022_s22 = scalar_lea.sflag [#allocation6], %s3021_s4 }
 0x57d   : > { %4165 = dma.done.wait (%p3847_p13), %s3022_s22, 256  }
 0x57e   : > { %4167 = vsyncadd (%p3847_p13), %s3022_s22, 4294967040  ;;  %s21_s25 = sadd.s32 1, %s4210_s25   ;;  %s5492_s28 = sld [smem:[#allocation19_spill]] }
 0x57f   : > { %p18_p11 = scmp.ge.s32.totalorder %s21_s25, 10   ;;  %s5493_s15 = smov %s4174_s16 }
 0x580   : > { %s5494_s16 = smov %s4178_s17  ;;  %s5495_s17 = smov %s4375_s1 }
 0x581   : > { %s5496_s18 = smov %s4186_s19  ;;  %s5497_s19 = smov %s4190_s20 }
 0x582   : > { %s5498_s20 = smov %s4378_s2  ;;  %s5499_s21 = smov %s4202_s23 }
 0x583   : > { %s5500_s22 = smov %s4206_s24  ;;  %s5502_s24 = smov %s5508_s10 }
 0x584   : > { %s5501_s23 = smov %s5492_s28  ;;  %20 = sbr.rel (!%p18_p11) target bundleno = 15 (0xf), region = 98 }
 0x589   :  { %3028 = vsyncpa [#allocation5], 1 }
 0x58a   :  { %3030 = vsyncpa [#allocation5 + $0x1], 1 }
 0x58b   :  { %3031 = vsyncpa [#allocation8], 1 }
 0x58c   :  { %3032 = vsyncpa [#allocation6], 1 }
 0x58d   :  { %3034 = vsyncpa [#allocation6 + $0x1], 1 }

// kernel: tpu_custom_call.1
= control target key start
LH: loop header
LB: loop body
LE: loop exit
PB: predicated region body
PF: predicated region fallthrough
CT: control target
= control target key end

     0   :  { %s5361_s0 = inlined_call_operand.hbm [shape: bf16[2,2048,256], index: 0, kind: input, shape index: {}]   ;;  %s5362_s1 = inlined_call_operand.hbm [shape: bf16[4,288,512], index: 1, kind: input, shape index: {}]   ;;  %s5363_s2 = inlined_call_operand.hbm [shape: s32[1,256], index: 2, kind: input, shape index: {}]   ;;  %s5364_s3 = inlined_call_operand.vmem [shape: f32[8,1], index: 3, kind: input, shape index: {}]   ;;  %s5365_s4 = inlined_call_operand.hbm [shape: f32[2,8,256], index: 4, kind: output, shape index: {}]  }
   0x1   :  { %5400 = sst [smem:[#allocation47_spill]] %s5362_s1 }
   0x2   :  { %5401 = sst [smem:[#allocation48_spill]] %s5363_s2 }
   0x3   :  { %5402 = sst [smem:[#allocation49_spill]] %s5364_s3 }
   0x4   :  { %5403 = sst [smem:[#allocation50_spill]] %s5365_s4 }
   0x5   :  { %9 = vsyncpa [#allocation5], 0 }
   0x6   :  { %11 = vsyncpa [#allocation5 + $0x1], 0 }
   0x7   :  { %12 = vsyncpa [#allocation8], 0 }
   0x8   :  { %13 = vsyncpa [#allocation6], 0 }
   0x9   :  { %15 = vsyncpa [#allocation6 + $0x1], 0  ;;  %s4257_s15 = smov 0   ;;  %s4259_s16 = smov 0  }
   0xa   :  { %s4261_s17 = smov 0   ;;  %s4263_s18 = smov 0  }
   0xb   :  { %s4265_s19 = smov 0   ;;  %s4267_s20 = smov 0  }
   0xc   :  { %s4269_s21 = smov 0   ;;  %s4271_s22 = smov 0  }
   0xd   :  { %s4273_s23 = smov 0   ;;  %s4275_s24 = smov 0  }
   0xe   :  { %s4277_s25 = smov 0  }
   0xf LB: > { %5404 = sst [smem:[#allocation14_spill]] %s4170_s15  ;;  %s3115_s26 = sadd.s32 4294967295, %s4210_s25   ;;  %s4210_s25 = sphi %s4277_s25, %s21_s25   ;;  %s4206_s24 = sphi %s4275_s24, %s5502_s24   ;;  %s4202_s23 = sphi %s4273_s23, %s5501_s23   ;;  %s4198_s22 = sphi %s4271_s22, %s5500_s22   ;;  %s4194_s21 = sphi %s4269_s21, %s5499_s21   ;;  %s4190_s20 = sphi %s4267_s20, %s5498_s20   ;;  %s4186_s19 = sphi %s4265_s19, %s5497_s19   ;;  %s4182_s18 = sphi %s4263_s18, %s5496_s18   ;;  %s4178_s17 = sphi %s4261_s17, %s5495_s17   ;;  %s4174_s16 = sphi %s4259_s16, %s5494_s16   ;;  %s4170_s15 = sphi %s4257_s15, %s5493_s15  }
  0x10   : > { %5405 = sst [smem:[#allocation15_spill]] %s4194_s21  ;;  %s3116_s27 = sadd.s32 4294967294, %s4210_s25  }
  0x11   : > { %5406 = sst [smem:[#allocation16_spill]] %s4198_s22  ;;  %p55_p0 = scmp.ne.s32.totalorder %s4186_s19, %s4182_s18 }
  0x12   : > { %p4313_p1 = scmp.eq.s32.totalorder %s3115_s26, 0  ;;  %p141_p2 = scmp.ne.s32.totalorder %s4178_s17, %s4174_s16 }
  0x13   : > { %p142_p3 = scmp.eq.s32.totalorder %s3115_s26, 7  ;;  %p147_p5 = scmp.ne.s32.totalorder %s4174_s16, %s4170_s15 }
  0x14   : > { %p4321_p4 = por %p4313_p1, %p55_p0  ;;  %p148_p7 = scmp.eq.s32.totalorder %s3116_s27, 7 }
  0x15   : > { %p4327_p6 = por %p142_p3, %p141_p2  ;;  %p3117_p8 = scmp.ge.s32.totalorder %s4210_s25, 1 }
  0x16   : > { %p155_p9 = scmp.lt.s32.totalorder %s4210_s25, 9  ;;  %p4333_p10 = por %p148_p7, %p147_p5 }
  0x17   : > { %s5409_s30 = scalar_select %p4327_p6, 1, 0 }
  0x18   : > { %s5411_s5 = scalar_select %p4333_p10, 1, 0 }
  0x19   : > { %5410 = sst [smem:[#allocation17_spill]] %s5409_s30  ;;  %p4337_p11 = pnand %p3117_p8, %p155_p9 }
  0x1a   : > { %5412 = sst [smem:[#allocation18_spill]] %s5411_s5  ;;  %s4212_s10 = smov [#allocation7]  }
  0x1b   : > { %s5414_s1 = sld [smem:[#allocation47_spill]]  ;;  %p3834_p12 = pneg %p4337_p11 }
  0x1c   : > { %s168_s11 = sshll.u32 %s4212_s10, 4  ;;  %s5415_s2 = sld [smem:[#allocation48_spill]]  ;;  %s169_s11 = int_to_ptr.vmem [resolvable:$true] %s168_s11 }
  0x1d   : > { %p3835_p13 = pnand %p3834_p12, %p4313_p1  ;;  %s4213_s18 = smov 256  }
  0x1e   : > { %s4214_s26 = smov 16   ;;  %s4215_s27 = smov [#allocation9]  }
  0x1f   : > { %s183_s7 = sshll.u32 %s4215_s27, 4  ;;  %s30_s8 = sadd.s32 1, %s4202_s23  ;;  %s184_s7 = int_to_ptr.vmem [resolvable:$true] %s183_s7 }
  0x20   : > { %p31_p0 = scmp.ge.s32.totalorder %s30_s8, 4  ;;  %s33_s10 = sadd.s32 1, %s4206_s24 }
  0x21   : > { %s166_s9 = sshll.u32 %s5414_s1, 4  ;;  %s42_s12 = sadd.s32 1, %s4190_s20  ;;  %s167_s9 = int_to_ptr.hbm [resolvable:$true] %s166_s9 }
  0x22   : > { %s181_s14 = sshll.u32 %s5415_s2, 4  ;;  %p49_p2 = scmp.ne.s32.totalorder %s4190_s20, %s4186_s19  ;;  %s182_s14 = int_to_ptr.hbm [resolvable:$true] %s181_s14 }
  0x23   : > { %3837 = dma.hbm_to_vmem [thread:$0]  (!%p3835_p13), %s167_s9, 36864, %s169_s11, [#allocation8], %s4213_s18, %s4213_s18, %s4214_s26  }
  0x24   : > { %3840 = dma.hbm_to_vmem [thread:$0]  (!%p3835_p13), %s182_s14, 32, %s184_s7, [#allocation8]  }
  0x25   : > { %s5504_s8 = smov (%p31_p0, %s30_s8), 0  ;;  %s5506_s10 = smov (!%p31_p0, %s33_s10), %s4206_s24 }
  0x26   : > { %5416 = sst [smem:[#allocation19_spill]] %s5504_s8  ;;  %s38_s9 = ssub.s32 %s4202_s23, %s5504_s8 }
  0x27   : > { %p50_p3 = scmp.eq.s32.totalorder %s4210_s25, 0  ;;  %p35_p5 = scmp.ge.s32.totalorder %s5506_s10, 2 }
  0x28   : > { %s131_s11 = sadd.s32 1, %s4178_s17  ;;  %p3851_p8 = scmp.lt.s32.totalorder %s4210_s25, 8 }
  0x29   : > { %p4363_p7 = por %p50_p3, %p49_p2  ;;  %s5508_s10 = smov (%p35_p5, %s5506_s10), 0 }
  0x2a   : > { %s197_s14 = sand.u32 1, %s4190_s20   ;;  %s3683_s18 = sshll.u32 %s4202_s23, 7 }
  0x2b   : > { %s37_s26 = ssub.s32 %s4206_s24, %s5508_s10  ;;  %s3121_s7 = sshll.u32 %s197_s14, 9 }
  0x2c   : > { %s39_s27 = sor.u32 %s38_s9, %s37_s26  ;;  %p129_p9 = scmp.eq.s32.totalorder %s37_s26, 0 }
  0x2d   : > { %p40_p12 = scmp.eq.s32.totalorder %s39_s27, 0  ;;  %s3124_s8 = sshll.u32 %s4206_s24, 9 }
  0x2e   : > { %s4375_s1 = scalar_select %p129_p9, %s4178_s17, %s131_s11  }
  0x2f   : > { %s4378_s2 = scalar_select %p40_p12, %s4190_s20, %s42_s12  }
  0x30   : > { %s207_s5 = sadd.s32 %s3683_s18, %s3124_s8  ;;  %s201_s15 = scalar_lea.vmem [#allocation4], %s3121_s7 }
  0x31   : > { %s212_s4 = sshll.u32 %s201_s15, 4  ;;  %s3125_s30 = sshll.u32 %s207_s5, 2  ;;  %s213_s4 = int_to_ptr.vmem [resolvable:$true] %s212_s4 }
  0x32   : > { %s209_s21 = scalar_lea.hbm %s5361_s0, %s3125_s30  ;;  %p3842_p13 = pnand %p3851_p8, %p4363_p7 }
  0x33   : > { %s210_s9 = sshll.u32 %s209_s21, 4  ;;  %s198_s26 = scalar_lea.sflag [#allocation5], %s197_s14  ;;  %s211_s9 = int_to_ptr.hbm [resolvable:$true] %s210_s9 }
  0x34   : > { %s4216_s11 = smov 128   ;;  %s4217_s27 = smov 8  }
  0x35   : > { %3844 = dma.hbm_to_vmem [thread:$0]  (!%p3842_p13), %s211_s9, 8192, %s213_s4, %s198_s26, %s4216_s11, %s4216_s11, %s4217_s27  }
  0x36   : > { %224 = sbr.rel (%p4337_p11) target bundleno = 1397 (0x575), region = 36 }
  0x3b   : > { %s226_s15 = sand.u32 1, %s4186_s19  }
  0x3c   : > { %s3127_s5 = sshll.u32 %s226_s15, 9  ;;  %s227_s8 = scalar_lea.sflag [#allocation5], %s226_s15 }
  0x3d   : > { %s4391_s12 = scalar_lea.vmem [#allocation4], %s3127_s5 }
  0x3e   : > { %4157 = dma.done.wait (%p4321_p4), %s227_s8, 8192  }
  0x3f   : > { %4159 = vsyncadd (%p4321_p4), %s227_s8, 4294959104 }
  0x40   : > { %4161 = dma.done.wait (%p4313_p1), [#allocation8], 36896  }
  0x41   : > { %4163 = vsyncadd (%p4313_p1), [#allocation8], 4294930400  ;;  %s263_s3 = sand.u32 1, %s4174_s16   ;;  %s5418_s22 = sld [smem:[#allocation15_spill]] }
  0x42   : > { %s3130_s4 = sshll.u32 %s263_s3, 4 }
  0x43   : > { %s4404_s21 = scalar_lea.vmem [#allocation10], %s3130_s4 }
  0x47   : > { %p3131_p11 = scmp.ne.s32.totalorder %s5418_s22, 0 }
  0x49   : > { %270 = sbr.rel (%p3131_p11) target bundleno = 151 (0x97), region = 52 }
  0x4e   : > { %v4218_v0 = vmov 0.0  }
  0x4f   : > { %271 = vst [vmem:[#allocation2 + $0xc8] sm:$0xff] %v4218_v0 }
  0x50   : > { %272 = vst [vmem:[#allocation2 + $0x8] sm:$0xff] %v4218_v0 }
  0x51   : > { %273 = vst [vmem:[#allocation2 + $0x40] sm:$0xff] %v4218_v0 }
  0x52   : > { %274 = vst [vmem:[#allocation2 + $0x28] sm:$0xff] %v4218_v0 }
  0x53   : > { %275 = vst [vmem:[#allocation2 + $0xe8] sm:$0xff] %v4218_v0 }
  0x54   : > { %276 = vst [vmem:[#allocation2 + $0xf0] sm:$0xff] %v4218_v0 }
  0x55   : > { %277 = vst [vmem:[#allocation2 + $0x70] sm:$0xff] %v4218_v0 }
  0x56   : > { %278 = vst [vmem:[#allocation2 + $0x120] sm:$0xff] %v4218_v0 }
  0x57   : > { %279 = vst [vmem:[#allocation2 + $0xd8] sm:$0xff] %v4218_v0 }
  0x58   : > { %280 = vst [vmem:[#allocation2 + $0x18] sm:$0xff] %v4218_v0 }
  0x59   : > { %281 = vst [vmem:[#allocation2 + $0xb0] sm:$0xff] %v4218_v0 }
  0x5a   : > { %282 = vst [vmem:[#allocation2 + $0x158] sm:$0xff] %v4218_v0 }
  0x5b   : > { %283 = vst [vmem:[#allocation2 + $0x108] sm:$0xff] %v4218_v0 }
  0x5c   : > { %284 = vst [vmem:[#allocation2 + $0x110] sm:$0xff] %v4218_v0 }
  0x5d   : > { %285 = vst [vmem:[#allocation2 + $0x1f8] sm:$0xff] %v4218_v0 }
  0x5e   : > { %286 = vst [vmem:[#allocation2 + $0xb8] sm:$0xff] %v4218_v0 }
  0x5f   : > { %287 = vst [vmem:[#allocation2 + $0x180] sm:$0xff] %v4218_v0 }
  0x60   : > { %288 = vst [vmem:[#allocation2 + $0x190] sm:$0xff] %v4218_v0 }
  0x61   : > { %289 = vst [vmem:[#allocation2 + $0x140] sm:$0xff] %v4218_v0 }
  0x62   : > { %290 = vst [vmem:[#allocation2 + $0x1c0] sm:$0xff] %v4218_v0 }
  0x63   : > { %291 = vst [vmem:[#allocation2 + $0xd0] sm:$0xff] %v4218_v0 }
  0x64   : > { %292 = vst [vmem:[#allocation2 + $0x138] sm:$0xff] %v4218_v0 }
  0x65   : > { %293 = vst [vmem:[#allocation2 + $0x60] sm:$0xff] %v4218_v0 }
  0x66   : > { %294 = vst [vmem:[#allocation2 + $0x1b8] sm:$0xff] %v4218_v0 }
  0x67   : > { %295 = vst [vmem:[#allocation2 + $0x88] sm:$0xff] %v4218_v0 }
  0x68   : > { %296 = vst [vmem:[#allocation2] sm:$0xff] %v4218_v0 }
  0x69   : > { %297 = vst [vmem:[#allocation2 + $0x188] sm:$0xff] %v4218_v0 }
  0x6a   : > { %298 = vst [vmem:[#allocation2 + $0x38] sm:$0xff] %v4218_v0 }
  0x6b   : > { %299 = vst [vmem:[#allocation2 + $0x1a8] sm:$0xff] %v4218_v0 }
  0x6c   : > { %300 = vst [vmem:[#allocation2 + $0x220] sm:$0xff] %v4218_v0 }
  0x6d   : > { %301 = vst [vmem:[#allocation2 + $0x1e8] sm:$0xff] %v4218_v0 }
  0x6e   : > { %302 = vst [vmem:[#allocation2 + $0x1c8] sm:$0xff] %v4218_v0 }
  0x6f   : > { %303 = vst [vmem:[#allocation2 + $0x80] sm:$0xff] %v4218_v0 }
  0x70   : > { %304 = vst [vmem:[#allocation2 + $0xf8] sm:$0xff] %v4218_v0 }
  0x71   : > { %305 = vst [vmem:[#allocation2 + $0x78] sm:$0xff] %v4218_v0 }
  0x72   : > { %306 = vst [vmem:[#allocation2 + $0x170] sm:$0xff] %v4218_v0 }
  0x73   : > { %307 = vst [vmem:[#allocation2 + $0x198] sm:$0xff] %v4218_v0 }
  0x74   : > { %308 = vst [vmem:[#allocation2 + $0xe0] sm:$0xff] %v4218_v0 }
  0x75   : > { %309 = vst [vmem:[#allocation2 + $0x1e0] sm:$0xff] %v4218_v0 }
  0x76   : > { %310 = vst [vmem:[#allocation2 + $0x1f0] sm:$0xff] %v4218_v0 }
  0x77   : > { %311 = vst [vmem:[#allocation2 + $0x48] sm:$0xff] %v4218_v0 }
  0x78   : > { %312 = vst [vmem:[#allocation2 + $0x98] sm:$0xff] %v4218_v0 }
  0x79   : > { %313 = vst [vmem:[#allocation2 + $0x238] sm:$0xff] %v4218_v0 }
  0x7a   : > { %314 = vst [vmem:[#allocation2 + $0x160] sm:$0xff] %v4218_v0 }
  0x7b   : > { %315 = vst [vmem:[#allocation2 + $0x50] sm:$0xff] %v4218_v0 }
  0x7c   : > { %316 = vst [vmem:[#allocation2 + $0x100] sm:$0xff] %v4218_v0 }
  0x7d   : > { %317 = vst [vmem:[#allocation2 + $0x30] sm:$0xff] %v4218_v0 }
  0x7e   : > { %318 = vst [vmem:[#allocation2 + $0x1b0] sm:$0xff] %v4218_v0 }
  0x7f   : > { %319 = vst [vmem:[#allocation2 + $0x90] sm:$0xff] %v4218_v0 }
  0x80   : > { %320 = vst [vmem:[#allocation2 + $0x130] sm:$0xff] %v4218_v0 }
  0x81   : > { %321 = vst [vmem:[#allocation2 + $0x68] sm:$0xff] %v4218_v0 }
  0x82   : > { %322 = vst [vmem:[#allocation2 + $0x230] sm:$0xff] %v4218_v0 }
  0x83   : > { %323 = vst [vmem:[#allocation2 + $0x1d8] sm:$0xff] %v4218_v0 }
  0x84   : > { %324 = vst [vmem:[#allocation2 + $0x228] sm:$0xff] %v4218_v0 }
  0x85   : > { %325 = vst [vmem:[#allocation2 + $0x218] sm:$0xff] %v4218_v0 }
  0x86   : > { %326 = vst [vmem:[#allocation2 + $0x200] sm:$0xff] %v4218_v0 }
  0x87   : > { %327 = vst [vmem:[#allocation2 + $0x10] sm:$0xff] %v4218_v0 }
  0x88   : > { %328 = vst [vmem:[#allocation2 + $0x128] sm:$0xff] %v4218_v0 }
  0x89   : > { %329 = vst [vmem:[#allocation2 + $0x178] sm:$0xff] %v4218_v0 }
  0x8a   : > { %330 = vst [vmem:[#allocation2 + $0x208] sm:$0xff] %v4218_v0 }
  0x8b   : > { %331 = vst [vmem:[#allocation2 + $0x210] sm:$0xff] %v4218_v0 }
  0x8c   : > { %332 = vst [vmem:[#allocation2 + $0x1d0] sm:$0xff] %v4218_v0 }
  0x8d   : > { %333 = vst [vmem:[#allocation2 + $0x168] sm:$0xff] %v4218_v0 }
  0x8e   : > { %334 = vst [vmem:[#allocation2 + $0xc0] sm:$0xff] %v4218_v0 }
  0x8f   : > { %335 = vst [vmem:[#allocation2 + $0x1a0] sm:$0xff] %v4218_v0 }
  0x90   : > { %336 = vst [vmem:[#allocation2 + $0x58] sm:$0xff] %v4218_v0 }
  0x91   : > { %337 = vst [vmem:[#allocation2 + $0x118] sm:$0xff] %v4218_v0 }
  0x92   : > { %338 = vst [vmem:[#allocation2 + $0x20] sm:$0xff] %v4218_v0 }
  0x93   : > { %339 = vst [vmem:[#allocation2 + $0x148] sm:$0xff] %v4218_v0 }
  0x94   : > { %340 = vst [vmem:[#allocation2 + $0xa8] sm:$0xff] %v4218_v0 }
  0x95   : > { %341 = vst [vmem:[#allocation2 + $0x150] sm:$0xff] %v4218_v0 }
  0x96   : > { %342 = vst [vmem:[#allocation2 + $0xa0] sm:$0xff] %v4218_v0 }
  0x97 PF: > { %v3479_v1 = vld [vmem:[%s4391_s12 + $0x70] sm:$0xf]  ;;  %v3772_v2 = vld [vmem:[%s4391_s12 + $0x74] sm:$0xf0]  ;;  %v3471_v12 = vld [vmem:[%s4391_s12 + $0x60] sm:$0xf] }
  0x98   : > { %v3543_v3 = vld [vmem:[%s4391_s12 + $0xf0] sm:$0xf]  ;;  %v3480_v4 = vor.u32 %v3772_v2, %v3479_v1  ;;  %v3788_v5 = vld [vmem:[%s4391_s12 + $0xf4] sm:$0xf0]  ;;  %v3770_v14 = vld [vmem:[%s4391_s12 + $0x64] sm:$0xf0] }
  0x99   : > { %v3607_v6 = vld [vmem:[%s4391_s12 + $0x170] sm:$0xf]  ;;  %v3804_v7 = vld [vmem:[%s4391_s12 + $0x174] sm:$0xf0]  ;;  %v3544_v8 = vor.u32 %v3788_v5, %v3543_v3  ;;  %v3535_v15 = vld [vmem:[%s4391_s12 + $0xe0] sm:$0xf]  ;;  %v3472_v17 = vor.u32 %v3770_v14, %v3471_v12 }
  0x9a   : > { %v3608_v9 = vor.u32 %v3804_v7, %v3607_v6  ;;  %v3671_v10 = vld [vmem:[%s4391_s12 + $0x1f0] sm:$0xf]  ;;  %v3820_v11 = vld [vmem:[%s4391_s12 + $0x1f4] sm:$0xf0]  ;;  %1234 = vmatpush.bf16.msra.mxu0 %v3480_v4  ;;  %v3786_v16 = vld [vmem:[%s4391_s12 + $0xe4] sm:$0xf0] }
  0x9b   : > { %v3672_v13 = vor.u32 %v3820_v11, %v3671_v10  ;;  %1333 = vmatpush.bf16.msra.mxu1 %v3544_v8  ;;  %v3536_v18 = vor.u32 %v3786_v16, %v3535_v15  ;;  %v3599_v19 = vld [vmem:[%s4391_s12 + $0x160] sm:$0xf]  ;;  %v3802_v20 = vld [vmem:[%s4391_s12 + $0x164] sm:$0xf0]  ;;  %v3463_v24 = vld [vmem:[%s4391_s12 + $0x50] sm:$0xf] }
  0x9c   : > { %1432 = vmatpush.bf16.msra.mxu2 %v3608_v9  ;;  %v3663_v21 = vld [vmem:[%s4391_s12 + $0x1e0] sm:$0xf]  ;;  %v3600_v22 = vor.u32 %v3802_v20, %v3599_v19  ;;  %v3818_v23 = vld [vmem:[%s4391_s12 + $0x1e4] sm:$0xf0]  ;;  %v3768_v25 = vld [vmem:[%s4391_s12 + $0x54] sm:$0xf0] }
  0x9d   : > { %1531 = vmatpush.bf16.msra.mxu3 %v3672_v13  ;;  %v3664_v26 = vor.u32 %v3818_v23, %v3663_v21  ;;  %v3527_v27 = vld [vmem:[%s4391_s12 + $0xd0] sm:$0xf]  ;;  %v3784_v28 = vld [vmem:[%s4391_s12 + $0xd4] sm:$0xf0]  ;;  %v3464_v30 = vor.u32 %v3768_v25, %v3463_v24  ;;  %v3455_v36 = vld [vmem:[%s4391_s12 + $0x40] sm:$0xf] }
  0x9e   : > { %v3591_v29 = vld [vmem:[%s4391_s12 + $0x150] sm:$0xf]  ;;  %1235 = vmatpush.bf16.msra.mxu0 %v3472_v17  ;;  %v3800_v31 = vld [vmem:[%s4391_s12 + $0x154] sm:$0xf0]  ;;  %v3528_v34 = vor.u32 %v3784_v28, %v3527_v27  ;;  %v3766_v37 = vld [vmem:[%s4391_s12 + $0x44] sm:$0xf0] }
  0x9f   : > { %v3655_v32 = vld [vmem:[%s4391_s12 + $0x1d0] sm:$0xf]  ;;  %v3816_v33 = vld [vmem:[%s4391_s12 + $0x1d4] sm:$0xf0]  ;;  %1334 = vmatpush.bf16.msra.mxu1 %v3536_v18  ;;  %v3592_v35 = vor.u32 %v3800_v31, %v3591_v29  ;;  %v3519_v38 = vld [vmem:[%s4391_s12 + $0xc0] sm:$0xf]  ;;  %v3456_v45 = vor.u32 %v3766_v37, %v3455_v36 }
  0xa0   : > { %1433 = vmatpush.bf16.msra.mxu2 %v3600_v22  ;;  %v3656_v39 = vor.u32 %v3816_v33, %v3655_v32  ;;  %v3782_v40 = vld [vmem:[%s4391_s12 + $0xc4] sm:$0xf0]  ;;  %v3583_v41 = vld [vmem:[%s4391_s12 + $0x140] sm:$0xf]  ;;  %v3447_v48 = vld [vmem:[%s4391_s12 + $0x30] sm:$0xf] }
  0xa1   : > { %1532 = vmatpush.bf16.msra.mxu3 %v3664_v26  ;;  %v3798_v42 = vld [vmem:[%s4391_s12 + $0x144] sm:$0xf0]  ;;  %v3647_v43 = vld [vmem:[%s4391_s12 + $0x1c0] sm:$0xf]  ;;  %v3520_v46 = vor.u32 %v3782_v40, %v3519_v38  ;;  %v3764_v49 = vld [vmem:[%s4391_s12 + $0x34] sm:$0xf0] }
  0xa2   : > { %v3814_v44 = vld [vmem:[%s4391_s12 + $0x1c4] sm:$0xf0]  ;;  %1236 = vmatpush.bf16.msra.mxu0 %v3464_v30  ;;  %v3584_v47 = vor.u32 %v3798_v42, %v3583_v41  ;;  %v3511_v50 = vld [vmem:[%s4391_s12 + $0xb0] sm:$0xf]  ;;  %v3780_v52 = vld [vmem:[%s4391_s12 + $0xb4] sm:$0xf0]  ;;  %v3448_v57 = vor.u32 %v3764_v49, %v3447_v48 }
  0xa3   : > { %1335 = vmatpush.bf16.msra.mxu1 %v3528_v34  ;;  %v3648_v51 = vor.u32 %v3814_v44, %v3647_v43  ;;  %v3575_v53 = vld [vmem:[%s4391_s12 + $0x130] sm:$0xf]  ;;  %v3796_v54 = vld [vmem:[%s4391_s12 + $0x134] sm:$0xf0]  ;;  %v3512_v58 = vor.u32 %v3780_v52, %v3511_v50  ;;  %v3439_v60 = vld [vmem:[%s4391_s12 + $0x20] sm:$0xf] }
  0xa4   : > { %1434 = vmatpush.bf16.msra.mxu2 %v3592_v35  ;;  %v3639_v55 = vld [vmem:[%s4391_s12 + $0x1b0] sm:$0xf]  ;;  %v3812_v56 = vld [vmem:[%s4391_s12 + $0x1b4] sm:$0xf0]  ;;  %v3576_v59 = vor.u32 %v3796_v54, %v3575_v53  ;;  %v3762_v61 = vld [vmem:[%s4391_s12 + $0x24] sm:$0xf0] }
  0xa5   : > { %1533 = vmatpush.bf16.msra.mxu3 %v3656_v39  ;;  %v3503_v62 = vld [vmem:[%s4391_s12 + $0xa0] sm:$0xf]  ;;  %v3640_v63 = vor.u32 %v3812_v56, %v3639_v55  ;;  %v3778_v0 = vld [vmem:[%s4391_s12 + $0xa4] sm:$0xf0]  ;;  %s5419_s28 = sld [smem:[#allocation15_spill]]  ;;  %v3440_v5 = vor.u32 %v3762_v61, %v3439_v60 }
  0xa6   : > { %1237 = vmatpush.bf16.msra.mxu0 %v3456_v45  ;;  %v3567_v1 = vld [vmem:[%s4391_s12 + $0x120] sm:$0xf]  ;;  %v3794_v2 = vld [vmem:[%s4391_s12 + $0x124] sm:$0xf0]  ;;  %v3431_v6 = vld [vmem:[%s4391_s12 + $0x10] sm:$0xf]  ;;  %v3504_v7 = vor.u32 %v3778_v0, %v3503_v62 }
  0xa7   : > { %1336 = vmatpush.bf16.msra.mxu1 %v3520_v46  ;;  %v3631_v3 = vld [vmem:[%s4391_s12 + $0x1a0] sm:$0xf]  ;;  %v3810_v4 = vld [vmem:[%s4391_s12 + $0x1a4] sm:$0xf0]  ;;  %v3568_v8 = vor.u32 %v3794_v2, %v3567_v1  ;;  %v3760_v9 = vld [vmem:[%s4391_s12 + $0x14] sm:$0xf0] }
  0xa8   : > { %1435 = vmatpush.bf16.msra.mxu2 %v3584_v47  ;;  %v3495_v10 = vld [vmem:[%s4391_s12 + $0x90] sm:$0xf]  ;;  %v3776_v11 = vld [vmem:[%s4391_s12 + $0x94] sm:$0xf0]  ;;  %v3632_v12 = vor.u32 %v3810_v4, %v3631_v3  ;;  %v3423_v17 = vld [vmem:[%s4391_s12] sm:$0xf]  ;;  %v3432_v18 = vor.u32 %v3760_v9, %v3431_v6 }
  0xa9   : > { %1534 = vmatpush.bf16.msra.mxu3 %v3648_v51  ;;  %v3559_v13 = vld [vmem:[%s4391_s12 + $0x110] sm:$0xf]  ;;  %v3792_v14 = vld [vmem:[%s4391_s12 + $0x114] sm:$0xf0]  ;;  %v3758_v19 = vld [vmem:[%s4391_s12 + $0x4] sm:$0xf0]  ;;  %v3496_v22 = vor.u32 %v3776_v11, %v3495_v10 }
  0xaa   : > { %1238 = vmatpush.bf16.msra.mxu0 %v3448_v57  ;;  %v3623_v15 = vld [vmem:[%s4391_s12 + $0x190] sm:$0xf]  ;;  %v3808_v16 = vld [vmem:[%s4391_s12 + $0x194] sm:$0xf0]  ;;  %v3487_v20 = vld [vmem:[%s4391_s12 + $0x80] sm:$0xf]  ;;  %v3560_v23 = vor.u32 %v3792_v14, %v3559_v13  ;;  %v3424_v33 = vor.u32 %v3758_v19, %v3423_v17 }
  0xab   : > { %1337 = vmatpush.bf16.msra.mxu1 %v3512_v58  ;;  %s3684_s29 = smul.u32 576, %s5419_s28  ;;  %v3774_v21 = vld [vmem:[%s4391_s12 + $0x84] sm:$0xf0]  ;;  %v3551_v24 = vld [vmem:[%s4391_s12 + $0x100] sm:$0xf]  ;;  %v3624_v26 = vor.u32 %v3808_v16, %v3623_v15  ;;  %p3677_p1 = scmp.ne.s32.totalorder %s5419_s28, 3 }
  0xac   : > { %1436 = vmatpush.bf16.msra.mxu2 %v3576_v59  ;;  %v3790_v25 = vld [vmem:[%s4391_s12 + $0x104] sm:$0xf0]  ;;  %v3615_v27 = vld [vmem:[%s4391_s12 + $0x180] sm:$0xf]  ;;  %v3803_v29 = vld [vmem:[%s4391_s12 + $0x174] sm:$0xf]  ;;  %v3488_v38 = vor.u32 %v3774_v21, %v3487_v20 }
  0xad   : > { %1535 = vmatpush.bf16.msra.mxu3 %v3640_v63  ;;  %v3806_v28 = vld [vmem:[%s4391_s12 + $0x184] sm:$0xf0]  ;;  %v3609_v30 = vld [vmem:[%s4391_s12 + $0x178] sm:$0xf0]  ;;  %v3819_v31 = vld [vmem:[%s4391_s12 + $0x1f4] sm:$0xf]  ;;  %v3552_v39 = vor.u32 %v3790_v25, %v3551_v24 }
  0xae   : > { %1239 = vmatpush.bf16.msra.mxu0 %v3440_v5  ;;  %v3673_v32 = vld [vmem:[%s4391_s12 + $0x1f8] sm:$0xf0]  ;;  %s4548_s30 = scalar_lea.vmem [#allocation7], %s3684_s29  ;;  %v3771_v37 = vld [vmem:[%s4391_s12 + $0x74] sm:$0xf]  ;;  %v3616_v43 = vor.u32 %v3806_v28, %v3615_v27  ;;  %v3612_v46 = vor.u32 %v3803_v29, %v3609_v30  ;;  %s4219_s6 = smov (!%p3677_p1), 96  }
  0xaf   : > { %1338 = vmatpush.bf16.msra.mxu1 %v3504_v7  ;;  %v3135_v34 = vld [vmem:[%s4548_s30] sm:$0xf]  ;;  %v3687_v35 = vld [vmem:[%s4548_s30 + $0xc] sm:$0xf0]  ;;  %v3685_v36 = vld [vmem:[%s4548_s30 + $0x4] sm:$0xf]  ;;  %v3676_v49 = vor.u32 %v3819_v31, %v3673_v32 }
  0xb0   : > { %1437 = vmatpush.bf16.msra.mxu2 %v3568_v8  ;;  %v3137_v40 = vld [vmem:[%s4548_s30 + $0x10] sm:$0xf0]  ;;  %v3143_v41 = vld [vmem:[%s4548_s30 + $0x8] sm:$0xf]  ;;  %v3688_v42 = vld [vmem:[%s4548_s30 + $0x14] sm:$0xf0]  ;;  %v4560_v48 = vor.u32 %v3687_v35, %v3135_v34 }
  0xb1   : > { %1536 = vmatpush.bf16.msra.mxu3 %v3632_v12  ;;  %v3686_v44 = vld [vmem:[%s4548_s30 + $0xc] sm:$0xf]  ;;  %v3145_v45 = vld [vmem:[%s4548_s30 + $0x18] sm:$0xf0]  ;;  %v3787_v50 = vld [vmem:[%s4391_s12 + $0xf4] sm:$0xf]  ;;  %v4564_v52 = vor.u32 %v3685_v36, %v3137_v40  ;;  %v4566_v53 = vor.u32 %v3688_v42, %v3143_v41 }
  0xb2   : > { %1240 = vmatpush.bf16.msra.mxu0 %v3432_v18  ;;  %v3481_v47 = vld [vmem:[%s4391_s12 + $0x78] sm:$0xf0]  ;;  %v4568_v54 = vor.u32 %v3686_v44, %v3145_v45  ;;  %v3801_v57 = vld [vmem:[%s4391_s12 + $0x164] sm:$0xf]  ;;  %v3601_v58 = vld [vmem:[%s4391_s12 + $0x168] sm:$0xf0] }
  0xb3   : > { %1339 = vmatpush.bf16.msra.mxu1 %v3496_v22  ;;  %v3545_v51 = vld [vmem:[%s4391_s12 + $0xf8] sm:$0xf0]  ;;  %v3484_v55 = vor.u32 %v3771_v37, %v3481_v47  ;;  %v3817_v59 = vld [vmem:[%s4391_s12 + $0x1e4] sm:$0xf]  ;;  %v3604_v60 = vor.u32 %v3801_v57, %v3601_v58  ;;  %v3665_v61 = vld [vmem:[%s4391_s12 + $0x1e8] sm:$0xf0] }
  0xb4   : > { %1438 = vmatpush.bf16.msra.mxu2 %v3560_v23  ;;  %v3548_v56 = vor.u32 %v3787_v50, %v3545_v51  ;;  %v3769_v62 = vld [vmem:[%s4391_s12 + $0x64] sm:$0xf]  ;;  %v3473_v63 = vld [vmem:[%s4391_s12 + $0x68] sm:$0xf0]  ;;  %v3668_v0 = vor.u32 %v3817_v59, %v3665_v61  ;;  %v3151_v5 = vld [vmem:[%s4548_s30 + $0x20] sm:$0xf] }
  0xb5   : > { %1537 = vmatpush.bf16.msra.mxu3 %v3624_v26  ;;  %v3476_v1 = vor.u32 %v3769_v62, %v3473_v63  ;;  %v3785_v2 = vld [vmem:[%s4391_s12 + $0xe4] sm:$0xf]  ;;  %v3537_v3 = vld [vmem:[%s4391_s12 + $0xe8] sm:$0xf0]  ;;  %v3691_v6 = vld [vmem:[%s4548_s30 + $0x2c] sm:$0xf0] }
  0xb6   : > { %1241 = vmatpush.bf16.msra.mxu0 %v3424_v33  ;;  %v3540_v4 = vor.u32 %v3785_v2, %v3537_v3  ;;  %v3689_v7 = vld [vmem:[%s4548_s30 + $0x24] sm:$0xf]  ;;  %v3153_v8 = vld [vmem:[%s4548_s30 + $0x30] sm:$0xf0]  ;;  %v3159_v9 = vld [vmem:[%s4548_s30 + $0x28] sm:$0xf]  ;;  %v4590_v13 = vor.u32 %v3691_v6, %v3151_v5 }
  0xb7   : > { %1340 = vmatpush.bf16.msra.mxu1 %v3488_v38  ;;  %v3692_v10 = vld [vmem:[%s4548_s30 + $0x34] sm:$0xf0]  ;;  %v3690_v11 = vld [vmem:[%s4548_s30 + $0x2c] sm:$0xf]  ;;  %v3161_v12 = vld [vmem:[%s4548_s30 + $0x38] sm:$0xf0]  ;;  %v4592_v14 = vor.u32 %v3689_v7, %v3153_v8 }
  0xb8   : > { %1439 = vmatpush.bf16.msra.mxu2 %v3552_v39  ;;  %v4594_v15 = vor.u32 %v3692_v10, %v3159_v9  ;;  %v4596_v16 = vor.u32 %v3690_v11, %v3161_v12  ;;  %v3167_v17 = vld [vmem:[%s4548_s30 + $0x40] sm:$0xf]  ;;  %v3695_v18 = vld [vmem:[%s4548_s30 + $0x4c] sm:$0xf0]  ;;  %v3693_v19 = vld [vmem:[%s4548_s30 + $0x44] sm:$0xf] }
  0xb9   : > { %1538 = vmatpush.bf16.msra.mxu3 %v3616_v43  ;;  %1242 = vmatmul.bf16.vlgmr.msra.gmra.mxu0 %v4560_v48  ;;  %v3169_v20 = vld [vmem:[%s4548_s30 + $0x50] sm:$0xf0]  ;;  %v3175_v21 = vld [vmem:[%s4548_s30 + $0x48] sm:$0xf]  ;;  %v3696_v22 = vld [vmem:[%s4548_s30 + $0x54] sm:$0xf0]  ;;  %v4610_v25 = vor.u32 %v3695_v18, %v3167_v17 }
  0xba   : > { %1341 = vmatmul.bf16.vlgmr.msra.gmra.mxu1 %v4564_v52  ;;  %1630 = vmatpush.bf16.msrb.mxu0 %v3484_v55  ;;  %v3694_v23 = vld [vmem:[%s4548_s30 + $0x4c] sm:$0xf]  ;;  %v3177_v24 = vld [vmem:[%s4548_s30 + $0x58] sm:$0xf0]  ;;  %v4612_v26 = vor.u32 %v3693_v19, %v3169_v20  ;;  %v4614_v27 = vor.u32 %v3696_v22, %v3175_v21  ;;  %v3799_v29 = vld [vmem:[%s4391_s12 + $0x154] sm:$0xf] }
  0xbb   : > { %1440 = vmatmul.bf16.vlgmr.msra.gmra.mxu2 %v4566_v53  ;;  %1729 = vmatpush.bf16.msrb.mxu1 %v3548_v56  ;;  %v4616_v28 = vor.u32 %v3694_v23, %v3177_v24  ;;  %v3593_v30 = vld [vmem:[%s4391_s12 + $0x158] sm:$0xf0]  ;;  %v3815_v31 = vld [vmem:[%s4391_s12 + $0x1d4] sm:$0xf]  ;;  %v3183_v41 = vld [vmem:[%s4548_s30 + $0x60] sm:$0xf] }
  0xbc   : > { %1828 = vmatpush.bf16.msrb.mxu2 %v3612_v46  ;;  %1539 = vmatmul.bf16.vlgmr.msra.gmra.mxu3 %v4568_v54  ;;  %v3596_v32 = vor.u32 %v3799_v29, %v3593_v30  ;;  %v3657_v33 = vld [vmem:[%s4391_s12 + $0x1d8] sm:$0xf0]  ;;  %v3767_v34 = vld [vmem:[%s4391_s12 + $0x54] sm:$0xf]  ;;  %v3699_v42 = vld [vmem:[%s4548_s30 + $0x6c] sm:$0xf0] }
  0xbd   : > { %1927 = vmatpush.bf16.msrb.mxu3 %v3676_v49  ;;  %v3465_v35 = vld [vmem:[%s4391_s12 + $0x58] sm:$0xf0]  ;;  %v3660_v36 = vor.u32 %v3815_v31, %v3657_v33  ;;  %v3783_v38 = vld [vmem:[%s4391_s12 + $0xd4] sm:$0xf]  ;;  %v3697_v43 = vld [vmem:[%s4548_s30 + $0x64] sm:$0xf]  ;;  %v4638_v50 = vor.u32 %v3699_v42, %v3183_v41 }
  0xbe   : > { %1631 = vmatpush.bf16.msrb.mxu0 %v3476_v1  ;;  %v3468_v37 = vor.u32 %v3767_v34, %v3465_v35  ;;  %v3529_v39 = vld [vmem:[%s4391_s12 + $0xd8] sm:$0xf0]  ;;  %v3185_v44 = vld [vmem:[%s4548_s30 + $0x70] sm:$0xf0]  ;;  %v3191_v45 = vld [vmem:[%s4548_s30 + $0x68] sm:$0xf] }
  0xbf   : > { %1730 = vmatpush.bf16.msrb.mxu1 %v3540_v4  ;;  %v3532_v40 = vor.u32 %v3783_v38, %v3529_v39  ;;  %v3700_v46 = vld [vmem:[%s4548_s30 + $0x74] sm:$0xf0]  ;;  %v3698_v47 = vld [vmem:[%s4548_s30 + $0x6c] sm:$0xf]  ;;  %v3193_v49 = vld [vmem:[%s4548_s30 + $0x78] sm:$0xf0]  ;;  %v4640_v51 = vor.u32 %v3697_v43, %v3185_v44 }
  0xc0   : > { %1829 = vmatpush.bf16.msrb.mxu2 %v3604_v60  ;;  %v4642_v55 = vor.u32 %v3700_v46, %v3191_v45  ;;  %v4644_v56 = vor.u32 %v3698_v47, %v3193_v49  ;;  %v3199_v57 = vld [vmem:[%s4548_s30 + $0x80] sm:$0xf]  ;;  %v3703_v58 = vld [vmem:[%s4548_s30 + $0x8c] sm:$0xf0]  ;;  %v3701_v59 = vld [vmem:[%s4548_s30 + $0x84] sm:$0xf] }
  0xc1   : > { %1928 = vmatpush.bf16.msrb.mxu3 %v3668_v0  ;;  %v3201_v60 = vld [vmem:[%s4548_s30 + $0x90] sm:$0xf0]  ;;  %v3207_v61 = vld [vmem:[%s4548_s30 + $0x88] sm:$0xf]  ;;  %v3704_v62 = vld [vmem:[%s4548_s30 + $0x94] sm:$0xf0]  ;;  %v4658_v1 = vor.u32 %v3703_v58, %v3199_v57 }
  0xc2   : > { %1632 = vmatpush.bf16.msrb.mxu0 %v3468_v37  ;;  %v3702_v63 = vld [vmem:[%s4548_s30 + $0x8c] sm:$0xf]  ;;  %v3209_v0 = vld [vmem:[%s4548_s30 + $0x98] sm:$0xf0]  ;;  %v4660_v2 = vor.u32 %v3701_v59, %v3201_v60  ;;  %v4662_v3 = vor.u32 %v3704_v62, %v3207_v61  ;;  %v3797_v5 = vld [vmem:[%s4391_s12 + $0x144] sm:$0xf] }
  0xc3   : > { %1731 = vmatpush.bf16.msrb.mxu1 %v3532_v40  ;;  %v4664_v4 = vor.u32 %v3702_v63, %v3209_v0  ;;  %v3585_v6 = vld [vmem:[%s4391_s12 + $0x148] sm:$0xf0]  ;;  %v3813_v7 = vld [vmem:[%s4391_s12 + $0x1c4] sm:$0xf]  ;;  %v3215_v11 = vld [vmem:[%s4548_s30 + $0xa0] sm:$0xf] }
  0xc4   : > { %1830 = vmatpush.bf16.msrb.mxu2 %v3596_v32  ;;  %v3588_v8 = vor.u32 %v3797_v5, %v3585_v6  ;;  %v3649_v9 = vld [vmem:[%s4391_s12 + $0x1c8] sm:$0xf0]  ;;  %v3707_v12 = vld [vmem:[%s4548_s30 + $0xac] sm:$0xf0]  ;;  %v3705_v17 = vld [vmem:[%s4548_s30 + $0xa4] sm:$0xf] }
  0xc5   : > { %1929 = vmatpush.bf16.msrb.mxu3 %v3660_v36  ;;  %v3652_v10 = vor.u32 %v3813_v7, %v3649_v9  ;;  %v3217_v18 = vld [vmem:[%s4548_s30 + $0xb0] sm:$0xf0]  ;;  %v3223_v19 = vld [vmem:[%s4548_s30 + $0xa8] sm:$0xf]  ;;  %v3708_v20 = vld [vmem:[%s4548_s30 + $0xb4] sm:$0xf0]  ;;  %v4682_v23 = vor.u32 %v3707_v12, %v3215_v11 }
  0xc6   : > { %v3706_v21 = vld [vmem:[%s4548_s30 + $0xac] sm:$0xf]  ;;  %v3225_v22 = vld [vmem:[%s4548_s30 + $0xb8] sm:$0xf0]  ;;  %v4684_v24 = vor.u32 %v3705_v17, %v3217_v18  ;;  %v4686_v29 = vor.u32 %v3708_v20, %v3223_v19  ;;  %v3765_v31 = vld [vmem:[%s4391_s12 + $0x44] sm:$0xf] }
  0xc7   : > { %v4688_v30 = vor.u32 %v3706_v21, %v3225_v22  ;;  %v3457_v32 = vld [vmem:[%s4391_s12 + $0x48] sm:$0xf0]  ;;  %v3781_v33 = vld [vmem:[%s4391_s12 + $0xc4] sm:$0xf]  ;;  %v3231_v37 = vld [vmem:[%s4548_s30 + $0xc0] sm:$0xf] }
  0xc8   : > { %1831 = vmatpush.bf16.msrb.mxu2 %v3588_v8  ;;  %v3460_v34 = vor.u32 %v3765_v31, %v3457_v32  ;;  %v3521_v35 = vld [vmem:[%s4391_s12 + $0xc8] sm:$0xf0]  ;;  %v3711_v38 = vld [vmem:[%s4548_s30 + $0xcc] sm:$0xf0]  ;;  %v3709_v39 = vld [vmem:[%s4548_s30 + $0xc4] sm:$0xf] }
  0xc9   : > { %1247 = vmatmul.bf16.gmra.mxu0 %v4590_v13  ;;  %1930 = vmatpush.bf16.msrb.mxu3 %v3652_v10  ;;  %v3524_v36 = vor.u32 %v3781_v33, %v3521_v35  ;;  %v3233_v40 = vld [vmem:[%s4548_s30 + $0xd0] sm:$0xf0]  ;;  %v3239_v41 = vld [vmem:[%s4548_s30 + $0xc8] sm:$0xf]  ;;  %v3712_v42 = vld [vmem:[%s4548_s30 + $0xd4] sm:$0xf0]  ;;  %v4706_v45 = vor.u32 %v3711_v38, %v3231_v37 }
  0xca   : > { %1346 = vmatmul.bf16.gmra.mxu1 %v4592_v14  ;;  %1633 = vmatpush.bf16.msrb.mxu0 %v3460_v34  ;;  %v3710_v43 = vld [vmem:[%s4548_s30 + $0xcc] sm:$0xf]  ;;  %v3241_v44 = vld [vmem:[%s4548_s30 + $0xd8] sm:$0xf0]  ;;  %v4708_v46 = vor.u32 %v3709_v39, %v3233_v40  ;;  %v4710_v47 = vor.u32 %v3712_v42, %v3239_v41  ;;  %v3247_v57 = vld [vmem:[%s4548_s30 + $0xe0] sm:$0xf] }
  0xcb   : > { %1445 = vmatmul.bf16.gmra.mxu2 %v4594_v15  ;;  %1732 = vmatpush.bf16.msrb.mxu1 %v3524_v36  ;;  %v4712_v49 = vor.u32 %v3710_v43, %v3241_v44  ;;  %v3715_v58 = vld [vmem:[%s4548_s30 + $0xec] sm:$0xf0]  ;;  %v3713_v59 = vld [vmem:[%s4548_s30 + $0xe4] sm:$0xf]  ;;  %v3249_v60 = vld [vmem:[%s4548_s30 + $0xf0] sm:$0xf0] }
  0xcc   : > { %1544 = vmatmul.bf16.gmra.mxu3 %v4596_v16  ;;  %v3255_v61 = vld [vmem:[%s4548_s30 + $0xe8] sm:$0xf]  ;;  %v3716_v62 = vld [vmem:[%s4548_s30 + $0xf4] sm:$0xf0]  ;;  %v3714_v63 = vld [vmem:[%s4548_s30 + $0xec] sm:$0xf]  ;;  %v4726_v5 = vor.u32 %v3715_v58, %v3247_v57  ;;  %v4728_v6 = vor.u32 %v3713_v59, %v3249_v60 }
  0xcd   : > { %v3257_v0 = vld [vmem:[%s4548_s30 + $0xf8] sm:$0xf0]  ;;  %v4730_v7 = vor.u32 %v3716_v62, %v3255_v61  ;;  %v3795_v9 = vld [vmem:[%s4391_s12 + $0x134] sm:$0xf]  ;;  %v3263_v19 = vld [vmem:[%s4548_s30 + $0x100] sm:$0xf] }
  0xce   : > { %v4732_v8 = vor.u32 %v3714_v63, %v3257_v0  ;;  %v3577_v10 = vld [vmem:[%s4391_s12 + $0x138] sm:$0xf0]  ;;  %v3811_v11 = vld [vmem:[%s4391_s12 + $0x1b4] sm:$0xf]  ;;  %v3719_v20 = vld [vmem:[%s4548_s30 + $0x10c] sm:$0xf0] }
  0xcf   : > { %v3580_v12 = vor.u32 %v3795_v9, %v3577_v10  ;;  %v3641_v17 = vld [vmem:[%s4391_s12 + $0x1b8] sm:$0xf0]  ;;  %v3717_v21 = vld [vmem:[%s4548_s30 + $0x104] sm:$0xf]  ;;  %v3265_v22 = vld [vmem:[%s4548_s30 + $0x110] sm:$0xf0]  ;;  %v4753_v38 = vor.u32 %v3719_v20, %v3263_v19 }
  0xd0   : > { %v3644_v18 = vor.u32 %v3811_v11, %v3641_v17  ;;  %v3271_v31 = vld [vmem:[%s4548_s30 + $0x108] sm:$0xf]  ;;  %v3720_v32 = vld [vmem:[%s4548_s30 + $0x114] sm:$0xf0]  ;;  %v3718_v33 = vld [vmem:[%s4548_s30 + $0x10c] sm:$0xf]  ;;  %v4756_v42 = vor.u32 %v3717_v21, %v3265_v22 }
  0xd1   : > { %1832 = vmatpush.bf16.msrb.mxu2 %v3580_v12  ;;  %v3273_v34 = vld [vmem:[%s4548_s30 + $0x118] sm:$0xf0]  ;;  %v3763_v35 = vld [vmem:[%s4391_s12 + $0x34] sm:$0xf]  ;;  %v4758_v43 = vor.u32 %v3720_v32, %v3271_v31  ;;  %v343_v0 = vld [vmem:[#allocation2 + $0xc8] sm:$0xff]  ;;  %s4220_s13 = smov (!%p3677_p1), 64  }
  0xd2   : > { %1931 = vmatpush.bf16.msrb.mxu3 %v3644_v18  ;;  %v3449_v36 = vld [vmem:[%s4391_s12 + $0x38] sm:$0xf0]  ;;  %v3779_v37 = vld [vmem:[%s4391_s12 + $0xb4] sm:$0xf]  ;;  %v4760_v58 = vor.u32 %v3718_v33, %v3273_v34  ;;  %v3279_v12 = vld [vmem:[%s4548_s30 + $0x120] sm:$0xf] }
  0xd3   : > { %v3452_v39 = vor.u32 %v3763_v35, %v3449_v36  ;;  %v3513_v40 = vld [vmem:[%s4391_s12 + $0xb8] sm:$0xf0]  ;;  %v3723_v17 = vld [vmem:[%s4548_s30 + $0x12c] sm:$0xf0]  ;;  %v3721_v18 = vld [vmem:[%s4548_s30 + $0x124] sm:$0xf] }
  0xd4   : > { %v3516_v44 = vor.u32 %v3779_v37, %v3513_v40  ;;  %5420 = vst [vmem:[#allocation20_spill] sm:$0xff] %v4760_v58  ;;  %v3281_v19 = vld [vmem:[%s4548_s30 + $0x130] sm:$0xf0]  ;;  %v3287_v20 = vld [vmem:[%s4548_s30 + $0x128] sm:$0xf]  ;;  %v4774_v34 = vor.u32 %v3723_v17, %v3279_v12  ;;  %s4222_s14 = smov (!%p3677_p1), 32  }
  0xd5   : > { %1634 = vmatpush.bf16.msrb.mxu0 %v3452_v39  ;;  %v3724_v21 = vld [vmem:[%s4548_s30 + $0x134] sm:$0xf0]  ;;  %v3722_v31 = vld [vmem:[%s4548_s30 + $0x12c] sm:$0xf]  ;;  %v3289_v32 = vld [vmem:[%s4548_s30 + $0x138] sm:$0xf0]  ;;  %v4776_v39 = vor.u32 %v3721_v18, %v3281_v19 }
  0xd6   : > { %1733 = vmatpush.bf16.msrb.mxu1 %v3516_v44  ;;  %5421 = vst [vmem:[#allocation21_spill] sm:$0xff] %v4774_v34  ;;  %v4778_v40 = vor.u32 %v3724_v21, %v3287_v20  ;;  %v3295_v17 = vld [vmem:[%s4548_s30 + $0x140] sm:$0xf]  ;;  %v3727_v18 = vld [vmem:[%s4548_s30 + $0x14c] sm:$0xf0]  ;;  %s4223_s18 = smov (!%p3677_p1), 30  }
  0xd7   : > { %5422 = vst [vmem:[#allocation22_spill] sm:$0xff] %v4776_v39  ;;  %v3725_v20 = vld [vmem:[%s4548_s30 + $0x144] sm:$0xf]  ;;  %v3297_v21 = vld [vmem:[%s4548_s30 + $0x150] sm:$0xf0]  ;;  %s4224_s7 = smov (!%p3677_p1), 68  }
  0xd8   : > { %5423 = vst [vmem:[#allocation23_spill] sm:$0xff] %v4778_v40  ;;  %s4225_s9 = smov (!%p3677_p1), 34   ;;  %s4226_s26 = smov (!%p3677_p1), 60  }
  0xd9   : > { %1252 = vmatmul.bf16.gmra.mxu0 %v4610_v25  ;;  %s4227_s11 = smov (!%p3677_p1), 102   ;;  %s4229_s27 = smov (!%p3677_p1), 90  }
  0xda   : > { %1351 = vmatmul.bf16.gmra.mxu1 %v4612_v26  ;;  %s4230_s15 = smov (!%p3677_p1), 8   ;;  %s4231_s5 = smov (!%p3677_p1), 120  }
  0xdb   : > { %1450 = vmatmul.bf16.gmra.mxu2 %v4614_v27  ;;  %s5474_s4 = sld [smem:[#allocation49_spill]] (!%p3677_p1) }
  0xdc   : > { %1549 = vmatmul.bf16.gmra.mxu3 %v4616_v28 }
  0xe9   : > { %1257 = vmatmul.bf16.gmra.mxu0 %v4638_v50 }
  0xea   : > { %1356 = vmatmul.bf16.gmra.mxu1 %v4640_v51 }
  0xeb   : > { %1455 = vmatmul.bf16.gmra.mxu2 %v4642_v55 }
  0xec   : > { %1554 = vmatmul.bf16.gmra.mxu3 %v4644_v56 }
  0xf9   : > { %1262 = vmatmul.bf16.gmra.mxu0 %v4658_v1 }
  0xfa   : > { %1361 = vmatmul.bf16.gmra.mxu1 %v4660_v2 }
  0xfb   : > { %1460 = vmatmul.bf16.gmra.mxu2 %v4662_v3 }
  0xfc   : > { %1559 = vmatmul.bf16.gmra.mxu3 %v4664_v4 }
 0x109   : > { %1267 = vmatmul.bf16.gmra.mxu0 %v4682_v23 }
 0x10a   : > { %1366 = vmatmul.bf16.gmra.mxu1 %v4684_v24 }
 0x10b   : > { %1465 = vmatmul.bf16.gmra.mxu2 %v4686_v29 }
 0x10c   : > { %1564 = vmatmul.bf16.gmra.mxu3 %v4688_v30 }
 0x119   : > { %1272 = vmatmul.bf16.gmra.mxu0 %v4706_v45 }
 0x11a   : > { %1371 = vmatmul.bf16.gmra.mxu1 %v4708_v46 }
 0x11b   : > { %1470 = vmatmul.bf16.gmra.mxu2 %v4710_v47 }
 0x11c   : > { %1569 = vmatmul.bf16.gmra.mxu3 %v4712_v49 }
 0x129   : > { %1277 = vmatmul.bf16.gmra.mxu0 %v4726_v5 }
 0x12a   : > { %1376 = vmatmul.bf16.gmra.mxu1 %v4728_v6 }
 0x12b   : > { %1475 = vmatmul.bf16.gmra.mxu2 %v4730_v7 }
 0x12c   : > { %1574 = vmatmul.bf16.gmra.mxu3 %v4732_v8 }
 0x136   : > { %v1243_v41 = vpop.f32.mrf.mxu0 }
 0x137   : > { %v1342_v57 = vpop.f32.mrf.mxu1 }
 0x138   : > { %v1343_v59 = vadd.f32 %v1342_v57, %v1243_v41  ;;  %v345_v41 = vld [vmem:[#allocation2 + $0x40] sm:$0xff]  ;;  %v4780_v57 = vor.u32 %v3722_v31, %v3289_v32  ;;  %v3728_v31 = vld [vmem:[%s4548_s30 + $0x154] sm:$0xf0]  ;;  %v3726_v32 = vld [vmem:[%s4548_s30 + $0x14c] sm:$0xf] }
 0x139   : > { %1282 = vmatmul.bf16.gmra.mxu0 %v4753_v38 }
 0x13a   : > { %1381 = vmatmul.bf16.gmra.mxu1 %v4756_v42  ;;  %5424 = vst [vmem:[#allocation24_spill] sm:$0xff] %v4780_v57 }
 0x13b   : > { %1480 = vmatmul.bf16.gmra.mxu2 %v4758_v43 }
 0x13c   : > { %1579 = vmatmul.bf16.gmra.mxu3 %v4760_v58 }
 0x13e   : > { %v1441_v60 = vpop.f32.mrf.mxu2  ;;  %v1245_v63 = vpop.f32.mrf.mxu0 }
 0x13f   : > { %v1442_v61 = vadd.f32 %v1441_v60, %v1343_v59  ;;  %v1540_v62 = vpop.f32.mrf.mxu3  ;;  %v1344_v9 = vpop.f32.mrf.mxu1 }
 0x140   : > { %v1345_v22 = vadd.f32 %v1344_v9, %v1245_v63 }
 0x141   : > { %v1541_v10 = vadd.f32 %v1540_v62, %v1442_v61 }
 0x143   : > { %v2026_v11 = vadd.f32 %v1541_v10, %v343_v0  ;;  %v347_v10 = vld [vmem:[#allocation2 + $0xe8] sm:$0xff] }
 0x145   : > { %2098 = vst [vmem:[#allocation2 + $0xc8] sm:$0xff] %v2026_v11 }
 0x146   : > { %v1443_v33 = vpop.f32.mrf.mxu2  ;;  %v1248_v37 = vpop.f32.mrf.mxu0 }
 0x147   : > { %v1444_v35 = vadd.f32 %v1443_v33, %v1345_v22  ;;  %v1542_v36 = vpop.f32.mrf.mxu3  ;;  %v1347_v44 = vpop.f32.mrf.mxu1  ;;  %v3303_v22 = vld [vmem:[%s4548_s30 + $0x148] sm:$0xf]  ;;  %v3305_v33 = vld [vmem:[%s4548_s30 + $0x158] sm:$0xf0] }
 0x148   : > { %v1348_v61 = vadd.f32 %v1347_v44, %v1248_v37  ;;  %v3569_v37 = vld [vmem:[%s4391_s12 + $0x128] sm:$0xf0]  ;;  %v4796_v44 = vor.u32 %v3727_v18, %v3295_v17  ;;  %v4808_v58 = vor.u32 %v3726_v32, %v3305_v33  ;;  %v351_v32 = vld [vmem:[#allocation2 + $0xd8] sm:$0xff] }
 0x149   : > { %v1543_v59 = vadd.f32 %v1542_v36, %v1444_v35  ;;  %1287 = vmatmul.bf16.gmra.mxu0 %v4774_v34  ;;  %v3793_v36 = vld [vmem:[%s4391_s12 + $0x124] sm:$0xf] }
 0x14a   : > { %1386 = vmatmul.bf16.gmra.mxu1 %v4776_v39  ;;  %v349_v39 = vld [vmem:[#allocation2 + $0x70] sm:$0xff] }
 0x14b   : > { %v2028_v60 = vadd.f32 %v1543_v59, %v345_v41  ;;  %1485 = vmatmul.bf16.gmra.mxu2 %v4778_v40  ;;  %v3572_v59 = vor.u32 %v3793_v36, %v3569_v37  ;;  %v3505_v40 = vld [vmem:[%s4391_s12 + $0xa8] sm:$0xf0]  ;;  %v3311_v37 = vld [vmem:[%s4548_s30 + $0x160] sm:$0xf] }
 0x14c   : > { %1584 = vmatmul.bf16.gmra.mxu3 %v4780_v57  ;;  %v4803_v57 = vor.u32 %v3728_v31, %v3303_v22 }
 0x14d   : > { %2100 = vst [vmem:[#allocation2 + $0x40] sm:$0xff] %v2028_v60  ;;  %v3809_v60 = vld [vmem:[%s4391_s12 + $0x1a4] sm:$0xf]  ;;  %1833 = vmatpush.bf16.msrb.mxu2 %v3572_v59 }
 0x14e   : > { %v1446_v62 = vpop.f32.mrf.mxu2  ;;  %v1250_v9 = vpop.f32.mrf.mxu0  ;;  %v3729_v59 = vld [vmem:[%s4548_s30 + $0x164] sm:$0xf] }
 0x14f   : > { %v1447_v63 = vadd.f32 %v1446_v62, %v1348_v61  ;;  %v1545_v0 = vpop.f32.mrf.mxu3  ;;  %v1349_v11 = vpop.f32.mrf.mxu1  ;;  %v3633_v61 = vld [vmem:[%s4391_s12 + $0x1a8] sm:$0xf0]  ;;  %v3761_v62 = vld [vmem:[%s4391_s12 + $0x24] sm:$0xf] }
 0x150   : > { %v1350_v35 = vadd.f32 %v1349_v11, %v1250_v9  ;;  %v3441_v9 = vld [vmem:[%s4391_s12 + $0x28] sm:$0xf0]  ;;  %v3777_v11 = vld [vmem:[%s4391_s12 + $0xa4] sm:$0xf] }
 0x151   : > { %v1546_v12 = vadd.f32 %v1545_v0, %v1447_v63  ;;  %v3444_v17 = vor.u32 %v3761_v62, %v3441_v9  ;;  %v3508_v18 = vor.u32 %v3777_v11, %v3505_v40  ;;  %v3732_v62 = vld [vmem:[%s4548_s30 + $0x174] sm:$0xf0] }
 0x153   : > { %v2030_v19 = vadd.f32 %v1546_v12, %v347_v10  ;;  %v4801_v12 = vor.u32 %v3725_v20, %v3297_v21  ;;  %1734 = vmatpush.bf16.msrb.mxu1 %v3508_v18  ;;  %1635 = vmatpush.bf16.msrb.mxu0 %v3444_v17 }
 0x155   : > { %2102 = vst [vmem:[#allocation2 + $0xe8] sm:$0xff] %v2030_v19  ;;  %v3636_v19 = vor.u32 %v3809_v60, %v3633_v61  ;;  %v3313_v60 = vld [vmem:[%s4548_s30 + $0x170] sm:$0xf0]  ;;  %v3319_v61 = vld [vmem:[%s4548_s30 + $0x168] sm:$0xf] }
 0x156   : > { %v1448_v41 = vpop.f32.mrf.mxu2  ;;  %v1253_v10 = vpop.f32.mrf.mxu0 }
 0x157   : > { %v1449_v63 = vadd.f32 %v1448_v41, %v1350_v35  ;;  %v1547_v0 = vpop.f32.mrf.mxu3  ;;  %v1352_v34 = vpop.f32.mrf.mxu1  ;;  %1932 = vmatpush.bf16.msrb.mxu3 %v3636_v19  ;;  %v3731_v41 = vld [vmem:[%s4548_s30 + $0x16c] sm:$0xf0] }
 0x158   : > { %v1353_v21 = vadd.f32 %v1352_v34, %v1253_v10  ;;  %v3321_v10 = vld [vmem:[%s4548_s30 + $0x178] sm:$0xf0]  ;;  %v4822_v9 = vor.u32 %v3731_v41, %v3311_v37  ;;  %v355_v41 = vld [vmem:[#allocation2 + $0x108] sm:$0xff] }
 0x159   : > { %v1548_v36 = vadd.f32 %v1547_v0, %v1449_v63  ;;  %1292 = vmatmul.bf16.gmra.mxu0 %v4796_v44  ;;  %v3730_v0 = vld [vmem:[%s4548_s30 + $0x16c] sm:$0xf] }
 0x15a   : > { %1391 = vmatmul.bf16.gmra.mxu1 %v4801_v12  ;;  %5425 = vst [vmem:[#allocation25_spill] sm:$0xff] %v4822_v9 }
 0x15b   : > { %v2032_v20 = vadd.f32 %v1548_v36, %v349_v39  ;;  %1490 = vmatmul.bf16.gmra.mxu2 %v4803_v57  ;;  %v4824_v36 = vor.u32 %v3729_v59, %v3313_v60 }
 0x15c   : > { %1589 = vmatmul.bf16.gmra.mxu3 %v4808_v58 }
 0x15d   : > { %2104 = vst [vmem:[#allocation2 + $0x70] sm:$0xff] %v2032_v20  ;;  %v4826_v20 = vor.u32 %v3732_v62, %v3319_v61  ;;  %v3327_v61 = vld [vmem:[%s4548_s30 + $0x180] sm:$0xf]  ;;  %v3735_v62 = vld [vmem:[%s4548_s30 + $0x18c] sm:$0xf0] }
 0x15e   : > { %v1451_v40 = vpop.f32.mrf.mxu2  ;;  %v1255_v39 = vpop.f32.mrf.mxu0  ;;  %5426 = vst [vmem:[#allocation26_spill] sm:$0xff] %v4824_v36 }
 0x15f   : > { %v1452_v22 = vadd.f32 %v1451_v40, %v1353_v21  ;;  %v1550_v31 = vpop.f32.mrf.mxu3  ;;  %v1354_v34 = vpop.f32.mrf.mxu1  ;;  %5427 = vst [vmem:[#allocation27_spill] sm:$0xff] %v4826_v20  ;;  %v353_v21 = vld [vmem:[#allocation2 + $0xb0] sm:$0xff] }
 0x160   : > { %v1355_v63 = vadd.f32 %v1354_v34, %v1255_v39 }
 0x161   : > { %v1551_v33 = vadd.f32 %v1550_v31, %v1452_v22  ;;  %v4828_v22 = vor.u32 %v3730_v0, %v3321_v10  ;;  %v3733_v0 = vld [vmem:[%s4548_s30 + $0x184] sm:$0xf]  ;;  %v3329_v10 = vld [vmem:[%s4548_s30 + $0x190] sm:$0xf0] }
 0x163   : > { %v2034_v35 = vadd.f32 %v1551_v33, %v351_v32  ;;  %5428 = vst [vmem:[#allocation28_spill] sm:$0xff] %v4828_v22 }
 0x165   : > { %2106 = vst [vmem:[#allocation2 + $0xd8] sm:$0xff] %v2034_v35 }
 0x166   : > { %v1453_v19 = vpop.f32.mrf.mxu2  ;;  %v1258_v18 = vpop.f32.mrf.mxu0 }
 0x167   : > { %v1454_v11 = vadd.f32 %v1453_v19, %v1355_v63  ;;  %v1552_v17 = vpop.f32.mrf.mxu3  ;;  %v1357_v40 = vpop.f32.mrf.mxu1  ;;  %v3335_v19 = vld [vmem:[%s4548_s30 + $0x188] sm:$0xf] }
 0x168   : > { %v1358_v32 = vadd.f32 %v1357_v40, %v1258_v18  ;;  %v3337_v18 = vld [vmem:[%s4548_s30 + $0x198] sm:$0xf0]  ;;  %v3791_v40 = vld [vmem:[%s4391_s12 + $0x114] sm:$0xf] }
 0x169   : > { %v1553_v31 = vadd.f32 %v1552_v17, %v1454_v11  ;;  %1297 = vmatmul.bf16.gmra.mxu0 %v4822_v9  ;;  %v3736_v11 = vld [vmem:[%s4548_s30 + $0x194] sm:$0xf0]  ;;  %v3734_v17 = vld [vmem:[%s4548_s30 + $0x18c] sm:$0xf] }
 0x16a   : > { %1396 = vmatmul.bf16.gmra.mxu1 %v4824_v36 }
 0x16b   : > { %v2036_v39 = vadd.f32 %v1553_v31, %v353_v21  ;;  %1495 = vmatmul.bf16.gmra.mxu2 %v4826_v20  ;;  %v3561_v31 = vld [vmem:[%s4391_s12 + $0x118] sm:$0xf0] }
 0x16c   : > { %1594 = vmatmul.bf16.gmra.mxu3 %v4828_v22 }
 0x16d   : > { %2108 = vst [vmem:[#allocation2 + $0xb0] sm:$0xff] %v2036_v39 }
 0x16e   : > { %v1456_v34 = vpop.f32.mrf.mxu2  ;;  %v1260_v37 = vpop.f32.mrf.mxu0 }
 0x16f   : > { %v1457_v33 = vadd.f32 %v1456_v34, %v1358_v32  ;;  %v1555_v35 = vpop.f32.mrf.mxu3  ;;  %v1359_v59 = vpop.f32.mrf.mxu1  ;;  %v4844_v32 = vor.u32 %v3735_v62, %v3327_v61  ;;  %v3564_v34 = vor.u32 %v3791_v40, %v3561_v31  ;;  %v359_v40 = vld [vmem:[#allocation2 + $0x180] sm:$0xff] }
 0x170   : > { %v1360_v21 = vadd.f32 %v1359_v59, %v1260_v37  ;;  %v4852_v59 = vor.u32 %v3734_v17, %v3337_v18 }
 0x171   : > { %v1556_v60 = vadd.f32 %v1555_v35, %v1457_v33  ;;  %5429 = vst [vmem:[#allocation29_spill] sm:$0xff] %v4844_v32  ;;  %v3807_v33 = vld [vmem:[%s4391_s12 + $0x194] sm:$0xf]  ;;  %v3625_v35 = vld [vmem:[%s4391_s12 + $0x198] sm:$0xf0]  ;;  %1834 = vmatpush.bf16.msrb.mxu2 %v3564_v34 }
 0x172   : > { %v3628_v9 = vor.u32 %v3807_v33, %v3625_v35  ;;  %5432 = vst [vmem:[#allocation32_spill] sm:$0xff] %v4852_v59  ;;  %v3343_v33 = vld [vmem:[%s4548_s30 + $0x1a0] sm:$0xf]  ;;  %v3739_v35 = vld [vmem:[%s4548_s30 + $0x1ac] sm:$0xf0] }
 0x173   : > { %v2038_v63 = vadd.f32 %v1556_v60, %v355_v41  ;;  %v4848_v41 = vor.u32 %v3733_v0, %v3329_v10  ;;  %v4850_v60 = vor.u32 %v3736_v11, %v3335_v19  ;;  %v3759_v0 = vld [vmem:[%s4391_s12 + $0x14] sm:$0xf]  ;;  %v3433_v10 = vld [vmem:[%s4391_s12 + $0x18] sm:$0xf0] }
 0x174   : > { %1933 = vmatpush.bf16.msrb.mxu3 %v3628_v9  ;;  %v3436_v11 = vor.u32 %v3759_v0, %v3433_v10  ;;  %v3775_v9 = vld [vmem:[%s4391_s12 + $0x94] sm:$0xf]  ;;  %v3353_v10 = vld [vmem:[%s4548_s30 + $0x1b8] sm:$0xf0] }
 0x175   : > { %2110 = vst [vmem:[#allocation2 + $0x108] sm:$0xff] %v2038_v63  ;;  %v357_v63 = vld [vmem:[#allocation2 + $0x1f8] sm:$0xff] }
 0x176   : > { %v1458_v39 = vpop.f32.mrf.mxu2  ;;  %v1263_v36 = vpop.f32.mrf.mxu0  ;;  %5430 = vst [vmem:[#allocation30_spill] sm:$0xff] %v4848_v41  ;;  %1636 = vmatpush.bf16.msrb.mxu0 %v3436_v11 }
 0x177   : > { %v1459_v22 = vadd.f32 %v1458_v39, %v1360_v21  ;;  %v1557_v20 = vpop.f32.mrf.mxu3  ;;  %5431 = vst [vmem:[#allocation31_spill] sm:$0xff] %v4850_v60  ;;  %v1362_v37 = vpop.f32.mrf.mxu1 }
 0x178   : > { %v1363_v21 = vadd.f32 %v1362_v37, %v1263_v36  ;;  %v3345_v37 = vld [vmem:[%s4548_s30 + $0x1b0] sm:$0xf0] }
 0x179   : > { %v1558_v61 = vadd.f32 %v1557_v20, %v1459_v22  ;;  %1302 = vmatmul.bf16.gmra.mxu0 %v4844_v32  ;;  %v3497_v20 = vld [vmem:[%s4391_s12 + $0x98] sm:$0xf0] }
 0x17a   : > { %1401 = vmatmul.bf16.gmra.mxu1 %v4848_v41  ;;  %v3500_v18 = vor.u32 %v3775_v9, %v3497_v20  ;;  %v3385_v41 = vld [vmem:[%s4548_s30 + $0x1f8] sm:$0xf0] }
 0x17b   : > { %v2040_v62 = vadd.f32 %v1558_v61, %v357_v63  ;;  %1500 = vmatmul.bf16.gmra.mxu2 %v4850_v60  ;;  %v3737_v63 = vld [vmem:[%s4548_s30 + $0x1a4] sm:$0xf]  ;;  %v3351_v61 = vld [vmem:[%s4548_s30 + $0x1a8] sm:$0xf] }
 0x17c   : > { %1599 = vmatmul.bf16.gmra.mxu3 %v4852_v59  ;;  %1735 = vmatpush.bf16.msrb.mxu1 %v3500_v18  ;;  %v4870_v59 = vor.u32 %v3739_v35, %v3343_v33  ;;  %v4872_v11 = vor.u32 %v3737_v63, %v3345_v37  ;;  %v363_v37 = vld [vmem:[#allocation2 + $0xd0] sm:$0xff] }
 0x17d   : > { %2112 = vst [vmem:[#allocation2 + $0x1f8] sm:$0xff] %v2040_v62  ;;  %v3740_v62 = vld [vmem:[%s4548_s30 + $0x1b4] sm:$0xf0] }
 0x17e   : > { %v1461_v19 = vpop.f32.mrf.mxu2  ;;  %v1265_v17 = vpop.f32.mrf.mxu0  ;;  %5433 = vst [vmem:[#allocation33_spill] sm:$0xff] %v4870_v59 }
 0x17f   : > { %v1462_v36 = vadd.f32 %v1461_v19, %v1363_v21  ;;  %v1560_v22 = vpop.f32.mrf.mxu3  ;;  %v1364_v31 = vpop.f32.mrf.mxu1  ;;  %v3738_v21 = vld [vmem:[%s4548_s30 + $0x1ac] sm:$0xf]  ;;  %5434 = vst [vmem:[#allocation34_spill] sm:$0xff] %v4872_v11 }
 0x180   : > { %v1365_v0 = vadd.f32 %v1364_v31, %v1265_v17 }
 0x181   : > { %v1561_v39 = vadd.f32 %v1560_v22, %v1462_v36  ;;  %v4874_v36 = vor.u32 %v3740_v62, %v3351_v61  ;;  %v361_v22 = vld [vmem:[#allocation2 + $0x140] sm:$0xff] }
 0x183   : > { %v2042_v34 = vadd.f32 %v1561_v39, %v359_v40  ;;  %5435 = vst [vmem:[#allocation35_spill] sm:$0xff] %v4874_v36  ;;  %v4876_v40 = vor.u32 %v3738_v21, %v3353_v10  ;;  %v3743_v21 = vld [vmem:[%s4548_s30 + $0x1cc] sm:$0xf0]  ;;  %v3741_v10 = vld [vmem:[%s4548_s30 + $0x1c4] sm:$0xf] }
 0x185   : > { %2114 = vst [vmem:[#allocation2 + $0x180] sm:$0xff] %v2042_v34 }
 0x186   : > { %v1463_v19 = vpop.f32.mrf.mxu2  ;;  %v1268_v60 = vpop.f32.mrf.mxu0  ;;  %5436 = vst [vmem:[#allocation36_spill] sm:$0xff] %v4876_v40 }
 0x187   : > { %v1464_v9 = vadd.f32 %v1463_v19, %v1365_v0  ;;  %v1562_v20 = vpop.f32.mrf.mxu3  ;;  %v1367_v18 = vpop.f32.mrf.mxu1  ;;  %v3359_v0 = vld [vmem:[%s4548_s30 + $0x1c0] sm:$0xf]  ;;  %v3361_v19 = vld [vmem:[%s4548_s30 + $0x1d0] sm:$0xf0] }
 0x188   : > { %v1368_v31 = vadd.f32 %v1367_v18, %v1268_v60  ;;  %v3742_v18 = vld [vmem:[%s4548_s30 + $0x1cc] sm:$0xf] }
 0x189   : > { %v1563_v39 = vadd.f32 %v1562_v20, %v1464_v9  ;;  %1307 = vmatmul.bf16.gmra.mxu0 %v4870_v59  ;;  %v3367_v9 = vld [vmem:[%s4548_s30 + $0x1c8] sm:$0xf]  ;;  %v3744_v20 = vld [vmem:[%s4548_s30 + $0x1d4] sm:$0xf0]  ;;  %v3746_v59 = vld [vmem:[%s4548_s30 + $0x1ec] sm:$0xf] }
 0x18a   : > { %1406 = vmatmul.bf16.gmra.mxu1 %v4872_v11 }
 0x18b   : > { %v2044_v17 = vadd.f32 %v1563_v39, %v361_v22  ;;  %1505 = vmatmul.bf16.gmra.mxu2 %v4874_v36  ;;  %v3369_v39 = vld [vmem:[%s4548_s30 + $0x1d8] sm:$0xf0] }
 0x18c   : > { %1604 = vmatmul.bf16.gmra.mxu3 %v4876_v40  ;;  %v4890_v40 = vor.u32 %v3743_v21, %v3359_v0  ;;  %v3789_v21 = vld [vmem:[%s4391_s12 + $0x104] sm:$0xf] }
 0x18d   : > { %2116 = vst [vmem:[#allocation2 + $0x140] sm:$0xff] %v2044_v17 }
 0x18e   : > { %v1466_v34 = vpop.f32.mrf.mxu2  ;;  %v1270_v63 = vpop.f32.mrf.mxu0  ;;  %5437 = vst [vmem:[#allocation37_spill] sm:$0xff] %v4890_v40 }
 0x18f   : > { %v1467_v33 = vadd.f32 %v1466_v34, %v1368_v31  ;;  %v1565_v35 = vpop.f32.mrf.mxu3  ;;  %v1369_v61 = vpop.f32.mrf.mxu1 }
 0x190   : > { %v1370_v22 = vadd.f32 %v1369_v61, %v1270_v63  ;;  %v4896_v63 = vor.u32 %v3742_v18, %v3369_v39  ;;  %v3757_v18 = vld [vmem:[%s4391_s12 + $0x4] sm:$0xf] }
 0x191   : > { %v1566_v62 = vadd.f32 %v1565_v35, %v1467_v33  ;;  %v4892_v33 = vor.u32 %v3741_v10, %v3361_v19  ;;  %v4894_v35 = vor.u32 %v3744_v20, %v3367_v9  ;;  %v3553_v10 = vld [vmem:[%s4391_s12 + $0x108] sm:$0xf0]  ;;  %v3805_v20 = vld [vmem:[%s4391_s12 + $0x184] sm:$0xf] }
 0x192   : > { %5440 = vst [vmem:[#allocation40_spill] sm:$0xff] %v4896_v63  ;;  %v3556_v9 = vor.u32 %v3789_v21, %v3553_v10 }
 0x193   : > { %v2046_v60 = vadd.f32 %v1566_v62, %v363_v37  ;;  %5438 = vst [vmem:[#allocation38_spill] sm:$0xff] %v4892_v33  ;;  %v365_v37 = vld [vmem:[#allocation2 + $0x60] sm:$0xff] }
 0x194   : > { %5439 = vst [vmem:[#allocation39_spill] sm:$0xff] %v4894_v35  ;;  %1835 = vmatpush.bf16.msrb.mxu2 %v3556_v9 }
 0x195   : > { %2118 = vst [vmem:[#allocation2 + $0xd0] sm:$0xff] %v2046_v60 }
 0x196   : > { %v1468_v17 = vpop.f32.mrf.mxu2  ;;  %v1273_v36 = vpop.f32.mrf.mxu0 }
 0x197   : > { %v1469_v31 = vadd.f32 %v1468_v17, %v1370_v22  ;;  %v1567_v34 = vpop.f32.mrf.mxu3  ;;  %v1372_v62 = vpop.f32.mrf.mxu1  ;;  %v3617_v22 = vld [vmem:[%s4391_s12 + $0x188] sm:$0xf0] }
 0x198   : > { %v1373_v0 = vadd.f32 %v1372_v62, %v1273_v36  ;;  %v3489_v62 = vld [vmem:[%s4391_s12 + $0x88] sm:$0xf0] }
 0x199   : > { %v1568_v61 = vadd.f32 %v1567_v34, %v1469_v31  ;;  %1312 = vmatmul.bf16.gmra.mxu0 %v4890_v40  ;;  %v3620_v31 = vor.u32 %v3805_v20, %v3617_v22  ;;  %v3425_v34 = vld [vmem:[%s4391_s12 + $0x8] sm:$0xf0]  ;;  %v3375_v20 = vld [vmem:[%s4548_s30 + $0x1e0] sm:$0xf]  ;;  %v3747_v22 = vld [vmem:[%s4548_s30 + $0x1ec] sm:$0xf0] }
 0x19a   : > { %1411 = vmatmul.bf16.gmra.mxu1 %v4892_v33  ;;  %v3428_v21 = vor.u32 %v3757_v18, %v3425_v34  ;;  %v3383_v33 = vld [vmem:[%s4548_s30 + $0x1e8] sm:$0xf]  ;;  %v3748_v40 = vld [vmem:[%s4548_s30 + $0x1f4] sm:$0xf0]  ;;  %v4918_v32 = vor.u32 %v3747_v22, %v3375_v20  ;;  %v3749_v20 = vld [vmem:[%s4548_s30 + $0x204] sm:$0xf] }
 0x19b   : > { %v2048_v60 = vadd.f32 %v1568_v61, %v365_v37  ;;  %1510 = vmatmul.bf16.gmra.mxu2 %v4894_v35  ;;  %v3773_v37 = vld [vmem:[%s4391_s12 + $0x84] sm:$0xf]  ;;  %v367_v61 = vld [vmem:[#allocation2 + $0x88] sm:$0xff]  ;;  %1934 = vmatpush.bf16.msrb.mxu3 %v3620_v31  ;;  %v3377_v35 = vld [vmem:[%s4548_s30 + $0x1f0] sm:$0xf0]  ;;  %v4922_v31 = vor.u32 %v3748_v40, %v3383_v33 }
 0x19c   : > { %1609 = vmatmul.bf16.gmra.mxu3 %v4896_v63  ;;  %v3492_v10 = vor.u32 %v3773_v37, %v3489_v62  ;;  %1637 = vmatpush.bf16.msrb.mxu0 %v3428_v21  ;;  %v3745_v63 = vld [vmem:[%s4548_s30 + $0x1e4] sm:$0xf]  ;;  %v369_v37 = vld [vmem:[#allocation2 + $0x188] sm:$0xff]  ;;  %v3393_v22 = vld [vmem:[%s4548_s30 + $0x210] sm:$0xf0] }
 0x19d   : > { %2120 = vst [vmem:[#allocation2 + $0x60] sm:$0xff] %v2048_v60  ;;  %v371_v33 = vld [vmem:[#allocation2 + $0x1a8] sm:$0xff] }
 0x19e   : > { %v1471_v19 = vpop.f32.mrf.mxu2  ;;  %v1275_v36 = vpop.f32.mrf.mxu0  ;;  %1736 = vmatpush.bf16.msrb.mxu1 %v3492_v10  ;;  %5441 = vst [vmem:[#allocation41_spill] sm:$0xff] %v4922_v31 }
 0x19f   : > { %v1472_v39 = vadd.f32 %v1471_v19, %v1373_v0  ;;  %v1570_v17 = vpop.f32.mrf.mxu3  ;;  %v1374_v60 = vpop.f32.mrf.mxu1 }
 0x1a0   : > { %v1375_v11 = vadd.f32 %v1374_v60, %v1275_v36 }
 0x1a1   : > { %v1571_v0 = vadd.f32 %v1570_v17, %v1472_v39  ;;  %v4920_v17 = vor.u32 %v3745_v63, %v3377_v35 }
 0x1a3   : > { %v2050_v19 = vadd.f32 %v1571_v0, %v367_v61  ;;  %v4924_v61 = vor.u32 %v3746_v59, %v3385_v41  ;;  %v3391_v0 = vld [vmem:[%s4548_s30 + $0x200] sm:$0xf] }
 0x1a5   : > { %2122 = vst [vmem:[#allocation2 + $0x88] sm:$0xff] %v2050_v19  ;;  %v3751_v19 = vld [vmem:[%s4548_s30 + $0x20c] sm:$0xf0] }
 0x1a6   : > { %v1473_v9 = vpop.f32.mrf.mxu2  ;;  %v1278_v39 = vpop.f32.mrf.mxu0  ;;  %5442 = vst [vmem:[#allocation42_spill] sm:$0xff] %v4924_v61 }
 0x1a7   : > { %v1474_v18 = vadd.f32 %v1473_v9, %v1375_v11  ;;  %v1572_v34 = vpop.f32.mrf.mxu3  ;;  %v1377_v62 = vpop.f32.mrf.mxu1  ;;  %v3399_v9 = vld [vmem:[%s4548_s30 + $0x208] sm:$0xf] }
 0x1a8   : > { %v1378_v60 = vadd.f32 %v1377_v62, %v1278_v39  ;;  %v3750_v39 = vld [vmem:[%s4548_s30 + $0x20c] sm:$0xf] }
 0x1a9   : > { %v1573_v21 = vadd.f32 %v1572_v34, %v1474_v18  ;;  %1317 = vmatmul.bf16.gmra.mxu0 %v4918_v32  ;;  %v3752_v18 = vld [vmem:[%s4548_s30 + $0x214] sm:$0xf0] }
 0x1aa   : > { %1416 = vmatmul.bf16.gmra.mxu1 %v4920_v17 }
 0x1ab   : > { %v2052_v36 = vadd.f32 %v1573_v21, %v369_v37  ;;  %1515 = vmatmul.bf16.gmra.mxu2 %v4922_v31  ;;  %v3401_v37 = vld [vmem:[%s4548_s30 + $0x218] sm:$0xf0]  ;;  %v4938_v21 = vor.u32 %v3751_v19, %v3391_v0 }
 0x1ac   : > { %1614 = vmatmul.bf16.gmra.mxu3 %v4924_v61  ;;  %v4940_v61 = vor.u32 %v3749_v20, %v3393_v22  ;;  %v375_v22 = vld [vmem:[#allocation2 + $0x80] sm:$0xff] }
 0x1ad   : > { %2124 = vst [vmem:[#allocation2 + $0x188] sm:$0xff] %v2052_v36 }
 0x1ae   : > { %v1476_v41 = vpop.f32.mrf.mxu2  ;;  %v1280_v40 = vpop.f32.mrf.mxu0  ;;  %5443 = vst [vmem:[#allocation43_spill] sm:$0xff] %v4938_v21 }
 0x1af   : > { %v1477_v59 = vadd.f32 %v1476_v41, %v1378_v60  ;;  %v1575_v11 = vpop.f32.mrf.mxu3  ;;  %v1379_v35 = vpop.f32.mrf.mxu1  ;;  %5444 = vst [vmem:[#allocation44_spill] sm:$0xff] %v4940_v61 }
 0x1b0   : > { %v1380_v34 = vadd.f32 %v1379_v35, %v1280_v40 }
 0x1b1   : > { %v1576_v63 = vadd.f32 %v1575_v11, %v1477_v59  ;;  %v4942_v59 = vor.u32 %v3752_v18, %v3399_v9  ;;  %v373_v11 = vld [vmem:[#allocation2 + $0x1e8] sm:$0xff] }
 0x1b3   : > { %v2054_v10 = vadd.f32 %v1576_v63, %v371_v33  ;;  %5445 = vst [vmem:[#allocation45_spill] sm:$0xff] %v4942_v59  ;;  %v4944_v63 = vor.u32 %v3750_v39, %v3401_v37  ;;  %v3755_v39 = vld [vmem:[%s4548_s30 + $0x22c] sm:$0xf0]  ;;  %v3753_v37 = vld [vmem:[%s4548_s30 + $0x224] sm:$0xf] }
 0x1b5   : > { %2126 = vst [vmem:[#allocation2 + $0x1a8] sm:$0xff] %v2054_v10 }
 0x1b6   : > { %v1478_v62 = vpop.f32.mrf.mxu2  ;;  %v1283_v41 = vpop.f32.mrf.mxu0  ;;  %5446 = vst [vmem:[#allocation46_spill] sm:$0xff] %v4944_v63 }
 0x1b7   : > { %v1479_v36 = vadd.f32 %v1478_v62, %v1380_v34  ;;  %v1577_v60 = vpop.f32.mrf.mxu3  ;;  %v1382_v33 = vpop.f32.mrf.mxu1  ;;  %v3407_v34 = vld [vmem:[%s4548_s30 + $0x220] sm:$0xf]  ;;  %v3409_v62 = vld [vmem:[%s4548_s30 + $0x230] sm:$0xf0] }
 0x1b8   : > { %v1383_v35 = vadd.f32 %v1382_v33, %v1283_v41  ;;  %v3417_v33 = vld [vmem:[%s4548_s30 + $0x238] sm:$0xf0] }
 0x1b9   : > { %v1578_v31 = vadd.f32 %v1577_v60, %v1479_v36  ;;  %1322 = vmatmul.bf16.gmra.mxu0 %v4938_v21  ;;  %v3415_v36 = vld [vmem:[%s4548_s30 + $0x228] sm:$0xf]  ;;  %v3756_v60 = vld [vmem:[%s4548_s30 + $0x234] sm:$0xf0] }
 0x1ba   : > { %1421 = vmatmul.bf16.gmra.mxu1 %v4940_v61  ;;  %v4960_v61 = vor.u32 %v3753_v37, %v3409_v62  ;;  %v379_v62 = vld [vmem:[#allocation2 + $0x198] sm:$0xff] }
 0x1bb   : > { %v2056_v40 = vadd.f32 %v1578_v31, %v373_v11  ;;  %1520 = vmatmul.bf16.gmra.mxu2 %v4942_v59  ;;  %v3754_v11 = vld [vmem:[%s4548_s30 + $0x22c] sm:$0xf] }
 0x1bc   : > { %1619 = vmatmul.bf16.gmra.mxu3 %v4944_v63  ;;  %v4958_v63 = vor.u32 %v3755_v39, %v3407_v34 }
 0x1bd   : > { %2128 = vst [vmem:[#allocation2 + $0x1e8] sm:$0xff] %v2056_v40 }
 0x1be   : > { %v1481_v10 = vpop.f32.mrf.mxu2  ;;  %v1285_v20 = vpop.f32.mrf.mxu0 }
 0x1bf   : > { %v1482_v0 = vadd.f32 %v1481_v10, %v1383_v35  ;;  %v1580_v19 = vpop.f32.mrf.mxu3  ;;  %v1384_v31 = vpop.f32.mrf.mxu1 }
 0x1c0   : > { %v1385_v41 = vadd.f32 %v1384_v31, %v1285_v20 }
 0x1c1   : > { %v1581_v9 = vadd.f32 %v1580_v19, %v1482_v0  ;;  %v4962_v0 = vor.u32 %v3756_v60, %v3415_v36  ;;  %v377_v19 = vld [vmem:[#allocation2 + $0x78] sm:$0xff] }
 0x1c3   : > { %v2058_v18 = vadd.f32 %v1581_v9, %v375_v22  ;;  %v4964_v9 = vor.u32 %v3754_v11, %v3417_v33 }
 0x1c5   : > { %2130 = vst [vmem:[#allocation2 + $0x80] sm:$0xff] %v2058_v18 }
 0x1c6   : > { %v1483_v40 = vpop.f32.mrf.mxu2  ;;  %v1288_v59 = vpop.f32.mrf.mxu0 }
 0x1c7   : > { %v1484_v35 = vadd.f32 %v1483_v40, %v1385_v41  ;;  %v1582_v10 = vpop.f32.mrf.mxu3  ;;  %v1387_v22 = vpop.f32.mrf.mxu1 }
 0x1c8   : > { %v1388_v31 = vadd.f32 %v1387_v22, %v1288_v59 }
 0x1c9   : > { %v1583_v21 = vadd.f32 %v1582_v10, %v1484_v35  ;;  %1327 = vmatmul.bf16.gmra.mxu0 %v4958_v63  ;;  %v381_v35 = vld [vmem:[#allocation2 + $0x1e0] sm:$0xff] }
 0x1ca   : > { %1426 = vmatmul.bf16.gmra.mxu1 %v4960_v61 }
 0x1cb   : > { %v2060_v20 = vadd.f32 %v1583_v21, %v377_v19  ;;  %1525 = vmatmul.bf16.gmra.mxu2 %v4962_v0 }
 0x1cc   : > { %1624 = vmatmul.bf16.gmra.mxu3 %v4964_v9 }
 0x1cd   : > { %2132 = vst [vmem:[#allocation2 + $0x78] sm:$0xff] %v2060_v20 }
 0x1ce   : > { %v1486_v18 = vpop.f32.mrf.mxu2  ;;  %v1290_v37 = vpop.f32.mrf.mxu0 }
 0x1cf   : > { %v1487_v34 = vadd.f32 %v1486_v18, %v1388_v31  ;;  %v1585_v39 = vpop.f32.mrf.mxu3  ;;  %v1389_v36 = vpop.f32.mrf.mxu1 }
 0x1d0   : > { %v1390_v11 = vadd.f32 %v1389_v36, %v1290_v37  ;;  %v383_v37 = vld [vmem:[#allocation2 + $0x48] sm:$0xff] }
 0x1d1   : > { %v1586_v60 = vadd.f32 %v1585_v39, %v1487_v34 }
 0x1d3   : > { %v2062_v41 = vadd.f32 %v1586_v60, %v379_v62 }
 0x1d5   : > { %2134 = vst [vmem:[#allocation2 + $0x198] sm:$0xff] %v2062_v41 }
 0x1d6   : > { %v1488_v33 = vpop.f32.mrf.mxu2  ;;  %v1293_v40 = vpop.f32.mrf.mxu0 }
 0x1d7   : > { %v1489_v21 = vadd.f32 %v1488_v33, %v1390_v11  ;;  %v1587_v59 = vpop.f32.mrf.mxu3  ;;  %v1392_v10 = vpop.f32.mrf.mxu1 }
 0x1d8   : > { %v1393_v20 = vadd.f32 %v1392_v10, %v1293_v40 }
 0x1d9   : > { %v1588_v19 = vadd.f32 %v1587_v59, %v1489_v21  ;;  %1638 = vmatmul.bf16.vlgmr.msrb.gmra.mxu0 %v4560_v48 }
 0x1da   : > { %1737 = vmatmul.bf16.vlgmr.msrb.gmra.mxu1 %v4564_v52  ;;  %v385_v52 = vld [vmem:[#allocation2 + $0x238] sm:$0xff] }
 0x1db   : > { %v2064_v22 = vadd.f32 %v1588_v19, %v381_v35  ;;  %1836 = vmatmul.bf16.vlgmr.msrb.gmra.mxu2 %v4566_v53 }
 0x1dc   : > { %1935 = vmatmul.bf16.vlgmr.msrb.gmra.mxu3 %v4568_v54 }
 0x1dd   : > { %2136 = vst [vmem:[#allocation2 + $0x1e0] sm:$0xff] %v2064_v22 }
 0x1de   : > { %v1491_v31 = vpop.f32.mrf.mxu2  ;;  %v1295_v39 = vpop.f32.mrf.mxu0 }
 0x1df   : > { %v1492_v18 = vadd.f32 %v1491_v31, %v1393_v20  ;;  %v1590_v34 = vpop.f32.mrf.mxu3  ;;  %v1394_v62 = vpop.f32.mrf.mxu1  ;;  %v387_v20 = vld [vmem:[#allocation2 + $0x50] sm:$0xff] }
 0x1e0   : > { %v1395_v41 = vadd.f32 %v1394_v62, %v1295_v39 }
 0x1e1   : > { %v1591_v36 = vadd.f32 %v1590_v34, %v1492_v18 }
 0x1e3   : > { %v2066_v60 = vadd.f32 %v1591_v36, %v383_v37 }
 0x1e5   : > { %2138 = vst [vmem:[#allocation2 + $0x48] sm:$0xff] %v2066_v60 }
 0x1e6   : > { %v1493_v48 = vpop.f32.mrf.mxu2  ;;  %v1298_v21 = vpop.f32.mrf.mxu0 }
 0x1e7   : > { %v1494_v11 = vadd.f32 %v1493_v48, %v1395_v41  ;;  %v1592_v33 = vpop.f32.mrf.mxu3  ;;  %v1397_v59 = vpop.f32.mrf.mxu1 }
 0x1e8   : > { %v1398_v40 = vadd.f32 %v1397_v59, %v1298_v21 }
 0x1e9   : > { %v1593_v53 = vadd.f32 %v1592_v33, %v1494_v11  ;;  %1643 = vmatmul.bf16.gmra.mxu0 %v4590_v13 }
 0x1ea   : > { %1742 = vmatmul.bf16.gmra.mxu1 %v4592_v14  ;;  %v389_v14 = vld [vmem:[#allocation2 + $0x30] sm:$0xff] }
 0x1eb   : > { %v2068_v54 = vadd.f32 %v1593_v53, %v385_v52  ;;  %1841 = vmatmul.bf16.gmra.mxu2 %v4594_v15  ;;  %v391_v52 = vld [vmem:[#allocation2 + $0x90] sm:$0xff] }
 0x1ec   : > { %1940 = vmatmul.bf16.gmra.mxu3 %v4596_v16 }
 0x1ed   : > { %2140 = vst [vmem:[#allocation2 + $0x238] sm:$0xff] %v2068_v54 }
 0x1ee   : > { %v1496_v35 = vpop.f32.mrf.mxu2  ;;  %v1300_v22 = vpop.f32.mrf.mxu0 }
 0x1ef   : > { %v1497_v10 = vadd.f32 %v1496_v35, %v1398_v40  ;;  %v1595_v19 = vpop.f32.mrf.mxu3  ;;  %v1399_v31 = vpop.f32.mrf.mxu1 }
 0x1f0   : > { %v1400_v39 = vadd.f32 %v1399_v31, %v1300_v22 }
 0x1f1   : > { %v1596_v18 = vadd.f32 %v1595_v19, %v1497_v10 }
 0x1f3   : > { %v2070_v34 = vadd.f32 %v1596_v18, %v387_v20 }
 0x1f5   : > { %2142 = vst [vmem:[#allocation2 + $0x50] sm:$0xff] %v2070_v34 }
 0x1f6   : > { %v1498_v13 = vpop.f32.mrf.mxu2  ;;  %v1303_v36 = vpop.f32.mrf.mxu0 }
 0x1f7   : > { %v1499_v37 = vadd.f32 %v1498_v13, %v1400_v39  ;;  %v1597_v62 = vpop.f32.mrf.mxu3  ;;  %v1402_v60 = vpop.f32.mrf.mxu1  ;;  %v395_v13 = vld [vmem:[#allocation2 + $0x1d8] sm:$0xff] }
 0x1f8   : > { %v1403_v41 = vadd.f32 %v1402_v60, %v1303_v36 }
 0x1f9   : > { %v1598_v15 = vadd.f32 %v1597_v62, %v1499_v37  ;;  %1648 = vmatmul.bf16.gmra.mxu0 %v4610_v25 }
 0x1fa   : > { %1747 = vmatmul.bf16.gmra.mxu1 %v4612_v26  ;;  %v393_v26 = vld [vmem:[#allocation2 + $0x68] sm:$0xff] }
 0x1fb   : > { %v2072_v16 = vadd.f32 %v1598_v15, %v389_v14  ;;  %1846 = vmatmul.bf16.gmra.mxu2 %v4614_v27 }
 0x1fc   : > { %1945 = vmatmul.bf16.gmra.mxu3 %v4616_v28 }
 0x1fd   : > { %2144 = vst [vmem:[#allocation2 + $0x30] sm:$0xff] %v2072_v16 }
 0x1fe   : > { %v1501_v48 = vpop.f32.mrf.mxu2  ;;  %v1305_v21 = vpop.f32.mrf.mxu0 }
 0x1ff   : > { %v1502_v11 = vadd.f32 %v1501_v48, %v1403_v41  ;;  %v1600_v33 = vpop.f32.mrf.mxu3  ;;  %v1404_v59 = vpop.f32.mrf.mxu1 }
 0x200   : > { %v1405_v40 = vadd.f32 %v1404_v59, %v1305_v21  ;;  %v399_v59 = vld [vmem:[#allocation2 + $0x10] sm:$0xff] }
 0x201   : > { %v1601_v53 = vadd.f32 %v1600_v33, %v1502_v11 }
 0x203   : > { %v2074_v54 = vadd.f32 %v1601_v53, %v391_v52 }
 0x205   : > { %2146 = vst [vmem:[#allocation2 + $0x90] sm:$0xff] %v2074_v54 }
 0x206   : > { %v1503_v25 = vpop.f32.mrf.mxu2  ;;  %v1308_v19 = vpop.f32.mrf.mxu0 }
 0x207   : > { %v1504_v35 = vadd.f32 %v1503_v25, %v1405_v40  ;;  %v1602_v10 = vpop.f32.mrf.mxu3  ;;  %v1407_v22 = vpop.f32.mrf.mxu1 }
 0x208   : > { %v1408_v20 = vadd.f32 %v1407_v22, %v1308_v19 }
 0x209   : > { %v1603_v27 = vadd.f32 %v1602_v10, %v1504_v35  ;;  %1653 = vmatmul.bf16.gmra.mxu0 %v4638_v50 }
 0x20a   : > { %1752 = vmatmul.bf16.gmra.mxu1 %v4640_v51  ;;  %v397_v51 = vld [vmem:[#allocation2 + $0x218] sm:$0xff] }
 0x20b   : > { %v2076_v28 = vadd.f32 %v1603_v27, %v393_v26  ;;  %1851 = vmatmul.bf16.gmra.mxu2 %v4642_v55 }
 0x20c   : > { %1950 = vmatmul.bf16.gmra.mxu3 %v4644_v56 }
 0x20d   : > { %2148 = vst [vmem:[#allocation2 + $0x68] sm:$0xff] %v2076_v28 }
 0x20e   : > { %v1506_v31 = vpop.f32.mrf.mxu2  ;;  %v1310_v39 = vpop.f32.mrf.mxu0 }
 0x20f   : > { %v1507_v18 = vadd.f32 %v1506_v31, %v1408_v20  ;;  %v1605_v34 = vpop.f32.mrf.mxu3  ;;  %v1409_v37 = vpop.f32.mrf.mxu1 }
 0x210   : > { %v1410_v14 = vadd.f32 %v1409_v37, %v1310_v39 }
 0x211   : > { %v1606_v62 = vadd.f32 %v1605_v34, %v1507_v18  ;;  %v403_v18 = vld [vmem:[#allocation2 + $0x210] sm:$0xff] }
 0x213   : > { %v2078_v36 = vadd.f32 %v1606_v62, %v395_v13 }
 0x215   : > { %2150 = vst [vmem:[#allocation2 + $0x1d8] sm:$0xff] %v2078_v36 }
 0x216   : > { %v1508_v50 = vpop.f32.mrf.mxu2  ;;  %v1313_v16 = vpop.f32.mrf.mxu0 }
 0x217   : > { %v1509_v60 = vadd.f32 %v1508_v50, %v1410_v14  ;;  %v1607_v15 = vpop.f32.mrf.mxu3  ;;  %v1412_v41 = vpop.f32.mrf.mxu1 }
 0x218   : > { %v1413_v48 = vadd.f32 %v1412_v41, %v1313_v16 }
 0x219   : > { %v1608_v55 = vadd.f32 %v1607_v15, %v1509_v60  ;;  %1658 = vmatmul.bf16.gmra.mxu0 %v4658_v1 }
 0x21a   : > { %1757 = vmatmul.bf16.gmra.mxu1 %v4660_v2  ;;  %v401_v2 = vld [vmem:[#allocation2 + $0x178] sm:$0xff] }
 0x21b   : > { %v2080_v56 = vadd.f32 %v1608_v55, %v397_v51  ;;  %1856 = vmatmul.bf16.gmra.mxu2 %v4662_v3  ;;  %v407_v55 = vld [vmem:[#allocation2 + $0x1a0] sm:$0xff] }
 0x21c   : > { %1955 = vmatmul.bf16.gmra.mxu3 %v4664_v4 }
 0x21d   : > { %2152 = vst [vmem:[#allocation2 + $0x218] sm:$0xff] %v2080_v56 }
 0x21e   : > { %v1511_v11 = vpop.f32.mrf.mxu2  ;;  %v1315_v52 = vpop.f32.mrf.mxu0 }
 0x21f   : > { %v1512_v33 = vadd.f32 %v1511_v11, %v1413_v48  ;;  %v1610_v21 = vpop.f32.mrf.mxu3  ;;  %v1414_v53 = vpop.f32.mrf.mxu1 }
 0x220   : > { %v1415_v25 = vadd.f32 %v1414_v53, %v1315_v52 }
 0x221   : > { %v1611_v54 = vadd.f32 %v1610_v21, %v1512_v33 }
 0x223   : > { %v2082_v40 = vadd.f32 %v1611_v54, %v399_v59 }
 0x225   : > { %2154 = vst [vmem:[#allocation2 + $0x10] sm:$0xff] %v2082_v40 }
 0x226   : > { %v1513_v1 = vpop.f32.mrf.mxu2  ;;  %v1318_v19 = vpop.f32.mrf.mxu0 }
 0x227   : > { %v1514_v35 = vadd.f32 %v1513_v1, %v1415_v25  ;;  %v1612_v10 = vpop.f32.mrf.mxu3  ;;  %v1417_v26 = vpop.f32.mrf.mxu1 }
 0x228   : > { %v1418_v22 = vadd.f32 %v1417_v26, %v1318_v19 }
 0x229   : > { %v1613_v3 = vadd.f32 %v1612_v10, %v1514_v35  ;;  %1663 = vmatmul.bf16.gmra.mxu0 %v4682_v23  ;;  %v411_v10 = vld [vmem:[#allocation2 + $0x148] sm:$0xff] }
 0x22a   : > { %1762 = vmatmul.bf16.gmra.mxu1 %v4684_v24  ;;  %v405_v24 = vld [vmem:[#allocation2 + $0x168] sm:$0xff] }
 0x22b   : > { %v2084_v4 = vadd.f32 %v1613_v3, %v401_v2  ;;  %1861 = vmatmul.bf16.gmra.mxu2 %v4686_v29 }
 0x22c   : > { %1960 = vmatmul.bf16.gmra.mxu3 %v4688_v30 }
 0x22d   : > { %2156 = vst [vmem:[#allocation2 + $0x178] sm:$0xff] %v2084_v4 }
 0x22e   : > { %v1516_v27 = vpop.f32.mrf.mxu2  ;;  %v1320_v31 = vpop.f32.mrf.mxu0 }
 0x22f   : > { %v1517_v28 = vadd.f32 %v1516_v27, %v1418_v22  ;;  %v1615_v20 = vpop.f32.mrf.mxu3  ;;  %v1419_v34 = vpop.f32.mrf.mxu1 }
 0x230   : > { %v1420_v37 = vadd.f32 %v1419_v34, %v1320_v31  ;;  %v5447_v31 = vld [vmem:[#allocation20_spill] sm:$0xff] }
 0x231   : > { %v1616_v39 = vadd.f32 %v1615_v20, %v1517_v28 }
 0x233   : > { %v2086_v13 = vadd.f32 %v1616_v39, %v403_v18 }
 0x235   : > { %2158 = vst [vmem:[#allocation2 + $0x210] sm:$0xff] %v2086_v13 }
 0x236   : > { %v1518_v23 = vpop.f32.mrf.mxu2  ;;  %v1323_v14 = vpop.f32.mrf.mxu0 }
 0x237   : > { %v1519_v62 = vadd.f32 %v1518_v23, %v1420_v37  ;;  %v1617_v36 = vpop.f32.mrf.mxu3  ;;  %v1422_v50 = vpop.f32.mrf.mxu1  ;;  %v344_v37 = vld [vmem:[#allocation2 + $0x8] sm:$0xff] }
 0x238   : > { %v1423_v60 = vadd.f32 %v1422_v50, %v1323_v14 }
 0x239   : > { %v1618_v29 = vadd.f32 %v1617_v36, %v1519_v62  ;;  %1668 = vmatmul.bf16.gmra.mxu0 %v4706_v45 }
 0x23a   : > { %1767 = vmatmul.bf16.gmra.mxu1 %v4708_v46  ;;  %v409_v46 = vld [vmem:[#allocation2 + $0x118] sm:$0xff] }
 0x23b   : > { %v2088_v30 = vadd.f32 %v1618_v29, %v405_v24  ;;  %1866 = vmatmul.bf16.gmra.mxu2 %v4710_v47 }
 0x23c   : > { %1965 = vmatmul.bf16.gmra.mxu3 %v4712_v49 }
 0x23d   : > { %2160 = vst [vmem:[#allocation2 + $0x168] sm:$0xff] %v2088_v30 }
 0x23e   : > { %v1521_v15 = vpop.f32.mrf.mxu2  ;;  %v1325_v41 = vpop.f32.mrf.mxu0 }
 0x23f   : > { %v1522_v16 = vadd.f32 %v1521_v15, %v1423_v60  ;;  %v1620_v51 = vpop.f32.mrf.mxu3  ;;  %v1424_v56 = vpop.f32.mrf.mxu1  ;;  %v5448_v60 = vld [vmem:[#allocation21_spill] sm:$0xff] }
 0x240   : > { %v1425_v33 = vadd.f32 %v1424_v56, %v1325_v41  ;;  %v5450_v41 = vld [vmem:[#allocation23_spill] sm:$0xff] }
 0x241   : > { %v1621_v48 = vadd.f32 %v1620_v51, %v1522_v16  ;;  %v5449_v51 = vld [vmem:[#allocation22_spill] sm:$0xff] }
 0x243   : > { %v2090_v11 = vadd.f32 %v1621_v48, %v407_v55  ;;  %v5451_v55 = vld [vmem:[#allocation24_spill] sm:$0xff] }
 0x245   : > { %2162 = vst [vmem:[#allocation2 + $0x1a0] sm:$0xff] %v2090_v11 }
 0x246   : > { %v1523_v45 = vpop.f32.mrf.mxu2  ;;  %v1328_v59 = vpop.f32.mrf.mxu0 }
 0x247   : > { %v1524_v21 = vadd.f32 %v1523_v45, %v1425_v33  ;;  %v1622_v52 = vpop.f32.mrf.mxu3  ;;  %v1427_v53 = vpop.f32.mrf.mxu1  ;;  %v348_v45 = vld [vmem:[#allocation2 + $0xf0] sm:$0xff] }
 0x248   : > { %v1428_v54 = vadd.f32 %v1427_v53, %v1328_v59 }
 0x249   : > { %v1623_v47 = vadd.f32 %v1622_v52, %v1524_v21  ;;  %1673 = vmatmul.bf16.gmra.mxu0 %v4726_v5 }
 0x24a   : > { %1772 = vmatmul.bf16.gmra.mxu1 %v4728_v6  ;;  %v413_v6 = vld [vmem:[#allocation2 + $0x150] sm:$0xff] }
 0x24b   : > { %v2092_v49 = vadd.f32 %v1623_v47, %v409_v46  ;;  %1871 = vmatmul.bf16.gmra.mxu2 %v4730_v7 }
 0x24c   : > { %1970 = vmatmul.bf16.gmra.mxu3 %v4732_v8 }
 0x24d   : > { %2164 = vst [vmem:[#allocation2 + $0x118] sm:$0xff] %v2092_v49 }
 0x24e   : > { %v1526_v40 = vpop.f32.mrf.mxu2  ;;  %v1330_v35 = vpop.f32.mrf.mxu0 }
 0x24f   : > { %v1527_v25 = vadd.f32 %v1526_v40, %v1428_v54  ;;  %v1625_v1 = vpop.f32.mrf.mxu3  ;;  %v1429_v19 = vpop.f32.mrf.mxu1  ;;  %v350_v40 = vld [vmem:[#allocation2 + $0x120] sm:$0xff] }
 0x250   : > { %v1430_v3 = vadd.f32 %v1429_v19, %v1330_v35 }
 0x251   : > { %v1626_v2 = vadd.f32 %v1625_v1, %v1527_v25 }
 0x253   : > { %v2094_v26 = vadd.f32 %v1626_v2, %v411_v10 }
 0x255   : > { %2166 = vst [vmem:[#allocation2 + $0x148] sm:$0xff] %v2094_v26 }
 0x256   : > { %v1528_v5 = vpop.f32.mrf.mxu2  ;;  %v1639_v27 = vpop.f32.mrf.mxu0 }
 0x257   : > { %v1529_v4 = vadd.f32 %v1528_v5, %v1430_v3  ;;  %v1627_v22 = vpop.f32.mrf.mxu3  ;;  %v1738_v28 = vpop.f32.mrf.mxu1  ;;  %v352_v5 = vld [vmem:[#allocation2 + $0x18] sm:$0xff] }
 0x258   : > { %v1739_v20 = vadd.f32 %v1738_v28, %v1639_v27 }
 0x259   : > { %v1628_v7 = vadd.f32 %v1627_v22, %v1529_v4  ;;  %1678 = vmatmul.bf16.gmra.mxu0 %v4753_v38 }
 0x25a   : > { %1777 = vmatmul.bf16.gmra.mxu1 %v4756_v42  ;;  %v346_v42 = vld [vmem:[#allocation2 + $0x28] sm:$0xff] }
 0x25b   : > { %v2096_v8 = vadd.f32 %v1628_v7, %v413_v6  ;;  %1876 = vmatmul.bf16.gmra.mxu2 %v4758_v43 }
 0x25c   : > { %1975 = vmatmul.bf16.gmra.mxu3 %v5447_v31  ;;  %v5452_v31 = vld [vmem:[#allocation25_spill] sm:$0xff] }
 0x25d   : > { %2168 = vst [vmem:[#allocation2 + $0x150] sm:$0xff] %v2096_v8 }
 0x25e   : > { %v1837_v18 = vpop.f32.mrf.mxu2  ;;  %v1641_v13 = vpop.f32.mrf.mxu0 }
 0x25f   : > { %v1838_v34 = vadd.f32 %v1837_v18, %v1739_v20  ;;  %v1936_v39 = vpop.f32.mrf.mxu3  ;;  %v1740_v23 = vpop.f32.mrf.mxu1 }
 0x260   : > { %v1741_v14 = vadd.f32 %v1740_v23, %v1641_v13  ;;  %v5455_v13 = vld [vmem:[#allocation28_spill] sm:$0xff] }
 0x261   : > { %v1937_v62 = vadd.f32 %v1936_v39, %v1838_v34  ;;  %v5453_v34 = vld [vmem:[#allocation26_spill] sm:$0xff]  ;;  %v5454_v39 = vld [vmem:[#allocation27_spill] sm:$0xff] }
 0x263   : > { %v2027_v36 = vadd.f32 %v1937_v62, %v344_v37 }
 0x265   : > { %2099 = vst [vmem:[#allocation2 + $0x8] sm:$0xff] %v2027_v36 }
 0x266   : > { %v1839_v38 = vpop.f32.mrf.mxu2  ;;  %v1644_v29 = vpop.f32.mrf.mxu0 }
 0x267   : > { %v1840_v24 = vadd.f32 %v1839_v38, %v1741_v14  ;;  %v1938_v50 = vpop.f32.mrf.mxu3  ;;  %v1743_v30 = vpop.f32.mrf.mxu1  ;;  %v356_v14 = vld [vmem:[#allocation2 + $0x110] sm:$0xff] }
 0x268   : > { %v1744_v16 = vadd.f32 %v1743_v30, %v1644_v29 }
 0x269   : > { %v1939_v43 = vadd.f32 %v1938_v50, %v1840_v24  ;;  %1683 = vmatmul.bf16.gmra.mxu0 %v5448_v60 }
 0x26a   : > { %1782 = vmatmul.bf16.gmra.mxu1 %v5449_v51 }
 0x26b   : > { %v2029_v15 = vadd.f32 %v1939_v43, %v346_v42  ;;  %1881 = vmatmul.bf16.gmra.mxu2 %v5450_v41  ;;  %v5456_v41 = vld [vmem:[#allocation29_spill] sm:$0xff] }
 0x26c   : > { %1980 = vmatmul.bf16.gmra.mxu3 %v5451_v55 }
 0x26d   : > { %2101 = vst [vmem:[#allocation2 + $0x28] sm:$0xff] %v2029_v15  ;;  %v358_v15 = vld [vmem:[#allocation2 + $0xb8] sm:$0xff] }
 0x26e   : > { %v1842_v56 = vpop.f32.mrf.mxu2  ;;  %v1646_v33 = vpop.f32.mrf.mxu0 }
 0x26f   : > { %v1843_v48 = vadd.f32 %v1842_v56, %v1744_v16  ;;  %v1941_v11 = vpop.f32.mrf.mxu3  ;;  %v1745_v21 = vpop.f32.mrf.mxu1 }
 0x270   : > { %v1746_v46 = vadd.f32 %v1745_v21, %v1646_v33  ;;  %v5459_v33 = vld [vmem:[#allocation32_spill] sm:$0xff] }
 0x271   : > { %v1942_v52 = vadd.f32 %v1941_v11, %v1843_v48  ;;  %v5457_v48 = vld [vmem:[#allocation30_spill] sm:$0xff]  ;;  %v5458_v11 = vld [vmem:[#allocation31_spill] sm:$0xff] }
 0x273   : > { %v2031_v59 = vadd.f32 %v1942_v52, %v348_v45 }
 0x275   : > { %2103 = vst [vmem:[#allocation2 + $0xf0] sm:$0xff] %v2031_v59 }
 0x276   : > { %v1844_v53 = vpop.f32.mrf.mxu2  ;;  %v1649_v54 = vpop.f32.mrf.mxu0 }
 0x277   : > { %v1845_v47 = vadd.f32 %v1844_v53, %v1746_v46  ;;  %v1943_v49 = vpop.f32.mrf.mxu3  ;;  %v1748_v25 = vpop.f32.mrf.mxu1  ;;  %v360_v46 = vld [vmem:[#allocation2 + $0x190] sm:$0xff] }
 0x278   : > { %v1749_v10 = vadd.f32 %v1748_v25, %v1649_v54 }
 0x279   : > { %v1944_v1 = vadd.f32 %v1943_v49, %v1845_v47  ;;  %1688 = vmatmul.bf16.gmra.mxu0 %v4796_v44 }
 0x27a   : > { %1787 = vmatmul.bf16.gmra.mxu1 %v4801_v12  ;;  %v354_v12 = vld [vmem:[#allocation2 + $0x158] sm:$0xff] }
 0x27b   : > { %v2033_v35 = vadd.f32 %v1944_v1, %v350_v40  ;;  %1886 = vmatmul.bf16.gmra.mxu2 %v4803_v57 }
 0x27c   : > { %1985 = vmatmul.bf16.gmra.mxu3 %v4808_v58 }
 0x27d   : > { %2105 = vst [vmem:[#allocation2 + $0x120] sm:$0xff] %v2033_v35 }
 0x27e   : > { %v1847_v19 = vpop.f32.mrf.mxu2  ;;  %v1651_v3 = vpop.f32.mrf.mxu0 }
 0x27f   : > { %v1848_v2 = vadd.f32 %v1847_v19, %v1749_v10  ;;  %v1946_v26 = vpop.f32.mrf.mxu3  ;;  %v1750_v4 = vpop.f32.mrf.mxu1  ;;  %v362_v10 = vld [vmem:[#allocation2 + $0x1c0] sm:$0xff] }
 0x280   : > { %v1751_v6 = vadd.f32 %v1750_v4, %v1651_v3  ;;  %v5461_v4 = vld [vmem:[#allocation34_spill] sm:$0xff] }
 0x281   : > { %v1947_v22 = vadd.f32 %v1946_v26, %v1848_v2  ;;  %v5460_v26 = vld [vmem:[#allocation33_spill] sm:$0xff] }
 0x283   : > { %v2035_v27 = vadd.f32 %v1947_v22, %v352_v5  ;;  %v5462_v22 = vld [vmem:[#allocation35_spill] sm:$0xff] }
 0x285   : > { %2107 = vst [vmem:[#allocation2 + $0x18] sm:$0xff] %v2035_v27  ;;  %v5463_v27 = vld [vmem:[#allocation36_spill] sm:$0xff] }
 0x286   : > { %v1849_v44 = vpop.f32.mrf.mxu2  ;;  %v1654_v8 = vpop.f32.mrf.mxu0 }
 0x287   : > { %v1850_v28 = vadd.f32 %v1849_v44, %v1751_v6  ;;  %v1948_v7 = vpop.f32.mrf.mxu3  ;;  %v1753_v20 = vpop.f32.mrf.mxu1 }
 0x288   : > { %v1754_v18 = vadd.f32 %v1753_v20, %v1654_v8  ;;  %v364_v8 = vld [vmem:[#allocation2 + $0x138] sm:$0xff] }
 0x289   : > { %v1949_v57 = vadd.f32 %v1948_v7, %v1850_v28  ;;  %1693 = vmatmul.bf16.gmra.mxu0 %v5452_v31 }
 0x28a   : > { %1792 = vmatmul.bf16.gmra.mxu1 %v5453_v34 }
 0x28b   : > { %v2037_v58 = vadd.f32 %v1949_v57, %v354_v12  ;;  %1891 = vmatmul.bf16.gmra.mxu2 %v5454_v39 }
 0x28c   : > { %1990 = vmatmul.bf16.gmra.mxu3 %v5455_v13  ;;  %v366_v13 = vld [vmem:[#allocation2 + $0x1b8] sm:$0xff] }
 0x28d   : > { %2109 = vst [vmem:[#allocation2 + $0x158] sm:$0xff] %v2037_v58 }
 0x28e   : > { %v1852_v37 = vpop.f32.mrf.mxu2  ;;  %v1656_v36 = vpop.f32.mrf.mxu0 }
 0x28f   : > { %v1853_v23 = vadd.f32 %v1852_v37, %v1754_v18  ;;  %v1951_v62 = vpop.f32.mrf.mxu3  ;;  %v1755_v38 = vpop.f32.mrf.mxu1 }
 0x290   : > { %v1756_v29 = vadd.f32 %v1755_v38, %v1656_v36  ;;  %v5465_v38 = vld [vmem:[#allocation38_spill] sm:$0xff] }
 0x291   : > { %v1952_v24 = vadd.f32 %v1951_v62, %v1853_v23  ;;  %v5464_v62 = vld [vmem:[#allocation37_spill] sm:$0xff] }
 0x293   : > { %v2039_v50 = vadd.f32 %v1952_v24, %v356_v14  ;;  %v5466_v24 = vld [vmem:[#allocation39_spill] sm:$0xff] }
 0x295   : > { %2111 = vst [vmem:[#allocation2 + $0x110] sm:$0xff] %v2039_v50  ;;  %v5467_v50 = vld [vmem:[#allocation40_spill] sm:$0xff] }
 0x296   : > { %v1854_v42 = vpop.f32.mrf.mxu2  ;;  %v1659_v60 = vpop.f32.mrf.mxu0 }
 0x297   : > { %v1855_v30 = vadd.f32 %v1854_v42, %v1756_v29  ;;  %v1953_v43 = vpop.f32.mrf.mxu3  ;;  %v1758_v16 = vpop.f32.mrf.mxu1 }
 0x298   : > { %v1759_v56 = vadd.f32 %v1758_v16, %v1659_v60  ;;  %v368_v60 = vld [vmem:[#allocation2] sm:$0xff] }
 0x299   : > { %v1954_v51 = vadd.f32 %v1953_v43, %v1855_v30  ;;  %1698 = vmatmul.bf16.gmra.mxu0 %v5456_v41 }
 0x29a   : > { %1797 = vmatmul.bf16.gmra.mxu1 %v5457_v48 }
 0x29b   : > { %v2041_v55 = vadd.f32 %v1954_v51, %v358_v15  ;;  %1896 = vmatmul.bf16.gmra.mxu2 %v5458_v11 }
 0x29c   : > { %1995 = vmatmul.bf16.gmra.mxu3 %v5459_v33  ;;  %v370_v33 = vld [vmem:[#allocation2 + $0x38] sm:$0xff] }
 0x29d   : > { %2113 = vst [vmem:[#allocation2 + $0xb8] sm:$0xff] %v2041_v55 }
 0x29e   : > { %v1857_v45 = vpop.f32.mrf.mxu2  ;;  %v1661_v59 = vpop.f32.mrf.mxu0 }
 0x29f   : > { %v1858_v21 = vadd.f32 %v1857_v45, %v1759_v56  ;;  %v1956_v52 = vpop.f32.mrf.mxu3  ;;  %v1760_v53 = vpop.f32.mrf.mxu1 }
 0x2a0   : > { %v1761_v54 = vadd.f32 %v1760_v53, %v1661_v59  ;;  %v5469_v53 = vld [vmem:[#allocation42_spill] sm:$0xff] }
 0x2a1   : > { %v1957_v47 = vadd.f32 %v1956_v52, %v1858_v21 }
 0x2a3   : > { %v2043_v49 = vadd.f32 %v1957_v47, %v360_v46  ;;  %v5468_v46 = vld [vmem:[#allocation41_spill] sm:$0xff] }
 0x2a5   : > { %2115 = vst [vmem:[#allocation2 + $0x190] sm:$0xff] %v2043_v49 }
 0x2a6   : > { %v1859_v40 = vpop.f32.mrf.mxu2  ;;  %v1664_v35 = vpop.f32.mrf.mxu0 }
 0x2a7   : > { %v1860_v25 = vadd.f32 %v1859_v40, %v1761_v54  ;;  %v1958_v1 = vpop.f32.mrf.mxu3  ;;  %v1763_v19 = vpop.f32.mrf.mxu1 }
 0x2a8   : > { %v1764_v5 = vadd.f32 %v1763_v19, %v1664_v35 }
 0x2a9   : > { %v1959_v2 = vadd.f32 %v1958_v1, %v1860_v25  ;;  %1703 = vmatmul.bf16.gmra.mxu0 %v5460_v26  ;;  %v372_v25 = vld [vmem:[#allocation2 + $0x220] sm:$0xff] }
 0x2aa   : > { %1802 = vmatmul.bf16.gmra.mxu1 %v5461_v4 }
 0x2ab   : > { %v2045_v3 = vadd.f32 %v1959_v2, %v362_v10  ;;  %1901 = vmatmul.bf16.gmra.mxu2 %v5462_v22  ;;  %v5470_v22 = vld [vmem:[#allocation43_spill] sm:$0xff] }
 0x2ac   : > { %2000 = vmatmul.bf16.gmra.mxu3 %v5463_v27 }
 0x2ad   : > { %2117 = vst [vmem:[#allocation2 + $0x1c0] sm:$0xff] %v2045_v3 }
 0x2ae   : > { %v1862_v6 = vpop.f32.mrf.mxu2  ;;  %v1666_v7 = vpop.f32.mrf.mxu0 }
 0x2af   : > { %v1863_v44 = vadd.f32 %v1862_v6, %v1764_v5  ;;  %v1961_v28 = vpop.f32.mrf.mxu3  ;;  %v1765_v12 = vpop.f32.mrf.mxu1 }
 0x2b0   : > { %v1766_v31 = vadd.f32 %v1765_v12, %v1666_v7  ;;  %v5473_v7 = vld [vmem:[#allocation46_spill] sm:$0xff] }
 0x2b1   : > { %v1962_v20 = vadd.f32 %v1961_v28, %v1863_v44  ;;  %v5471_v44 = vld [vmem:[#allocation44_spill] sm:$0xff]  ;;  %v5472_v28 = vld [vmem:[#allocation45_spill] sm:$0xff] }
 0x2b3   : > { %v2047_v57 = vadd.f32 %v1962_v20, %v364_v8 }
 0x2b5   : > { %2119 = vst [vmem:[#allocation2 + $0x138] sm:$0xff] %v2047_v57 }
 0x2b6   : > { %v1864_v58 = vpop.f32.mrf.mxu2  ;;  %v1669_v39 = vpop.f32.mrf.mxu0 }
 0x2b7   : > { %v1865_v18 = vadd.f32 %v1864_v58, %v1766_v31  ;;  %v1963_v34 = vpop.f32.mrf.mxu3  ;;  %v1768_v37 = vpop.f32.mrf.mxu1  ;;  %v376_v31 = vld [vmem:[#allocation2 + $0xf8] sm:$0xff] }
 0x2b8   : > { %v1769_v14 = vadd.f32 %v1768_v37, %v1669_v39 }
 0x2b9   : > { %v1964_v23 = vadd.f32 %v1963_v34, %v1865_v18  ;;  %1708 = vmatmul.bf16.gmra.mxu0 %v5464_v62 }
 0x2ba   : > { %1807 = vmatmul.bf16.gmra.mxu1 %v5465_v38 }
 0x2bb   : > { %v2049_v36 = vadd.f32 %v1964_v23, %v366_v13  ;;  %1906 = vmatmul.bf16.gmra.mxu2 %v5466_v24 }
 0x2bc   : > { %2005 = vmatmul.bf16.gmra.mxu3 %v5467_v50 }
 0x2bd   : > { %2121 = vst [vmem:[#allocation2 + $0x1b8] sm:$0xff] %v2049_v36  ;;  %v378_v36 = vld [vmem:[#allocation2 + $0x170] sm:$0xff] }
 0x2be   : > { %v1867_v29 = vpop.f32.mrf.mxu2  ;;  %v1671_v43 = vpop.f32.mrf.mxu0 }
 0x2bf   : > { %v1868_v42 = vadd.f32 %v1867_v29, %v1769_v14  ;;  %v1966_v30 = vpop.f32.mrf.mxu3  ;;  %v1770_v15 = vpop.f32.mrf.mxu1 }
 0x2c0   : > { %v1771_v41 = vadd.f32 %v1770_v15, %v1671_v43 }
 0x2c1   : > { %v1967_v16 = vadd.f32 %v1966_v30, %v1868_v42 }
 0x2c3   : > { %v2051_v51 = vadd.f32 %v1967_v16, %v368_v60  ;;  %v380_v60 = vld [vmem:[#allocation2 + $0xe0] sm:$0xff] }
 0x2c5   : > { %2123 = vst [vmem:[#allocation2] sm:$0xff] %v2051_v51 }
 0x2c6   : > { %v1869_v55 = vpop.f32.mrf.mxu2  ;;  %v1674_v11 = vpop.f32.mrf.mxu0 }
 0x2c7   : > { %v1870_v56 = vadd.f32 %v1869_v55, %v1771_v41  ;;  %v1968_v48 = vpop.f32.mrf.mxu3  ;;  %v1773_v45 = vpop.f32.mrf.mxu1 }
 0x2c8   : > { %v1774_v59 = vadd.f32 %v1773_v45, %v1674_v11 }
 0x2c9   : > { %v1969_v21 = vadd.f32 %v1968_v48, %v1870_v56  ;;  %1713 = vmatmul.bf16.gmra.mxu0 %v4918_v32 }
 0x2ca   : > { %1812 = vmatmul.bf16.gmra.mxu1 %v4920_v17  ;;  %v374_v17 = vld [vmem:[#allocation2 + $0x1c8] sm:$0xff] }
 0x2cb   : > { %v2053_v52 = vadd.f32 %v1969_v21, %v370_v33  ;;  %1911 = vmatmul.bf16.gmra.mxu2 %v5468_v46  ;;  %v384_v46 = vld [vmem:[#allocation2 + $0x98] sm:$0xff] }
 0x2cc   : > { %2010 = vmatmul.bf16.gmra.mxu3 %v5469_v53 }
 0x2cd   : > { %2125 = vst [vmem:[#allocation2 + $0x38] sm:$0xff] %v2053_v52 }
 0x2ce   : > { %v1872_v47 = vpop.f32.mrf.mxu2  ;;  %v1676_v40 = vpop.f32.mrf.mxu0 }
 0x2cf   : > { %v1873_v49 = vadd.f32 %v1872_v47, %v1774_v59  ;;  %v1971_v54 = vpop.f32.mrf.mxu3  ;;  %v1775_v1 = vpop.f32.mrf.mxu1 }
 0x2d0   : > { %v1776_v19 = vadd.f32 %v1775_v1, %v1676_v40 }
 0x2d1   : > { %v1972_v35 = vadd.f32 %v1971_v54, %v1873_v49 }
 0x2d3   : > { %v2055_v10 = vadd.f32 %v1972_v35, %v372_v25 }
 0x2d5   : > { %2127 = vst [vmem:[#allocation2 + $0x220] sm:$0xff] %v2055_v10  ;;  %v386_v10 = vld [vmem:[#allocation2 + $0x160] sm:$0xff] }
 0x2d6   : > { %v1874_v32 = vpop.f32.mrf.mxu2  ;;  %v1679_v3 = vpop.f32.mrf.mxu0 }
 0x2d7   : > { %v1875_v2 = vadd.f32 %v1874_v32, %v1776_v19  ;;  %v1973_v26 = vpop.f32.mrf.mxu3  ;;  %v1778_v5 = vpop.f32.mrf.mxu1 }
 0x2d8   : > { %v1779_v6 = vadd.f32 %v1778_v5, %v1679_v3 }
 0x2d9   : > { %v1974_v4 = vadd.f32 %v1973_v26, %v1875_v2  ;;  %1718 = vmatmul.bf16.gmra.mxu0 %v5470_v22  ;;  %v388_v22 = vld [vmem:[#allocation2 + $0x100] sm:$0xff] }
 0x2da   : > { %1817 = vmatmul.bf16.gmra.mxu1 %v5471_v44 }
 0x2db   : > { %v2057_v27 = vadd.f32 %v1974_v4, %v374_v17  ;;  %1916 = vmatmul.bf16.gmra.mxu2 %v5472_v28 }
 0x2dc   : > { %2015 = vmatmul.bf16.gmra.mxu3 %v5473_v7 }
 0x2dd   : > { %2129 = vst [vmem:[#allocation2 + $0x1c8] sm:$0xff] %v2057_v27 }
 0x2de   : > { %v1877_v8 = vpop.f32.mrf.mxu2  ;;  %v1681_v57 = vpop.f32.mrf.mxu0 }
 0x2df   : > { %v1878_v12 = vadd.f32 %v1877_v8, %v1779_v6  ;;  %v1976_v20 = vpop.f32.mrf.mxu3  ;;  %v1780_v58 = vpop.f32.mrf.mxu1 }
 0x2e0   : > { %v1781_v39 = vadd.f32 %v1780_v58, %v1681_v57  ;;  %v390_v57 = vld [vmem:[#allocation2 + $0x1b0] sm:$0xff] }
 0x2e1   : > { %v1977_v18 = vadd.f32 %v1976_v20, %v1878_v12 }
 0x2e3   : > { %v2059_v34 = vadd.f32 %v1977_v18, %v376_v31 }
 0x2e5   : > { %2131 = vst [vmem:[#allocation2 + $0xf8] sm:$0xff] %v2059_v34 }
 0x2e6   : > { %v1879_v13 = vpop.f32.mrf.mxu2  ;;  %v1684_v62 = vpop.f32.mrf.mxu0 }
 0x2e7   : > { %v1880_v37 = vadd.f32 %v1879_v13, %v1781_v39  ;;  %v1978_v23 = vpop.f32.mrf.mxu3  ;;  %v1783_v14 = vpop.f32.mrf.mxu1 }
 0x2e8   : > { %v1784_v50 = vadd.f32 %v1783_v14, %v1684_v62  ;;  %v392_v62 = vld [vmem:[#allocation2 + $0x130] sm:$0xff] }
 0x2e9   : > { %v1979_v38 = vadd.f32 %v1978_v23, %v1880_v37  ;;  %1723 = vmatmul.bf16.gmra.mxu0 %v4958_v63 }
 0x2ea   : > { %1822 = vmatmul.bf16.gmra.mxu1 %v4960_v61  ;;  %v382_v61 = vld [vmem:[#allocation2 + $0x1f0] sm:$0xff] }
 0x2eb   : > { %v2061_v24 = vadd.f32 %v1979_v38, %v378_v36  ;;  %1921 = vmatmul.bf16.gmra.mxu2 %v4962_v0 }
 0x2ec   : > { %2020 = vmatmul.bf16.gmra.mxu3 %v4964_v9 }
 0x2ed   : > { %2133 = vst [vmem:[#allocation2 + $0x170] sm:$0xff] %v2061_v24 }
 0x2ee   : > { %v1882_v29 = vpop.f32.mrf.mxu2  ;;  %v1686_v43 = vpop.f32.mrf.mxu0 }
 0x2ef   : > { %v1883_v42 = vadd.f32 %v1882_v29, %v1784_v50  ;;  %v1981_v30 = vpop.f32.mrf.mxu3  ;;  %v1785_v15 = vpop.f32.mrf.mxu1 }
 0x2f0   : > { %v1786_v41 = vadd.f32 %v1785_v15, %v1686_v43  ;;  %v394_v43 = vld [vmem:[#allocation2 + $0x230] sm:$0xff] }
 0x2f1   : > { %v1982_v16 = vadd.f32 %v1981_v30, %v1883_v42 }
 0x2f3   : > { %v2063_v51 = vadd.f32 %v1982_v16, %v380_v60 }
 0x2f5   : > { %2135 = vst [vmem:[#allocation2 + $0xe0] sm:$0xff] %v2063_v51 }
 0x2f6   : > { %v1884_v63 = vpop.f32.mrf.mxu2  ;;  %v1689_v48 = vpop.f32.mrf.mxu0 }
 0x2f7   : > { %v1885_v55 = vadd.f32 %v1884_v63, %v1786_v41  ;;  %v1983_v56 = vpop.f32.mrf.mxu3  ;;  %v1788_v11 = vpop.f32.mrf.mxu1 }
 0x2f8   : > { %v1789_v9 = vadd.f32 %v1788_v11, %v1689_v48  ;;  %v396_v48 = vld [vmem:[#allocation2 + $0x228] sm:$0xff] }
 0x2f9   : > { %v1984_v0 = vadd.f32 %v1983_v56, %v1885_v55 }
 0x2fb   : > { %v2065_v33 = vadd.f32 %v1984_v0, %v382_v61 }
 0x2fd   : > { %2137 = vst [vmem:[#allocation2 + $0x1f0] sm:$0xff] %v2065_v33 }
 0x2fe   : > { %v1887_v45 = vpop.f32.mrf.mxu2  ;;  %v1691_v59 = vpop.f32.mrf.mxu0 }
 0x2ff   : > { %v1888_v21 = vadd.f32 %v1887_v45, %v1789_v9  ;;  %v1986_v52 = vpop.f32.mrf.mxu3  ;;  %v1790_v53 = vpop.f32.mrf.mxu1 }
 0x300   : > { %v1791_v54 = vadd.f32 %v1790_v53, %v1691_v59  ;;  %v398_v59 = vld [vmem:[#allocation2 + $0x200] sm:$0xff] }
 0x301   : > { %v1987_v47 = vadd.f32 %v1986_v52, %v1888_v21 }
 0x303   : > { %v2067_v49 = vadd.f32 %v1987_v47, %v384_v46 }
 0x305   : > { %2139 = vst [vmem:[#allocation2 + $0x98] sm:$0xff] %v2067_v49 }
 0x306   : > { %v1889_v40 = vpop.f32.mrf.mxu2  ;;  %v1694_v35 = vpop.f32.mrf.mxu0 }
 0x307   : > { %v1890_v25 = vadd.f32 %v1889_v40, %v1791_v54  ;;  %v1988_v1 = vpop.f32.mrf.mxu3  ;;  %v1793_v19 = vpop.f32.mrf.mxu1 }
 0x308   : > { %v1794_v26 = vadd.f32 %v1793_v19, %v1694_v35  ;;  %v400_v35 = vld [vmem:[#allocation2 + $0x128] sm:$0xff] }
 0x309   : > { %v1989_v32 = vadd.f32 %v1988_v1, %v1890_v25 }
 0x30b   : > { %v2069_v2 = vadd.f32 %v1989_v32, %v386_v10 }
 0x30d   : > { %2141 = vst [vmem:[#allocation2 + $0x160] sm:$0xff] %v2069_v2 }
 0x30e   : > { %v1892_v3 = vpop.f32.mrf.mxu2  ;;  %v1696_v4 = vpop.f32.mrf.mxu0 }
 0x30f   : > { %v1893_v17 = vadd.f32 %v1892_v3, %v1794_v26  ;;  %v1991_v5 = vpop.f32.mrf.mxu3  ;;  %v1795_v27 = vpop.f32.mrf.mxu1 }
 0x310   : > { %v1796_v28 = vadd.f32 %v1795_v27, %v1696_v4  ;;  %v402_v4 = vld [vmem:[#allocation2 + $0x208] sm:$0xff] }
 0x311   : > { %v1992_v6 = vadd.f32 %v1991_v5, %v1893_v17 }
 0x313   : > { %v2071_v44 = vadd.f32 %v1992_v6, %v388_v22 }
 0x315   : > { %2143 = vst [vmem:[#allocation2 + $0x100] sm:$0xff] %v2071_v44 }
 0x316   : > { %v1894_v7 = vpop.f32.mrf.mxu2  ;;  %v1699_v20 = vpop.f32.mrf.mxu0 }
 0x317   : > { %v1895_v8 = vadd.f32 %v1894_v7, %v1796_v28  ;;  %v1993_v12 = vpop.f32.mrf.mxu3  ;;  %v1798_v31 = vpop.f32.mrf.mxu1 }
 0x318   : > { %v1799_v34 = vadd.f32 %v1798_v31, %v1699_v20  ;;  %v404_v20 = vld [vmem:[#allocation2 + $0x1d0] sm:$0xff] }
 0x319   : > { %v1994_v58 = vadd.f32 %v1993_v12, %v1895_v8 }
 0x31b   : > { %v2073_v18 = vadd.f32 %v1994_v58, %v390_v57 }
 0x31d   : > { %2145 = vst [vmem:[#allocation2 + $0x1b0] sm:$0xff] %v2073_v18 }
 0x31e   : > { %v1897_v39 = vpop.f32.mrf.mxu2  ;;  %v1701_v23 = vpop.f32.mrf.mxu0 }
 0x31f   : > { %v1898_v13 = vadd.f32 %v1897_v39, %v1799_v34  ;;  %v1996_v37 = vpop.f32.mrf.mxu3  ;;  %v1800_v36 = vpop.f32.mrf.mxu1 }
 0x320   : > { %v1801_v24 = vadd.f32 %v1800_v36, %v1701_v23  ;;  %v406_v23 = vld [vmem:[#allocation2 + $0xc0] sm:$0xff] }
 0x321   : > { %v1997_v14 = vadd.f32 %v1996_v37, %v1898_v13 }
 0x323   : > { %v2075_v38 = vadd.f32 %v1997_v14, %v392_v62 }
 0x325   : > { %2147 = vst [vmem:[#allocation2 + $0x130] sm:$0xff] %v2075_v38 }
 0x326   : > { %v1899_v50 = vpop.f32.mrf.mxu2  ;;  %v1704_v30 = vpop.f32.mrf.mxu0 }
 0x327   : > { %v1900_v29 = vadd.f32 %v1899_v50, %v1801_v24  ;;  %v1998_v42 = vpop.f32.mrf.mxu3  ;;  %v1803_v60 = vpop.f32.mrf.mxu1 }
 0x328   : > { %v1804_v51 = vadd.f32 %v1803_v60, %v1704_v30  ;;  %v408_v30 = vld [vmem:[#allocation2 + $0x58] sm:$0xff] }
 0x329   : > { %v1999_v15 = vadd.f32 %v1998_v42, %v1900_v29 }
 0x32b   : > { %v2077_v16 = vadd.f32 %v1999_v15, %v394_v43 }
 0x32d   : > { %2149 = vst [vmem:[#allocation2 + $0x230] sm:$0xff] %v2077_v16 }
 0x32e   : > { %v1902_v41 = vpop.f32.mrf.mxu2  ;;  %v1706_v56 = vpop.f32.mrf.mxu0 }
 0x32f   : > { %v1903_v63 = vadd.f32 %v1902_v41, %v1804_v51  ;;  %v2001_v55 = vpop.f32.mrf.mxu3  ;;  %v1805_v61 = vpop.f32.mrf.mxu1 }
 0x330   : > { %v1806_v33 = vadd.f32 %v1805_v61, %v1706_v56 }
 0x331   : > { %v2002_v11 = vadd.f32 %v2001_v55, %v1903_v63  ;;  %v410_v55 = vld [vmem:[#allocation2 + $0x20] sm:$0xff] }
 0x333   : > { %v2079_v0 = vadd.f32 %v2002_v11, %v396_v48 }
 0x335   : > { %2151 = vst [vmem:[#allocation2 + $0x228] sm:$0xff] %v2079_v0 }
 0x336   : > { %v1904_v9 = vpop.f32.mrf.mxu2  ;;  %v1709_v52 = vpop.f32.mrf.mxu0 }
 0x337   : > { %v1905_v45 = vadd.f32 %v1904_v9, %v1806_v33  ;;  %v2003_v21 = vpop.f32.mrf.mxu3  ;;  %v1808_v46 = vpop.f32.mrf.mxu1 }
 0x338   : > { %v1809_v49 = vadd.f32 %v1808_v46, %v1709_v52 }
 0x339   : > { %v2004_v53 = vadd.f32 %v2003_v21, %v1905_v45  ;;  %v412_v21 = vld [vmem:[#allocation2 + $0xa8] sm:$0xff] }
 0x33b   : > { %v2081_v47 = vadd.f32 %v2004_v53, %v398_v59 }
 0x33d   : > { %2153 = vst [vmem:[#allocation2 + $0x200] sm:$0xff] %v2081_v47 }
 0x33e   : > { %v1907_v54 = vpop.f32.mrf.mxu2  ;;  %v1711_v1 = vpop.f32.mrf.mxu0 }
 0x33f   : > { %v1908_v40 = vadd.f32 %v1907_v54, %v1809_v49  ;;  %v2006_v25 = vpop.f32.mrf.mxu3  ;;  %v1810_v10 = vpop.f32.mrf.mxu1 }
 0x340   : > { %v1811_v2 = vadd.f32 %v1810_v10, %v1711_v1 }
 0x341   : > { %v2007_v19 = vadd.f32 %v2006_v25, %v1908_v40  ;;  %v414_v40 = vld [vmem:[#allocation2 + $0xa0] sm:$0xff] }
 0x343   : > { %v2083_v32 = vadd.f32 %v2007_v19, %v400_v35 }
 0x345   : > { %2155 = vst [vmem:[#allocation2 + $0x128] sm:$0xff] %v2083_v32 }
 0x346   : > { %v1909_v26 = vpop.f32.mrf.mxu2  ;;  %v1714_v5 = vpop.f32.mrf.mxu0 }
 0x347   : > { %v1910_v3 = vadd.f32 %v1909_v26, %v1811_v2  ;;  %v2008_v17 = vpop.f32.mrf.mxu3  ;;  %v1813_v22 = vpop.f32.mrf.mxu1 }
 0x348   : > { %v1814_v44 = vadd.f32 %v1813_v22, %v1714_v5 }
 0x349   : > { %v2009_v27 = vadd.f32 %v2008_v17, %v1910_v3 }
 0x34b   : > { %v2085_v6 = vadd.f32 %v2009_v27, %v402_v4 }
 0x34d   : > { %2157 = vst [vmem:[#allocation2 + $0x208] sm:$0xff] %v2085_v6 }
 0x34e   : > { %v1912_v28 = vpop.f32.mrf.mxu2  ;;  %v1716_v12 = vpop.f32.mrf.mxu0 }
 0x34f   : > { %v1913_v7 = vadd.f32 %v1912_v28, %v1814_v44  ;;  %v2011_v8 = vpop.f32.mrf.mxu3  ;;  %v1815_v57 = vpop.f32.mrf.mxu1 }
 0x350   : > { %v1816_v18 = vadd.f32 %v1815_v57, %v1716_v12 }
 0x351   : > { %v2012_v31 = vadd.f32 %v2011_v8, %v1913_v7 }
 0x353   : > { %v2087_v58 = vadd.f32 %v2012_v31, %v404_v20 }
 0x355   : > { %2159 = vst [vmem:[#allocation2 + $0x1d0] sm:$0xff] %v2087_v58 }
 0x356   : > { %v1914_v34 = vpop.f32.mrf.mxu2  ;;  %v1719_v37 = vpop.f32.mrf.mxu0 }
 0x357   : > { %v1915_v39 = vadd.f32 %v1914_v34, %v1816_v18  ;;  %v2013_v13 = vpop.f32.mrf.mxu3  ;;  %v1818_v62 = vpop.f32.mrf.mxu1 }
 0x358   : > { %v1819_v38 = vadd.f32 %v1818_v62, %v1719_v37 }
 0x359   : > { %v2014_v36 = vadd.f32 %v2013_v13, %v1915_v39 }
 0x35b   : > { %v2089_v14 = vadd.f32 %v2014_v36, %v406_v23 }
 0x35d   : > { %2161 = vst [vmem:[#allocation2 + $0xc0] sm:$0xff] %v2089_v14 }
 0x35e   : > { %v1917_v24 = vpop.f32.mrf.mxu2  ;;  %v1721_v42 = vpop.f32.mrf.mxu0 }
 0x35f   : > { %v1918_v50 = vadd.f32 %v1917_v24, %v1819_v38  ;;  %v2016_v29 = vpop.f32.mrf.mxu3  ;;  %v1820_v43 = vpop.f32.mrf.mxu1 }
 0x360   : > { %v1821_v16 = vadd.f32 %v1820_v43, %v1721_v42 }
 0x361   : > { %v2017_v60 = vadd.f32 %v2016_v29, %v1918_v50 }
 0x363   : > { %v2091_v15 = vadd.f32 %v2017_v60, %v408_v30 }
 0x365   : > { %2163 = vst [vmem:[#allocation2 + $0x58] sm:$0xff] %v2091_v15 }
 0x366   : > { %v1919_v51 = vpop.f32.mrf.mxu2  ;;  %v1724_v56 = vpop.f32.mrf.mxu0 }
 0x367   : > { %v1920_v41 = vadd.f32 %v1919_v51, %v1821_v16  ;;  %v2018_v63 = vpop.f32.mrf.mxu3  ;;  %v1823_v48 = vpop.f32.mrf.mxu1 }
 0x368   : > { %v1824_v0 = vadd.f32 %v1823_v48, %v1724_v56 }
 0x369   : > { %v2019_v61 = vadd.f32 %v2018_v63, %v1920_v41 }
 0x36b   : > { %v2093_v11 = vadd.f32 %v2019_v61, %v410_v55 }
 0x36d   : > { %2165 = vst [vmem:[#allocation2 + $0x20] sm:$0xff] %v2093_v11 }
 0x36e   : > { %v1922_v33 = vpop.f32.mrf.mxu2  ;;  %v1726_v59 = vpop.f32.mrf.mxu0 }
 0x36f   : > { %v1923_v9 = vadd.f32 %v1922_v33, %v1824_v0  ;;  %v2021_v45 = vpop.f32.mrf.mxu3  ;;  %v1825_v46 = vpop.f32.mrf.mxu1 }
 0x370   : > { %v1826_v47 = vadd.f32 %v1825_v46, %v1726_v59 }
 0x371   : > { %v2022_v52 = vadd.f32 %v2021_v45, %v1923_v9 }
 0x373   : > { %v2095_v53 = vadd.f32 %v2022_v52, %v412_v21 }
 0x375   : > { %2167 = vst [vmem:[#allocation2 + $0xa8] sm:$0xff] %v2095_v53 }
 0x376   : > { %v1924_v49 = vpop.f32.mrf.mxu2 }
 0x377   : > { %v1925_v54 = vadd.f32 %v1924_v49, %v1826_v47  ;;  %v2023_v25 = vpop.f32.mrf.mxu3 }
 0x379   : > { %v2024_v1 = vadd.f32 %v2023_v25, %v1925_v54  ;;  %2173 = sbr.rel (%p3677_p1) target bundleno = 1376 (0x560), region = 56 }
 0x37b   : > { %v2097_v35 = vadd.f32 %v2024_v1, %v414_v40 }
 0x37d   : > { %2169 = vst [vmem:[#allocation2 + $0xa0] sm:$0xff] %v2097_v35 }
 0x37e   : > { %v2218_v10 = vld [vmem:[#allocation2 + $0x120] sm:$0xff]  ;;  %v2224_v19 = vld [vmem:[#allocation2 + $0x110] sm:$0xff]  ;;  %v4221_v32 = vmov 0.0   ;;  %v2223_v2 = vld [vmem:[#allocation2 + $0x108] sm:$0xff]  ;;  %vm2283_vm0 = vcmask 523264   ;;  %vm2262_vm1 = vcmask 785408  }
 0x37f   : > { %2260 = vrot.lane.b32.xlu1 %v2218_v10, %s4219_s6  ;;  %2279 = vrot.lane.b32.xlu2 %v2224_v19, %s4220_s13  ;;  %v2217_v26 = vld [vmem:[#allocation2 + $0x70] sm:$0xff]  ;;  %v2220_v3 = vld [vmem:[#allocation2 + $0x18] sm:$0xff]  ;;  %v2227_v44 = vld [vmem:[#allocation2 + $0x180] sm:$0xff]  ;;  %vm2365_vm2 = vcmask 261120   ;;  %vm2617_vm6 = vcmask 490496   ;;  %vm2309_vm10 = vcmask 277504  }
 0x380   : > { %3964 = vrot.lane.b32.xlu0 %v4221_v32, %s4219_s6  ;;  %v2225_v17 = vld [vmem:[#allocation2 + $0x1f8] sm:$0xff]  ;;  %v2221_v4 = vld [vmem:[#allocation2 + $0xb0] sm:$0xff]  ;;  %v2448_v28 = vld [vmem:[#allocation2] sm:$0xff]  ;;  %vm2432_vm14 = vcmask 244736  }
 0x381   : > { %v2219_v5 = vld [vmem:[#allocation2 + $0xd8] sm:$0xff]  ;;  %v2228_v6 = vld [vmem:[#allocation2 + $0x190] sm:$0xff]  ;;  %v2449_v7 = vld [vmem:[#allocation2 + $0x188] sm:$0xff] }
 0x382   : > { %v2222_v22 = vld [vmem:[#allocation2 + $0x158] sm:$0xff]  ;;  %v2447_v8 = vld [vmem:[#allocation2 + $0x88] sm:$0xff]  ;;  %v2452_v20 = vld [vmem:[#allocation2 + $0x220] sm:$0xff] }
 0x383   : > { %v2226_v27 = vld [vmem:[#allocation2 + $0xb8] sm:$0xff]  ;;  %v2451_v12 = vld [vmem:[#allocation2 + $0x1a8] sm:$0xff]  ;;  %v2639_v58 = vld [vmem:[#allocation2 + $0x130] sm:$0xff] }
 0x384   : > { %v2450_v57 = vld [vmem:[#allocation2 + $0x38] sm:$0xff]  ;;  %v2633_v18 = vld [vmem:[#allocation2 + $0x160] sm:$0xff]  ;;  %v2638_v34 = vld [vmem:[#allocation2 + $0x90] sm:$0xff] }
 0x385   : > { %v2632_v31 = vld [vmem:[#allocation2 + $0x238] sm:$0xff]  ;;  %v2635_v39 = vld [vmem:[#allocation2 + $0x100] sm:$0xff]  ;;  %v2634_v13 = vld [vmem:[#allocation2 + $0x50] sm:$0xff] }
 0x386   : > { %v2636_v36 = vld [vmem:[#allocation2 + $0x30] sm:$0xff]  ;;  %v2442_v55 = vld [vmem:[#allocation2 + $0x1c0] sm:$0xff]  ;;  %v2453_v11 = vld [vmem:[#allocation2 + $0x1e8] sm:$0xff] }
 0x387   : > { %2277 = vrot.lane.b32.xlu1 %v2223_v2, %s4220_s13  ;;  %3969 = vrot.lane.b32.xlu2 %v4221_v32, %s4220_s13  ;;  %v2455_v9 = vld [vmem:[#allocation2 + $0x80] sm:$0xff]  ;;  %v2212_v52 = vld [vmem:[#allocation2 + $0x8] sm:$0xff]  ;;  %v2444_v47 = vld [vmem:[#allocation2 + $0x138] sm:$0xff] }
 0x388   : > { %2258 = vrot.lane.b32.xlu0 %v2217_v26, %s4219_s6  ;;  %v2457_v1 = vld [vmem:[#allocation2 + $0x78] sm:$0xff]  ;;  %v2213_v19 = vld [vmem:[#allocation2 + $0x40] sm:$0xff] }
 0x38f   : > { %2327 = vrot.lane.b32.xlu1 %v2220_v3, %s4219_s6  ;;  %2342 = vrot.lane.b32.xlu2 %v2225_v17, %s4220_s13 }
 0x390   : > { %2325 = vrot.lane.b32.xlu0 %v2219_v5, %s4219_s6  ;;  %v2211_v5 = vld [vmem:[#allocation2 + $0xc8] sm:$0xff] }
 0x397   : > { %2381 = vrot.lane.b32.xlu1 %v2221_v4, %s4219_s6  ;;  %2383 = vrot.lane.b32.xlu2 %v2222_v22, %s4219_s6 }
 0x398   : > { %2344 = vrot.lane.b32.xlu0 %v2226_v27, %s4220_s13 }
 0x39f   : > { %2403 = vrot.lane.b32.xlu1 %v2228_v6, %s4220_s13  ;;  %3974 = vrot.lane.b32.xlu2 %v4221_v32, %s4220_s13 }
 0x3a0   : > { %2401 = vrot.lane.b32.xlu0 %v2227_v44, %s4220_s13 }
 0x3a7   : > { %2490 = vrot.lane.b32.xlu1 %v2448_v28, %s4220_s13  ;;  %2539 = vrot.lane.b32.xlu2 %v2449_v7, %s4220_s13 }
 0x3a8   : > { %2488 = vrot.lane.b32.xlu0 %v2447_v8, %s4220_s13 }
 0x3af   : > { %2580 = vrot.lane.b32.xlu1 %v2451_v12, %s4220_s13  ;;  %2582 = vrot.lane.b32.xlu2 %v2452_v20, %s4220_s13 }
 0x3b0   : > { %2541 = vrot.lane.b32.xlu0 %v2450_v57, %s4220_s13 }
 0x3b7   : > { %2673 = vrot.lane.b32.xlu2 %v2632_v31, %s4222_s14  ;;  %3984 = vrot.lane.b32.xlu1 %v4221_v32, %s4222_s14  ;;  %v2446_v31 = vld [vmem:[#allocation2 + $0x1b8] sm:$0xff] }
 0x3b8   : > { %3979 = vrot.lane.b32.xlu0 %v4221_v32, %s4220_s13 }
 0x3bf   : > { %2693 = vrot.lane.b32.xlu2 %v2639_v58, %s4220_s13  ;;  %2691 = vrot.lane.b32.xlu1 %v2638_v34, %s4220_s13 }
 0x3c0   : > { %2675 = vrot.lane.b32.xlu0 %v2633_v18, %s4222_s14  ;;  %v2216_v18 = vld [vmem:[#allocation2 + $0xf0] sm:$0xff] }
 0x3c7   : > { %2740 = vrot.lane.b32.xlu1 %v2635_v39, %s4222_s14  ;;  %2793 = vrot.lane.b32.xlu2 %v2636_v36, %s4222_s14  ;;  %v2215_v36 = vld [vmem:[#allocation2 + $0xe8] sm:$0xff] }
 0x3c8   : > { %2738 = vrot.lane.b32.xlu0 %v2634_v13, %s4222_s14 }
 0x3d9   : > { %v5077_v37 = vpop.permute.xlu2 %2279 }
 0x3e1   : > { %v5082_v14 = vpop.permute.xlu2 %3969 }
 0x3e2   : > { %v3971_v21 = vunpack.i.l.bf16 %v5082_v14 }
 0x3e4   : > { %v2285_v49 = vsel %vm2283_vm0, %v5077_v37, %v3971_v21  ;;  %v2454_v21 = vld [vmem:[#allocation2 + $0x1c8] sm:$0xff] }
 0x3e9   : > { %v2343_v29 = vpop.permute.xlu2 %2342 }
 0x3f1   : > { %v2261_v23 = vpop.permute.xlu1 %2260  ;;  %v5093_v15 = vpop.permute.xlu2 %2383 }
 0x3f2   : > { %v5079_v62 = vpop.permute.xlu0 %3964  ;;  %v2270_v53 = vadd.f32 %v2261_v23, %v2212_v52  ;;  %v2458_v52 = vld [vmem:[#allocation2 + $0x170] sm:$0xff] }
 0x3f3   : > { %v3966_v10 = vunpack.i.l.bf16 %v5079_v62  ;;  %v3967_v6 = vunpack.i.h.bf16 %v5079_v62 }
 0x3f4   : > { %v2291_v25 = vadd.f32 %v2285_v49, %v2270_v53  ;;  %v2626_v49 = vld [vmem:[#allocation2 + $0x198] sm:$0xff] }
 0x3f5   : > { %v2388_v34 = vsel %vm2262_vm1, %v5093_v15, %v3967_v6 }
 0x3f6   : > { %v2394_v62 = vadd.f32 %v2388_v34, %v2216_v18 }
 0x3f9   : > { %v5084_v38 = vpop.permute.xlu1 %2277  ;;  %v3975_v63 = vpop.permute.xlu2 %3974 }
 0x3fa   : > { %v2259_v24 = vpop.permute.xlu0 %2258  ;;  %v3977_v56 = vunpack.i.h.bf16 %v3975_v63  ;;  %v3976_v12 = vunpack.i.l.bf16 %v3975_v63  ;;  %v2284_v57 = vsel %vm2283_vm0, %v5084_v38, %v5077_v37 }
 0x3fb   : > { %v2263_v3 = vsel %vm2262_vm1, %v3966_v10, %v2259_v24  ;;  %v2264_v4 = vsel %vm2262_vm1, %v2259_v24, %v2261_v23  ;;  %v2214_v24 = vld [vmem:[#allocation2 + $0x28] sm:$0xff] }
 0x3fc   : > { %v2289_v44 = vadd.f32 %v5084_v38, %v2263_v3  ;;  %v2269_v8 = vadd.f32 %v2264_v4, %v2211_v5  ;;  %v3972_v38 = vunpack.i.h.bf16 %v5082_v14  ;;  %v2643_v3 = vld [vmem:[#allocation2 + $0x228] sm:$0xff]  ;;  %v2627_v5 = vld [vmem:[#allocation2 + $0xe0] sm:$0xff] }
 0x3fe   : > { %v2290_v13 = vadd.f32 %v2284_v57, %v2269_v8 }
 0x401   : > { %v5086_v50 = vpop.permute.xlu1 %2327  ;;  %v2540_v59 = vpop.permute.xlu2 %2539 }
 0x402   : > { %v2326_v42 = vpop.permute.xlu0 %2325  ;;  %v2553_v46 = vadd.f32 %v2540_v59, %v2455_v9 }
 0x403   : > { %v2353_v30 = vadd.f32 %v2343_v29, %v2326_v42  ;;  %v2329_v2 = vsel %vm2262_vm1, %v2326_v42, %v5086_v50 }
 0x404   : > { %v2334_v22 = vadd.f32 %v2329_v2, %v2213_v19 }
 0x405   : > { %2359 = vrot.lane.b32.xlu1 %v2353_v30, %s4222_s14  ;;  %v2443_v30 = vld [vmem:[#allocation2 + $0xd0] sm:$0xff] }
 0x409   : > { %v5089_v43 = vpop.permute.xlu1 %2381  ;;  %v2583_v20 = vpop.permute.xlu2 %2582 }
 0x40a   : > { %v5091_v60 = vpop.permute.xlu0 %2344  ;;  %v2387_v37 = vsel %vm2262_vm1, %v5089_v43, %v5093_v15 }
 0x40b   : > { %v2348_v17 = vsel %vm2283_vm0, %v2343_v29, %v5091_v60  ;;  %v2393_v42 = vadd.f32 %v2387_v37, %v2215_v36  ;;  %v2349_v15 = vsel %vm2283_vm0, %v5091_v60, %v3972_v38 }
 0x40c   : > { %v2354_v7 = vadd.f32 %v2348_v17, %v2334_v22 }
 0x411   : > { %v5095_v16 = vpop.permute.xlu1 %2403 }
 0x412   : > { %v5097_v51 = vpop.permute.xlu0 %2401  ;;  %v2408_v39 = vsel %vm2283_vm0, %v5095_v16, %v3976_v12 }
 0x413   : > { %v2412_v41 = vadd.f32 %v5097_v51, %v5089_v43  ;;  %v2414_v29 = vadd.f32 %v2408_v39, %v2394_v62  ;;  %v2407_v63 = vsel %vm2283_vm0, %v5097_v51, %v5095_v16  ;;  %v2335_v43 = vadd.f32 %v5086_v50, %v2214_v24  ;;  %v2445_v16 = vld [vmem:[#allocation2 + $0x60] sm:$0xff] }
 0x414   : > { %v5195_v62 = vld [vmem:[#allocation9] sm:$0x3] }
 0x415   : > { %2426 = vrot.lane.b32.xlu0 %v2412_v41, %s4223_s18  ;;  %vm2292_vm3 = vcmp.ge.s32.totalorder %v5195_v62, 2  ;;  %vm2293_vm4 = vcmp.lt.s32.totalorder %v5195_v62, 18  ;;  %vm2415_vm7 = vcmp.ge.s32.totalorder %v5195_v62, 4294967294  ;;  %vm2416_vm8 = vcmp.lt.s32.totalorder %v5195_v62, 14 }
 0x416   : > { %vm2294_vm5 = vmand %vm2292_vm3, %vm2293_vm4  ;;  %vm2506_vm12 = vcmp.ge.s32.totalorder %v5195_v62, 4  ;;  %vm2507_vm13 = vcmp.lt.s32.totalorder %v5195_v62, 20  ;;  %vm2600_vm15 = vcmp.ge.s32.totalorder %v5195_v62, 4294967292  ;;  %vm2601_vm3 = vcmp.lt.s32.totalorder %v5195_v62, 12 }
 0x417   : > { %vm2417_vm9 = vmand %vm2415_vm7, %vm2416_vm8 }
 0x418   : > { %vm2602_vm8 = vmand %vm2600_vm15, %vm2601_vm3  ;;  %vm2827_vm15 = vcmp.ge.s32.totalorder %v5195_v62, 4294967290  ;;  %vm2828_vm3 = vcmp.lt.s32.totalorder %v5195_v62, 10 }
 0x419   : > { %v5102_v48 = vpop.permute.xlu1 %2490 }
 0x41a   : > { %v2499_v61 = vadd.f32 %v5102_v48, %v2442_v55  ;;  %v5105_v0 = vpop.permute.xlu0 %2488  ;;  %v2413_v55 = vadd.f32 %v2407_v63, %v2393_v42 }
 0x41b   : > { %v2492_v33 = vsel %vm2283_vm0, %v3977_v56, %v5105_v0  ;;  %v2456_v56 = vld [vmem:[#allocation2 + $0xf8] sm:$0xff] }
 0x41c   : > { %2521 = vrot.lane.b32.xlu1 %v2499_v61, %s4224_s7  ;;  %v2503_v45 = vadd.f32 %v2492_v33, %v2453_v11  ;;  %v2355_v61 = vadd.f32 %v2349_v15, %v2335_v43  ;;  %v2441_v11 = vld [vmem:[#allocation2 + $0x140] sm:$0xff]  ;;  %v2493_v33 = vsel %vm2283_vm0, %v5105_v0, %v5102_v48  ;;  %v2642_v0 = vld [vmem:[#allocation2 + $0x1d8] sm:$0xff] }
 0x41d   : > { %v2498_v50 = vadd.f32 %v2493_v33, %v2441_v11 }
 0x41e   : > { %2517 = vrot.lane.b32.xlu2 %v2503_v45, %s4224_s7  ;;  %v2640_v45 = vld [vmem:[#allocation2 + $0x68] sm:$0xff] }
 0x421   : > { %v2581_v35 = vpop.permute.xlu1 %2580 }
 0x422   : > { %v2542_v54 = vpop.permute.xlu0 %2541  ;;  %v2597_v26 = vadd.f32 %v2581_v35, %v2457_v1  ;;  %v2586_v51 = vsel %vm2283_vm0, %v2581_v35, %v2583_v20 }
 0x423   : > { %v2549_v40 = vadd.f32 %v2542_v54, %v2444_v47  ;;  %v2543_v41 = vsel %vm2283_vm0, %v2540_v59, %v2542_v54  ;;  %v2592_v60 = vadd.f32 %v2586_v51, %v2445_v16  ;;  %v2674_v59 = vpop.permute.xlu2 %2673 }
 0x424   : > { %2559 = vrot.lane.b32.xlu1 %v2553_v46, %s4220_s13  ;;  %v2548_v14 = vadd.f32 %v2543_v41, %v2443_v30  ;;  %v2504_v46 = vadd.f32 %v2498_v50, %v2454_v21 }
 0x425   : > { %2563 = vrot.lane.b32.xlu0 %v2549_v40, %s4220_s13  ;;  %v2598_v53 = vadd.f32 %v2592_v60, %v2458_v52  ;;  %v2637_v40 = vld [vmem:[#allocation2 + $0x1b0] sm:$0xff] }
 0x426   : > { %2307 = vrot.lane.b32.xlu2 %v2291_v25, %s4225_s9  ;;  %v2554_v9 = vadd.f32 %v2548_v14, %v2456_v56  ;;  %v2641_v25 = vld [vmem:[#allocation2 + $0x230] sm:$0xff] }
 0x429   : > { %v5164_v47 = vpop.permute.xlu1 %3984 }
 0x42a   : > { %v5124_v27 = vpop.permute.xlu0 %3979 }
 0x42b   : > { %v3981_v28 = vunpack.i.l.bf16 %v5124_v27  ;;  %v3982_v1 = vunpack.i.h.bf16 %v5124_v27  ;;  %v2694_v35 = vpop.permute.xlu2 %2693 }
 0x42c   : > { %2611 = vrot.lane.b32.xlu1 %v2597_v26, %s4226_s26  ;;  %v3986_v26 = vunpack.i.l.bf16 %v5164_v47 }
 0x42d   : > { %2303 = vrot.lane.b32.xlu0 %v2289_v44, %s4225_s9  ;;  %v2587_v58 = vsel %vm2283_vm0, %v2583_v20, %v3981_v28  ;;  %v2698_v19 = vsel %vm2283_vm0, %v2694_v35, %v3982_v1  ;;  %v4228_v20 = vmov 0  }
 0x42e   : > { %2361 = vrot.lane.b32.xlu2 %v2354_v7, %s4222_s14  ;;  %v2593_v23 = vadd.f32 %v2587_v58, %v2446_v31  ;;  %v2677_v4 = vsel %vm2365_vm2, %v3986_v26, %v2674_v59  ;;  %3993 = vset.pattern.permute.xlu0 %v4228_v20  ;;  %v2295_v42 = vsel %vm2294_vm5, 1, %v4228_v20  ;;  %v2418_v14 = vsel %vm2417_vm9, 1, %v4228_v20  ;;  %vm2508_vm5 = vmand %vm2506_vm12, %vm2507_vm13 }
 0x42f   : > { %v2296_v63 = vperm.slane %v2295_v42, 0  ;;  %v2419_v16 = vperm.slane %v2418_v14, 0  ;;  %v2297_v51 = vperm.slane %v2295_v42, 1  ;;  %v2420_v50 = vperm.slane %v2418_v14, 1  ;;  %v2863_v14 = vld [vmem:[#allocation2 + $0x1a0] sm:$0xff] }
 0x430   : > { %vm2523_vm9 = vcmask 556032  }
 0x431   : > { %v2692_v17 = vpop.permute.xlu1 %2691  ;;  %vm2298_vm11 = vcmp.eq.s32.totalorder %v2296_v63, 1  ;;  %vm2421_vm4 = vcmp.eq.s32.totalorder %v2419_v16, 1  ;;  %vm2299_vm7 = vcmp.eq.s32.totalorder %v2297_v51, 1 }
 0x432   : > { %v2676_v48 = vpop.permute.xlu0 %2675  ;;  %v2697_v22 = vsel %vm2283_vm0, %v2692_v17, %v2694_v35 }
 0x433   : > { %v2678_v54 = vsel %vm2365_vm2, %v2674_v59, %v2676_v48  ;;  %v2684_v27 = vadd.f32 %v2676_v48, %v2627_v5  ;;  %v2702_v6 = vadd.f32 %v2697_v22, %v2677_v4 }
 0x434   : > { %2305 = vrot.lane.b32.xlu1 %v2290_v13, %s4225_s9  ;;  %v2683_v10 = vadd.f32 %v2678_v54, %v2626_v49  ;;  %v2603_v54 = vsel %vm2602_vm8, 1, %v4228_v20 }
 0x435   : > { %2615 = vrot.lane.b32.xlu0 %v2593_v23, %s4226_s26  ;;  %v2704_v44 = vadd.f32 %v3982_v1, %v2684_v27  ;;  %v2605_v26 = vperm.slane %v2603_v54, 1 }
 0x436   : > { %2430 = vrot.lane.b32.xlu2 %v2414_v29, %s4223_s18  ;;  %v2703_v2 = vadd.f32 %v2698_v19, %v2683_v10  ;;  %v2604_v19 = vperm.slane %v2603_v54, 0 }
 0x437   : > { %vm2607_vm13 = vcmp.eq.s32.totalorder %v2605_v26, 1 }
 0x438   : > { %vm2606_vm12 = vcmp.eq.s32.totalorder %v2604_v19, 1 }
 0x439   : > { %v5178_v28 = vpop.permute.xlu1 %2740 }
 0x43a   : > { %v5180_v7 = vpop.permute.xlu0 %2738 }
 0x43b   : > { %v5185_v8 = vsel %vm2365_vm2, %v5180_v7, %v5178_v28 }
 0x43c   : > { %2428 = vrot.lane.b32.xlu1 %v2413_v55, %s4223_s18 }
 0x43d   : > { %2363 = vrot.lane.b32.xlu0 %v2355_v61, %s4222_s14 }
 0x43e   : > { %2561 = vrot.lane.b32.xlu2 %v2554_v9, %s4220_s13 }
 0x444   : > { %2755 = vrot.lane.b32.xlu1 %v2640_v45, %s4220_s13 }
 0x445   : > { %2519 = vrot.lane.b32.xlu0 %v2504_v46, %s4224_s7  ;;  %v2509_v46 = vsel %vm2508_vm5, 1, %v4228_v20  ;;  %vm2905_vm5 = vcmp.lt.s32.totalorder %v5195_v62, 24 }
 0x446   : > { %2613 = vrot.lane.b32.xlu2 %v2598_v53, %s4226_s26  ;;  %v2511_v1 = vperm.slane %v2509_v46, 1 }
 0x44c   : > { %2813 = vrot.lane.b32.xlu1 %v2642_v0, %s4220_s13 }
 0x44d   : > { %2795 = vrot.lane.b32.xlu0 %v2637_v40, %s4222_s14 }
 0x44e   : > { %2757 = vrot.lane.b32.xlu2 %v2641_v25, %s4220_s13  ;;  %v2510_v25 = vperm.slane %v2509_v46, 0  ;;  %v2866_v46 = vld [vmem:[#allocation2 + $0x20] sm:$0xff] }
 0x454   : > { %2718 = vrot.lane.b32.xlu1 %v2703_v2, %s4227_s11 }
 0x455   : > { %3989 = vrot.lane.b32.xlu0 %v4221_v32, %s4220_s13  ;;  %v5187_v32 = vpop.permute.xlu2 %2793 }
 0x456   : > { %2815 = vrot.lane.b32.xlu2 %v2643_v3, %s4220_s13 }
 0x45d   : > { %2716 = vrot.lane.b32.xlu0 %v2702_v6, %s4227_s11 }
 0x45e   : > { %2720 = vrot.lane.b32.xlu2 %v2704_v44, %s4227_s11 }
 0x477   : > { %v2360_v31 = vpop.permute.xlu1 %2359 }
 0x478   : > { %v5189_v12 = vpop.permute.xlu2 %2517 }
 0x480   : > { %v2308_v57 = vpop.permute.xlu2 %2307 }
 0x487   : > { %v2427_v39 = vpop.permute.xlu0 %2426 }
 0x488   : > { %v2362_v58 = vpop.permute.xlu2 %2361 }
 0x489   : > { %v2366_v18 = vsel %vm2365_vm2, %v2360_v31, %v2362_v58 }
 0x48e   : > { %v5193_v34 = vpop.permute.xlu1 %2521 }
 0x490   : > { %v2431_v13 = vpop.permute.xlu2 %2430 }
 0x496   : > { %v2560_v23 = vpop.permute.xlu1 %2559 }
 0x497   : > { %v2564_v36 = vpop.permute.xlu0 %2563 }
 0x498   : > { %v2562_v37 = vpop.permute.xlu2 %2561 }
 0x499   : > { %v5200_v38 = vsel %vm2283_vm0, %v2560_v23, %v2562_v37  ;;  %v5203_v24 = vsel %vm2283_vm0, %v2562_v37, %v2564_v36 }
 0x49e   : > { %v2612_v29 = vpop.permute.xlu1 %2611 }
 0x49f   : > { %v2304_v30 = vpop.permute.xlu0 %2303 }
 0x4a0   : > { %v2614_v41 = vpop.permute.xlu2 %2613 }
 0x4a1   : > { %v5209_v43 = vsel %vm2617_vm6, %v2612_v29, %v2614_v41  ;;  %v2628_v29 = vld [vmem:[#allocation2 + $0x1e0] sm:$0xff] }
 0x4a2   : > { %v2747_v63 = vadd.f32 %v5185_v8, %v2628_v29 }
 0x4a6   : > { %v2306_v15 = vpop.permute.xlu1 %2305 }
 0x4a7   : > { %v2310_v55 = vsel %vm2309_vm10, %v2304_v30, %v2306_v15  ;;  %v2311_v56 = vsel %vm2309_vm10, %v2306_v15, %v2308_v57  ;;  %v2616_v11 = vpop.permute.xlu0 %2615  ;;  %vm2512_vm10 = vcmp.eq.s32.totalorder %v2510_v25, 1 }
 0x4a8   : > { %v2314_v61 = vsel %vm2298_vm11, %v2310_v55, 0.0  ;;  %v2619_v9 = vsel %vm2617_vm6, %v2614_v41, %v2616_v11  ;;  %vm2422_vm6 = vcmp.eq.s32.totalorder %v2420_v50, 1  ;;  %v2315_v53 = vsel %vm2299_vm7, %v2311_v56, 0.0  ;;  %v2758_v35 = vpop.permute.xlu2 %2757  ;;  %v2870_v55 = vld [vmem:[#allocation2 + $0xa0] sm:$0xff]  ;;  %vm2829_vm7 = vmand %vm2827_vm15, %vm2828_vm3 }
 0x4a9   : > { %v2370_v33 = vadd.f32 %v2366_v18, %v2314_v61  ;;  %vm2513_vm11 = vcmp.eq.s32.totalorder %v2511_v1, 1  ;;  %v2622_v18 = vsel %vm2606_vm12, %v5209_v43, 0.0  ;;  %v3987_v56 = vunpack.i.h.bf16 %v5164_v47 }
 0x4aa   : > { %v2954_v8 = vadd.f32 %v2870_v55, %v2863_v14  ;;  %vm2957_vm12 = vcmp.ge.s32.totalorder %v5195_v62, 4294967288  ;;  %vm2921_vm15 = vcmask 64512  }
 0x4ae   : > { %v2429_v60 = vpop.permute.xlu1 %2428 }
 0x4af   : > { %v2433_v45 = vsel %vm2432_vm14, %v2427_v39, %v2429_v60  ;;  %v2434_v21 = vsel %vm2432_vm14, %v2429_v60, %v2431_v13  ;;  %v2364_v59 = vpop.permute.xlu0 %2363 }
 0x4b0   : > { %v2437_v52 = vsel %vm2421_vm4, %v2433_v45, 0.0  ;;  %v2367_v0 = vsel %vm2365_vm2, %v2362_v58, %v2364_v59  ;;  %v2438_v40 = vsel %vm2422_vm6, %v2434_v21, 0.0  ;;  %v2816_v39 = vpop.permute.xlu2 %2815  ;;  %v2853_v21 = vld [vmem:[#allocation2 + $0x218] sm:$0xff]  ;;  %v2859_v59 = vld [vmem:[#allocation2 + $0x210] sm:$0xff]  ;;  %vm2904_vm4 = vcmp.ge.s32.totalorder %v5195_v62, 8 }
 0x4b1   : > { %v2439_v48 = vadd.f32 %v2437_v52, %v2370_v33  ;;  %v2371_v49 = vadd.f32 %v2367_v0, %v2315_v53  ;;  %v2631_v33 = vld [vmem:[#allocation2 + $0x98] sm:$0xff]  ;;  %v2860_v52 = vld [vmem:[#allocation2 + $0x1d0] sm:$0xff]  ;;  %vm2906_vm8 = vmand %vm2904_vm4, %vm2905_vm5  ;;  %vm2722_vm6 = vcmask 834560  }
 0x4b2   : > { %v2897_v53 = vadd.f32 %v2860_v52, %v2853_v21  ;;  %v2857_v0 = vld [vmem:[#allocation2 + $0x178] sm:$0xff] }
 0x4b3   : > { %v2440_v10 = vadd.f32 %v2438_v40, %v2371_v49  ;;  %v2864_v49 = vld [vmem:[#allocation2 + $0x58] sm:$0xff]  ;;  %v2858_v40 = vld [vmem:[#allocation2 + $0x208] sm:$0xff] }
 0x4b4   : > { %v2949_v54 = vadd.f32 %v2864_v49, %v2857_v0 }
 0x4b6   : > { %v2756_v2 = vpop.permute.xlu1 %2755 }
 0x4b7   : > { %v2761_v3 = vsel %vm2283_vm0, %v2756_v2, %v2758_v35  ;;  %v2520_v5 = vpop.permute.xlu0 %2519 }
 0x4b8   : > { %v2766_v17 = vadd.f32 %v2761_v3, %v5180_v7  ;;  %v2524_v4 = vsel %vm2523_vm9, %v5189_v12, %v2520_v5  ;;  %v2525_v22 = vsel %vm2523_vm9, %v2520_v5, %v5193_v34  ;;  %v2623_v7 = vsel %vm2607_vm13, %v2619_v9, 0.0  ;;  %v2630_v9 = vld [vmem:[#allocation2 + $0x48] sm:$0xff]  ;;  %v2721_v1 = vpop.permute.xlu2 %2720 }
 0x4b9   : > { %v2528_v27 = vsel %vm2512_vm10, %v2524_v4, 0.0  ;;  %v2529_v6 = vsel %vm2513_vm11, %v2525_v22, 0.0  ;;  %v2830_v22 = vsel %vm2829_vm7, 1, %v4228_v20  ;;  %vm2844_vm11 = vcmask 736256  }
 0x4ba   : > { %2772 = vrot.lane.b32.xlu0 %v2766_v17, %s4219_s6  ;;  %v2530_v44 = vadd.f32 %v2528_v27, %v2439_v48  ;;  %v2531_v57 = vadd.f32 %v2529_v6, %v2440_v10  ;;  %v2902_v48 = vadd.f32 %v2866_v46, %v2859_v59  ;;  %vm2958_vm13 = vcmp.lt.s32.totalorder %v5195_v62, 8 }
 0x4bc   : > { %v2569_v31 = vadd.f32 %v5200_v38, %v2530_v44  ;;  %v2570_v58 = vadd.f32 %v5203_v24, %v2531_v57  ;;  %v2629_v38 = vld [vmem:[#allocation2 + $0x1f0] sm:$0xff]  ;;  %v2865_v24 = vld [vmem:[#allocation2 + $0x118] sm:$0xff] }
 0x4bd   : > { %v2748_v30 = vadd.f32 %v5178_v28, %v2629_v38 }
 0x4be   : > { %v2814_v13 = vpop.permute.xlu1 %2813  ;;  %v5229_v34 = vadd.f32 %v2623_v7, %v2570_v58  ;;  %v5231_v23 = vadd.f32 %v2622_v18, %v2569_v31  ;;  %v2907_v31 = vsel %vm2906_vm8, 1, %v4228_v20  ;;  %v2831_v7 = vperm.slane %v2830_v22, 0 }
 0x4bf   : > { %v2819_v12 = vsel %vm2283_vm0, %v2814_v13, %v2816_v39  ;;  %v2796_v37 = vpop.permute.xlu0 %2795  ;;  %v2908_v13 = vperm.slane %v2907_v31, 0 }
 0x4c0   : > { %v2824_v36 = vadd.f32 %v2819_v12, %v5187_v32  ;;  %v2800_v28 = vsel %vm2365_vm2, %v2796_v37, %v3987_v56  ;;  %v2799_v16 = vsel %vm2365_vm2, %v5187_v32, %v2796_v37  ;;  %v2983_v32 = vld [vmem:[%s5474_s4] sm:$0xff]  ;;  %vm2706_vm2 = vcmp.lt.s32.totalorder %v5195_v62, 22 }
 0x4c1   : > { %v2806_v51 = vadd.f32 %v2800_v28, %v2631_v33  ;;  %v2805_v60 = vadd.f32 %v2799_v16, %v2630_v9  ;;  %v2909_v12 = vperm.slane %v2907_v31, 1  ;;  %vm5288_vm3 = vcmp.eq.s32.totalorder %v2908_v13, 1  ;;  %v2855_v9 = vld [vmem:[#allocation2 + $0x10] sm:$0xff] }
 0x4c2   : > { %2838 = vrot.lane.b32.xlu0 %v2824_v36, %s4229_s27 }
 0x4c3   : > { %vm5292_vm4 = vcmp.eq.s32.totalorder %v2909_v12, 1 }
 0x4c6   : > { %v2719_v10 = vpop.permute.xlu1 %2718 }
 0x4c7   : > { %v3990_v42 = vpop.permute.xlu0 %3989  ;;  %v2724_v58 = vsel %vm2722_vm6, %v2719_v10, %v2721_v1 }
 0x4c8   : > { %v3991_v41 = vunpack.i.l.bf16 %v3990_v42  ;;  %v3992_v11 = vunpack.i.h.bf16 %v3990_v42 }
 0x4ca   : > { %2915 = vrot.lane.b32.xlu0 %v2865_v24, %s4230_s15  ;;  %v2768_v43 = vadd.f32 %v3991_v41, %v2748_v30  ;;  %v2762_v15 = vsel %vm2283_vm0, %v2758_v35, %v3991_v41  ;;  %v2820_v50 = vsel %vm2283_vm0, %v2816_v39, %v3992_v11  ;;  %v2826_v47 = vadd.f32 %v3992_v11, %v2806_v51 }
 0x4cb   : > { %v2767_v61 = vadd.f32 %v2762_v15, %v2747_v63  ;;  %v2825_v45 = vadd.f32 %v2820_v50, %v2805_v60  ;;  %vm2705_vm0 = vcmp.ge.s32.totalorder %v5195_v62, 6  ;;  %v2832_v39 = vperm.slane %v2830_v22, 1  ;;  %v2861_v50 = vld [vmem:[#allocation2 + $0x168] sm:$0xff]  ;;  %v2862_v60 = vld [vmem:[#allocation2 + $0xc0] sm:$0xff] }
 0x4cc   : > { %2776 = vrot.lane.b32.xlu2 %v2768_v43, %s4219_s6  ;;  %vm2707_vm14 = vmand %vm2705_vm0, %vm2706_vm2  ;;  %vm5276_vm0 = vcmp.eq.s32.totalorder %v2831_v7, 1 }
 0x4cd   : > { %2774 = vrot.lane.b32.xlu1 %v2767_v61, %s4219_s6  ;;  %v2708_v3 = vsel %vm2707_vm14, 1, %v4228_v20  ;;  %vm5280_vm2 = vcmp.eq.s32.totalorder %v2832_v39, 1  ;;  %vm2959_vm14 = vmand %vm2957_vm12, %vm2958_vm13 }
 0x4ce   : > { %v2710_v17 = vperm.slane %v2708_v3, 1  ;;  %v2709_v5 = vperm.slane %v2708_v3, 0 }
 0x4cf   : > { %v2717_v25 = vpop.permute.xlu0 %2716 }
 0x4d0   : > { %vm5261_vm9 = vcmp.eq.s32.totalorder %v2710_v17, 1  ;;  %vm5265_vm10 = vcmp.eq.s32.totalorder %v2709_v5, 1  ;;  %v2723_v18 = vsel %vm2722_vm6, %v2717_v25, %v2719_v10 }
 0x4d1   : > { %v2728_v36 = vsel %vm5261_vm9, %v2724_v58, 0.0  ;;  %v2727_v37 = vsel %vm5265_vm10, %v2723_v18, 0.0 }
 0x4d2   : > { %2968 = vrot.lane.b32.xlu0 %v2954_v8, %s4231_s5  ;;  %v2730_v63 = vadd.f32 %v2728_v36, %v5229_v34  ;;  %v2729_v43 = vadd.f32 %v2727_v37, %v5231_v23  ;;  %v2960_v34 = vsel %vm2959_vm14, 1, %v4228_v20 }
 0x4d3   : > { %v2961_v52 = vperm.slane %v2960_v34, 0  ;;  %v2962_v59 = vperm.slane %v2960_v34, 1 }
 0x4d4   : > { %2842 = vrot.lane.b32.xlu2 %v2826_v47, %s4229_s27  ;;  %v2868_v47 = vld [vmem:[#allocation2 + $0xa8] sm:$0xff] }
 0x4d5   : > { %2840 = vrot.lane.b32.xlu1 %v2825_v45, %s4229_s27  ;;  %vm2963_vm5 = vcmp.eq.s32.totalorder %v2961_v52, 1  ;;  %vm2964_vm7 = vcmp.eq.s32.totalorder %v2962_v59, 1 }
 0x4da   : > { %2986 = vperm.xlu0 %3993, %v2983_v32   ;;  %v2935_v32 = vadd.f32 %v2862_v60, %v2855_v9 }
 0x4dc   : > { %2919 = vrot.lane.b32.xlu2 %v2897_v53, %s4230_s15  ;;  %v2938_v53 = vadd.f32 %v2868_v47, %v2861_v50 }
 0x4dd   : > { %2917 = vrot.lane.b32.xlu1 %v2902_v48, %s4230_s15 }
 0x4e4   : > { %2972 = vrot.lane.b32.xlu2 %v2858_v40, %s4231_s5 }
 0x4e5   : > { %2970 = vrot.lane.b32.xlu1 %v2949_v54, %s4231_s5 }
 0x526   : > { %v2777_v19 = vpop.permute.xlu2 %2776 }
 0x52c   : > { %v2773_v35 = vpop.permute.xlu0 %2772 }
 0x52e   : > { %v2843_v4 = vpop.permute.xlu2 %2842 }
 0x534   : > { %v2839_v2 = vpop.permute.xlu0 %2838 }
 0x536   : > { %v2920_v38 = vpop.permute.xlu2 %2919 }
 0x53c   : > { %v2916_v27 = vpop.permute.xlu0 %2915 }
 0x53e   : > { %v2973_v48 = vpop.permute.xlu2 %2972 }
 0x53f   : > { %v2775_v26 = vpop.permute.xlu1 %2774 }
 0x540   : > { %v2778_v62 = vsel %vm2262_vm1, %v2773_v35, %v2775_v26  ;;  %v2779_v41 = vsel %vm2262_vm1, %v2775_v26, %v2777_v19  ;;  %vm2974_vm1 = vcmask 982016  }
 0x541   : > { %v2782_v33 = vadd.f32 %v2778_v62, %v2729_v43  ;;  %v2783_v23 = vadd.f32 %v2779_v41, %v2730_v63 }
 0x544   : > { %v2969_v11 = vpop.permute.xlu0 %2968 }
 0x547   : > { %v2841_v57 = vpop.permute.xlu1 %2840 }
 0x548   : > { %v2845_v42 = vsel %vm2844_vm11, %v2839_v2, %v2841_v57  ;;  %v2846_v30 = vsel %vm2844_vm11, %v2841_v57, %v2843_v4 }
 0x549   : > { %v2849_v55 = vsel %vm5276_vm0, %v2845_v42, 0.0  ;;  %v2850_v56 = vsel %vm5280_vm2, %v2846_v30, 0.0 }
 0x54a   : > { %v2851_v45 = vadd.f32 %v2849_v55, %v2782_v33  ;;  %v2852_v21 = vadd.f32 %v2850_v56, %v2783_v23 }
 0x54c   : > { %v2987_v10 = vpop.permute.xlu0 %2986 }
 0x54f   : > { %v2918_v61 = vpop.permute.xlu1 %2917 }
 0x550   : > { %v2922_v28 = vsel %vm2921_vm15, %v2916_v27, %v2918_v61  ;;  %v2923_v8 = vsel %vm2921_vm15, %v2918_v61, %v2920_v38 }
 0x551   : > { %v2926_v16 = vsel %vm5288_vm3, %v2922_v28, 0.0  ;;  %v2927_v51 = vsel %vm5292_vm4, %v2923_v8, 0.0 }
 0x552   : > { %v2928_v46 = vadd.f32 %v2926_v16, %v2851_v45  ;;  %v2929_v20 = vadd.f32 %v2927_v51, %v2852_v21 }
 0x554   : > { %v2940_v40 = vadd.f32 %v2938_v53, %v2928_v46  ;;  %v2941_v25 = vadd.f32 %v2935_v32, %v2929_v20 }
 0x557   : > { %v2971_v0 = vpop.permute.xlu1 %2970 }
 0x558   : > { %v2975_v49 = vsel %vm2974_vm1, %v2969_v11, %v2971_v0  ;;  %v2976_v54 = vsel %vm2974_vm1, %v2971_v0, %v2973_v48 }
 0x559   : > { %v2979_v1 = vsel %vm2963_vm5, %v2975_v49, 0.0  ;;  %v2980_v35 = vsel %vm2964_vm7, %v2976_v54, 0.0 }
 0x55a   : > { %v2981_v19 = vadd.f32 %v2979_v1, %v2940_v40  ;;  %v2982_v2 = vadd.f32 %v2980_v35, %v2941_v25 }
 0x55c   : > { %v2989_v26 = vadd.f32 %v2987_v10, %v2981_v19  ;;  %v2990_v3 = vadd.f32 %v2987_v10, %v2982_v2 }
 0x55e   : > { %2991 = vst [vmem:[%s4404_s21] sm:$0xff] %v2989_v26 }
 0x55f   : > { %2992 = vst [vmem:[%s4404_s21 + $0x8] sm:$0xff] %v2990_v3 }
 0x560 PF: > { %s5487_s22 = sld [smem:[#allocation16_spill]]  ;;  %s3007_s18 = sshll.u32 %s4404_s21, 4  ;;  %s3008_s18 = int_to_ptr.vmem [resolvable:$true] %s3007_s18 }
 0x561   : > { %s5489_s13 = sld [smem:[#allocation50_spill]]  ;;  %s2994_s9 = scalar_lea.sflag [#allocation6], %s263_s3 }
 0x566   : > { %s3821_s29 = sshll.u32 %s5487_s22, 4 }
 0x567   : > { %s3005_s14 = scalar_lea.hbm %s5489_s13, %s3821_s29  ;;  %s4104_s5 = scalar_lea.hbm %s5489_s13, 32 }
 0x568   : > { %s3009_s7 = sshll.u32 %s3005_s14, 4  ;;  %s3010_s7 = int_to_ptr.hbm [resolvable:$true] %s3009_s7 }
 0x569   : > { %s4098_s26 = sshra.s32 %s3010_s7, 4  ;;  %s4099_s26 = int_to_ptr.hbm [resolvable:$true] %s4098_s26 }
 0x56a   : > { %s4100_s11 = scalar_lea.hbm %s4099_s26, 16  ;;  %p4105_p3 = scmp.lt.s32.totalorder %s4099_s26, %s5489_s13 }
 0x56b   : > { %p4101_p4 = scmp.ne.s32.totalorder %s4099_s26, %s4100_s11  ;;  %p4106_p5 = scmp.lt.s32.totalorder %s4104_s5, %s4100_s11 }
 0x56d   : > { %p4102_p0 = pnand %p4101_p4, %p4327_p6  ;;  %p4107_p7 = por %p4106_p5, %p4105_p3 }
 0x56f   : > { %p4103_p2 = pneg %p4102_p0 }
 0x571   : > { %p4108_p8 = pnand %p4107_p7, %p4103_p2 }
 0x573   : > { %4111 = shalt.err (!%p4108_p8)
}
 0x574   : > { %3832 = dma.vmem_to_hbm [thread:$0]  (%p4327_p6), %s3008_s18, 256, %s3010_s7, %s2994_s9  }
 0x575 PF: > { %s5490_s3 = sld [smem:[#allocation14_spill]]  ;;  %p3854_p9 = scmp.ge.s32.totalorder %s4210_s25, 2 }
 0x577   : > { %p3846_p12 = pnand %p3854_p9, %p4333_p10 }
 0x579   : > { %p3847_p13 = pneg %p3846_p12 }
 0x57b   : > { %s3021_s4 = sand.u32 1, %s5490_s3  }
 0x57c   : > { %s3022_s22 = scalar_lea.sflag [#allocation6], %s3021_s4 }
 0x57d   : > { %4165 = dma.done.wait (%p3847_p13), %s3022_s22, 256  }
 0x57e   : > { %4167 = vsyncadd (%p3847_p13), %s3022_s22, 4294967040  ;;  %s21_s25 = sadd.s32 1, %s4210_s25   ;;  %s5492_s28 = sld [smem:[#allocation19_spill]] }
 0x57f   : > { %p18_p11 = scmp.ge.s32.totalorder %s21_s25, 10   ;;  %s5493_s15 = smov %s4174_s16 }
 0x580   : > { %s5494_s16 = smov %s4178_s17  ;;  %s5495_s17 = smov %s4375_s1 }
 0x581   : > { %s5496_s18 = smov %s4186_s19  ;;  %s5497_s19 = smov %s4190_s20 }
 0x582   : > { %s5498_s20 = smov %s4378_s2  ;;  %s5499_s21 = smov %s4202_s23 }
 0x583   : > { %s5500_s22 = smov %s4206_s24  ;;  %s5502_s24 = smov %s5508_s10 }
 0x584   : > { %s5501_s23 = smov %s5492_s28  ;;  %20 = sbr.rel (!%p18_p11) target bundleno = 15 (0xf), region = 98 }
 0x589   :  { %3028 = vsyncpa [#allocation5], 1 }
 0x58a   :  { %3030 = vsyncpa [#allocation5 + $0x1], 1 }
 0x58b   :  { %3031 = vsyncpa [#allocation8], 1 }
 0x58c   :  { %3032 = vsyncpa [#allocation6], 1 }
 0x58d   :  { %3034 = vsyncpa [#allocation6 + $0x1], 1 }

</bundles_post_ra>
